<compile_context>
chip_gen: v7x
topology: tpu7x:2x2x1
jax: 0.10.0
libtpu: 0.0.40
codegen_flags: <defaults>
</compile_context>

<pallas_src>
import functools

import jax
import jax.numpy as jnp
from jax.experimental import pallas as pl
from jax.experimental.pallas import tpu as pltpu

F32 = jnp.float32
BF16 = jnp.bfloat16
EPS = 1e-5                 # PyTorch BatchNorm2d default eps
_MIN_PALLAS_M = 128        # GEMMs with fewer output rows go to XLA (launch overhead)


def _round_up(x, m):
    return ((x + m - 1) // m) * m


def _device_caps():
    """Generation-aware tile caps + scoped-VMEM limit."""
    kind = ""
    try:
        kind = jax.devices()[0].device_kind.lower()
    except Exception:
        pass
    if "v7" in kind:
        # v7x: 2 TensorCores/chip, 64 MiB VMEM/TC -> modest tiles, >=2 M blocks,
        # leave Mosaic headroom under the physical VMEM.
        return {'tm': 512, 'tn': 256, 'vmem': 40 * 1024 * 1024, 'two_tc': True}
    if "v5" in kind:
        # v5e: 4x128^2 MXU -> tn=128; f32 epilogue kept (no bf16 VPU).
        return {'tm': 1024, 'tn': 128, 'vmem': 64 * 1024 * 1024, 'two_tc': False}
    # v6e default: 2x256^2 MXU, 128 MiB VMEM.
    return {'tm': 1024, 'tn': 256, 'vmem': 64 * 1024 * 1024, 'two_tc': False}


_CAPS = _device_caps()


def _pick_m_tile(M):
    """Choose the M tile first, then pad M up to a multiple of it."""
    tm = min(_round_up(M, 8), _CAPS['tm'])
    if _CAPS['two_tc'] and M >= 256 and -(-M // tm) < 2:
        # v7x: make sure the 'parallel' M axis has >=2 blocks (one per TC).
        tm = _round_up(-(-M // 2), 8)
    Mp = _round_up(M, tm)
    return tm, Mp, Mp // tm


def _pick_n_tile(cout):
    """Lane tile: 128-multiples when possible, otherwise a full-dim block
    (no channel padding / slicing passes)."""
    if cout % 128 == 0:
        tn = min(cout, _CAPS['tn'])
        while cout % tn:
            tn -= 128
    else:
        tn = cout
    return tn, cout // tn


def _compiler_params():
    return pltpu.CompilerParams(
        dimension_semantics=("parallel", "parallel"),
        vmem_limit_bytes=_CAPS['vmem'])


# ----------------------------------------------------------------------------
# Pallas kernels
# ----------------------------------------------------------------------------
def _gemm_kernel(p_ref, w_ref, b_ref, o_ref, *, relu):
    acc = jnp.dot(p_ref[...], w_ref[...], preferred_element_type=jnp.float32)
    out = acc + b_ref[...]                       # f32 epilogue (v5e: no bf16 VPU)
    if relu:
        out = jnp.maximum(out, 0.0)
    o_ref[...] = out.astype(o_ref.dtype)         # bf16 store (lane-dense)


def _gemm_res_kernel(p_ref, w_ref, b_ref, r_ref, o_ref, *, relu):
    acc = jnp.dot(p_ref[...], w_ref[...], preferred_element_type=jnp.float32)
    out = acc + b_ref[...] + r_ref[...].astype(jnp.float32)
    if relu:
        out = jnp.maximum(out, 0.0)
    o_ref[...] = out.astype(o_ref.dtype)


def _conv3x3_body(x_ref, h_ref, w_ref, taps):
    """Implicit im2col: the 9 taps are static row-offset slices of the
    (tile + halo) activation block; one small MXU matmul per tap."""
    tm = x_ref.shape[0]
    xfull = jnp.concatenate([x_ref[...], h_ref[...]], axis=0)
    acc = None
    for t, off in enumerate(taps):
        part = jnp.dot(xfull[off:off + tm, :], w_ref[t],
                       preferred_element_type=jnp.float32)
        acc = part if acc is None else acc + part
    return acc


def _conv3x3_kernel(x_ref, h_ref, w_ref, b_ref, o_ref, *, taps, relu):
    out = _conv3x3_body(x_ref, h_ref, w_ref, taps) + b_ref[...]
    if relu:
        out = jnp.maximum(out, 0.0)
    o_ref[...] = out.astype(o_ref.dtype)


def _conv3x3_res_kernel(x_ref, h_ref, w_ref, b_ref, r_ref, o_ref, *, taps, relu):
    out = (_conv3x3_body(x_ref, h_ref, w_ref, taps) + b_ref[...]
           + r_ref[...].astype(jnp.float32))
    if relu:
        out = jnp.maximum(out, 0.0)
    o_ref[...] = out.astype(o_ref.dtype)


# ----------------------------------------------------------------------------
# Pallas wrappers
# ----------------------------------------------------------------------------
def _pallas_gemm(P, Wm, bias, residual, relu):
    """relu((P @ Wm) + bias (+ residual)) -> bf16.

    P:(M,K) bf16, Wm:(K,cout) f32, bias:(cout,) f32, residual:(M,cout) bf16|None.
    Single full-K block; grid only over (M tiles, Cout tiles), both parallel.
    """
    M, K = P.shape
    cout = Wm.shape[1]
    tm, Mp, mblocks = _pick_m_tile(M)
    tn, nblocks = _pick_n_tile(cout)

    if Mp != M:
        P = jnp.pad(P, ((0, Mp - M), (0, 0)))
    Wb = Wm.astype(BF16)
    Bb = bias.astype(F32).reshape(1, cout)

    grid = (mblocks, nblocks)
    in_specs = [pl.BlockSpec((tm, K), lambda i, j: (i, 0)),
                pl.BlockSpec((K, tn), lambda i, j: (0, j)),
                pl.BlockSpec((1, tn), lambda i, j: (0, j))]
    o_spec = pl.BlockSpec((tm, tn), lambda i, j: (i, j))
    out_shape = jax.ShapeDtypeStruct((Mp, cout), BF16)

    if residual is None:
        out = pl.pallas_call(
            functools.partial(_gemm_kernel, relu=relu),
            grid=grid, in_specs=in_specs, out_specs=o_spec,
            out_shape=out_shape, compiler_params=_compiler_params(),
        )(P, Wb, Bb)
    else:
        R = residual.astype(BF16)
        if Mp != M:
            R = jnp.pad(R, ((0, Mp - M), (0, 0)))
        out = pl.pallas_call(
            functools.partial(_gemm_res_kernel, relu=relu),
            grid=grid, in_specs=in_specs + [o_spec], out_specs=o_spec,
            out_shape=out_shape, compiler_params=_compiler_params(),
            input_output_aliases={3: 0},       # residual buffer reused for output
        )(P, Wb, Bb, R)
    return out if Mp == M else out[:M]


def _pallas_conv3x3_s1(x, w_hwio, bias, residual, relu):
    """Implicit-im2col fused conv for 3x3 / stride 1 / pad 1.  NHWC bf16 in/out.

    The padded activation is flattened to (N*Hp*Wp, Cin); output row b holds the
    conv result for flat position b, garbage rows (the pad fringe) are sliced
    away afterwards.  The kernel reads a (tm + halo) row window (main block +
    the next `halo` rows via a second BlockSpec) and forms the 9 taps as static
    row-offset slices, so no patch array is ever written to HBM.
    """
    N, H, W, cin = x.shape
    cout = w_hwio.shape[-1]
    Hp, Wp = H + 2, W + 2
    rows = N * Hp * Wp
    o_max = 2 * Wp + 2                      # largest tap offset (di=2, dj=2)

    tm, Mp, mblocks = _pick_m_tile(rows)
    if o_max > tm:
        return None                         # halo > row tile: caller falls back
    halo = _round_up(o_max, 128)
    if halo > tm or tm % halo:
        halo = tm
    hstep = tm // halo
    tn, nblocks = _pick_n_tile(cout)

    xf = jnp.pad(x, ((0, 0), (1, 1), (1, 1), (0, 0))).reshape(rows, cin)
    xf = jnp.pad(xf, ((0, Mp + halo - rows), (0, 0)))
    wt = w_hwio.reshape(9, cin, cout).astype(BF16)
    bb = bias.astype(F32).reshape(1, cout)
    taps = tuple(di * Wp + dj for di in range(3) for dj in range(3))

    grid = (mblocks, nblocks)
    in_specs = [pl.BlockSpec((tm, cin), lambda i, j: (i, 0)),
                pl.BlockSpec((halo, cin), lambda i, j: ((i + 1) * hstep, 0)),
                pl.BlockSpec((9, cin, tn), lambda i, j: (0, 0, j)),
                pl.BlockSpec((1, tn), lambda i, j: (0, j))]
    o_spec = pl.BlockSpec((tm, tn), lambda i, j: (i, j))
    out_shape = jax.ShapeDtypeStruct((Mp, cout), BF16)

    if residual is None:
        out = pl.pallas_call(
            functools.partial(_conv3x3_kernel, taps=taps, relu=relu),
            grid=grid, in_specs=in_specs, out_specs=o_spec,
            out_shape=out_shape, compiler_params=_compiler_params(),
        )(xf, xf, wt, bb)
    else:
        rp = jnp.pad(residual.astype(BF16), ((0, 0), (0, 2), (0, 2), (0, 0)))
        rp = rp.reshape(rows, cout)
        if Mp != rows:
            rp = jnp.pad(rp, ((0, Mp - rows), (0, 0)))
        out = pl.pallas_call(
            functools.partial(_conv3x3_res_kernel, taps=taps, relu=relu),
            grid=grid, in_specs=in_specs + [o_spec], out_specs=o_spec,
            out_shape=out_shape, compiler_params=_compiler_params(),
            input_output_aliases={4: 0},
        )(xf, xf, wt, bb, rp)

    out = out[:rows].reshape(N, Hp, Wp, cout)[:, :H, :W, :]
    return out


# ----------------------------------------------------------------------------
# Conv lowering
# ----------------------------------------------------------------------------
def _im2col(x, kh, kw, stride, pad):
    """x: NHWC bf16 -> patches (N*OH*OW, kh*kw*C), row order (kh, kw, C)."""
    N, H, W, C = x.shape
    if pad:
        x = jnp.pad(x, ((0, 0), (pad, pad), (pad, pad), (0, 0)))
    OH = (H + 2 * pad - kh) // stride + 1
    OW = (W + 2 * pad - kw) // stride + 1
    cols = []
    for i in range(kh):
        for j in range(kw):
            cols.append(x[:, i:i + stride * OH:stride, j:j + stride * OW:stride, :])
    patches = jnp.stack(cols, axis=3)           # N, OH, OW, kh*kw, C
    return patches.reshape(N * OH * OW, kh * kw * C), OH, OW


def _xla_conv(x, w_hwio, bias, stride, pad, relu, residual):
    """Tiny-layer fallback (output rows < 128): plain XLA conv, fused epilogue."""
    out = jax.lax.conv_general_dilated(
        x, w_hwio.astype(BF16),
        window_strides=(stride, stride),
        padding=((pad, pad), (pad, pad)),
        dimension_numbers=('NHWC', 'HWIO', 'NHWC'),
        preferred_element_type=jnp.float32)
    out = out + bias.astype(F32)
    if residual is not None:
        out = out + residual.astype(F32)
    if relu:
        out = jnp.maximum(out, 0.0)
    return out.astype(BF16)


def conv_bn(x, p, stride, pad, relu, residual=None):
    """Fused Conv2d(bias=False) + BatchNorm2d (+residual) (+ReLU). NHWC bf16."""
    w, scale, bias = p['w'], p['s'], p['b']
    cout, cin, kh, kw = w.shape
    # Fold BN scale into the weight wrapper-side; only the bias enters the kernel.
    w_hwio = jnp.transpose(w, (2, 3, 1, 0)) * scale          # (kh,kw,cin,cout) f32

    N, H, W, _ = x.shape
    OH = (H + 2 * pad - kh) // stride + 1
    OW = (W + 2 * pad - kw) // stride + 1
    m_out = N * OH * OW

    if m_out < _MIN_PALLAS_M:
        # Sub-128-row GEMMs: pallas_call launch/pipeline overhead dominates.
        return _xla_conv(x, w_hwio, bias, stride, pad, relu, residual)

    if kh == 1 and kw == 1:
        xs = x if stride == 1 else x[:, ::stride, ::stride, :]
        P = xs.reshape(m_out, cin)
        r2 = None if residual is None else residual.reshape(m_out, cout)
        out = _pallas_gemm(P, w_hwio.reshape(cin, cout), bias, r2, relu)
        return out.reshape(N, OH, OW, cout)

    if kh == 3 and stride == 1 and pad == 1:
        out = _pallas_conv3x3_s1(x, w_hwio, bias, residual, relu)
        if out is not None:
            return out

    # Strided 3x3 (or oversized halo): explicit bf16 im2col -> GEMM.
    # TODO(synk): implicit lowering (space-to-depth) for stride-2 3x3 convs.
    patches, OH, OW = _im2col(x, kh, kw, stride, pad)
    r2 = None if residual is None else residual.reshape(N * OH * OW, cout)
    out = _pallas_gemm(patches, w_hwio.reshape(kh * kw * cin, cout), bias, r2, relu)
    return out.reshape(N, OH, OW, cout)


# ----------------------------------------------------------------------------
# Deterministic parameter construction (mirrors the PyTorch __init__ shapes)
# ----------------------------------------------------------------------------
class ParamGen:
    def __init__(self, seed=1):
        self.key = jax.random.PRNGKey(seed)

    def _next(self):
        self.key, sub = jax.random.split(self.key)
        return sub

    def conv_w(self, cin, cout, k):
        # matches init_weights: nn.init.normal_(weight, std=0.001)
        return 0.001 * jax.random.normal(self._next(), (cout, cin, k, k), F32)

    def conv_bn(self, cin, cout, k):
        gamma = jnp.ones((cout,), F32)
        beta = jnp.zeros((cout,), F32)
        mean = jnp.zeros((cout,), F32)
        var = jnp.ones((cout,), F32)
        scale = gamma / jnp.sqrt(var + EPS)
        bias = beta - mean * scale
        return {'w': self.conv_w(cin, cout, k), 's': scale, 'b': bias}


def make_basic(pg, inplanes, planes, stride=1, downsample=False):
    return {'conv1': pg.conv_bn(inplanes, planes, 3),
            'conv2': pg.conv_bn(planes, planes, 3),
            'stride': stride,
            'down': pg.conv_bn(inplanes, planes, 1) if downsample else None}


def make_bottleneck(pg, inplanes, planes, stride=1, downsample=False):
    return {'conv1': pg.conv_bn(inplanes, planes, 1),
            'conv2': pg.conv_bn(planes, planes, 3),
            'conv3': pg.conv_bn(planes, planes * 4, 1),
            'stride': stride,
            'down': pg.conv_bn(inplanes, planes * 4, 1) if downsample else None}


def make_layer(pg, block, inplanes, planes, blocks, stride=1):
    exp = 4 if block == 'BOTTLENECK' else 1
    maker = make_bottleneck if block == 'BOTTLENECK' else make_basic
    ds = (stride != 1 or inplanes != planes * exp)
    layers = [maker(pg, inplanes, planes, stride, ds)]
    inplanes = planes * exp
    for _ in range(1, blocks):
        layers.append(maker(pg, inplanes, planes, 1, False))
    return layers


def make_transition(pg, pre, cur):
    layers = []
    for i in range(len(cur)):
        if i < len(pre):
            if cur[i] != pre[i]:
                layers.append({'kind': 'same', 'cb': pg.conv_bn(pre[i], cur[i], 3)})
            else:
                layers.append(None)
        else:
            chain = []
            for j in range(i + 1 - len(pre)):
                inch = pre[-1]
                outch = cur[i] if j == i - len(pre) else inch
                chain.append(pg.conv_bn(inch, outch, 3))
            layers.append({'kind': 'down', 'chain': chain})
    return layers


def make_hr_module(pg, num_branches, block, num_blocks, num_inchannels,
                   num_channels, multi_scale_output):
    exp = 4 if block == 'BOTTLENECK' else 1
    maker = make_bottleneck if block == 'BOTTLENECK' else make_basic
    inch = list(num_inchannels)
    branches = []
    for bi in range(num_branches):
        blks = []
        ds = (inch[bi] != num_channels[bi] * exp)
        blks.append(maker(pg, inch[bi], num_channels[bi], 1, ds))
        inch[bi] = num_channels[bi] * exp
        for _ in range(1, num_blocks[bi]):
            blks.append(maker(pg, inch[bi], num_channels[bi], 1, False))
        branches.append(blks)

    fuse = None
    if num_branches > 1:
        fuse = []
        for i in range(num_branches if multi_scale_output else 1):
            row = []
            for j in range(num_branches):
                if j > i:
                    row.append({'kind': 'up', 'cb': pg.conv_bn(inch[j], inch[i], 1)})
                elif j == i:
                    row.append(None)
                else:
                    chain = []
                    for k in range(i - j):
                        if k == i - j - 1:
                            chain.append({'cb': pg.conv_bn(inch[j], inch[i], 3),
                                          'relu': False})
                        else:
                            chain.append({'cb': pg.conv_bn(inch[j], inch[j], 3),
                                          'relu': True})
                    row.append({'kind': 'down', 'chain': chain})
            fuse.append(row)
    return {'block': block, 'branches': branches, 'fuse': fuse}, inch


def make_stage(pg, cfg, num_inchannels, multi_scale_output=True):
    mods = []
    inch = list(num_inchannels)
    for i in range(cfg['NUM_MODULES']):
        rmso = not (not multi_scale_output and i == cfg['NUM_MODULES'] - 1)
        m, inch = make_hr_module(pg, cfg['NUM_BRANCHES'], cfg['BLOCK'],
                                 cfg['NUM_BLOCKS'], inch, cfg['NUM_CHANNELS'], rmso)
        mods.append(m)
    return mods, inch


def make_hrnet_params(seed, extra):
    pg = ParamGen(seed)
    params = {}
    params['conv1'] = pg.conv_bn(3, 64, 3)
    params['conv2'] = pg.conv_bn(64, 64, 3)

    s1 = extra['STAGE1']
    exp1 = 4 if s1['BLOCK'] == 'BOTTLENECK' else 1
    params['layer1'] = make_layer(pg, s1['BLOCK'], 64,
                                  s1['NUM_CHANNELS'][0], s1['NUM_BLOCKS'][0])
    stage1_out = exp1 * s1['NUM_CHANNELS'][0]

    s2 = extra['STAGE2']
    exp2 = 4 if s2['BLOCK'] == 'BOTTLENECK' else 1
    nc2 = [c * exp2 for c in s2['NUM_CHANNELS']]
    params['transition1'] = make_transition(pg, [stage1_out], nc2)
    params['stage2'], pre = make_stage(pg, s2, nc2)

    s3 = extra['STAGE3']
    exp3 = 4 if s3['BLOCK'] == 'BOTTLENECK' else 1
    nc3 = [c * exp3 for c in s3['NUM_CHANNELS']]
    params['transition2'] = make_transition(pg, pre, nc3)
    params['stage3'], pre = make_stage(pg, s3, nc3)

    s4 = extra['STAGE4']
    exp4 = 4 if s4['BLOCK'] == 'BOTTLENECK' else 1
    nc4 = [c * exp4 for c in s4['NUM_CHANNELS']]
    params['transition3'] = make_transition(pg, pre, nc4)
    params['stage4'], pre = make_stage(pg, s4, nc4, multi_scale_output=True)
    return params


# ----------------------------------------------------------------------------
# Forward pass (mirrors the PyTorch module semantics)
# ----------------------------------------------------------------------------
def basic_fwd(p, x):
    out = conv_bn(x, p['conv1'], p['stride'], 1, relu=True)
    if p['down'] is not None:
        residual = conv_bn(x, p['down'], p['stride'], 0, relu=False)
    else:
        residual = x
    return conv_bn(out, p['conv2'], 1, 1, relu=True, residual=residual)


def bottleneck_fwd(p, x):
    out = conv_bn(x, p['conv1'], 1, 0, relu=True)
    out = conv_bn(out, p['conv2'], p['stride'], 1, relu=True)
    if p['down'] is not None:
        residual = conv_bn(x, p['down'], p['stride'], 0, relu=False)
    else:
        residual = x
    return conv_bn(out, p['conv3'], 1, 0, relu=True, residual=residual)


def transition_fwd(t, x):
    if t is None:
        return x
    if t['kind'] == 'same':
        return conv_bn(x, t['cb'], 1, 1, relu=True)
    z = x
    for cb in t['chain']:
        z = conv_bn(z, cb, 2, 1, relu=True)
    return z


def _fuse_down(f, xj):
    z = xj
    for step in f['chain']:
        z = conv_bn(z, step['cb'], 2, 1, relu=step['relu'])
    return z


def hr_module_fwd(m, xs):
    bfwd = bottleneck_fwd if m['block'] == 'BOTTLENECK' else basic_fwd
    nb = len(m['branches'])
    xs = list(xs)
    for bi in range(nb):
        z = xs[bi]
        for blk in m['branches'][bi]:
            z = bfwd(blk, z)
        xs[bi] = z
    if nb == 1:
        return xs

    fuse = m['fuse']
    nrows = len(fuse)

    # Batch all same-input 1x1 fuse projections from branch j into ONE GEMM with
    # concatenated output channels (fills MXU lanes, one launch), then split.
    up = {}
    for j in range(1, nb):
        rows = list(range(min(j, nrows)))
        if not rows:
            continue
        cbs = [fuse[i][j]['cb'] for i in rows]
        cat = {'w': jnp.concatenate([cb['w'] for cb in cbs], axis=0),
               's': jnp.concatenate([cb['s'] for cb in cbs], axis=0),
               'b': jnp.concatenate([cb['b'] for cb in cbs], axis=0)}
        z = conv_bn(xs[j], cat, 1, 0, relu=False)
        off = 0
        for i, cb in zip(rows, cbs):
            co = cb['w'].shape[0]
            up[(i, j)] = z[..., off:off + co]
            off += co

    out = []
    for i in range(nrows):
        y = xs[0] if i == 0 else _fuse_down(fuse[i][0], xs[0])
        for j in range(1, nb):
            if i == j:
                y = y + xs[j]
            elif j > i:
                z = up[(i, j)]
                N, _, _, C = z.shape
                th, tw = xs[i].shape[1], xs[i].shape[2]
                # F.interpolate(..., mode='bilinear', align_corners=False) equivalent
                y = y + jax.image.resize(z, (N, th, tw, C), method='bilinear')
            else:
                y = y + _fuse_down(fuse[i][j], xs[j])
        out.append(jnp.maximum(y, 0.0))
    return out


def stage_fwd(mods, xs):
    for m in mods:
        xs = hr_module_fwd(m, xs)
    return xs


def hrnet_forward(params, extra, x_nchw):
    # layout: NCHW in / NCHW out (PyTorch convention); NHWC bf16 internally.
    x = jnp.transpose(x_nchw, (0, 2, 3, 1)).astype(BF16)
    x = conv_bn(x, params['conv1'], 2, 1, relu=True)
    x = conv_bn(x, params['conv2'], 2, 1, relu=True)
    blk_fwd = bottleneck_fwd if extra['STAGE1']['BLOCK'] == 'BOTTLENECK' else basic_fwd
    for blk in params['layer1']:
        x = blk_fwd(blk, x)

    # transition1 + stage2
    x_list = []
    for i in range(extra['STAGE2']['NUM_BRANCHES']):
        t = params['transition1'][i]
        x_list.append(transition_fwd(t, x) if t is not None else x)
    y_list = stage_fwd(params['stage2'], x_list)

    # transition2 + stage3
    x_list = []
    for i in range(extra['STAGE3']['NUM_BRANCHES']):
        t = params['transition2'][i]
        if t is not None:
            src = y_list[i] if i < extra['STAGE2']['NUM_BRANCHES'] else y_list[-1]
            x_list.append(transition_fwd(t, src))
        else:
            x_list.append(y_list[i])
    y_list = stage_fwd(params['stage3'], x_list)

    # transition3 + stage4
    x_list = []
    for i in range(extra['STAGE4']['NUM_BRANCHES']):
        t = params['transition3'][i]
        if t is not None:
            src = y_list[i] if i < extra['STAGE3']['NUM_BRANCHES'] else y_list[-1]
            x_list.append(transition_fwd(t, src))
        else:
            x_list.append(y_list[i])
    y_list = stage_fwd(params['stage4'], x_list)

    return [jnp.transpose(y.astype(F32), (0, 3, 1, 2)) for y in y_list]


# ----------------------------------------------------------------------------
# Small HRNet config (kept tiny so the script runs quickly)
# ----------------------------------------------------------------------------
CONFIG = {'MODEL': {'EXTRA': {
    'STAGE1': {'NUM_MODULES': 1, 'NUM_BRANCHES': 1, 'BLOCK': 'BOTTLENECK',
               'NUM_BLOCKS': [1], 'NUM_CHANNELS': [8], 'FUSE_METHOD': 'SUM'},
    'STAGE2': {'NUM_MODULES': 1, 'NUM_BRANCHES': 2, 'BLOCK': 'BASIC',
               'NUM_BLOCKS': [1, 1], 'NUM_CHANNELS': [8, 16], 'FUSE_METHOD': 'SUM'},
    'STAGE3': {'NUM_MODULES': 1, 'NUM_BRANCHES': 3, 'BLOCK': 'BASIC',
               'NUM_BLOCKS': [1, 1, 1], 'NUM_CHANNELS': [8, 16, 32], 'FUSE_METHOD': 'SUM'},
    'STAGE4': {'NUM_MODULES': 1, 'NUM_BRANCHES': 4, 'BLOCK': 'BASIC',
               'NUM_BLOCKS': [1, 1, 1, 1], 'NUM_CHANNELS': [8, 16, 32, 64], 'FUSE_METHOD': 'SUM'},
}}}


if __name__ == "__main__":
    extra = CONFIG['MODEL']['EXTRA']
    params = make_hrnet_params(seed=1, extra=extra)

    key = jax.random.PRNGKey(0)
    x = jax.random.normal(key, (2, 3, 32, 32), F32)   # NCHW, like PyTorch

    fwd = jax.jit(lambda inp: hrnet_forward(params, extra, inp))
    outs = jax.block_until_ready(fwd(x))

    expected = [(2, 8, 8, 8), (2, 16, 4, 4), (2, 32, 2, 2), (2, 64, 1, 1)]
    got = [tuple(int(d) for d in o.shape) for o in outs]
    assert got == expected, (got, expected)
    assert all(o.dtype == F32 for o in outs)
    print("KERNEL_OK")
</pallas_src>

<mosaic_0001>
module attributes {stable_mosaic.version = 11 : i64} {
  func.func @_gemm_kernel(%arg0: i32, %arg1: i32, %arg2: memref<512x27xbf16, #tpu.memory_space<vmem>>, %arg3: memref<27x64xbf16, #tpu.memory_space<vmem>>, %arg4: memref<1x64xf32, #tpu.memory_space<vmem>>, %arg5: memref<512x64xbf16, #tpu.memory_space<vmem>>) attributes {dimension_semantics = [#tpu.dimension_semantics<parallel>, #tpu.dimension_semantics<parallel>], iteration_bounds = array<i64: 1, 1>, scalar_prefetch = 0 : i64, scratch_operands = 0 : i64, tpu.core_type = #tpu.core_type<tc>, window_params = [{transform_indices = @transform_0, window_bounds = array<i64: 512, 27>}, {transform_indices = @transform_1, window_bounds = array<i64: 27, 64>}, {transform_indices = @transform_2, window_bounds = array<i64: 1, 64>}, {transform_indices = @transform_3, window_bounds = array<i64: 512, 64>}]} {
    %c0 = arith.constant 0 : index
    %c0_0 = arith.constant 0 : index
    %0 = vector.load %arg2[%c0, %c0_0] : memref<512x27xbf16, #tpu.memory_space<vmem>>, vector<512x27xbf16>
    %c0_1 = arith.constant 0 : index
    %c0_2 = arith.constant 0 : index
    %1 = vector.load %arg3[%c0_1, %c0_2] : memref<27x64xbf16, #tpu.memory_space<vmem>>, vector<27x64xbf16>
    %cst = arith.constant dense<0.000000e+00> : vector<512x64xf32>
    %2 = tpu.matmul %0, %1, %cst {dimension_numbers = #tpu.dot_dimension_numbers<[1], [0], [0], [1], [0, 0, 1, 1], [], []>} : vector<512x27xbf16>, vector<27x64xbf16>, vector<512x64xf32> -> vector<512x64xf32>
    %c0_3 = arith.constant 0 : index
    %c0_4 = arith.constant 0 : index
    %3 = vector.load %arg4[%c0_3, %c0_4] : memref<1x64xf32, #tpu.memory_space<vmem>>, vector<1x64xf32>
    %4 = vector.broadcast %3 : vector<1x64xf32> to vector<512x64xf32>
    %5 = arith.addf %2, %4 : vector<512x64xf32>
    %cst_5 = arith.constant 0.000000e+00 : f32
    %6 = vector.broadcast %cst_5 : f32 to vector<512x64xf32>
    %7 = arith.maximumf %5, %6 : vector<512x64xf32>
    %8 = arith.truncf %7 : vector<512x64xf32> to vector<512x64xbf16>
    %c0_6 = arith.constant 0 : index
    %c0_7 = arith.constant 0 : index
    %9 = vector.load %arg5[%c0_6, %c0_7] : memref<512x64xbf16, #tpu.memory_space<vmem>>, vector<512x64xbf16>
    tpu.vector_store %arg5[%c0_6, %c0_7], %8 {strides = array<i32>} : memref<512x64xbf16, #tpu.memory_space<vmem>>, vector<512x64xbf16>,
    return
  }
  func.func @transform_0(%arg0: i32, %arg1: i32) -> (i32, i32) {
    %c0_i32 = arith.constant 0 : i32
    %c0_i32_0 = arith.constant 0 : i32
    return %arg0, %c0_i32 : i32, i32
  }
  func.func @transform_1(%arg0: i32, %arg1: i32) -> (i32, i32) {
    %c0_i32 = arith.constant 0 : i32
    %c0_i32_0 = arith.constant 0 : i32
    return %c0_i32, %arg1 : i32, i32
  }
  func.func @transform_2(%arg0: i32, %arg1: i32) -> (i32, i32) {
    %c0_i32 = arith.constant 0 : i32
    %c0_i32_0 = arith.constant 0 : i32
    return %c0_i32, %arg1 : i32, i32
  }
  func.func @transform_3(%arg0: i32, %arg1: i32) -> (i32, i32) {
    %c0_i32 = arith.constant 0 : i32
    return %arg0, %arg1 : i32, i32
  }
}

module attributes {stable_mosaic.version = 11 : i64} {
  func.func @_gemm_kernel(%arg0: i32, %arg1: i32, %arg2: memref<128x576xbf16, #tpu.memory_space<vmem>>, %arg3: memref<576x64xbf16, #tpu.memory_space<vmem>>, %arg4: memref<1x64xf32, #tpu.memory_space<vmem>>, %arg5: memref<128x64xbf16, #tpu.memory_space<vmem>>) attributes {dimension_semantics = [#tpu.dimension_semantics<parallel>, #tpu.dimension_semantics<parallel>], iteration_bounds = array<i64: 1, 1>, scalar_prefetch = 0 : i64, scratch_operands = 0 : i64, tpu.core_type = #tpu.core_type<tc>, window_params = [{transform_indices = @transform_0, window_bounds = array<i64: 128, 576>}, {transform_indices = @transform_1, window_bounds = array<i64: 576, 64>}, {transform_indices = @transform_2, window_bounds = array<i64: 1, 64>}, {transform_indices = @transform_3, window_bounds = array<i64: 128, 64>}]} {
    %c0 = arith.constant 0 : index
    %c0_0 = arith.constant 0 : index
    %0 = vector.load %arg2[%c0, %c0_0] : memref<128x576xbf16, #tpu.memory_space<vmem>>, vector<128x576xbf16>
    %c0_1 = arith.constant 0 : index
    %c0_2 = arith.constant 0 : index
    %1 = vector.load %arg3[%c0_1, %c0_2] : memref<576x64xbf16, #tpu.memory_space<vmem>>, vector<576x64xbf16>
    %cst = arith.constant dense<0.000000e+00> : vector<128x64xf32>
    %2 = tpu.matmul %0, %1, %cst {dimension_numbers = #tpu.dot_dimension_numbers<[1], [0], [0], [1], [0, 0, 1, 1], [], []>} : vector<128x576xbf16>, vector<576x64xbf16>, vector<128x64xf32> -> vector<128x64xf32>
    %c0_3 = arith.constant 0 : index
    %c0_4 = arith.constant 0 : index
    %3 = vector.load %arg4[%c0_3, %c0_4] : memref<1x64xf32, #tpu.memory_space<vmem>>, vector<1x64xf32>
    %4 = vector.broadcast %3 : vector<1x64xf32> to vector<128x64xf32>
    %5 = arith.addf %2, %4 : vector<128x64xf32>
    %cst_5 = arith.constant 0.000000e+00 : f32
    %6 = vector.broadcast %cst_5 : f32 to vector<128x64xf32>
    %7 = arith.maximumf %5, %6 : vector<128x64xf32>
    %8 = arith.truncf %7 : vector<128x64xf32> to vector<128x64xbf16>
    %c0_6 = arith.constant 0 : index
    %c0_7 = arith.constant 0 : index
    %9 = vector.load %arg5[%c0_6, %c0_7] : memref<128x64xbf16, #tpu.memory_space<vmem>>, vector<128x64xbf16>
    tpu.vector_store %arg5[%c0_6, %c0_7], %8 {strides = array<i32>} : memref<128x64xbf16, #tpu.memory_space<vmem>>, vector<128x64xbf16>,
    return
  }
  func.func @transform_0(%arg0: i32, %arg1: i32) -> (i32, i32) {
    %c0_i32 = arith.constant 0 : i32
    %c0_i32_0 = arith.constant 0 : i32
    return %arg0, %c0_i32 : i32, i32
  }
  func.func @transform_1(%arg0: i32, %arg1: i32) -> (i32, i32) {
    %c0_i32 = arith.constant 0 : i32
    %c0_i32_0 = arith.constant 0 : i32
    return %c0_i32, %arg1 : i32, i32
  }
  func.func @transform_2(%arg0: i32, %arg1: i32) -> (i32, i32) {
    %c0_i32 = arith.constant 0 : i32
    %c0_i32_0 = arith.constant 0 : i32
    return %c0_i32, %arg1 : i32, i32
  }
  func.func @transform_3(%arg0: i32, %arg1: i32) -> (i32, i32) {
    %c0_i32 = arith.constant 0 : i32
    return %arg0, %arg1 : i32, i32
  }
}

module attributes {stable_mosaic.version = 11 : i64} {
  func.func @_gemm_kernel(%arg0: i32, %arg1: i32, %arg2: memref<128x64xbf16, #tpu.memory_space<vmem>>, %arg3: memref<64x8xbf16, #tpu.memory_space<vmem>>, %arg4: memref<1x8xf32, #tpu.memory_space<vmem>>, %arg5: memref<128x8xbf16, #tpu.memory_space<vmem>>) attributes {dimension_semantics = [#tpu.dimension_semantics<parallel>, #tpu.dimension_semantics<parallel>], iteration_bounds = array<i64: 1, 1>, scalar_prefetch = 0 : i64, scratch_operands = 0 : i64, tpu.core_type = #tpu.core_type<tc>, window_params = [{transform_indices = @transform_0, window_bounds = array<i64: 128, 64>}, {transform_indices = @transform_1, window_bounds = array<i64: 64, 8>}, {transform_indices = @transform_2, window_bounds = array<i64: 1, 8>}, {transform_indices = @transform_3, window_bounds = array<i64: 128, 8>}]} {
    %c0 = arith.constant 0 : index
    %c0_0 = arith.constant 0 : index
    %0 = vector.load %arg2[%c0, %c0_0] : memref<128x64xbf16, #tpu.memory_space<vmem>>, vector<128x64xbf16>
    %c0_1 = arith.constant 0 : index
    %c0_2 = arith.constant 0 : index
    %1 = vector.load %arg3[%c0_1, %c0_2] : memref<64x8xbf16, #tpu.memory_space<vmem>>, vector<64x8xbf16>
    %cst = arith.constant dense<0.000000e+00> : vector<128x8xf32>
    %2 = tpu.matmul %0, %1, %cst {dimension_numbers = #tpu.dot_dimension_numbers<[1], [0], [0], [1], [0, 0, 1, 1], [], []>} : vector<128x64xbf16>, vector<64x8xbf16>, vector<128x8xf32> -> vector<128x8xf32>
    %c0_3 = arith.constant 0 : index
    %c0_4 = arith.constant 0 : index
    %3 = vector.load %arg4[%c0_3, %c0_4] : memref<1x8xf32, #tpu.memory_space<vmem>>, vector<1x8xf32>
    %4 = vector.broadcast %3 : vector<1x8xf32> to vector<128x8xf32>
    %5 = arith.addf %2, %4 : vector<128x8xf32>
    %cst_5 = arith.constant 0.000000e+00 : f32
    %6 = vector.broadcast %cst_5 : f32 to vector<128x8xf32>
    %7 = arith.maximumf %5, %6 : vector<128x8xf32>
    %8 = arith.truncf %7 : vector<128x8xf32> to vector<128x8xbf16>
    %c0_6 = arith.constant 0 : index
    %c0_7 = arith.constant 0 : index
    %9 = vector.load %arg5[%c0_6, %c0_7] : memref<128x8xbf16, #tpu.memory_space<vmem>>, vector<128x8xbf16>
    tpu.vector_store %arg5[%c0_6, %c0_7], %8 {strides = array<i32>} : memref<128x8xbf16, #tpu.memory_space<vmem>>, vector<128x8xbf16>,
    return
  }
  func.func @transform_0(%arg0: i32, %arg1: i32) -> (i32, i32) {
    %c0_i32 = arith.constant 0 : i32
    %c0_i32_0 = arith.constant 0 : i32
    return %arg0, %c0_i32 : i32, i32
  }
  func.func @transform_1(%arg0: i32, %arg1: i32) -> (i32, i32) {
    %c0_i32 = arith.constant 0 : i32
    %c0_i32_0 = arith.constant 0 : i32
    return %c0_i32, %arg1 : i32, i32
  }
  func.func @transform_2(%arg0: i32, %arg1: i32) -> (i32, i32) {
    %c0_i32 = arith.constant 0 : i32
    %c0_i32_0 = arith.constant 0 : i32
    return %c0_i32, %arg1 : i32, i32
  }
  func.func @transform_3(%arg0: i32, %arg1: i32) -> (i32, i32) {
    %c0_i32 = arith.constant 0 : i32
    return %arg0, %arg1 : i32, i32
  }
}

module attributes {stable_mosaic.version = 11 : i64} {
  func.func @_conv3x3_kernel(%arg0: i32, %arg1: i32, %arg2: memref<200x8xbf16, #tpu.memory_space<vmem>>, %arg3: memref<200x8xbf16, #tpu.memory_space<vmem>>, %arg4: memref<9x8x8xbf16, #tpu.memory_space<vmem>>, %arg5: memref<1x8xf32, #tpu.memory_space<vmem>>, %arg6: memref<200x8xbf16, #tpu.memory_space<vmem>>) attributes {dimension_semantics = [#tpu.dimension_semantics<parallel>, #tpu.dimension_semantics<parallel>], iteration_bounds = array<i64: 1, 1>, scalar_prefetch = 0 : i64, scratch_operands = 0 : i64, tpu.core_type = #tpu.core_type<tc>, window_params = [{transform_indices = @transform_0, window_bounds = array<i64: 200, 8>}, {transform_indices = @transform_1, window_bounds = array<i64: 200, 8>}, {transform_indices = @transform_2, window_bounds = array<i64: 9, 8, 8>}, {transform_indices = @transform_3, window_bounds = array<i64: 1, 8>}, {transform_indices = @transform_4, window_bounds = array<i64: 200, 8>}]} {
    %c0 = arith.constant 0 : index
    %c0_0 = arith.constant 0 : index
    %0 = vector.load %arg2[%c0, %c0_0] : memref<200x8xbf16, #tpu.memory_space<vmem>>, vector<200x8xbf16>
    %c0_1 = arith.constant 0 : index
    %c0_2 = arith.constant 0 : index
    %1 = vector.load %arg3[%c0_1, %c0_2] : memref<200x8xbf16, #tpu.memory_space<vmem>>, vector<200x8xbf16>
    %2 = tpu.concatenate %0, %1 in 0 : vector<200x8xbf16>, vector<200x8xbf16> -> vector<400x8xbf16>
    %3 = vector.extract_strided_slice %2 {offsets = [0, 0], sizes = [200, 8], strides = [1, 1]} : vector<400x8xbf16> to vector<200x8xbf16>
    %c0_3 = arith.constant 0 : index
    %c0_4 = arith.constant 0 : index
    %c0_5 = arith.constant 0 : index
    %4 = vector.load %arg4[%c0_3, %c0_4, %c0_5] : memref<9x8x8xbf16, #tpu.memory_space<vmem>>, vector<1x8x8xbf16>
    %5 = vector.shape_cast %4 : vector<1x8x8xbf16> to vector<8x8xbf16>
    %cst = arith.constant dense<0.000000e+00> : vector<200x8xf32>
    %6 = tpu.matmul %3, %5, %cst {dimension_numbers = #tpu.dot_dimension_numbers<[1], [0], [0], [1], [0, 0, 1, 1], [], []>} : vector<200x8xbf16>, vector<8x8xbf16>, vector<200x8xf32> -> vector<200x8xf32>
    %7 = vector.extract_strided_slice %2 {offsets = [1, 0], sizes = [200, 8], strides = [1, 1]} : vector<400x8xbf16> to vector<200x8xbf16>
    %c1 = arith.constant 1 : index
    %c0_6 = arith.constant 0 : index
    %c0_7 = arith.constant 0 : index
    %8 = vector.load %arg4[%c1, %c0_6, %c0_7] : memref<9x8x8xbf16, #tpu.memory_space<vmem>>, vector<1x8x8xbf16>
    %9 = vector.shape_cast %8 : vector<1x8x8xbf16> to vector<8x8xbf16>
    %cst_8 = arith.constant dense<0.000000e+00> : vector<200x8xf32>
    %10 = tpu.matmul %7, %9, %cst_8 {dimension_numbers = #tpu.dot_dimension_numbers<[1], [0], [0], [1], [0, 0, 1, 1], [], []>} : vector<200x8xbf16>, vector<8x8xbf16>, vector<200x8xf32> -> vector<200x8xf32>
    %11 = arith.addf %6, %10 : vector<200x8xf32>
    %12 = vector.extract_strided_slice %2 {offsets = [2, 0], sizes = [200, 8], strides = [1, 1]} : vector<400x8xbf16> to vector<200x8xbf16>
    %c2 = arith.constant 2 : index
    %c0_9 = arith.constant 0 : index
    %c0_10 = arith.constant 0 : index
    %13 = vector.load %arg4[%c2, %c0_9, %c0_10] : memref<9x8x8xbf16, #tpu.memory_space<vmem>>, vector<1x8x8xbf16>
    %14 = vector.shape_cast %13 : vector<1x8x8xbf16> to vector<8x8xbf16>
    %cst_11 = arith.constant dense<0.000000e+00> : vector<200x8xf32>
    %15 = tpu.matmul %12, %14, %cst_11 {dimension_numbers = #tpu.dot_dimension_numbers<[1], [0], [0], [1], [0, 0, 1, 1], [], []>} : vector<200x8xbf16>, vector<8x8xbf16>, vector<200x8xf32> -> vector<200x8xf32>
    %16 = arith.addf %11, %15 : vector<200x8xf32>
    %17 = vector.extract_strided_slice %2 {offsets = [10, 0], sizes = [200, 8], strides = [1, 1]} : vector<400x8xbf16> to vector<200x8xbf16>
    %c3 = arith.constant 3 : index
    %c0_12 = arith.constant 0 : index
    %c0_13 = arith.constant 0 : index
    %18 = vector.load %arg4[%c3, %c0_12, %c0_13] : memref<9x8x8xbf16, #tpu.memory_space<vmem>>, vector<1x8x8xbf16>
    %19 = vector.shape_cast %18 : vector<1x8x8xbf16> to vector<8x8xbf16>
    %cst_14 = arith.constant dense<0.000000e+00> : vector<200x8xf32>
    %20 = tpu.matmul %17, %19, %cst_14 {dimension_numbers = #tpu.dot_dimension_numbers<[1], [0], [0], [1], [0, 0, 1, 1], [], []>} : vector<200x8xbf16>, vector<8x8xbf16>, vector<200x8xf32> -> vector<200x8xf32>
    %21 = arith.addf %16, %20 : vector<200x8xf32>
    %22 = vector.extract_strided_slice %2 {offsets = [11, 0], sizes = [200, 8], strides = [1, 1]} : vector<400x8xbf16> to vector<200x8xbf16>
    %c4 = arith.constant 4 : index
    %c0_15 = arith.constant 0 : index
    %c0_16 = arith.constant 0 : index
    %23 = vector.load %arg4[%c4, %c0_15, %c0_16] : memref<9x8x8xbf16, #tpu.memory_space<vmem>>, vector<1x8x8xbf16>
    %24 = vector.shape_cast %23 : vector<1x8x8xbf16> to vector<8x8xbf16>
    %cst_17 = arith.constant dense<0.000000e+00> : vector<200x8xf32>
    %25 = tpu.matmul %22, %24, %cst_17 {dimension_numbers = #tpu.dot_dimension_numbers<[1], [0], [0], [1], [0, 0, 1, 1], [], []>} : vector<200x8xbf16>, vector<8x8xbf16>, vector<200x8xf32> -> vector<200x8xf32>
    %26 = arith.addf %21, %25 : vector<200x8xf32>
    %27 = vector.extract_strided_slice %2 {offsets = [12, 0], sizes = [200, 8], strides = [1, 1]} : vector<400x8xbf16> to vector<200x8xbf16>
    %c5 = arith.constant 5 : index
    %c0_18 = arith.constant 0 : index
    %c0_19 = arith.constant 0 : index
    %28 = vector.load %arg4[%c5, %c0_18, %c0_19] : memref<9x8x8xbf16, #tpu.memory_space<vmem>>, vector<1x8x8xbf16>
    %29 = vector.shape_cast %28 : vector<1x8x8xbf16> to vector<8x8xbf16>
    %cst_20 = arith.constant dense<0.000000e+00> : vector<200x8xf32>
    %30 = tpu.matmul %27, %29, %cst_20 {dimension_numbers = #tpu.dot_dimension_numbers<[1], [0], [0], [1], [0, 0, 1, 1], [], []>} : vector<200x8xbf16>, vector<8x8xbf16>, vector<200x8xf32> -> vector<200x8xf32>
    %31 = arith.addf %26, %30 : vector<200x8xf32>
    %32 = vector.extract_strided_slice %2 {offsets = [20, 0], sizes = [200, 8], strides = [1, 1]} : vector<400x8xbf16> to vector<200x8xbf16>
    %c6 = arith.constant 6 : index
    %c0_21 = arith.constant 0 : index
    %c0_22 = arith.constant 0 : index
    %33 = vector.load %arg4[%c6, %c0_21, %c0_22] : memref<9x8x8xbf16, #tpu.memory_space<vmem>>, vector<1x8x8xbf16>
    %34 = vector.shape_cast %33 : vector<1x8x8xbf16> to vector<8x8xbf16>
    %cst_23 = arith.constant dense<0.000000e+00> : vector<200x8xf32>
    %35 = tpu.matmul %32, %34, %cst_23 {dimension_numbers = #tpu.dot_dimension_numbers<[1], [0], [0], [1], [0, 0, 1, 1], [], []>} : vector<200x8xbf16>, vector<8x8xbf16>, vector<200x8xf32> -> vector<200x8xf32>
    %36 = arith.addf %31, %35 : vector<200x8xf32>
    %37 = vector.extract_strided_slice %2 {offsets = [21, 0], sizes = [200, 8], strides = [1, 1]} : vector<400x8xbf16> to vector<200x8xbf16>
    %c7 = arith.constant 7 : index
    %c0_24 = arith.constant 0 : index
    %c0_25 = arith.constant 0 : index
    %38 = vector.load %arg4[%c7, %c0_24, %c0_25] : memref<9x8x8xbf16, #tpu.memory_space<vmem>>, vector<1x8x8xbf16>
    %39 = vector.shape_cast %38 : vector<1x8x8xbf16> to vector<8x8xbf16>
    %cst_26 = arith.constant dense<0.000000e+00> : vector<200x8xf32>
    %40 = tpu.matmul %37, %39, %cst_26 {dimension_numbers = #tpu.dot_dimension_numbers<[1], [0], [0], [1], [0, 0, 1, 1], [], []>} : vector<200x8xbf16>, vector<8x8xbf16>, vector<200x8xf32> -> vector<200x8xf32>
    %41 = arith.addf %36, %40 : vector<200x8xf32>
    %42 = vector.extract_strided_slice %2 {offsets = [22, 0], sizes = [200, 8], strides = [1, 1]} : vector<400x8xbf16> to vector<200x8xbf16>
    %c8 = arith.constant 8 : index
    %c0_27 = arith.constant 0 : index
    %c0_28 = arith.constant 0 : index
    %43 = vector.load %arg4[%c8, %c0_27, %c0_28] : memref<9x8x8xbf16, #tpu.memory_space<vmem>>, vector<1x8x8xbf16>
    %44 = vector.shape_cast %43 : vector<1x8x8xbf16> to vector<8x8xbf16>
    %cst_29 = arith.constant dense<0.000000e+00> : vector<200x8xf32>
    %45 = tpu.matmul %42, %44, %cst_29 {dimension_numbers = #tpu.dot_dimension_numbers<[1], [0], [0], [1], [0, 0, 1, 1], [], []>} : vector<200x8xbf16>, vector<8x8xbf16>, vector<200x8xf32> -> vector<200x8xf32>
    %46 = arith.addf %41, %45 : vector<200x8xf32>
    %c0_30 = arith.constant 0 : index
    %c0_31 = arith.constant 0 : index
    %47 = vector.load %arg5[%c0_30, %c0_31] : memref<1x8xf32, #tpu.memory_space<vmem>>, vector<1x8xf32>
    %48 = vector.broadcast %47 : vector<1x8xf32> to vector<200x8xf32>
    %49 = arith.addf %46, %48 : vector<200x8xf32>
    %cst_32 = arith.constant 0.000000e+00 : f32
    %50 = vector.broadcast %cst_32 : f32 to vector<200x8xf32>
    %51 = arith.maximumf %49, %50 : vector<200x8xf32>
    %52 = arith.truncf %51 : vector<200x8xf32> to vector<200x8xbf16>
    %c0_33 = arith.constant 0 : index
    %c0_34 = arith.constant 0 : index
    %53 = vector.load %arg6[%c0_33, %c0_34] : memref<200x8xbf16, #tpu.memory_space<vmem>>, vector<200x8xbf16>
    tpu.vector_store %arg6[%c0_33, %c0_34], %52 {strides = array<i32>} : memref<200x8xbf16, #tpu.memory_space<vmem>>, vector<200x8xbf16>,
    return
  }
  func.func @transform_0(%arg0: i32, %arg1: i32) -> (i32, i32) {
    %c0_i32 = arith.constant 0 : i32
    %c0_i32_0 = arith.constant 0 : i32
    return %arg0, %c0_i32 : i32, i32
  }
  func.func @transform_1(%arg0: i32, %arg1: i32) -> (i32, i32) {
    %c1_i32 = arith.constant 1 : i32
    %0 = arith.addi %arg0, %c1_i32 : i32
    %c1_i32_0 = arith.constant 1 : i32
    %1 = arith.muli %0, %c1_i32_0 : i32
    %c0_i32 = arith.constant 0 : i32
    %c0_i32_1 = arith.constant 0 : i32
    return %1, %c0_i32 : i32, i32
  }
  func.func @transform_2(%arg0: i32, %arg1: i32) -> (i32, i32, i32) {
    %c0_i32 = arith.constant 0 : i32
    %c0_i32_0 = arith.constant 0 : i32
    %c0_i32_1 = arith.constant 0 : i32
    return %c0_i32, %c0_i32_0, %arg1 : i32, i32, i32
  }
  func.func @transform_3(%arg0: i32, %arg1: i32) -> (i32, i32) {
    %c0_i32 = arith.constant 0 : i32
    %c0_i32_0 = arith.constant 0 : i32
    return %c0_i32, %arg1 : i32, i32
  }
  func.func @transform_4(%arg0: i32, %arg1: i32) -> (i32, i32) {
    %c0_i32 = arith.constant 0 : i32
    return %arg0, %arg1 : i32, i32
  }
}

module attributes {stable_mosaic.version = 11 : i64} {
  func.func @_gemm_kernel(%arg0: i32, %arg1: i32, %arg2: memref<128x64xbf16, #tpu.memory_space<vmem>>, %arg3: memref<64x32xbf16, #tpu.memory_space<vmem>>, %arg4: memref<1x32xf32, #tpu.memory_space<vmem>>, %arg5: memref<128x32xbf16, #tpu.memory_space<vmem>>) attributes {dimension_semantics = [#tpu.dimension_semantics<parallel>, #tpu.dimension_semantics<parallel>], iteration_bounds = array<i64: 1, 1>, scalar_prefetch = 0 : i64, scratch_operands = 0 : i64, tpu.core_type = #tpu.core_type<tc>, window_params = [{transform_indices = @transform_0, window_bounds = array<i64: 128, 64>}, {transform_indices = @transform_1, window_bounds = array<i64: 64, 32>}, {transform_indices = @transform_2, window_bounds = array<i64: 1, 32>}, {transform_indices = @transform_3, window_bounds = array<i64: 128, 32>}]} {
    %c0 = arith.constant 0 : index
    %c0_0 = arith.constant 0 : index
    %0 = vector.load %arg2[%c0, %c0_0] : memref<128x64xbf16, #tpu.memory_space<vmem>>, vector<128x64xbf16>
    %c0_1 = arith.constant 0 : index
    %c0_2 = arith.constant 0 : index
    %1 = vector.load %arg3[%c0_1, %c0_2] : memref<64x32xbf16, #tpu.memory_space<vmem>>, vector<64x32xbf16>
    %cst = arith.constant dense<0.000000e+00> : vector<128x32xf32>
    %2 = tpu.matmul %0, %1, %cst {dimension_numbers = #tpu.dot_dimension_numbers<[1], [0], [0], [1], [0, 0, 1, 1], [], []>} : vector<128x64xbf16>, vector<64x32xbf16>, vector<128x32xf32> -> vector<128x32xf32>
    %c0_3 = arith.constant 0 : index
    %c0_4 = arith.constant 0 : index
    %3 = vector.load %arg4[%c0_3, %c0_4] : memref<1x32xf32, #tpu.memory_space<vmem>>, vector<1x32xf32>
    %4 = vector.broadcast %3 : vector<1x32xf32> to vector<128x32xf32>
    %5 = arith.addf %2, %4 : vector<128x32xf32>
    %6 = arith.truncf %5 : vector<128x32xf32> to vector<128x32xbf16>
    %c0_5 = arith.constant 0 : index
    %c0_6 = arith.constant 0 : index
    %7 = vector.load %arg5[%c0_5, %c0_6] : memref<128x32xbf16, #tpu.memory_space<vmem>>, vector<128x32xbf16>
    tpu.vector_store %arg5[%c0_5, %c0_6], %6 {strides = array<i32>} : memref<128x32xbf16, #tpu.memory_space<vmem>>, vector<128x32xbf16>,
    return
  }
  func.func @transform_0(%arg0: i32, %arg1: i32) -> (i32, i32) {
    %c0_i32 = arith.constant 0 : i32
    %c0_i32_0 = arith.constant 0 : i32
    return %arg0, %c0_i32 : i32, i32
  }
  func.func @transform_1(%arg0: i32, %arg1: i32) -> (i32, i32) {
    %c0_i32 = arith.constant 0 : i32
    %c0_i32_0 = arith.constant 0 : i32
    return %c0_i32, %arg1 : i32, i32
  }
  func.func @transform_2(%arg0: i32, %arg1: i32) -> (i32, i32) {
    %c0_i32 = arith.constant 0 : i32
    %c0_i32_0 = arith.constant 0 : i32
    return %c0_i32, %arg1 : i32, i32
  }
  func.func @transform_3(%arg0: i32, %arg1: i32) -> (i32, i32) {
    %c0_i32 = arith.constant 0 : i32
    return %arg0, %arg1 : i32, i32
  }
}

module attributes {stable_mosaic.version = 11 : i64} {
  func.func @_gemm_res_kernel(%arg0: i32, %arg1: i32, %arg2: memref<128x8xbf16, #tpu.memory_space<vmem>>, %arg3: memref<8x32xbf16, #tpu.memory_space<vmem>>, %arg4: memref<1x32xf32, #tpu.memory_space<vmem>>, %arg5: memref<128x32xbf16, #tpu.memory_space<vmem>>, %arg6: memref<128x32xbf16, #tpu.memory_space<vmem>>) attributes {dimension_semantics = [#tpu.dimension_semantics<parallel>, #tpu.dimension_semantics<parallel>], iteration_bounds = array<i64: 1, 1>, scalar_prefetch = 0 : i64, scratch_operands = 0 : i64, tpu.core_type = #tpu.core_type<tc>, window_params = [{transform_indices = @transform_0, window_bounds = array<i64: 128, 8>}, {transform_indices = @transform_1, window_bounds = array<i64: 8, 32>}, {transform_indices = @transform_2, window_bounds = array<i64: 1, 32>}, {transform_indices = @transform_3, window_bounds = array<i64: 128, 32>}, {transform_indices = @transform_4, window_bounds = array<i64: 128, 32>}]} {
    %c0 = arith.constant 0 : index
    %c0_0 = arith.constant 0 : index
    %0 = vector.load %arg2[%c0, %c0_0] : memref<128x8xbf16, #tpu.memory_space<vmem>>, vector<128x8xbf16>
    %c0_1 = arith.constant 0 : index
    %c0_2 = arith.constant 0 : index
    %1 = vector.load %arg3[%c0_1, %c0_2] : memref<8x32xbf16, #tpu.memory_space<vmem>>, vector<8x32xbf16>
    %cst = arith.constant dense<0.000000e+00> : vector<128x32xf32>
    %2 = tpu.matmul %0, %1, %cst {dimension_numbers = #tpu.dot_dimension_numbers<[1], [0], [0], [1], [0, 0, 1, 1], [], []>} : vector<128x8xbf16>, vector<8x32xbf16>, vector<128x32xf32> -> vector<128x32xf32>
    %c0_3 = arith.constant 0 : index
    %c0_4 = arith.constant 0 : index
    %3 = vector.load %arg4[%c0_3, %c0_4] : memref<1x32xf32, #tpu.memory_space<vmem>>, vector<1x32xf32>
    %4 = vector.broadcast %3 : vector<1x32xf32> to vector<128x32xf32>
    %5 = arith.addf %2, %4 : vector<128x32xf32>
    %c0_5 = arith.constant 0 : index
    %c0_6 = arith.constant 0 : index
    %6 = vector.load %arg5[%c0_5, %c0_6] : memref<128x32xbf16, #tpu.memory_space<vmem>>, vector<128x32xbf16>
    %7 = arith.extf %6 : vector<128x32xbf16> to vector<128x32xf32>
    %8 = arith.addf %5, %7 : vector<128x32xf32>
    %cst_7 = arith.constant 0.000000e+00 : f32
    %9 = vector.broadcast %cst_7 : f32 to vector<128x32xf32>
    %10 = arith.maximumf %8, %9 : vector<128x32xf32>
    %11 = arith.truncf %10 : vector<128x32xf32> to vector<128x32xbf16>
    %c0_8 = arith.constant 0 : index
    %c0_9 = arith.constant 0 : index
    %12 = vector.load %arg6[%c0_8, %c0_9] : memref<128x32xbf16, #tpu.memory_space<vmem>>, vector<128x32xbf16>
    tpu.vector_store %arg6[%c0_8, %c0_9], %11 {strides = array<i32>} : memref<128x32xbf16, #tpu.memory_space<vmem>>, vector<128x32xbf16>,
    return
  }
  func.func @transform_0(%arg0: i32, %arg1: i32) -> (i32, i32) {
    %c0_i32 = arith.constant 0 : i32
    %c0_i32_0 = arith.constant 0 : i32
    return %arg0, %c0_i32 : i32, i32
  }
  func.func @transform_1(%arg0: i32, %arg1: i32) -> (i32, i32) {
    %c0_i32 = arith.constant 0 : i32
    %c0_i32_0 = arith.constant 0 : i32
    return %c0_i32, %arg1 : i32, i32
  }
  func.func @transform_2(%arg0: i32, %arg1: i32) -> (i32, i32) {
    %c0_i32 = arith.constant 0 : i32
    %c0_i32_0 = arith.constant 0 : i32
    return %c0_i32, %arg1 : i32, i32
  }
  func.func @transform_3(%arg0: i32, %arg1: i32) -> (i32, i32) {
    %c0_i32 = arith.constant 0 : i32
    return %arg0, %arg1 : i32, i32
  }
  func.func @transform_4(%arg0: i32, %arg1: i32) -> (i32, i32) {
    %c0_i32 = arith.constant 0 : i32
    return %arg0, %arg1 : i32, i32
  }
}

module attributes {stable_mosaic.version = 11 : i64} {
  func.func @_conv3x3_kernel(%arg0: i32, %arg1: i32, %arg2: memref<200x32xbf16, #tpu.memory_space<vmem>>, %arg3: memref<200x32xbf16, #tpu.memory_space<vmem>>, %arg4: memref<9x32x8xbf16, #tpu.memory_space<vmem>>, %arg5: memref<1x8xf32, #tpu.memory_space<vmem>>, %arg6: memref<200x8xbf16, #tpu.memory_space<vmem>>) attributes {dimension_semantics = [#tpu.dimension_semantics<parallel>, #tpu.dimension_semantics<parallel>], iteration_bounds = array<i64: 1, 1>, scalar_prefetch = 0 : i64, scratch_operands = 0 : i64, tpu.core_type = #tpu.core_type<tc>, window_params = [{transform_indices = @transform_0, window_bounds = array<i64: 200, 32>}, {transform_indices = @transform_1, window_bounds = array<i64: 200, 32>}, {transform_indices = @transform_2, window_bounds = array<i64: 9, 32, 8>}, {transform_indices = @transform_3, window_bounds = array<i64: 1, 8>}, {transform_indices = @transform_4, window_bounds = array<i64: 200, 8>}]} {
    %c0 = arith.constant 0 : index
    %c0_0 = arith.constant 0 : index
    %0 = vector.load %arg2[%c0, %c0_0] : memref<200x32xbf16, #tpu.memory_space<vmem>>, vector<200x32xbf16>
    %c0_1 = arith.constant 0 : index
    %c0_2 = arith.constant 0 : index
    %1 = vector.load %arg3[%c0_1, %c0_2] : memref<200x32xbf16, #tpu.memory_space<vmem>>, vector<200x32xbf16>
    %2 = tpu.concatenate %0, %1 in 0 : vector<200x32xbf16>, vector<200x32xbf16> -> vector<400x32xbf16>
    %3 = vector.extract_strided_slice %2 {offsets = [0, 0], sizes = [200, 32], strides = [1, 1]} : vector<400x32xbf16> to vector<200x32xbf16>
    %c0_3 = arith.constant 0 : index
    %c0_4 = arith.constant 0 : index
    %c0_5 = arith.constant 0 : index
    %4 = vector.load %arg4[%c0_3, %c0_4, %c0_5] : memref<9x32x8xbf16, #tpu.memory_space<vmem>>, vector<1x32x8xbf16>
    %5 = vector.shape_cast %4 : vector<1x32x8xbf16> to vector<32x8xbf16>
    %cst = arith.constant dense<0.000000e+00> : vector<200x8xf32>
    %6 = tpu.matmul %3, %5, %cst {dimension_numbers = #tpu.dot_dimension_numbers<[1], [0], [0], [1], [0, 0, 1, 1], [], []>} : vector<200x32xbf16>, vector<32x8xbf16>, vector<200x8xf32> -> vector<200x8xf32>
    %7 = vector.extract_strided_slice %2 {offsets = [1, 0], sizes = [200, 32], strides = [1, 1]} : vector<400x32xbf16> to vector<200x32xbf16>
    %c1 = arith.constant 1 : index
    %c0_6 = arith.constant 0 : index
    %c0_7 = arith.constant 0 : index
    %8 = vector.load %arg4[%c1, %c0_6, %c0_7] : memref<9x32x8xbf16, #tpu.memory_space<vmem>>, vector<1x32x8xbf16>
    %9 = vector.shape_cast %8 : vector<1x32x8xbf16> to vector<32x8xbf16>
    %cst_8 = arith.constant dense<0.000000e+00> : vector<200x8xf32>
    %10 = tpu.matmul %7, %9, %cst_8 {dimension_numbers = #tpu.dot_dimension_numbers<[1], [0], [0], [1], [0, 0, 1, 1], [], []>} : vector<200x32xbf16>, vector<32x8xbf16>, vector<200x8xf32> -> vector<200x8xf32>
    %11 = arith.addf %6, %10 : vector<200x8xf32>
    %12 = vector.extract_strided_slice %2 {offsets = [2, 0], sizes = [200, 32], strides = [1, 1]} : vector<400x32xbf16> to vector<200x32xbf16>
    %c2 = arith.constant 2 : index
    %c0_9 = arith.constant 0 : index
    %c0_10 = arith.constant 0 : index
    %13 = vector.load %arg4[%c2, %c0_9, %c0_10] : memref<9x32x8xbf16, #tpu.memory_space<vmem>>, vector<1x32x8xbf16>
    %14 = vector.shape_cast %13 : vector<1x32x8xbf16> to vector<32x8xbf16>
    %cst_11 = arith.constant dense<0.000000e+00> : vector<200x8xf32>
    %15 = tpu.matmul %12, %14, %cst_11 {dimension_numbers = #tpu.dot_dimension_numbers<[1], [0], [0], [1], [0, 0, 1, 1], [], []>} : vector<200x32xbf16>, vector<32x8xbf16>, vector<200x8xf32> -> vector<200x8xf32>
    %16 = arith.addf %11, %15 : vector<200x8xf32>
    %17 = vector.extract_strided_slice %2 {offsets = [10, 0], sizes = [200, 32], strides = [1, 1]} : vector<400x32xbf16> to vector<200x32xbf16>
    %c3 = arith.constant 3 : index
    %c0_12 = arith.constant 0 : index
    %c0_13 = arith.constant 0 : index
    %18 = vector.load %arg4[%c3, %c0_12, %c0_13] : memref<9x32x8xbf16, #tpu.memory_space<vmem>>, vector<1x32x8xbf16>
    %19 = vector.shape_cast %18 : vector<1x32x8xbf16> to vector<32x8xbf16>
    %cst_14 = arith.constant dense<0.000000e+00> : vector<200x8xf32>
    %20 = tpu.matmul %17, %19, %cst_14 {dimension_numbers = #tpu.dot_dimension_numbers<[1], [0], [0], [1], [0, 0, 1, 1], [], []>} : vector<200x32xbf16>, vector<32x8xbf16>, vector<200x8xf32> -> vector<200x8xf32>
    %21 = arith.addf %16, %20 : vector<200x8xf32>
    %22 = vector.extract_strided_slice %2 {offsets = [11, 0], sizes = [200, 32], strides = [1, 1]} : vector<400x32xbf16> to vector<200x32xbf16>
    %c4 = arith.constant 4 : index
    %c0_15 = arith.constant 0 : index
    %c0_16 = arith.constant 0 : index
    %23 = vector.load %arg4[%c4, %c0_15, %c0_16] : memref<9x32x8xbf16, #tpu.memory_space<vmem>>, vector<1x32x8xbf16>
    %24 = vector.shape_cast %23 : vector<1x32x8xbf16> to vector<32x8xbf16>
    %cst_17 = arith.constant dense<0.000000e+00> : vector<200x8xf32>
    %25 = tpu.matmul %22, %24, %cst_17 {dimension_numbers = #tpu.dot_dimension_numbers<[1], [0], [0], [1], [0, 0, 1, 1], [], []>} : vector<200x32xbf16>, vector<32x8xbf16>, vector<200x8xf32> -> vector<200x8xf32>
    %26 = arith.addf %21, %25 : vector<200x8xf32>
    %27 = vector.extract_strided_slice %2 {offsets = [12, 0], sizes = [200, 32], strides = [1, 1]} : vector<400x32xbf16> to vector<200x32xbf16>
    %c5 = arith.constant 5 : index
    %c0_18 = arith.constant 0 : index
    %c0_19 = arith.constant 0 : index
    %28 = vector.load %arg4[%c5, %c0_18, %c0_19] : memref<9x32x8xbf16, #tpu.memory_space<vmem>>, vector<1x32x8xbf16>
    %29 = vector.shape_cast %28 : vector<1x32x8xbf16> to vector<32x8xbf16>
    %cst_20 = arith.constant dense<0.000000e+00> : vector<200x8xf32>
    %30 = tpu.matmul %27, %29, %cst_20 {dimension_numbers = #tpu.dot_dimension_numbers<[1], [0], [0], [1], [0, 0, 1, 1], [], []>} : vector<200x32xbf16>, vector<32x8xbf16>, vector<200x8xf32> -> vector<200x8xf32>
    %31 = arith.addf %26, %30 : vector<200x8xf32>
    %32 = vector.extract_strided_slice %2 {offsets = [20, 0], sizes = [200, 32], strides = [1, 1]} : vector<400x32xbf16> to vector<200x32xbf16>
    %c6 = arith.constant 6 : index
    %c0_21 = arith.constant 0 : index
    %c0_22 = arith.constant 0 : index
    %33 = vector.load %arg4[%c6, %c0_21, %c0_22] : memref<9x32x8xbf16, #tpu.memory_space<vmem>>, vector<1x32x8xbf16>
    %34 = vector.shape_cast %33 : vector<1x32x8xbf16> to vector<32x8xbf16>
    %cst_23 = arith.constant dense<0.000000e+00> : vector<200x8xf32>
    %35 = tpu.matmul %32, %34, %cst_23 {dimension_numbers = #tpu.dot_dimension_numbers<[1], [0], [0], [1], [0, 0, 1, 1], [], []>} : vector<200x32xbf16>, vector<32x8xbf16>, vector<200x8xf32> -> vector<200x8xf32>
    %36 = arith.addf %31, %35 : vector<200x8xf32>
    %37 = vector.extract_strided_slice %2 {offsets = [21, 0], sizes = [200, 32], strides = [1, 1]} : vector<400x32xbf16> to vector<200x32xbf16>
    %c7 = arith.constant 7 : index
    %c0_24 = arith.constant 0 : index
    %c0_25 = arith.constant 0 : index
    %38 = vector.load %arg4[%c7, %c0_24, %c0_25] : memref<9x32x8xbf16, #tpu.memory_space<vmem>>, vector<1x32x8xbf16>
    %39 = vector.shape_cast %38 : vector<1x32x8xbf16> to vector<32x8xbf16>
    %cst_26 = arith.constant dense<0.000000e+00> : vector<200x8xf32>
    %40 = tpu.matmul %37, %39, %cst_26 {dimension_numbers = #tpu.dot_dimension_numbers<[1], [0], [0], [1], [0, 0, 1, 1], [], []>} : vector<200x32xbf16>, vector<32x8xbf16>, vector<200x8xf32> -> vector<200x8xf32>
    %41 = arith.addf %36, %40 : vector<200x8xf32>
    %42 = vector.extract_strided_slice %2 {offsets = [22, 0], sizes = [200, 32], strides = [1, 1]} : vector<400x32xbf16> to vector<200x32xbf16>
    %c8 = arith.constant 8 : index
    %c0_27 = arith.constant 0 : index
    %c0_28 = arith.constant 0 : index
    %43 = vector.load %arg4[%c8, %c0_27, %c0_28] : memref<9x32x8xbf16, #tpu.memory_space<vmem>>, vector<1x32x8xbf16>
    %44 = vector.shape_cast %43 : vector<1x32x8xbf16> to vector<32x8xbf16>
    %cst_29 = arith.constant dense<0.000000e+00> : vector<200x8xf32>
    %45 = tpu.matmul %42, %44, %cst_29 {dimension_numbers = #tpu.dot_dimension_numbers<[1], [0], [0], [1], [0, 0, 1, 1], [], []>} : vector<200x32xbf16>, vector<32x8xbf16>, vector<200x8xf32> -> vector<200x8xf32>
    %46 = arith.addf %41, %45 : vector<200x8xf32>
    %c0_30 = arith.constant 0 : index
    %c0_31 = arith.constant 0 : index
    %47 = vector.load %arg5[%c0_30, %c0_31] : memref<1x8xf32, #tpu.memory_space<vmem>>, vector<1x8xf32>
    %48 = vector.broadcast %47 : vector<1x8xf32> to vector<200x8xf32>
    %49 = arith.addf %46, %48 : vector<200x8xf32>
    %cst_32 = arith.constant 0.000000e+00 : f32
    %50 = vector.broadcast %cst_32 : f32 to vector<200x8xf32>
    %51 = arith.maximumf %49, %50 : vector<200x8xf32>
    %52 = arith.truncf %51 : vector<200x8xf32> to vector<200x8xbf16>
    %c0_33 = arith.constant 0 : index
    %c0_34 = arith.constant 0 : index
    %53 = vector.load %arg6[%c0_33, %c0_34] : memref<200x8xbf16, #tpu.memory_space<vmem>>, vector<200x8xbf16>
    tpu.vector_store %arg6[%c0_33, %c0_34], %52 {strides = array<i32>} : memref<200x8xbf16, #tpu.memory_space<vmem>>, vector<200x8xbf16>,
    return
  }
  func.func @transform_0(%arg0: i32, %arg1: i32) -> (i32, i32) {
    %c0_i32 = arith.constant 0 : i32
    %c0_i32_0 = arith.constant 0 : i32
    return %arg0, %c0_i32 : i32, i32
  }
  func.func @transform_1(%arg0: i32, %arg1: i32) -> (i32, i32) {
    %c1_i32 = arith.constant 1 : i32
    %0 = arith.addi %arg0, %c1_i32 : i32
    %c1_i32_0 = arith.constant 1 : i32
    %1 = arith.muli %0, %c1_i32_0 : i32
    %c0_i32 = arith.constant 0 : i32
    %c0_i32_1 = arith.constant 0 : i32
    return %1, %c0_i32 : i32, i32
  }
  func.func @transform_2(%arg0: i32, %arg1: i32) -> (i32, i32, i32) {
    %c0_i32 = arith.constant 0 : i32
    %c0_i32_0 = arith.constant 0 : i32
    %c0_i32_1 = arith.constant 0 : i32
    return %c0_i32, %c0_i32_0, %arg1 : i32, i32, i32
  }
  func.func @transform_3(%arg0: i32, %arg1: i32) -> (i32, i32) {
    %c0_i32 = arith.constant 0 : i32
    %c0_i32_0 = arith.constant 0 : i32
    return %c0_i32, %arg1 : i32, i32
  }
  func.func @transform_4(%arg0: i32, %arg1: i32) -> (i32, i32) {
    %c0_i32 = arith.constant 0 : i32
    return %arg0, %arg1 : i32, i32
  }
}

module attributes {stable_mosaic.version = 11 : i64} {
  func.func @_conv3x3_res_kernel(%arg0: i32, %arg1: i32, %arg2: memref<200x8xbf16, #tpu.memory_space<vmem>>, %arg3: memref<200x8xbf16, #tpu.memory_space<vmem>>, %arg4: memref<9x8x8xbf16, #tpu.memory_space<vmem>>, %arg5: memref<1x8xf32, #tpu.memory_space<vmem>>, %arg6: memref<200x8xbf16, #tpu.memory_space<vmem>>, %arg7: memref<200x8xbf16, #tpu.memory_space<vmem>>) attributes {dimension_semantics = [#tpu.dimension_semantics<parallel>, #tpu.dimension_semantics<parallel>], iteration_bounds = array<i64: 1, 1>, scalar_prefetch = 0 : i64, scratch_operands = 0 : i64, tpu.core_type = #tpu.core_type<tc>, window_params = [{transform_indices = @transform_0, window_bounds = array<i64: 200, 8>}, {transform_indices = @transform_1, window_bounds = array<i64: 200, 8>}, {transform_indices = @transform_2, window_bounds = array<i64: 9, 8, 8>}, {transform_indices = @transform_3, window_bounds = array<i64: 1, 8>}, {transform_indices = @transform_4, window_bounds = array<i64: 200, 8>}, {transform_indices = @transform_5, window_bounds = array<i64: 200, 8>}]} {
    %c0 = arith.constant 0 : index
    %c0_0 = arith.constant 0 : index
    %0 = vector.load %arg2[%c0, %c0_0] : memref<200x8xbf16, #tpu.memory_space<vmem>>, vector<200x8xbf16>
    %c0_1 = arith.constant 0 : index
    %c0_2 = arith.constant 0 : index
    %1 = vector.load %arg3[%c0_1, %c0_2] : memref<200x8xbf16, #tpu.memory_space<vmem>>, vector<200x8xbf16>
    %2 = tpu.concatenate %0, %1 in 0 : vector<200x8xbf16>, vector<200x8xbf16> -> vector<400x8xbf16>
    %3 = vector.extract_strided_slice %2 {offsets = [0, 0], sizes = [200, 8], strides = [1, 1]} : vector<400x8xbf16> to vector<200x8xbf16>
    %c0_3 = arith.constant 0 : index
    %c0_4 = arith.constant 0 : index
    %c0_5 = arith.constant 0 : index
    %4 = vector.load %arg4[%c0_3, %c0_4, %c0_5] : memref<9x8x8xbf16, #tpu.memory_space<vmem>>, vector<1x8x8xbf16>
    %5 = vector.shape_cast %4 : vector<1x8x8xbf16> to vector<8x8xbf16>
    %cst = arith.constant dense<0.000000e+00> : vector<200x8xf32>
    %6 = tpu.matmul %3, %5, %cst {dimension_numbers = #tpu.dot_dimension_numbers<[1], [0], [0], [1], [0, 0, 1, 1], [], []>} : vector<200x8xbf16>, vector<8x8xbf16>, vector<200x8xf32> -> vector<200x8xf32>
    %7 = vector.extract_strided_slice %2 {offsets = [1, 0], sizes = [200, 8], strides = [1, 1]} : vector<400x8xbf16> to vector<200x8xbf16>
    %c1 = arith.constant 1 : index
    %c0_6 = arith.constant 0 : index
    %c0_7 = arith.constant 0 : index
    %8 = vector.load %arg4[%c1, %c0_6, %c0_7] : memref<9x8x8xbf16, #tpu.memory_space<vmem>>, vector<1x8x8xbf16>
    %9 = vector.shape_cast %8 : vector<1x8x8xbf16> to vector<8x8xbf16>
    %cst_8 = arith.constant dense<0.000000e+00> : vector<200x8xf32>
    %10 = tpu.matmul %7, %9, %cst_8 {dimension_numbers = #tpu.dot_dimension_numbers<[1], [0], [0], [1], [0, 0, 1, 1], [], []>} : vector<200x8xbf16>, vector<8x8xbf16>, vector<200x8xf32> -> vector<200x8xf32>
    %11 = arith.addf %6, %10 : vector<200x8xf32>
    %12 = vector.extract_strided_slice %2 {offsets = [2, 0], sizes = [200, 8], strides = [1, 1]} : vector<400x8xbf16> to vector<200x8xbf16>
    %c2 = arith.constant 2 : index
    %c0_9 = arith.constant 0 : index
    %c0_10 = arith.constant 0 : index
    %13 = vector.load %arg4[%c2, %c0_9, %c0_10] : memref<9x8x8xbf16, #tpu.memory_space<vmem>>, vector<1x8x8xbf16>
    %14 = vector.shape_cast %13 : vector<1x8x8xbf16> to vector<8x8xbf16>
    %cst_11 = arith.constant dense<0.000000e+00> : vector<200x8xf32>
    %15 = tpu.matmul %12, %14, %cst_11 {dimension_numbers = #tpu.dot_dimension_numbers<[1], [0], [0], [1], [0, 0, 1, 1], [], []>} : vector<200x8xbf16>, vector<8x8xbf16>, vector<200x8xf32> -> vector<200x8xf32>
    %16 = arith.addf %11, %15 : vector<200x8xf32>
    %17 = vector.extract_strided_slice %2 {offsets = [10, 0], sizes = [200, 8], strides = [1, 1]} : vector<400x8xbf16> to vector<200x8xbf16>
    %c3 = arith.constant 3 : index
    %c0_12 = arith.constant 0 : index
    %c0_13 = arith.constant 0 : index
    %18 = vector.load %arg4[%c3, %c0_12, %c0_13] : memref<9x8x8xbf16, #tpu.memory_space<vmem>>, vector<1x8x8xbf16>
    %19 = vector.shape_cast %18 : vector<1x8x8xbf16> to vector<8x8xbf16>
    %cst_14 = arith.constant dense<0.000000e+00> : vector<200x8xf32>
    %20 = tpu.matmul %17, %19, %cst_14 {dimension_numbers = #tpu.dot_dimension_numbers<[1], [0], [0], [1], [0, 0, 1, 1], [], []>} : vector<200x8xbf16>, vector<8x8xbf16>, vector<200x8xf32> -> vector<200x8xf32>
    %21 = arith.addf %16, %20 : vector<200x8xf32>
    %22 = vector.extract_strided_slice %2 {offsets = [11, 0], sizes = [200, 8], strides = [1, 1]} : vector<400x8xbf16> to vector<200x8xbf16>
    %c4 = arith.constant 4 : index
    %c0_15 = arith.constant 0 : index
    %c0_16 = arith.constant 0 : index
    %23 = vector.load %arg4[%c4, %c0_15, %c0_16] : memref<9x8x8xbf16, #tpu.memory_space<vmem>>, vector<1x8x8xbf16>
    %24 = vector.shape_cast %23 : vector<1x8x8xbf16> to vector<8x8xbf16>
    %cst_17 = arith.constant dense<0.000000e+00> : vector<200x8xf32>
    %25 = tpu.matmul %22, %24, %cst_17 {dimension_numbers = #tpu.dot_dimension_numbers<[1], [0], [0], [1], [0, 0, 1, 1], [], []>} : vector<200x8xbf16>, vector<8x8xbf16>, vector<200x8xf32> -> vector<200x8xf32>
    %26 = arith.addf %21, %25 : vector<200x8xf32>
    %27 = vector.extract_strided_slice %2 {offsets = [12, 0], sizes = [200, 8], strides = [1, 1]} : vector<400x8xbf16> to vector<200x8xbf16>
    %c5 = arith.constant 5 : index
    %c0_18 = arith.constant 0 : index
    %c0_19 = arith.constant 0 : index
    %28 = vector.load %arg4[%c5, %c0_18, %c0_19] : memref<9x8x8xbf16, #tpu.memory_space<vmem>>, vector<1x8x8xbf16>
    %29 = vector.shape_cast %28 : vector<1x8x8xbf16> to vector<8x8xbf16>
    %cst_20 = arith.constant dense<0.000000e+00> : vector<200x8xf32>
    %30 = tpu.matmul %27, %29, %cst_20 {dimension_numbers = #tpu.dot_dimension_numbers<[1], [0], [0], [1], [0, 0, 1, 1], [], []>} : vector<200x8xbf16>, vector<8x8xbf16>, vector<200x8xf32> -> vector<200x8xf32>
    %31 = arith.addf %26, %30 : vector<200x8xf32>
    %32 = vector.extract_strided_slice %2 {offsets = [20, 0], sizes = [200, 8], strides = [1, 1]} : vector<400x8xbf16> to vector<200x8xbf16>
    %c6 = arith.constant 6 : index
    %c0_21 = arith.constant 0 : index
    %c0_22 = arith.constant 0 : index
    %33 = vector.load %arg4[%c6, %c0_21, %c0_22] : memref<9x8x8xbf16, #tpu.memory_space<vmem>>, vector<1x8x8xbf16>
    %34 = vector.shape_cast %33 : vector<1x8x8xbf16> to vector<8x8xbf16>
    %cst_23 = arith.constant dense<0.000000e+00> : vector<200x8xf32>
    %35 = tpu.matmul %32, %34, %cst_23 {dimension_numbers = #tpu.dot_dimension_numbers<[1], [0], [0], [1], [0, 0, 1, 1], [], []>} : vector<200x8xbf16>, vector<8x8xbf16>, vector<200x8xf32> -> vector<200x8xf32>
    %36 = arith.addf %31, %35 : vector<200x8xf32>
    %37 = vector.extract_strided_slice %2 {offsets = [21, 0], sizes = [200, 8], strides = [1, 1]} : vector<400x8xbf16> to vector<200x8xbf16>
    %c7 = arith.constant 7 : index
    %c0_24 = arith.constant 0 : index
    %c0_25 = arith.constant 0 : index
    %38 = vector.load %arg4[%c7, %c0_24, %c0_25] : memref<9x8x8xbf16, #tpu.memory_space<vmem>>, vector<1x8x8xbf16>
    %39 = vector.shape_cast %38 : vector<1x8x8xbf16> to vector<8x8xbf16>
    %cst_26 = arith.constant dense<0.000000e+00> : vector<200x8xf32>
    %40 = tpu.matmul %37, %39, %cst_26 {dimension_numbers = #tpu.dot_dimension_numbers<[1], [0], [0], [1], [0, 0, 1, 1], [], []>} : vector<200x8xbf16>, vector<8x8xbf16>, vector<200x8xf32> -> vector<200x8xf32>
    %41 = arith.addf %36, %40 : vector<200x8xf32>
    %42 = vector.extract_strided_slice %2 {offsets = [22, 0], sizes = [200, 8], strides = [1, 1]} : vector<400x8xbf16> to vector<200x8xbf16>
    %c8 = arith.constant 8 : index
    %c0_27 = arith.constant 0 : index
    %c0_28 = arith.constant 0 : index
    %43 = vector.load %arg4[%c8, %c0_27, %c0_28] : memref<9x8x8xbf16, #tpu.memory_space<vmem>>, vector<1x8x8xbf16>
    %44 = vector.shape_cast %43 : vector<1x8x8xbf16> to vector<8x8xbf16>
    %cst_29 = arith.constant dense<0.000000e+00> : vector<200x8xf32>
    %45 = tpu.matmul %42, %44, %cst_29 {dimension_numbers = #tpu.dot_dimension_numbers<[1], [0], [0], [1], [0, 0, 1, 1], [], []>} : vector<200x8xbf16>, vector<8x8xbf16>, vector<200x8xf32> -> vector<200x8xf32>
    %46 = arith.addf %41, %45 : vector<200x8xf32>
    %c0_30 = arith.constant 0 : index
    %c0_31 = arith.constant 0 : index
    %47 = vector.load %arg5[%c0_30, %c0_31] : memref<1x8xf32, #tpu.memory_space<vmem>>, vector<1x8xf32>
    %48 = vector.broadcast %47 : vector<1x8xf32> to vector<200x8xf32>
    %49 = arith.addf %46, %48 : vector<200x8xf32>
    %c0_32 = arith.constant 0 : index
    %c0_33 = arith.constant 0 : index
    %50 = vector.load %arg6[%c0_32, %c0_33] : memref<200x8xbf16, #tpu.memory_space<vmem>>, vector<200x8xbf16>
    %51 = arith.extf %50 : vector<200x8xbf16> to vector<200x8xf32>
    %52 = arith.addf %49, %51 : vector<200x8xf32>
    %cst_34 = arith.constant 0.000000e+00 : f32
    %53 = vector.broadcast %cst_34 : f32 to vector<200x8xf32>
    %54 = arith.maximumf %52, %53 : vector<200x8xf32>
    %55 = arith.truncf %54 : vector<200x8xf32> to vector<200x8xbf16>
    %c0_35 = arith.constant 0 : index
    %c0_36 = arith.constant 0 : index
    %56 = vector.load %arg7[%c0_35, %c0_36] : memref<200x8xbf16, #tpu.memory_space<vmem>>, vector<200x8xbf16>
    tpu.vector_store %arg7[%c0_35, %c0_36], %55 {strides = array<i32>} : memref<200x8xbf16, #tpu.memory_space<vmem>>, vector<200x8xbf16>,
    return
  }
  func.func @transform_0(%arg0: i32, %arg1: i32) -> (i32, i32) {
    %c0_i32 = arith.constant 0 : i32
    %c0_i32_0 = arith.constant 0 : i32
    return %arg0, %c0_i32 : i32, i32
  }
  func.func @transform_1(%arg0: i32, %arg1: i32) -> (i32, i32) {
    %c1_i32 = arith.constant 1 : i32
    %0 = arith.addi %arg0, %c1_i32 : i32
    %c1_i32_0 = arith.constant 1 : i32
    %1 = arith.muli %0, %c1_i32_0 : i32
    %c0_i32 = arith.constant 0 : i32
    %c0_i32_1 = arith.constant 0 : i32
    return %1, %c0_i32 : i32, i32
  }
  func.func @transform_2(%arg0: i32, %arg1: i32) -> (i32, i32, i32) {
    %c0_i32 = arith.constant 0 : i32
    %c0_i32_0 = arith.constant 0 : i32
    %c0_i32_1 = arith.constant 0 : i32
    return %c0_i32, %c0_i32_0, %arg1 : i32, i32, i32
  }
  func.func @transform_3(%arg0: i32, %arg1: i32) -> (i32, i32) {
    %c0_i32 = arith.constant 0 : i32
    %c0_i32_0 = arith.constant 0 : i32
    return %c0_i32, %arg1 : i32, i32
  }
  func.func @transform_4(%arg0: i32, %arg1: i32) -> (i32, i32) {
    %c0_i32 = arith.constant 0 : i32
    return %arg0, %arg1 : i32, i32
  }
  func.func @transform_5(%arg0: i32, %arg1: i32) -> (i32, i32) {
    %c0_i32 = arith.constant 0 : i32
    return %arg0, %arg1 : i32, i32
  }
}

</mosaic_0001>

<bundles_post_ra>
// kernel: _lambda_.13
= control target key start
LH: loop header
LB: loop body
LE: loop exit
PB: predicated region body
PF: predicated region fallthrough
CT: control target
= control target key end

     0   :  { %8 = vsyncpa [#allocation3], 0  ;;  %s1786_s0 = inlined_call_operand.hbm [shape: bf16[512,27], index: 0, kind: input, shape index: {}]   ;;  %s1787_s1 = inlined_call_operand.hbm [shape: bf16[27,64], index: 1, kind: input, shape index: {}]   ;;  %s1788_s2 = inlined_call_operand.hbm [shape: f32[1,64], index: 2, kind: input, shape index: {}]   ;;  %s1789_s3 = inlined_call_operand.hbm [shape: bf16[512,64], index: 3, kind: output, shape index: {}]  }
   0x1   :  { %9 = vsyncpa [#allocation6], 0 }
   0x2   :  { %10 = vsyncpa [#allocation4], 0  ;;  %s1533_s12 = smov [#allocation5]   ;;  %s1534_s14 = smov [#allocation2]  }
   0x3   :  { %s28_s13 = sshll.u32 %s1533_s12, 4  ;;  %s16_s15 = sshll.u32 %s1534_s14, 4  ;;  %s29_s13 = int_to_ptr.vmem [resolvable:$true] %s28_s13  ;;  %s1560_s15 = int_to_ptr.vmem [resolvable:$true] %s16_s15 }
   0x4   :  { %s1439_s18 = scalar_lea.hbm %s1787_s1, 256 }
   0x5   :  { %p1440_p0 = scmp.ne.s32.totalorder %s1787_s1, %s1439_s18  ;;  %p1443_p1 = scmp.lt.u32.totalorder %s1439_s18, %s1787_s1 }
   0x7   :  { %p1445_p2 = pnand %p1443_p1, %p1440_p0 }
   0x9   :  { %1448 = shalt.err (!%p1445_p2)
}
   0xa   :  { %s1449_s23 = scalar_lea.vmem %s29_s13, 256  ;;  %p1454_p4 = scmp.lt.s32.totalorder %s29_s13, %s29_s13 }
   0xb   :  { %p1450_p3 = scmp.ne.s32.totalorder %s29_s13, %s1449_s23  ;;  %p1455_p5 = scmp.lt.s32.totalorder %s1449_s23, %s1449_s23 }
   0xd   :  { %p1456_p6 = por %p1455_p5, %p1454_p4 }
   0xf   :  { %p1457_p7 = pnand %p1456_p6, %p1450_p3 }
  0x11   :  { %1460 = shalt.err (!%p1457_p7)
}
  0x12   :  { %s1535_s24 = smov 64   ;;  %s1536_s25 = smov 4  }
  0x13   :  { %34 = dma.hbm_to_vmem [thread:$0]  %s1787_s1, 256, %s29_s13, [#allocation6], %s1535_s24, %s1535_s24, %s1536_s25  }
  0x14   :  { %s1461_s30 = scalar_lea.hbm %s1786_s0, 4096 }
  0x15   :  { %p1462_p8 = scmp.ne.s32.totalorder %s1786_s0, %s1461_s30  ;;  %p1465_p9 = scmp.lt.u32.totalorder %s1461_s30, %s1786_s0 }
  0x17   :  { %p1467_p10 = pnand %p1465_p9, %p1462_p8 }
  0x19   :  { %1470 = shalt.err (!%p1467_p10)
}
  0x1a   :  { %s1471_s8 = scalar_lea.vmem %s1560_s15, 4096  ;;  %p1476_p12 = scmp.lt.s32.totalorder %s1560_s15, %s1560_s15 }
  0x1b   :  { %p1472_p11 = scmp.ne.s32.totalorder %s1560_s15, %s1471_s8  ;;  %p1477_p13 = scmp.lt.s32.totalorder %s1471_s8, %s1471_s8 }
  0x1d   :  { %p1478_p0 = por %p1477_p13, %p1476_p12 }
  0x1f   :  { %p1479_p1 = pnand %p1478_p0, %p1472_p11 }
  0x21   :  { %1482 = shalt.err (!%p1479_p1)
}
  0x22   :  { %22 = dma.hbm_to_vmem [thread:$0]  %s1786_s0, 4096, %s1560_s15, [#allocation3], %s1535_s24, %s1535_s24, %s1536_s25  }
  0x23   :  { %s1537_s10 = smov [#allocation7]   ;;  %s1483_s14 = scalar_lea.hbm %s1788_s2, 16 }
  0x24   :  { %s41_s11 = sshll.u32 %s1537_s10, 4  ;;  %p1484_p2 = scmp.ne.s32.totalorder %s1788_s2, %s1483_s14  ;;  %s42_s11 = int_to_ptr.vmem [resolvable:$true] %s41_s11 }
  0x25   :  { %p1487_p3 = scmp.lt.u32.totalorder %s1483_s14, %s1788_s2 }
  0x27   :  { %p1489_p4 = pnand %p1487_p3, %p1484_p2 }
  0x29   :  { %1492 = shalt.err (!%p1489_p4)
}
  0x2a   :  { %s1493_s20 = scalar_lea.vmem %s42_s11, 16  ;;  %s1497_s0 = scalar_lea.vmem %s42_s11, 32 }
  0x2b   :  { %p1494_p5 = scmp.ne.s32.totalorder %s42_s11, %s1493_s20  ;;  %p1498_p6 = scmp.lt.s32.totalorder %s42_s11, %s42_s11 }
  0x2c   :  { %p1499_p7 = scmp.lt.s32.totalorder %s1497_s0, %s1493_s20 }
  0x2e   :  { %p1500_p8 = por %p1499_p7, %p1498_p6 }
  0x30   :  { %p1501_p9 = pnand %p1500_p8, %p1494_p5 }
  0x32   :  { %1504 = shalt.err (!%p1501_p9)
}
  0x33   :  { %44 = dma.hbm_to_vmem [thread:$0]  %s1788_s2, 16, %s42_s11, [#allocation6]  }
  0x34   :  { %1527 = dma.done.wait [#allocation3], 4096  }
  0x35   :  { %1528 = vsyncadd [#allocation3], 4294963200 }
  0x36   :  { %1529 = dma.done.wait [#allocation6], 272  }
  0x37   :  { %1530 = vsyncadd [#allocation6], 4294967024  ;;  %vm398_vm0 = vcmask 1044480   ;;  %vm399_vm1 = vcmask 1045504   ;;  %v1538_v0 = vmov 65535   ;;  %vm301_vm2 = vcmask 220160  }
  0x38   :  { %v400_v1 = vsel %vm398_vm0, 4294967295, %v1538_v0  ;;  %v1405_v2 = vld [vmem:[#allocation5] sm:$0xff]   ;;  %v1406_v4 = vld [vmem:[#allocation5 + $0x8] sm:$0x3f]   ;;  %v1411_v10 = vld [vmem:[#allocation2 + $0x10] sm:$0xff]   ;;  %vm1014_vm3 = vcmask 519168  }
  0x39   :  { %v401_v3 = vsel %vm399_vm1, %v400_v1, 0  ;;  %1326 = vmatprep.subr.bf16.mxu0 %v1405_v2  ;;  %1394 = vmatprep.subr.bf16.mxu1 %v1405_v2  ;;  %v1407_v5 = vld [vmem:[#allocation2] sm:$0xff]   ;;  %v1409_v8 = vld [vmem:[#allocation2 + $0x8] sm:$0xff]   ;;  %v1412_v11 = vld [vmem:[#allocation2 + $0x90] sm:$0xff]   ;;  %s1539_s2 = smov [#allocation8]  }
  0x3a   :  { %1327 = vmatpush3.bf16.msra.mxu0 %v1405_v2  ;;  %1396 = vmatpush3.bf16.msra.mxu1 %v1405_v2  ;;  %v403_v6 = vand.u32 %v1406_v4, %v401_v3  ;;  %v1408_v7 = vld [vmem:[#allocation2 + $0x80] sm:$0xff]   ;;  %v1410_v9 = vld [vmem:[#allocation2 + $0x88] sm:$0xff]   ;;  %v1413_v12 = vld [vmem:[#allocation2 + $0x18] sm:$0xff]   ;;  %s1084_s22 = sshll.u32 %s1539_s2, 4  ;;  %s1085_s22 = int_to_ptr.vmem [resolvable:$true] %s1084_s22 }
  0x3b   :  { %1330 = vmatprep.mubr.msk.bf16.mxu0 %vm301_vm2, %v1407_v5  ;;  %1362 = vmatprep.mubr.msk.bf16.mxu1 %vm301_vm2, %v1408_v7  ;;  %v1414_v13 = vld [vmem:[#allocation2 + $0x98] sm:$0xff]   ;;  %v1415_v14 = vld [vmem:[#allocation2 + $0x20] sm:$0xff]   ;;  %v1417_v16 = vld [vmem:[#allocation2 + $0x28] sm:$0xff]   ;;  %s1505_s23 = scalar_lea.vmem %s1085_s22, 4096  ;;  %p1510_p11 = scmp.lt.s32.totalorder %s1085_s22, %s1085_s22 }
  0x3c   :  { %1328 = vmatprep.subr.bf16.mxu0 %v403_v6  ;;  %1395 = vmatprep.subr.bf16.mxu1 %v403_v6  ;;  %v1416_v15 = vld [vmem:[#allocation2 + $0xa0] sm:$0xff]   ;;  %v1418_v17 = vld [vmem:[#allocation2 + $0xa8] sm:$0xff]   ;;  %v1419_v18 = vld [vmem:[#allocation2 + $0x30] sm:$0xff]   ;;  %p1506_p10 = scmp.ne.s32.totalorder %s1085_s22, %s1505_s23  ;;  %p1511_p12 = scmp.lt.s32.totalorder %s1505_s23, %s1505_s23 }
  0x3d   :  { %v1420_v19 = vld [vmem:[#allocation2 + $0xb0] sm:$0xff]   ;;  %v1421_v20 = vld [vmem:[#allocation2 + $0x38] sm:$0xff]   ;;  %v1423_v22 = vld [vmem:[#allocation2 + $0x40] sm:$0xff]  }
  0x3e   :  { %1329 = vmatpush3.bf16.msra.mxu0 %v403_v6  ;;  %1397 = vmatpush3.bf16.msra.mxu1 %v403_v6  ;;  %v1422_v21 = vld [vmem:[#allocation2 + $0xb8] sm:$0xff]   ;;  %v1424_v23 = vld [vmem:[#allocation2 + $0xc0] sm:$0xff]   ;;  %v1425_v24 = vld [vmem:[#allocation2 + $0x48] sm:$0xff]   ;;  %p1512_p13 = por %p1511_p12, %p1510_p11 }
  0x3f   :  { %v1426_v25 = vld [vmem:[#allocation2 + $0xc8] sm:$0xff]   ;;  %v1427_v26 = vld [vmem:[#allocation2 + $0x50] sm:$0xff]   ;;  %v1429_v28 = vld [vmem:[#allocation2 + $0x58] sm:$0xff]  }
  0x40   :  { %v1428_v27 = vld [vmem:[#allocation2 + $0xd0] sm:$0xff]   ;;  %v1430_v29 = vld [vmem:[#allocation2 + $0xd8] sm:$0xff]   ;;  %v1431_v30 = vld [vmem:[#allocation2 + $0x60] sm:$0xff]   ;;  %p1513_p0 = pnand %p1512_p13, %p1506_p10 }
  0x41   :  { %1331 = vmatmul.mubr.msk.bf16.vlgmr.msra.gmra.mrb[0].mxu0 %vm301_vm2, %v1409_v8  ;;  %1363 = vmatmul.mubr.msk.bf16.vlgmr.msra.gmra.mrb[0].mxu1 %vm301_vm2, %v1410_v9  ;;  %v1432_v31 = vld [vmem:[#allocation2 + $0xe0] sm:$0xff]   ;;  %v1433_v32 = vld [vmem:[#allocation2 + $0x68] sm:$0xff]   ;;  %v1435_v34 = vld [vmem:[#allocation2 + $0x70] sm:$0xff]  }
  0x42   :  { %1334 = vmatprep.mubr.msk.bf16.mxu0 %vm301_vm2, %v1411_v10  ;;  %1366 = vmatprep.mubr.msk.bf16.mxu1 %vm301_vm2, %v1412_v11  ;;  %v1434_v33 = vld [vmem:[#allocation2 + $0xe8] sm:$0xff]   ;;  %v1436_v35 = vld [vmem:[#allocation2 + $0xf0] sm:$0xff]   ;;  %v1437_v36 = vld [vmem:[#allocation2 + $0x78] sm:$0xff]  }
  0x43   :  { %v1438_v37 = vld [vmem:[#allocation2 + $0xf8] sm:$0xff]   ;;  %v1641_v38 = vld [vmem:[#allocation7] ss:$0 sm:$0xff] }
  0x49   :  { %1335 = vmatmul.mubr.msk.bf16.gmra.mrb[4].mxu0 %vm301_vm2, %v1413_v12  ;;  %1367 = vmatmul.mubr.msk.bf16.gmra.mrb[4].mxu1 %vm301_vm2, %v1414_v13 }
  0x4a   :  { %1338 = vmatprep.mubr.msk.bf16.mxu0 %vm301_vm2, %v1415_v14  ;;  %1370 = vmatprep.mubr.msk.bf16.mxu1 %vm301_vm2, %v1416_v15 }
  0x51   :  { %1339 = vmatmul.mubr.msk.bf16.gmra.mrb[8].mxu0 %vm301_vm2, %v1417_v16  ;;  %1371 = vmatmul.mubr.msk.bf16.gmra.mrb[8].mxu1 %vm301_vm2, %v1418_v17 }
  0x52   :  { %1342 = vmatprep.mubr.msk.bf16.mxu0 %vm301_vm2, %v1419_v18  ;;  %1374 = vmatprep.mubr.msk.bf16.mxu1 %vm301_vm2, %v1420_v19 }
  0x59   :  { %1343 = vmatmul.mubr.msk.bf16.gmra.mrb[12].mxu0 %vm301_vm2, %v1421_v20  ;;  %1375 = vmatmul.mubr.msk.bf16.gmra.mrb[12].mxu1 %vm301_vm2, %v1422_v21 }
  0x5a   :  { %1346 = vmatprep.mubr.msk.bf16.mxu0 %vm301_vm2, %v1423_v22  ;;  %1378 = vmatprep.mubr.msk.bf16.mxu1 %vm301_vm2, %v1424_v23 }
  0x61   :  { %1347 = vmatmul.mubr.msk.bf16.gmra.mrb[16].mxu0 %vm301_vm2, %v1425_v24  ;;  %1379 = vmatmul.mubr.msk.bf16.gmra.mrb[16].mxu1 %vm301_vm2, %v1426_v25 }
  0x62   :  { %1350 = vmatprep.mubr.msk.bf16.mxu0 %vm301_vm2, %v1427_v26  ;;  %1382 = vmatprep.mubr.msk.bf16.mxu1 %vm301_vm2, %v1428_v27 }
  0x69   :  { %1351 = vmatmul.mubr.msk.bf16.gmra.mrb[20].mxu0 %vm301_vm2, %v1429_v28  ;;  %1383 = vmatmul.mubr.msk.bf16.gmra.mrb[20].mxu1 %vm301_vm2, %v1430_v29 }
  0x6a   :  { %1354 = vmatprep.mubr.msk.bf16.mxu0 %vm301_vm2, %v1431_v30  ;;  %1386 = vmatprep.mubr.msk.bf16.mxu1 %vm301_vm2, %v1432_v31 }
  0x71   :  { %1355 = vmatmul.mubr.msk.bf16.gmra.mrb[24].mxu0 %vm301_vm2, %v1433_v32  ;;  %1387 = vmatmul.mubr.msk.bf16.gmra.mrb[24].mxu1 %vm301_vm2, %v1434_v33 }
  0x72   :  { %1358 = vmatprep.mubr.msk.bf16.mxu0 %vm301_vm2, %v1435_v34  ;;  %1390 = vmatprep.mubr.msk.bf16.mxu1 %vm301_vm2, %v1436_v35 }
  0x79   :  { %1359 = vmatmul.mubr.msk.bf16.gmra.mrb[28].mxu0 %vm301_vm2, %v1437_v36  ;;  %1391 = vmatmul.mubr.msk.bf16.gmra.mrb[28].mxu1 %vm301_vm2, %v1438_v37 }
 0x114   :  { %v1332_v39 = vpop.f32.mrb[0].mxu0  ;;  %v1364_v40 = vpop.f32.mrb[0].mxu1 }
 0x115   :  { %v448_v41 = vadd.f32 %v1332_v39, %v1641_v38  ;;  %v576_v42 = vadd.f32 %v1364_v40, %v1641_v38  ;;  %v439_v43 = vpop.f32.mrb[1].mxu0  ;;  %v567_v44 = vpop.f32.mrb[1].mxu1 }
 0x116   :  { %v440_v45 = vadd.f32 %v1641_v38, %v439_v43  ;;  %v568_v46 = vadd.f32 %v1641_v38, %v567_v44  ;;  %v1333_v47 = vpop.f32.mrb[2].mxu0  ;;  %v1365_v48 = vpop.f32.mrb[2].mxu1 }
 0x117   :  { %v696_v49 = vmax.f32 %v448_v41, 0.0  ;;  %v728_v50 = vmax.f32 %v576_v42, 0.0  ;;  %v451_v51 = vadd.f32 %v1333_v47, %v1641_v38  ;;  %v579_v52 = vadd.f32 %v1365_v48, %v1641_v38  ;;  %v442_v53 = vpop.f32.mrb[3].mxu0  ;;  %v570_v54 = vpop.f32.mrb[3].mxu1 }
 0x118   :  { %v694_v55 = vmax.f32 %v440_v45, 0.0  ;;  %v726_v56 = vmax.f32 %v568_v46, 0.0  ;;  %v443_v57 = vadd.f32 %v1641_v38, %v442_v53  ;;  %v571_v58 = vadd.f32 %v1641_v38, %v570_v54 }
 0x119   :  { %v1230_v59 = vpack.c.bf16 %v696_v49, %v696_v49  ;;  %v1262_v60 = vpack.c.bf16 %v728_v50, %v728_v50  ;;  %v697_v61 = vmax.f32 %v451_v51, 0.0  ;;  %v729_v62 = vmax.f32 %v579_v52, 0.0 }
 0x11a   :  { %v1228_v63 = vpack.c.bf16 %v694_v55, %v694_v55  ;;  %v1260_v0 = vpack.c.bf16 %v726_v56, %v726_v56  ;;  %v695_v1 = vmax.f32 %v443_v57, 0.0  ;;  %v727_v2 = vmax.f32 %v571_v58, 0.0 }
 0x11b   :  { %1017 = vst.msk [vmem:[#allocation8 + $0x8] sm:$0xf] %vm1014_vm3, %v1230_v59  ;;  %1049 = vst.msk [vmem:[#allocation8 + $0x88] sm:$0xf] %vm1014_vm3, %v1262_v60  ;;  %v1231_v3 = vpack.c.bf16 %v697_v61, %v697_v61  ;;  %v1263_v4 = vpack.c.bf16 %v729_v62, %v729_v62 }
 0x11c   :  { %1015 = vst.msk [vmem:[#allocation8] sm:$0xf] %vm1014_vm3, %v1228_v63  ;;  %1047 = vst.msk [vmem:[#allocation8 + $0x80] sm:$0xf] %vm1014_vm3, %v1260_v0  ;;  %v1229_v5 = vpack.c.bf16 %v695_v1, %v695_v1  ;;  %v1261_v6 = vpack.c.bf16 %v727_v2, %v727_v2  ;;  %v1336_v7 = vpop.f32.mrb[4].mxu0  ;;  %v1368_v8 = vpop.f32.mrb[4].mxu1 }
 0x11d   :  { %1018 = vst.msk [vmem:[#allocation8 + $0xc] sm:$0xf] %vm1014_vm3, %v1231_v3  ;;  %1050 = vst.msk [vmem:[#allocation8 + $0x8c] sm:$0xf] %vm1014_vm3, %v1263_v4  ;;  %v464_v9 = vadd.f32 %v1336_v7, %v1641_v38  ;;  %v592_v10 = vadd.f32 %v1368_v8, %v1641_v38  ;;  %v455_v11 = vpop.f32.mrb[5].mxu0  ;;  %v583_v12 = vpop.f32.mrb[5].mxu1 }
 0x11e   :  { %1016 = vst.msk [vmem:[#allocation8 + $0x4] sm:$0xf] %vm1014_vm3, %v1229_v5  ;;  %1048 = vst.msk [vmem:[#allocation8 + $0x84] sm:$0xf] %vm1014_vm3, %v1261_v6  ;;  %v456_v13 = vadd.f32 %v1641_v38, %v455_v11  ;;  %v584_v14 = vadd.f32 %v1641_v38, %v583_v12  ;;  %v1337_v15 = vpop.f32.mrb[6].mxu0  ;;  %v1369_v16 = vpop.f32.mrb[6].mxu1 }
 0x11f   :  { %v700_v17 = vmax.f32 %v464_v9, 0.0  ;;  %v732_v18 = vmax.f32 %v592_v10, 0.0  ;;  %v467_v19 = vadd.f32 %v1337_v15, %v1641_v38  ;;  %v595_v20 = vadd.f32 %v1369_v16, %v1641_v38  ;;  %v458_v21 = vpop.f32.mrb[7].mxu0  ;;  %v586_v22 = vpop.f32.mrb[7].mxu1 }
 0x120   :  { %v698_v23 = vmax.f32 %v456_v13, 0.0  ;;  %v730_v24 = vmax.f32 %v584_v14, 0.0  ;;  %v459_v25 = vadd.f32 %v1641_v38, %v458_v21  ;;  %v587_v26 = vadd.f32 %v1641_v38, %v586_v22 }
 0x121   :  { %v1234_v27 = vpack.c.bf16 %v700_v17, %v700_v17  ;;  %v1266_v28 = vpack.c.bf16 %v732_v18, %v732_v18  ;;  %v701_v29 = vmax.f32 %v467_v19, 0.0  ;;  %v733_v30 = vmax.f32 %v595_v20, 0.0 }
 0x122   :  { %v1232_v31 = vpack.c.bf16 %v698_v23, %v698_v23  ;;  %v1264_v32 = vpack.c.bf16 %v730_v24, %v730_v24  ;;  %v699_v33 = vmax.f32 %v459_v25, 0.0  ;;  %v731_v34 = vmax.f32 %v587_v26, 0.0 }
 0x123   :  { %1021 = vst.msk [vmem:[#allocation8 + $0x18] sm:$0xf] %vm1014_vm3, %v1234_v27  ;;  %1053 = vst.msk [vmem:[#allocation8 + $0x98] sm:$0xf] %vm1014_vm3, %v1266_v28  ;;  %v1235_v35 = vpack.c.bf16 %v701_v29, %v701_v29  ;;  %v1267_v36 = vpack.c.bf16 %v733_v30, %v733_v30 }
 0x124   :  { %1019 = vst.msk [vmem:[#allocation8 + $0x10] sm:$0xf] %vm1014_vm3, %v1232_v31  ;;  %1051 = vst.msk [vmem:[#allocation8 + $0x90] sm:$0xf] %vm1014_vm3, %v1264_v32  ;;  %v1233_v37 = vpack.c.bf16 %v699_v33, %v699_v33  ;;  %v1265_v39 = vpack.c.bf16 %v731_v34, %v731_v34  ;;  %v1340_v40 = vpop.f32.mrb[8].mxu0  ;;  %v1372_v41 = vpop.f32.mrb[8].mxu1 }
 0x125   :  { %1022 = vst.msk [vmem:[#allocation8 + $0x1c] sm:$0xf] %vm1014_vm3, %v1235_v35  ;;  %1054 = vst.msk [vmem:[#allocation8 + $0x9c] sm:$0xf] %vm1014_vm3, %v1267_v36  ;;  %v480_v42 = vadd.f32 %v1340_v40, %v1641_v38  ;;  %v608_v43 = vadd.f32 %v1372_v41, %v1641_v38  ;;  %v471_v44 = vpop.f32.mrb[9].mxu0  ;;  %v599_v45 = vpop.f32.mrb[9].mxu1 }
 0x126   :  { %1020 = vst.msk [vmem:[#allocation8 + $0x14] sm:$0xf] %vm1014_vm3, %v1233_v37  ;;  %1052 = vst.msk [vmem:[#allocation8 + $0x94] sm:$0xf] %vm1014_vm3, %v1265_v39  ;;  %v472_v46 = vadd.f32 %v1641_v38, %v471_v44  ;;  %v600_v47 = vadd.f32 %v1641_v38, %v599_v45  ;;  %v1341_v48 = vpop.f32.mrb[10].mxu0  ;;  %v1373_v49 = vpop.f32.mrb[10].mxu1 }
 0x127   :  { %v704_v50 = vmax.f32 %v480_v42, 0.0  ;;  %v736_v51 = vmax.f32 %v608_v43, 0.0  ;;  %v483_v52 = vadd.f32 %v1341_v48, %v1641_v38  ;;  %v611_v53 = vadd.f32 %v1373_v49, %v1641_v38  ;;  %v474_v54 = vpop.f32.mrb[11].mxu0  ;;  %v602_v55 = vpop.f32.mrb[11].mxu1 }
 0x128   :  { %v702_v56 = vmax.f32 %v472_v46, 0.0  ;;  %v734_v57 = vmax.f32 %v600_v47, 0.0  ;;  %v475_v58 = vadd.f32 %v1641_v38, %v474_v54  ;;  %v603_v59 = vadd.f32 %v1641_v38, %v602_v55 }
 0x129   :  { %v1238_v60 = vpack.c.bf16 %v704_v50, %v704_v50  ;;  %v1270_v61 = vpack.c.bf16 %v736_v51, %v736_v51  ;;  %v705_v62 = vmax.f32 %v483_v52, 0.0  ;;  %v737_v63 = vmax.f32 %v611_v53, 0.0 }
 0x12a   :  { %v1236_v0 = vpack.c.bf16 %v702_v56, %v702_v56  ;;  %v1268_v1 = vpack.c.bf16 %v734_v57, %v734_v57  ;;  %v703_v2 = vmax.f32 %v475_v58, 0.0  ;;  %v735_v3 = vmax.f32 %v603_v59, 0.0 }
 0x12b   :  { %1025 = vst.msk [vmem:[#allocation8 + $0x28] sm:$0xf] %vm1014_vm3, %v1238_v60  ;;  %1057 = vst.msk [vmem:[#allocation8 + $0xa8] sm:$0xf] %vm1014_vm3, %v1270_v61  ;;  %v1239_v4 = vpack.c.bf16 %v705_v62, %v705_v62  ;;  %v1271_v5 = vpack.c.bf16 %v737_v63, %v737_v63 }
 0x12c   :  { %1023 = vst.msk [vmem:[#allocation8 + $0x20] sm:$0xf] %vm1014_vm3, %v1236_v0  ;;  %1055 = vst.msk [vmem:[#allocation8 + $0xa0] sm:$0xf] %vm1014_vm3, %v1268_v1  ;;  %v1237_v6 = vpack.c.bf16 %v703_v2, %v703_v2  ;;  %v1269_v7 = vpack.c.bf16 %v735_v3, %v735_v3  ;;  %v1344_v8 = vpop.f32.mrb[12].mxu0  ;;  %v1376_v9 = vpop.f32.mrb[12].mxu1 }
 0x12d   :  { %1026 = vst.msk [vmem:[#allocation8 + $0x2c] sm:$0xf] %vm1014_vm3, %v1239_v4  ;;  %1058 = vst.msk [vmem:[#allocation8 + $0xac] sm:$0xf] %vm1014_vm3, %v1271_v5  ;;  %v496_v10 = vadd.f32 %v1344_v8, %v1641_v38  ;;  %v624_v11 = vadd.f32 %v1376_v9, %v1641_v38  ;;  %v487_v12 = vpop.f32.mrb[13].mxu0  ;;  %v615_v13 = vpop.f32.mrb[13].mxu1 }
 0x12e   :  { %1024 = vst.msk [vmem:[#allocation8 + $0x24] sm:$0xf] %vm1014_vm3, %v1237_v6  ;;  %1056 = vst.msk [vmem:[#allocation8 + $0xa4] sm:$0xf] %vm1014_vm3, %v1269_v7  ;;  %v488_v14 = vadd.f32 %v1641_v38, %v487_v12  ;;  %v616_v15 = vadd.f32 %v1641_v38, %v615_v13  ;;  %v1345_v16 = vpop.f32.mrb[14].mxu0  ;;  %v1377_v17 = vpop.f32.mrb[14].mxu1 }
 0x12f   :  { %v708_v18 = vmax.f32 %v496_v10, 0.0  ;;  %v740_v19 = vmax.f32 %v624_v11, 0.0  ;;  %v499_v20 = vadd.f32 %v1345_v16, %v1641_v38  ;;  %v627_v21 = vadd.f32 %v1377_v17, %v1641_v38  ;;  %v490_v22 = vpop.f32.mrb[15].mxu0  ;;  %v618_v23 = vpop.f32.mrb[15].mxu1 }
 0x130   :  { %v706_v24 = vmax.f32 %v488_v14, 0.0  ;;  %v738_v25 = vmax.f32 %v616_v15, 0.0  ;;  %v491_v26 = vadd.f32 %v1641_v38, %v490_v22  ;;  %v619_v27 = vadd.f32 %v1641_v38, %v618_v23 }
 0x131   :  { %v1242_v28 = vpack.c.bf16 %v708_v18, %v708_v18  ;;  %v1274_v29 = vpack.c.bf16 %v740_v19, %v740_v19  ;;  %v709_v30 = vmax.f32 %v499_v20, 0.0  ;;  %v741_v31 = vmax.f32 %v627_v21, 0.0 }
 0x132   :  { %v1240_v32 = vpack.c.bf16 %v706_v24, %v706_v24  ;;  %v1272_v33 = vpack.c.bf16 %v738_v25, %v738_v25  ;;  %v707_v34 = vmax.f32 %v491_v26, 0.0  ;;  %v739_v35 = vmax.f32 %v619_v27, 0.0 }
 0x133   :  { %1029 = vst.msk [vmem:[#allocation8 + $0x38] sm:$0xf] %vm1014_vm3, %v1242_v28  ;;  %1061 = vst.msk [vmem:[#allocation8 + $0xb8] sm:$0xf] %vm1014_vm3, %v1274_v29  ;;  %v1243_v36 = vpack.c.bf16 %v709_v30, %v709_v30  ;;  %v1275_v37 = vpack.c.bf16 %v741_v31, %v741_v31 }
 0x134   :  { %1027 = vst.msk [vmem:[#allocation8 + $0x30] sm:$0xf] %vm1014_vm3, %v1240_v32  ;;  %1059 = vst.msk [vmem:[#allocation8 + $0xb0] sm:$0xf] %vm1014_vm3, %v1272_v33  ;;  %v1241_v39 = vpack.c.bf16 %v707_v34, %v707_v34  ;;  %v1273_v40 = vpack.c.bf16 %v739_v35, %v739_v35  ;;  %v1348_v41 = vpop.f32.mrb[16].mxu0  ;;  %v1380_v42 = vpop.f32.mrb[16].mxu1 }
 0x135   :  { %1030 = vst.msk [vmem:[#allocation8 + $0x3c] sm:$0xf] %vm1014_vm3, %v1243_v36  ;;  %1062 = vst.msk [vmem:[#allocation8 + $0xbc] sm:$0xf] %vm1014_vm3, %v1275_v37  ;;  %v512_v43 = vadd.f32 %v1348_v41, %v1641_v38  ;;  %v640_v44 = vadd.f32 %v1380_v42, %v1641_v38  ;;  %v503_v45 = vpop.f32.mrb[17].mxu0  ;;  %v631_v46 = vpop.f32.mrb[17].mxu1 }
 0x136   :  { %1028 = vst.msk [vmem:[#allocation8 + $0x34] sm:$0xf] %vm1014_vm3, %v1241_v39  ;;  %1060 = vst.msk [vmem:[#allocation8 + $0xb4] sm:$0xf] %vm1014_vm3, %v1273_v40  ;;  %v504_v47 = vadd.f32 %v1641_v38, %v503_v45  ;;  %v632_v48 = vadd.f32 %v1641_v38, %v631_v46  ;;  %v1349_v49 = vpop.f32.mrb[18].mxu0  ;;  %v1381_v50 = vpop.f32.mrb[18].mxu1 }
 0x137   :  { %v712_v51 = vmax.f32 %v512_v43, 0.0  ;;  %v744_v52 = vmax.f32 %v640_v44, 0.0  ;;  %v515_v53 = vadd.f32 %v1349_v49, %v1641_v38  ;;  %v643_v54 = vadd.f32 %v1381_v50, %v1641_v38  ;;  %v506_v55 = vpop.f32.mrb[19].mxu0  ;;  %v634_v56 = vpop.f32.mrb[19].mxu1 }
 0x138   :  { %v710_v57 = vmax.f32 %v504_v47, 0.0  ;;  %v742_v58 = vmax.f32 %v632_v48, 0.0  ;;  %v507_v59 = vadd.f32 %v1641_v38, %v506_v55  ;;  %v635_v60 = vadd.f32 %v1641_v38, %v634_v56 }
 0x139   :  { %v1246_v61 = vpack.c.bf16 %v712_v51, %v712_v51  ;;  %v1278_v62 = vpack.c.bf16 %v744_v52, %v744_v52  ;;  %v713_v63 = vmax.f32 %v515_v53, 0.0  ;;  %v745_v0 = vmax.f32 %v643_v54, 0.0 }
 0x13a   :  { %v1244_v1 = vpack.c.bf16 %v710_v57, %v710_v57  ;;  %v1276_v2 = vpack.c.bf16 %v742_v58, %v742_v58  ;;  %v711_v3 = vmax.f32 %v507_v59, 0.0  ;;  %v743_v4 = vmax.f32 %v635_v60, 0.0 }
 0x13b   :  { %1033 = vst.msk [vmem:[#allocation8 + $0x48] sm:$0xf] %vm1014_vm3, %v1246_v61  ;;  %1065 = vst.msk [vmem:[#allocation8 + $0xc8] sm:$0xf] %vm1014_vm3, %v1278_v62  ;;  %v1247_v5 = vpack.c.bf16 %v713_v63, %v713_v63  ;;  %v1279_v6 = vpack.c.bf16 %v745_v0, %v745_v0 }
 0x13c   :  { %1031 = vst.msk [vmem:[#allocation8 + $0x40] sm:$0xf] %vm1014_vm3, %v1244_v1  ;;  %1063 = vst.msk [vmem:[#allocation8 + $0xc0] sm:$0xf] %vm1014_vm3, %v1276_v2  ;;  %v1245_v7 = vpack.c.bf16 %v711_v3, %v711_v3  ;;  %v1277_v8 = vpack.c.bf16 %v743_v4, %v743_v4  ;;  %v1352_v9 = vpop.f32.mrb[20].mxu0  ;;  %v1384_v10 = vpop.f32.mrb[20].mxu1 }
 0x13d   :  { %1034 = vst.msk [vmem:[#allocation8 + $0x4c] sm:$0xf] %vm1014_vm3, %v1247_v5  ;;  %1066 = vst.msk [vmem:[#allocation8 + $0xcc] sm:$0xf] %vm1014_vm3, %v1279_v6  ;;  %v528_v11 = vadd.f32 %v1352_v9, %v1641_v38  ;;  %v656_v12 = vadd.f32 %v1384_v10, %v1641_v38  ;;  %v519_v13 = vpop.f32.mrb[21].mxu0  ;;  %v647_v14 = vpop.f32.mrb[21].mxu1 }
 0x13e   :  { %1032 = vst.msk [vmem:[#allocation8 + $0x44] sm:$0xf] %vm1014_vm3, %v1245_v7  ;;  %1064 = vst.msk [vmem:[#allocation8 + $0xc4] sm:$0xf] %vm1014_vm3, %v1277_v8  ;;  %v520_v15 = vadd.f32 %v1641_v38, %v519_v13  ;;  %v648_v16 = vadd.f32 %v1641_v38, %v647_v14  ;;  %v1353_v17 = vpop.f32.mrb[22].mxu0  ;;  %v1385_v18 = vpop.f32.mrb[22].mxu1 }
 0x13f   :  { %v716_v19 = vmax.f32 %v528_v11, 0.0  ;;  %v748_v20 = vmax.f32 %v656_v12, 0.0  ;;  %v531_v21 = vadd.f32 %v1353_v17, %v1641_v38  ;;  %v659_v22 = vadd.f32 %v1385_v18, %v1641_v38  ;;  %v522_v23 = vpop.f32.mrb[23].mxu0  ;;  %v650_v24 = vpop.f32.mrb[23].mxu1 }
 0x140   :  { %v714_v25 = vmax.f32 %v520_v15, 0.0  ;;  %v746_v26 = vmax.f32 %v648_v16, 0.0  ;;  %v523_v27 = vadd.f32 %v1641_v38, %v522_v23  ;;  %v651_v28 = vadd.f32 %v1641_v38, %v650_v24 }
 0x141   :  { %v1250_v29 = vpack.c.bf16 %v716_v19, %v716_v19  ;;  %v1282_v30 = vpack.c.bf16 %v748_v20, %v748_v20  ;;  %v717_v31 = vmax.f32 %v531_v21, 0.0  ;;  %v749_v32 = vmax.f32 %v659_v22, 0.0 }
 0x142   :  { %v1248_v33 = vpack.c.bf16 %v714_v25, %v714_v25  ;;  %v1280_v34 = vpack.c.bf16 %v746_v26, %v746_v26  ;;  %v715_v35 = vmax.f32 %v523_v27, 0.0  ;;  %v747_v36 = vmax.f32 %v651_v28, 0.0 }
 0x143   :  { %1037 = vst.msk [vmem:[#allocation8 + $0x58] sm:$0xf] %vm1014_vm3, %v1250_v29  ;;  %1069 = vst.msk [vmem:[#allocation8 + $0xd8] sm:$0xf] %vm1014_vm3, %v1282_v30  ;;  %v1251_v37 = vpack.c.bf16 %v717_v31, %v717_v31  ;;  %v1283_v39 = vpack.c.bf16 %v749_v32, %v749_v32 }
 0x144   :  { %1035 = vst.msk [vmem:[#allocation8 + $0x50] sm:$0xf] %vm1014_vm3, %v1248_v33  ;;  %1067 = vst.msk [vmem:[#allocation8 + $0xd0] sm:$0xf] %vm1014_vm3, %v1280_v34  ;;  %v1249_v40 = vpack.c.bf16 %v715_v35, %v715_v35  ;;  %v1281_v41 = vpack.c.bf16 %v747_v36, %v747_v36  ;;  %v1356_v42 = vpop.f32.mrb[24].mxu0  ;;  %v1388_v43 = vpop.f32.mrb[24].mxu1 }
 0x145   :  { %1038 = vst.msk [vmem:[#allocation8 + $0x5c] sm:$0xf] %vm1014_vm3, %v1251_v37  ;;  %1070 = vst.msk [vmem:[#allocation8 + $0xdc] sm:$0xf] %vm1014_vm3, %v1283_v39  ;;  %v544_v44 = vadd.f32 %v1356_v42, %v1641_v38  ;;  %v672_v45 = vadd.f32 %v1388_v43, %v1641_v38  ;;  %v535_v46 = vpop.f32.mrb[25].mxu0  ;;  %v663_v47 = vpop.f32.mrb[25].mxu1 }
 0x146   :  { %1036 = vst.msk [vmem:[#allocation8 + $0x54] sm:$0xf] %vm1014_vm3, %v1249_v40  ;;  %1068 = vst.msk [vmem:[#allocation8 + $0xd4] sm:$0xf] %vm1014_vm3, %v1281_v41  ;;  %v536_v48 = vadd.f32 %v1641_v38, %v535_v46  ;;  %v664_v49 = vadd.f32 %v1641_v38, %v663_v47  ;;  %v1357_v50 = vpop.f32.mrb[26].mxu0  ;;  %v1389_v51 = vpop.f32.mrb[26].mxu1 }
 0x147   :  { %v720_v52 = vmax.f32 %v544_v44, 0.0  ;;  %v752_v53 = vmax.f32 %v672_v45, 0.0  ;;  %v547_v54 = vadd.f32 %v1357_v50, %v1641_v38  ;;  %v675_v55 = vadd.f32 %v1389_v51, %v1641_v38  ;;  %v538_v56 = vpop.f32.mrb[27].mxu0  ;;  %v666_v57 = vpop.f32.mrb[27].mxu1 }
 0x148   :  { %v718_v58 = vmax.f32 %v536_v48, 0.0  ;;  %v750_v59 = vmax.f32 %v664_v49, 0.0  ;;  %v539_v60 = vadd.f32 %v1641_v38, %v538_v56  ;;  %v667_v61 = vadd.f32 %v1641_v38, %v666_v57 }
 0x149   :  { %v1254_v62 = vpack.c.bf16 %v720_v52, %v720_v52  ;;  %v1286_v63 = vpack.c.bf16 %v752_v53, %v752_v53  ;;  %v721_v0 = vmax.f32 %v547_v54, 0.0  ;;  %v753_v1 = vmax.f32 %v675_v55, 0.0 }
 0x14a   :  { %v1252_v2 = vpack.c.bf16 %v718_v58, %v718_v58  ;;  %v1284_v3 = vpack.c.bf16 %v750_v59, %v750_v59  ;;  %v719_v4 = vmax.f32 %v539_v60, 0.0  ;;  %v751_v5 = vmax.f32 %v667_v61, 0.0 }
 0x14b   :  { %1041 = vst.msk [vmem:[#allocation8 + $0x68] sm:$0xf] %vm1014_vm3, %v1254_v62  ;;  %1073 = vst.msk [vmem:[#allocation8 + $0xe8] sm:$0xf] %vm1014_vm3, %v1286_v63  ;;  %v1255_v6 = vpack.c.bf16 %v721_v0, %v721_v0  ;;  %v1287_v7 = vpack.c.bf16 %v753_v1, %v753_v1 }
 0x14c   :  { %1039 = vst.msk [vmem:[#allocation8 + $0x60] sm:$0xf] %vm1014_vm3, %v1252_v2  ;;  %1071 = vst.msk [vmem:[#allocation8 + $0xe0] sm:$0xf] %vm1014_vm3, %v1284_v3  ;;  %v1253_v8 = vpack.c.bf16 %v719_v4, %v719_v4  ;;  %v1285_v9 = vpack.c.bf16 %v751_v5, %v751_v5  ;;  %v1360_v10 = vpop.f32.mrb[28].mxu0  ;;  %v1392_v11 = vpop.f32.mrb[28].mxu1 }
 0x14d   :  { %1042 = vst.msk [vmem:[#allocation8 + $0x6c] sm:$0xf] %vm1014_vm3, %v1255_v6  ;;  %1074 = vst.msk [vmem:[#allocation8 + $0xec] sm:$0xf] %vm1014_vm3, %v1287_v7  ;;  %v560_v12 = vadd.f32 %v1360_v10, %v1641_v38  ;;  %v688_v13 = vadd.f32 %v1392_v11, %v1641_v38  ;;  %v551_v14 = vpop.f32.mrb[29].mxu0  ;;  %v679_v15 = vpop.f32.mrb[29].mxu1 }
 0x14e   :  { %1040 = vst.msk [vmem:[#allocation8 + $0x64] sm:$0xf] %vm1014_vm3, %v1253_v8  ;;  %1072 = vst.msk [vmem:[#allocation8 + $0xe4] sm:$0xf] %vm1014_vm3, %v1285_v9  ;;  %v552_v16 = vadd.f32 %v1641_v38, %v551_v14  ;;  %v680_v17 = vadd.f32 %v1641_v38, %v679_v15  ;;  %v1361_v18 = vpop.f32.mrb[30].mxu0  ;;  %v1393_v19 = vpop.f32.mrb[30].mxu1 }
 0x14f   :  { %v724_v20 = vmax.f32 %v560_v12, 0.0  ;;  %v756_v21 = vmax.f32 %v688_v13, 0.0  ;;  %v563_v22 = vadd.f32 %v1361_v18, %v1641_v38  ;;  %v691_v23 = vadd.f32 %v1393_v19, %v1641_v38  ;;  %v554_v24 = vpop.f32.mrb[31].mxu0  ;;  %v682_v25 = vpop.f32.mrb[31].mxu1 }
 0x150   :  { %v722_v26 = vmax.f32 %v552_v16, 0.0  ;;  %v754_v27 = vmax.f32 %v680_v17, 0.0  ;;  %v555_v28 = vadd.f32 %v1641_v38, %v554_v24  ;;  %v683_v29 = vadd.f32 %v1641_v38, %v682_v25 }
 0x151   :  { %v1258_v30 = vpack.c.bf16 %v724_v20, %v724_v20  ;;  %v1290_v31 = vpack.c.bf16 %v756_v21, %v756_v21  ;;  %v725_v32 = vmax.f32 %v563_v22, 0.0  ;;  %v757_v33 = vmax.f32 %v691_v23, 0.0 }
 0x152   :  { %v1256_v34 = vpack.c.bf16 %v722_v26, %v722_v26  ;;  %v1288_v35 = vpack.c.bf16 %v754_v27, %v754_v27  ;;  %v723_v36 = vmax.f32 %v555_v28, 0.0  ;;  %v755_v37 = vmax.f32 %v683_v29, 0.0 }
 0x153   :  { %1045 = vst.msk [vmem:[#allocation8 + $0x78] sm:$0xf] %vm1014_vm3, %v1258_v30  ;;  %1077 = vst.msk [vmem:[#allocation8 + $0xf8] sm:$0xf] %vm1014_vm3, %v1290_v31  ;;  %v1259_v39 = vpack.c.bf16 %v725_v32, %v725_v32  ;;  %v1291_v40 = vpack.c.bf16 %v757_v33, %v757_v33 }
 0x154   :  { %1043 = vst.msk [vmem:[#allocation8 + $0x70] sm:$0xf] %vm1014_vm3, %v1256_v34  ;;  %1075 = vst.msk [vmem:[#allocation8 + $0xf0] sm:$0xf] %vm1014_vm3, %v1288_v35  ;;  %v1257_v38 = vpack.c.bf16 %v723_v36, %v723_v36  ;;  %v1289_v41 = vpack.c.bf16 %v755_v37, %v755_v37 }
 0x155   :  { %1046 = vst.msk [vmem:[#allocation8 + $0x7c] sm:$0xf] %vm1014_vm3, %v1259_v39  ;;  %1078 = vst.msk [vmem:[#allocation8 + $0xfc] sm:$0xf] %vm1014_vm3, %v1291_v40 }
 0x156   :  { %1044 = vst.msk [vmem:[#allocation8 + $0x74] sm:$0xf] %vm1014_vm3, %v1257_v38  ;;  %1076 = vst.msk [vmem:[#allocation8 + $0xf4] sm:$0xf] %vm1014_vm3, %v1289_v41 }
 0x157   :  { %1516 = shalt.err (!%p1513_p0)
}
 0x158   :  { %s1517_s28 = scalar_lea.hbm %s1789_s3, 4096 }
 0x159   :  { %p1518_p1 = scmp.ne.s32.totalorder %s1789_s3, %s1517_s28  ;;  %p1521_p2 = scmp.lt.u32.totalorder %s1517_s28, %s1789_s3 }
 0x15b   :  { %p1523_p3 = pnand %p1521_p2, %p1518_p1 }
 0x15d   :  { %1526 = shalt.err (!%p1523_p3)
}
 0x15e   :  { %1090 = dma.vmem_to_hbm [thread:$0]  %s1085_s22, 4096, %s1789_s3, [#allocation4], %s1535_s24, %s1535_s24, %s1536_s25  }
 0x15f   :  { %1531 = dma.done.wait [#allocation4], 4096  }
 0x160   :  { %1532 = vsyncadd [#allocation4], 4294963200 }
 0x161   :  { %1094 = vsyncpa [#allocation3], 1 }
 0x162   :  { %1095 = vsyncpa [#allocation6], 1 }
 0x163   :  { %1096 = vsyncpa [#allocation4], 1 }

// kernel: _lambda_.14
= control target key start
LH: loop header
LB: loop body
LE: loop exit
PB: predicated region body
PF: predicated region fallthrough
CT: control target
= control target key end

     0   :  { %8 = vsyncpa [#allocation3], 0  ;;  %s1669_s0 = inlined_call_operand.hbm [shape: bf16[128,576], index: 0, kind: input, shape index: {}]   ;;  %s1670_s1 = inlined_call_operand.hbm [shape: bf16[576,64], index: 1, kind: input, shape index: {}]   ;;  %s1671_s2 = inlined_call_operand.hbm [shape: f32[1,64], index: 2, kind: input, shape index: {}]   ;;  %s1672_s3 = inlined_call_operand.hbm [shape: bf16[128,64], index: 3, kind: output, shape index: {}]  }
   0x1   :  { %9 = vsyncpa [#allocation6], 0 }
   0x2   :  { %10 = vsyncpa [#allocation4], 0  ;;  %s1512_s12 = smov [#allocation5]   ;;  %s1418_s16 = scalar_lea.hbm %s1670_s1, 4608 }
   0x3   :  { %s28_s13 = sshll.u32 %s1512_s12, 4  ;;  %p1419_p0 = scmp.ne.s32.totalorder %s1670_s1, %s1418_s16  ;;  %s29_s13 = int_to_ptr.vmem [resolvable:$true] %s28_s13 }
   0x4   :  { %p1422_p1 = scmp.lt.u32.totalorder %s1418_s16, %s1670_s1 }
   0x6   :  { %p1424_p2 = pnand %p1422_p1, %p1419_p0 }
   0x8   :  { %1427 = shalt.err (!%p1424_p2)
}
   0x9   :  { %s1428_s21 = scalar_lea.vmem %s29_s13, 4608  ;;  %p1433_p4 = scmp.lt.s32.totalorder %s29_s13, %s29_s13 }
   0xa   :  { %p1429_p3 = scmp.ne.s32.totalorder %s29_s13, %s1428_s21  ;;  %p1434_p5 = scmp.lt.s32.totalorder %s1428_s21, %s1428_s21 }
   0xc   :  { %p1435_p6 = por %p1434_p5, %p1433_p4 }
   0xe   :  { %p1436_p7 = pnand %p1435_p6, %p1429_p3 }
  0x10   :  { %1439 = shalt.err (!%p1436_p7)
}
  0x11   :  { %s1513_s22 = smov 64   ;;  %s1514_s23 = smov 4  }
  0x12   :  { %34 = dma.hbm_to_vmem [thread:$0]  %s1670_s1, 4608, %s29_s13, [#allocation6], %s1513_s22, %s1513_s22, %s1514_s23  }
  0x13   :  { %s1515_s26 = smov [#allocation2]   ;;  %s1440_s30 = scalar_lea.hbm %s1669_s0, 5120 }
  0x14   :  { %s16_s27 = sshll.u32 %s1515_s26, 4  ;;  %p1441_p8 = scmp.ne.s32.totalorder %s1669_s0, %s1440_s30  ;;  %s17_s27 = int_to_ptr.vmem [resolvable:$true] %s16_s27 }
  0x15   :  { %p1444_p9 = scmp.lt.u32.totalorder %s1440_s30, %s1669_s0 }
  0x17   :  { %p1446_p10 = pnand %p1444_p9, %p1441_p8 }
  0x19   :  { %1449 = shalt.err (!%p1446_p10)
}
  0x1a   :  { %s1450_s8 = scalar_lea.vmem %s17_s27, 5120  ;;  %p1455_p12 = scmp.lt.s32.totalorder %s17_s27, %s17_s27 }
  0x1b   :  { %p1451_p11 = scmp.ne.s32.totalorder %s17_s27, %s1450_s8  ;;  %p1456_p13 = scmp.lt.s32.totalorder %s1450_s8, %s1450_s8 }
  0x1d   :  { %p1457_p0 = por %p1456_p13, %p1455_p12 }
  0x1f   :  { %p1458_p1 = pnand %p1457_p0, %p1451_p11 }
  0x21   :  { %1461 = shalt.err (!%p1458_p1)
}
  0x22   :  { %s1516_s1 = smov 320   ;;  %s1517_s9 = smov 20  }
  0x23   :  { %22 = dma.hbm_to_vmem [thread:$0]  %s1669_s0, 5120, %s17_s27, [#allocation3], %s1516_s1, %s1516_s1, %s1517_s9  }
  0x24   :  { %s1518_s12 = smov [#allocation7]   ;;  %s1462_s16 = scalar_lea.hbm %s1671_s2, 16 }
  0x25   :  { %s41_s13 = sshll.u32 %s1518_s12, 4  ;;  %p1463_p2 = scmp.ne.s32.totalorder %s1671_s2, %s1462_s16  ;;  %s42_s13 = int_to_ptr.vmem [resolvable:$true] %s41_s13 }
  0x26   :  { %p1466_p3 = scmp.lt.u32.totalorder %s1462_s16, %s1671_s2 }
  0x28   :  { %p1468_p4 = pnand %p1466_p3, %p1463_p2 }
  0x2a   :  { %1471 = shalt.err (!%p1468_p4)
}
  0x2b   :  { %s1472_s21 = scalar_lea.vmem %s42_s13, 16  ;;  %s1476_s0 = scalar_lea.vmem %s42_s13, 32 }
  0x2c   :  { %p1473_p5 = scmp.ne.s32.totalorder %s42_s13, %s1472_s21  ;;  %p1477_p6 = scmp.lt.s32.totalorder %s42_s13, %s42_s13 }
  0x2d   :  { %p1478_p7 = scmp.lt.s32.totalorder %s1476_s0, %s1472_s21 }
  0x2f   :  { %p1479_p8 = por %p1478_p7, %p1477_p6 }
  0x31   :  { %p1480_p9 = pnand %p1479_p8, %p1473_p5 }
  0x33   :  { %1483 = shalt.err (!%p1480_p9)
}
  0x34   :  { %44 = dma.hbm_to_vmem [thread:$0]  %s1671_s2, 16, %s42_s13, [#allocation6]  }
  0x35   :  { %1506 = dma.done.wait [#allocation3], 5120  }
  0x36   :  { %1507 = vsyncadd [#allocation3], 4294962176 }
  0x37   :  { %1508 = dma.done.wait [#allocation6], 4624  }
  0x38   :  { %1509 = vsyncadd [#allocation6], 4294962672  ;;  %v1326_v0 = vld [vmem:[#allocation5 + $0x40] sm:$0xff]   ;;  %v1330_v4 = vld [vmem:[#allocation5 + $0x48] sm:$0xff]   ;;  %vm598_vm0 = vcmask 523264   ;;  %vm994_vm1 = vcmask 519168  }
  0x39   :  { %v1327_v1 = vld [vmem:[#allocation5 + $0xc0] sm:$0xff]   ;;  %1146 = vmatprep.subr.bf16.mxu0 %v1326_v0  ;;  %v1331_v5 = vld [vmem:[#allocation5 + $0xc8] sm:$0xff]   ;;  %v1334_v8 = vld [vmem:[#allocation5 + $0x50] sm:$0xff]   ;;  %s1519_s2 = smov [#allocation8]  }
  0x3a   :  { %v1328_v2 = vld [vmem:[#allocation5] sm:$0xff]   ;;  %1210 = vmatprep.subr.bf16.mxu1 %v1327_v1  ;;  %v1332_v6 = vld [vmem:[#allocation5 + $0x8] sm:$0xff]   ;;  %v1335_v9 = vld [vmem:[#allocation5 + $0xd0] sm:$0xff]   ;;  %s1016_s26 = sshll.u32 %s1519_s2, 4  ;;  %s1017_s26 = int_to_ptr.vmem [resolvable:$true] %s1016_s26 }
  0x3b   :  { %v1329_v3 = vld [vmem:[#allocation5 + $0x80] sm:$0xff]   ;;  %1147 = vmatpush3.bf16.msra.mxu0 %v1328_v2  ;;  %v1333_v7 = vld [vmem:[#allocation5 + $0x88] sm:$0xff]   ;;  %v1336_v10 = vld [vmem:[#allocation5 + $0x10] sm:$0xff]   ;;  %s1484_s27 = scalar_lea.vmem %s1017_s26, 1024  ;;  %p1489_p11 = scmp.lt.s32.totalorder %s1017_s26, %s1017_s26 }
  0x3c   :  { %1211 = vmatpush3.bf16.msra.mxu1 %v1329_v3  ;;  %1148 = vmatprep.subr.bf16.mxu0 %v1330_v4  ;;  %v1337_v11 = vld [vmem:[#allocation5 + $0x90] sm:$0xff]   ;;  %v1338_v12 = vld [vmem:[#allocation5 + $0x58] sm:$0xff]   ;;  %v1342_v16 = vld [vmem:[#allocation5 + $0x60] sm:$0xff]   ;;  %p1485_p10 = scmp.ne.s32.totalorder %s1017_s26, %s1484_s27  ;;  %p1490_p12 = scmp.lt.s32.totalorder %s1484_s27, %s1484_s27 }
  0x3d   :  { %1212 = vmatprep.subr.bf16.mxu1 %v1331_v5  ;;  %v1339_v13 = vld [vmem:[#allocation5 + $0xd8] sm:$0xff]   ;;  %v1343_v17 = vld [vmem:[#allocation5 + $0xe0] sm:$0xff]   ;;  %v1346_v20 = vld [vmem:[#allocation5 + $0x68] sm:$0xff]  }
  0x3e   :  { %v1340_v14 = vld [vmem:[#allocation5 + $0x18] sm:$0xff]   ;;  %v1344_v18 = vld [vmem:[#allocation5 + $0x20] sm:$0xff]   ;;  %v1347_v21 = vld [vmem:[#allocation5 + $0xe8] sm:$0xff]   ;;  %p1491_p13 = por %p1490_p12, %p1489_p11 }
  0x3f   :  { %1149 = vmatpush3.bf16.msra.mxu0 %v1332_v6  ;;  %v1341_v15 = vld [vmem:[#allocation5 + $0x98] sm:$0xff]   ;;  %v1345_v19 = vld [vmem:[#allocation5 + $0xa0] sm:$0xff]   ;;  %v1348_v22 = vld [vmem:[#allocation5 + $0x28] sm:$0xff]  }
  0x40   :  { %1213 = vmatpush3.bf16.msra.mxu1 %v1333_v7  ;;  %1150 = vmatprep.subr.bf16.mxu0 %v1334_v8  ;;  %v1349_v23 = vld [vmem:[#allocation5 + $0xa8] sm:$0xff]   ;;  %v1350_v24 = vld [vmem:[#allocation5 + $0x70] sm:$0xff]   ;;  %v1354_v28 = vld [vmem:[#allocation5 + $0x78] sm:$0xff]   ;;  %p1492_p0 = pnand %p1491_p13, %p1485_p10 }
  0x41   :  { %1214 = vmatprep.subr.bf16.mxu1 %v1335_v9  ;;  %v1351_v25 = vld [vmem:[#allocation5 + $0xf0] sm:$0xff]   ;;  %v1355_v29 = vld [vmem:[#allocation5 + $0xf8] sm:$0xff]   ;;  %v1363_v35 = vld [vmem:[#allocation2 + $0xc] ss:$20 sps:$4 sm:$0xff]  }
  0x42   :  { %v1352_v26 = vld [vmem:[#allocation5 + $0x30] sm:$0xff]   ;;  %v1356_v30 = vld [vmem:[#allocation5 + $0x38] sm:$0xff]   ;;  %v1364_v36 = vld [vmem:[#allocation5 + $0x100] sm:$0xff]   ;;  %752 = vmatprep.mubr.bf16.mxu1 %v1363_v35 }
  0x43   :  { %1151 = vmatpush3.bf16.msra.mxu0 %v1336_v10  ;;  %v1353_v27 = vld [vmem:[#allocation5 + $0xb0] sm:$0xff]   ;;  %v1357_v31 = vld [vmem:[#allocation5 + $0xb8] sm:$0xff]   ;;  %v1365_v37 = vld [vmem:[#allocation2 + $0x2c] ss:$20 sps:$4 sm:$0xff]  }
  0x44   :  { %1215 = vmatpush3.bf16.msra.mxu1 %v1337_v11  ;;  %1152 = vmatprep.subr.bf16.mxu0 %v1338_v12  ;;  %v1358_v32 = vld [vmem:[#allocation2] ss:$20 sps:$4 sm:$0xff]   ;;  %v1360_v33 = vld [vmem:[#allocation2 + $0x4] ss:$20 sps:$4 sm:$0xff]   ;;  %v1361_v34 = vld [vmem:[#allocation2 + $0x8] ss:$20 sps:$4 sm:$0xff]  }
  0x45   :  { %1216 = vmatprep.subr.bf16.mxu1 %v1339_v13  ;;  %655 = vmatprep.mubr.bf16.mxu0 %v1360_v33  ;;  %v1367_v38 = vld [vmem:[#allocation2 + $0x34] ss:$20 sps:$4 sm:$0xff]   ;;  %v1370_v40 = vld [vmem:[#allocation2 + $0x30] ss:$20 sps:$4 sm:$0xff]   ;;  %v1376_v45 = vld [vmem:[#allocation2 + $0x58] ss:$20 sps:$4 sm:$0xff]  }
  0x46   :  { %v1369_v39 = vld [vmem:[#allocation2 + $0x28] ss:$20 sps:$4 sm:$0xff]   ;;  %v1375_v44 = vld [vmem:[#allocation2 + $0x50] ss:$20 sps:$4 sm:$0xff]   ;;  %v1382_v50 = vld [vmem:[#allocation2 + $0x78] ss:$20 sps:$4 sm:$0xff]  }
  0x47   :  { %1153 = vmatpush3.bf16.msra.mxu0 %v1340_v14  ;;  %v1371_v41 = vld [vmem:[#allocation2 + $0x54] ss:$20 sps:$4 sm:$0xff]   ;;  %v1373_v43 = vld [vmem:[#allocation2 + $0x5c] ss:$20 sps:$4 sm:$0xff]   ;;  %v1380_v48 = vld [vmem:[#allocation2 + $0x84] ss:$20 sps:$4 sm:$0xff]  }
  0x48   :  { %1217 = vmatpush3.bf16.msra.mxu1 %v1341_v15  ;;  %1154 = vmatprep.subr.bf16.mxu0 %v1342_v16  ;;  %v1377_v42 = vld [vmem:[#allocation5 + $0x108] sm:$0xff]   ;;  %v1390_v46 = vld [vmem:[#allocation5 + $0x110] sm:$0xff]   ;;  %v1403_v49 = vld [vmem:[#allocation5 + $0x118] sm:$0xff]  }
  0x49   :  { %1218 = vmatprep.subr.bf16.mxu1 %v1343_v17  ;;  %v1378_v47 = vld [vmem:[#allocation2 + $0x7c] ss:$20 sps:$4 sm:$0xff]   ;;  %v1383_v51 = vld [vmem:[#allocation2 + $0x80] ss:$20 sps:$4 sm:$0xff]   ;;  %v1384_v52 = vld [vmem:[#allocation2 + $0xa4] ss:$20 sps:$4 sm:$0xff]  }
  0x4a   :  { %v1386_v53 = vld [vmem:[#allocation2 + $0xac] ss:$20 sps:$4 sm:$0xff]   ;;  %v1389_v55 = vld [vmem:[#allocation2 + $0xa8] ss:$20 sps:$4 sm:$0xff]   ;;  %v1396_v59 = vld [vmem:[#allocation2 + $0xd0] ss:$20 sps:$4 sm:$0xff]  }
  0x4b   :  { %1155 = vmatpush3.bf16.msra.mxu0 %v1344_v18  ;;  %v1388_v54 = vld [vmem:[#allocation2 + $0xa0] ss:$20 sps:$4 sm:$0xff]   ;;  %v1395_v58 = vld [vmem:[#allocation2 + $0xc8] ss:$20 sps:$4 sm:$0xff]   ;;  %v1401_v62 = vld [vmem:[#allocation2 + $0xf0] ss:$20 sps:$4 sm:$0xff]  }
  0x4c   :  { %1219 = vmatpush3.bf16.msra.mxu1 %v1345_v19  ;;  %1156 = vmatprep.subr.bf16.mxu0 %v1346_v20  ;;  %v1391_v56 = vld [vmem:[#allocation2 + $0xcc] ss:$20 sps:$4 sm:$0xff]   ;;  %v1393_v57 = vld [vmem:[#allocation2 + $0xd4] ss:$20 sps:$4 sm:$0xff]   ;;  %v1399_v61 = vld [vmem:[#allocation2 + $0xfc] ss:$20 sps:$4 sm:$0xff]  }
  0x4d   :  { %1220 = vmatprep.subr.bf16.mxu1 %v1347_v21  ;;  %v1397_v60 = vld [vmem:[#allocation2 + $0xf4] ss:$20 sps:$4 sm:$0xff]   ;;  %v1402_v63 = vld [vmem:[#allocation2 + $0xf8] ss:$20 sps:$4 sm:$0xff]   ;;  %v1404_v0 = vld [vmem:[#allocation2 + $0x11c] ss:$20 sps:$4 sm:$0xff]  }
  0x4e   :  { %v1406_v1 = vld [vmem:[#allocation2 + $0x124] ss:$20 sps:$4 sm:$0xff]   ;;  %v1409_v3 = vld [vmem:[#allocation2 + $0x120] ss:$20 sps:$4 sm:$0xff]   ;;  %v1416_v10 = vld [vmem:[#allocation2 + $0x88] ss:$20 sps:$4 sm:$0xff]  }
  0x4f   :  { %1157 = vmatpush3.bf16.msra.mxu0 %v1348_v22  ;;  %v1408_v2 = vld [vmem:[#allocation2 + $0x118] ss:$20 sps:$4 sm:$0xff]   ;;  %v1410_v4 = vld [vmem:[#allocation2 + $0x10] ss:$20 sps:$4 sm:$0xff]   ;;  %v1414_v8 = vld [vmem:[#allocation2 + $0x60] ss:$20 sps:$4 sm:$0xff]  }
  0x50   :  { %1221 = vmatpush3.bf16.msra.mxu1 %v1349_v23  ;;  %1158 = vmatprep.subr.bf16.mxu0 %v1350_v24  ;;  %v1411_v5 = vld [vmem:[#allocation2 + $0xb0] ss:$20 sps:$4 sm:$0xff]   ;;  %v1412_v6 = vld [vmem:[#allocation2 + $0x38] ss:$20 sps:$4 sm:$0xff]   ;;  %v1415_v9 = vld [vmem:[#allocation2 + $0x100] ss:$20 sps:$4 sm:$0xff]  }
  0x51   :  { %1222 = vmatprep.subr.bf16.mxu1 %v1351_v25  ;;  %v1413_v7 = vld [vmem:[#allocation2 + $0xd8] ss:$20 sps:$4 sm:$0xff]   ;;  %v1417_v11 = vld [vmem:[#allocation2 + $0x128] ss:$20 sps:$4 sm:$0xff]   ;;  %v1587_v14 = vld [vmem:[#allocation7] ss:$0 sm:$0xff] }
  0x53   :  { %1159 = vmatpush3.bf16.msra.mxu0 %v1352_v26 }
  0x54   :  { %1223 = vmatpush3.bf16.msra.mxu1 %v1353_v27  ;;  %1160 = vmatprep.subr.bf16.mxu0 %v1354_v28 }
  0x55   :  { %1224 = vmatprep.subr.bf16.mxu1 %v1355_v29 }
  0x57   :  { %1161 = vmatpush3.bf16.msra.mxu0 %v1356_v30 }
  0x58   :  { %1225 = vmatpush3.bf16.msra.mxu1 %v1357_v31  ;;  %1286 = vmatprep.subr.bf16.mxu0 %v1364_v36 }
  0x59   :  { %1310 = vmatprep.subr.bf16.mxu1 %v1364_v36 }
  0x5a   :  { %656 = vmatmul.mubr.bf16.vlgmr.msra.gmra.mrb[0].mxu0 %v1358_v32 }
  0x5b   :  { %753 = vmatmul.mubr.bf16.vlgmr.msra.gmra.mrb[0].mxu1 %v1361_v34  ;;  %1287 = vmatpush3.bf16.msra.mxu0 %v1364_v36 }
  0x5c   :  { %1314 = vmatpush3.bf16.msra.mxu1 %v1364_v36  ;;  %663 = vmatprep.mubr.bf16.mxu0 %v1365_v37 }
  0x5d   :  { %760 = vmatprep.mubr.bf16.mxu1 %v1367_v38  ;;  %1288 = vmatprep.subr.bf16.mxu0 %v1377_v42 }
  0x5e   :  { %1311 = vmatprep.subr.bf16.mxu1 %v1377_v42 }
  0x5f   :  { %1289 = vmatpush3.bf16.msra.mxu0 %v1377_v42 }
  0x60   :  { %1315 = vmatpush3.bf16.msra.mxu1 %v1377_v42  ;;  %1290 = vmatprep.subr.bf16.mxu0 %v1390_v46 }
  0x61   :  { %1312 = vmatprep.subr.bf16.mxu1 %v1390_v46 }
  0x62   :  { %664 = vmatmul.mubr.bf16.gmra.mrb[4].mxu0 %v1369_v39 }
  0x63   :  { %761 = vmatmul.mubr.bf16.gmra.mrb[4].mxu1 %v1370_v40  ;;  %671 = vmatprep.mubr.bf16.mxu0 %v1371_v41 }
  0x64   :  { %768 = vmatprep.mubr.bf16.mxu1 %v1373_v43  ;;  %1291 = vmatpush3.bf16.msra.mxu0 %v1390_v46 }
  0x65   :  { %1316 = vmatpush3.bf16.msra.mxu1 %v1390_v46  ;;  %1292 = vmatprep.subr.bf16.mxu0 %v1403_v49 }
  0x66   :  { %1313 = vmatprep.subr.bf16.mxu1 %v1403_v49 }
  0x68   :  { %1293 = vmatpush3.bf16.msra.mxu0 %v1403_v49 }
  0x69   :  { %1317 = vmatpush3.bf16.msra.mxu1 %v1403_v49 }
  0x6a   :  { %672 = vmatmul.mubr.bf16.gmra.mrb[8].mxu0 %v1375_v44 }
  0x6b   :  { %769 = vmatmul.mubr.bf16.gmra.mrb[8].mxu1 %v1376_v45  ;;  %679 = vmatprep.mubr.bf16.mxu0 %v1378_v47 }
  0x6c   :  { %776 = vmatprep.mubr.bf16.mxu1 %v1380_v48 }
  0x72   :  { %680 = vmatmul.mubr.bf16.gmra.mrb[12].mxu0 %v1382_v50 }
  0x73   :  { %777 = vmatmul.mubr.bf16.gmra.mrb[12].mxu1 %v1383_v51  ;;  %687 = vmatprep.mubr.bf16.mxu0 %v1384_v52 }
  0x74   :  { %784 = vmatprep.mubr.bf16.mxu1 %v1386_v53 }
  0x7a   :  { %688 = vmatmul.mubr.bf16.gmra.mrb[16].mxu0 %v1388_v54 }
  0x7b   :  { %785 = vmatmul.mubr.bf16.gmra.mrb[16].mxu1 %v1389_v55  ;;  %695 = vmatprep.mubr.bf16.mxu0 %v1391_v56 }
  0x7c   :  { %792 = vmatprep.mubr.bf16.mxu1 %v1393_v57 }
  0x82   :  { %696 = vmatmul.mubr.bf16.gmra.mrb[20].mxu0 %v1395_v58 }
  0x83   :  { %793 = vmatmul.mubr.bf16.gmra.mrb[20].mxu1 %v1396_v59  ;;  %703 = vmatprep.mubr.bf16.mxu0 %v1397_v60 }
  0x84   :  { %800 = vmatprep.mubr.bf16.mxu1 %v1399_v61 }
  0x8a   :  { %704 = vmatmul.mubr.bf16.gmra.mrb[24].mxu0 %v1401_v62 }
  0x8b   :  { %801 = vmatmul.mubr.bf16.gmra.mrb[24].mxu1 %v1402_v63  ;;  %711 = vmatprep.mubr.bf16.mxu0 %v1404_v0 }
  0x8c   :  { %808 = vmatprep.mubr.bf16.mxu1 %v1406_v1 }
  0x92   :  { %712 = vmatmul.mubr.bf16.gmra.mrb[28].mxu0 %v1408_v2 }
  0x93   :  { %809 = vmatmul.mubr.bf16.gmra.mrb[28].mxu1 %v1409_v3  ;;  %1294 = vmatprep.mubr.msk.bf16.mxu0 %vm598_vm0, %v1410_v4 }
  0x94   :  { %1302 = vmatprep.mubr.msk.bf16.mxu1 %vm598_vm0, %v1411_v5 }
  0x9a   :  { %1295 = vmatmul.mubr.msk.bf16.vlgmr.msra.gmra.mrb[32].mxu0 %vm598_vm0, %v1412_v6 }
  0x9b   :  { %1303 = vmatmul.mubr.msk.bf16.vlgmr.msra.gmra.mrb[32].mxu1 %vm598_vm0, %v1413_v7  ;;  %1298 = vmatprep.mubr.msk.bf16.mxu0 %vm598_vm0, %v1414_v8 }
  0x9c   :  { %1306 = vmatprep.mubr.msk.bf16.mxu1 %vm598_vm0, %v1415_v9 }
  0xa2   :  { %1299 = vmatmul.mubr.msk.bf16.gmra.mrb[36].mxu0 %vm598_vm0, %v1416_v10 }
  0xa3   :  { %1307 = vmatmul.mubr.msk.bf16.gmra.mrb[36].mxu1 %vm598_vm0, %v1417_v11 }
 0x12d   :  { %v1162_v12 = vpop.f32.mrb[0].mxu0 }
 0x12e   :  { %v1226_v13 = vpop.f32.mrb[0].mxu1  ;;  %v1163_v15 = vpop.f32.mrb[1].mxu0 }
 0x12f   :  { %v1164_v16 = vadd.f32 %v1163_v15, %v1162_v12  ;;  %v1227_v17 = vpop.f32.mrb[1].mxu1  ;;  %v1165_v18 = vpop.f32.mrb[2].mxu0 }
 0x130   :  { %v1228_v19 = vadd.f32 %v1227_v17, %v1226_v13  ;;  %v1229_v20 = vpop.f32.mrb[2].mxu1  ;;  %v1166_v21 = vpop.f32.mrb[3].mxu0 }
 0x131   :  { %v658_v22 = vadd.f32 %v1164_v16, %v1587_v14  ;;  %v1167_v23 = vadd.f32 %v1166_v21, %v1165_v18  ;;  %v1230_v24 = vpop.f32.mrb[3].mxu1 }
 0x132   :  { %v1231_v25 = vadd.f32 %v1230_v24, %v1229_v20 }
 0x133   :  { %v661_v26 = vadd.f32 %v1167_v23, %v1587_v14  ;;  %v1591_v27 = vadd.f32 %v1228_v19, %v658_v22 }
 0x135   :  { %v1168_v28 = vpop.f32.mrb[4].mxu0  ;;  %v1593_v29 = vadd.f32 %v1231_v25, %v661_v26 }
 0x136   :  { %v1232_v30 = vpop.f32.mrb[4].mxu1  ;;  %v1169_v31 = vpop.f32.mrb[5].mxu0 }
 0x137   :  { %v1170_v32 = vadd.f32 %v1169_v31, %v1168_v28  ;;  %v1233_v33 = vpop.f32.mrb[5].mxu1  ;;  %v1171_v34 = vpop.f32.mrb[6].mxu0 }
 0x138   :  { %v1234_v35 = vadd.f32 %v1233_v33, %v1232_v30  ;;  %v1235_v36 = vpop.f32.mrb[6].mxu1  ;;  %v1172_v37 = vpop.f32.mrb[7].mxu0 }
 0x139   :  { %v666_v38 = vadd.f32 %v1170_v32, %v1587_v14  ;;  %v1173_v39 = vadd.f32 %v1172_v37, %v1171_v34  ;;  %v1236_v40 = vpop.f32.mrb[7].mxu1 }
 0x13a   :  { %v1237_v41 = vadd.f32 %v1236_v40, %v1235_v36 }
 0x13b   :  { %v669_v42 = vadd.f32 %v1173_v39, %v1587_v14  ;;  %v1597_v43 = vadd.f32 %v1234_v35, %v666_v38 }
 0x13d   :  { %v1174_v44 = vpop.f32.mrb[8].mxu0  ;;  %v1599_v45 = vadd.f32 %v1237_v41, %v669_v42 }
 0x13e   :  { %v1238_v46 = vpop.f32.mrb[8].mxu1  ;;  %v1175_v47 = vpop.f32.mrb[9].mxu0 }
 0x13f   :  { %v1176_v48 = vadd.f32 %v1175_v47, %v1174_v44  ;;  %v1239_v49 = vpop.f32.mrb[9].mxu1  ;;  %v1177_v50 = vpop.f32.mrb[10].mxu0 }
 0x140   :  { %v1240_v51 = vadd.f32 %v1239_v49, %v1238_v46  ;;  %v1241_v52 = vpop.f32.mrb[10].mxu1  ;;  %v1178_v53 = vpop.f32.mrb[11].mxu0 }
 0x141   :  { %v674_v54 = vadd.f32 %v1176_v48, %v1587_v14  ;;  %v1179_v55 = vadd.f32 %v1178_v53, %v1177_v50  ;;  %v1242_v56 = vpop.f32.mrb[11].mxu1 }
 0x142   :  { %v1243_v57 = vadd.f32 %v1242_v56, %v1241_v52 }
 0x143   :  { %v677_v58 = vadd.f32 %v1179_v55, %v1587_v14  ;;  %v1603_v59 = vadd.f32 %v1240_v51, %v674_v54 }
 0x145   :  { %v1180_v60 = vpop.f32.mrb[12].mxu0  ;;  %v1605_v61 = vadd.f32 %v1243_v57, %v677_v58 }
 0x146   :  { %v1244_v62 = vpop.f32.mrb[12].mxu1  ;;  %v1181_v63 = vpop.f32.mrb[13].mxu0 }
 0x147   :  { %v1182_v0 = vadd.f32 %v1181_v63, %v1180_v60  ;;  %v1245_v1 = vpop.f32.mrb[13].mxu1  ;;  %v1183_v2 = vpop.f32.mrb[14].mxu0 }
 0x148   :  { %v1246_v3 = vadd.f32 %v1245_v1, %v1244_v62  ;;  %v1247_v4 = vpop.f32.mrb[14].mxu1  ;;  %v1184_v5 = vpop.f32.mrb[15].mxu0 }
 0x149   :  { %v682_v6 = vadd.f32 %v1182_v0, %v1587_v14  ;;  %v1185_v7 = vadd.f32 %v1184_v5, %v1183_v2  ;;  %v1248_v8 = vpop.f32.mrb[15].mxu1 }
 0x14a   :  { %v1249_v9 = vadd.f32 %v1248_v8, %v1247_v4 }
 0x14b   :  { %v685_v10 = vadd.f32 %v1185_v7, %v1587_v14  ;;  %v1609_v11 = vadd.f32 %v1246_v3, %v682_v6 }
 0x14d   :  { %v1186_v12 = vpop.f32.mrb[16].mxu0  ;;  %v1611_v13 = vadd.f32 %v1249_v9, %v685_v10 }
 0x14e   :  { %v1250_v15 = vpop.f32.mrb[16].mxu1  ;;  %v1187_v16 = vpop.f32.mrb[17].mxu0 }
 0x14f   :  { %v1188_v17 = vadd.f32 %v1187_v16, %v1186_v12  ;;  %v1251_v18 = vpop.f32.mrb[17].mxu1  ;;  %v1189_v19 = vpop.f32.mrb[18].mxu0 }
 0x150   :  { %v1252_v20 = vadd.f32 %v1251_v18, %v1250_v15  ;;  %v1253_v21 = vpop.f32.mrb[18].mxu1  ;;  %v1190_v22 = vpop.f32.mrb[19].mxu0 }
 0x151   :  { %v690_v23 = vadd.f32 %v1188_v17, %v1587_v14  ;;  %v1191_v24 = vadd.f32 %v1190_v22, %v1189_v19  ;;  %v1254_v25 = vpop.f32.mrb[19].mxu1 }
 0x152   :  { %v1255_v26 = vadd.f32 %v1254_v25, %v1253_v21 }
 0x153   :  { %v693_v28 = vadd.f32 %v1191_v24, %v1587_v14  ;;  %v787_v30 = vadd.f32 %v1252_v20, %v690_v23 }
 0x155   :  { %v1192_v31 = vpop.f32.mrb[20].mxu0  ;;  %v1615_v32 = vadd.f32 %v1255_v26, %v693_v28 }
 0x156   :  { %v1256_v33 = vpop.f32.mrb[20].mxu1  ;;  %v1193_v34 = vpop.f32.mrb[21].mxu0 }
 0x157   :  { %v1194_v35 = vadd.f32 %v1193_v34, %v1192_v31  ;;  %v1257_v36 = vpop.f32.mrb[21].mxu1  ;;  %v1195_v37 = vpop.f32.mrb[22].mxu0 }
 0x158   :  { %v1258_v38 = vadd.f32 %v1257_v36, %v1256_v33  ;;  %v1259_v39 = vpop.f32.mrb[22].mxu1  ;;  %v1196_v40 = vpop.f32.mrb[23].mxu0 }
 0x159   :  { %v698_v41 = vadd.f32 %v1194_v35, %v1587_v14  ;;  %v1197_v42 = vadd.f32 %v1196_v40, %v1195_v37  ;;  %v1260_v44 = vpop.f32.mrb[23].mxu1 }
 0x15a   :  { %v1261_v46 = vadd.f32 %v1260_v44, %v1259_v39 }
 0x15b   :  { %v701_v47 = vadd.f32 %v1197_v42, %v1587_v14  ;;  %v795_v48 = vadd.f32 %v1258_v38, %v698_v41 }
 0x15d   :  { %v1198_v49 = vpop.f32.mrb[24].mxu0  ;;  %v798_v50 = vadd.f32 %v1261_v46, %v701_v47 }
 0x15e   :  { %v1262_v51 = vpop.f32.mrb[24].mxu1  ;;  %v1199_v52 = vpop.f32.mrb[25].mxu0 }
 0x15f   :  { %v1200_v53 = vadd.f32 %v1199_v52, %v1198_v49  ;;  %v1263_v54 = vpop.f32.mrb[25].mxu1  ;;  %v1201_v55 = vpop.f32.mrb[26].mxu0 }
 0x160   :  { %v1264_v56 = vadd.f32 %v1263_v54, %v1262_v51  ;;  %v1265_v57 = vpop.f32.mrb[26].mxu1  ;;  %v1202_v58 = vpop.f32.mrb[27].mxu0 }
 0x161   :  { %v706_v60 = vadd.f32 %v1200_v53, %v1587_v14  ;;  %v1203_v62 = vadd.f32 %v1202_v58, %v1201_v55  ;;  %v1266_v63 = vpop.f32.mrb[27].mxu1 }
 0x162   :  { %v1267_v0 = vadd.f32 %v1266_v63, %v1265_v57 }
 0x163   :  { %v709_v1 = vadd.f32 %v1203_v62, %v1587_v14  ;;  %v1621_v2 = vadd.f32 %v1264_v56, %v706_v60 }
 0x165   :  { %v1204_v3 = vpop.f32.mrb[28].mxu0  ;;  %v1623_v4 = vadd.f32 %v1267_v0, %v709_v1 }
 0x166   :  { %v1268_v5 = vpop.f32.mrb[28].mxu1  ;;  %v1205_v6 = vpop.f32.mrb[29].mxu0 }
 0x167   :  { %v1206_v7 = vadd.f32 %v1205_v6, %v1204_v3  ;;  %v1269_v8 = vpop.f32.mrb[29].mxu1  ;;  %v1207_v9 = vpop.f32.mrb[30].mxu0 }
 0x168   :  { %v1270_v10 = vadd.f32 %v1269_v8, %v1268_v5  ;;  %v1271_v12 = vpop.f32.mrb[30].mxu1  ;;  %v1208_v15 = vpop.f32.mrb[31].mxu0 }
 0x169   :  { %v714_v16 = vadd.f32 %v1206_v7, %v1587_v14  ;;  %v1209_v17 = vadd.f32 %v1208_v15, %v1207_v9  ;;  %v1272_v18 = vpop.f32.mrb[31].mxu1 }
 0x16a   :  { %v1273_v19 = vadd.f32 %v1272_v18, %v1271_v12 }
 0x16b   :  { %v717_v20 = vadd.f32 %v1209_v17, %v1587_v14  ;;  %v811_v21 = vadd.f32 %v1270_v10, %v714_v16 }
 0x16d   :  { %v1296_v22 = vpop.f32.mrb[32].mxu0  ;;  %v814_v23 = vadd.f32 %v1273_v19, %v717_v20 }
 0x16e   :  { %v860_v24 = vadd.f32 %v1296_v22, %v1597_v43  ;;  %v1304_v25 = vpop.f32.mrb[32].mxu1  ;;  %v851_v26 = vpop.f32.mrb[33].mxu0 }
 0x16f   :  { %v892_v28 = vadd.f32 %v1304_v25, %v795_v48  ;;  %v852_v31 = vadd.f32 %v851_v26, %v1591_v27  ;;  %v883_v33 = vpop.f32.mrb[33].mxu1  ;;  %v1297_v34 = vpop.f32.mrb[34].mxu0 }
 0x170   :  { %v916_v35 = vmax.f32 %v860_v24, 0.0  ;;  %v884_v36 = vadd.f32 %v883_v33, %v787_v30  ;;  %v863_v37 = vadd.f32 %v1297_v34, %v1599_v45  ;;  %v1305_v38 = vpop.f32.mrb[34].mxu1  ;;  %v854_v39 = vpop.f32.mrb[35].mxu0 }
 0x171   :  { %v924_v14 = vmax.f32 %v892_v28, 0.0  ;;  %v914_v40 = vmax.f32 %v852_v31, 0.0  ;;  %v895_v41 = vadd.f32 %v1305_v38, %v798_v50  ;;  %v855_v42 = vadd.f32 %v854_v39, %v1593_v29  ;;  %v886_v43 = vpop.f32.mrb[35].mxu1 }
 0x172   :  { %v1132_v44 = vpack.c.bf16 %v916_v35, %v916_v35  ;;  %v922_v46 = vmax.f32 %v884_v36, 0.0  ;;  %v917_v47 = vmax.f32 %v863_v37, 0.0  ;;  %v887_v27 = vadd.f32 %v886_v43, %v1615_v32 }
 0x173   :  { %v1140_v48 = vpack.c.bf16 %v924_v14, %v924_v14  ;;  %v1130_v49 = vpack.c.bf16 %v914_v40, %v914_v40  ;;  %v925_v51 = vmax.f32 %v895_v41, 0.0  ;;  %v915_v52 = vmax.f32 %v855_v42, 0.0 }
 0x174   :  { %997 = vst.msk [vmem:[#allocation8 + $0x8] sm:$0xf] %vm994_vm1, %v1132_v44  ;;  %v1138_v45 = vpack.c.bf16 %v922_v46, %v922_v46  ;;  %v1133_v30 = vpack.c.bf16 %v917_v47, %v917_v47  ;;  %v923_v53 = vmax.f32 %v887_v27, 0.0 }
 0x175   :  { %1005 = vst.msk [vmem:[#allocation8 + $0x28] sm:$0xf] %vm994_vm1, %v1140_v48  ;;  %995 = vst.msk [vmem:[#allocation8] sm:$0xf] %vm994_vm1, %v1130_v49  ;;  %v1141_v29 = vpack.c.bf16 %v925_v51, %v925_v51  ;;  %v1131_v50 = vpack.c.bf16 %v915_v52, %v915_v52  ;;  %v1300_v54 = vpop.f32.mrb[36].mxu0 }
 0x176   :  { %1003 = vst.msk [vmem:[#allocation8 + $0x20] sm:$0xf] %vm994_vm1, %v1138_v45  ;;  %998 = vst.msk [vmem:[#allocation8 + $0xc] sm:$0xf] %vm994_vm1, %v1133_v30  ;;  %v1139_v32 = vpack.c.bf16 %v923_v53, %v923_v53  ;;  %v876_v55 = vadd.f32 %v1300_v54, %v1609_v11  ;;  %v1308_v56 = vpop.f32.mrb[36].mxu1  ;;  %v867_v57 = vpop.f32.mrb[37].mxu0 }
 0x177   :  { %1006 = vst.msk [vmem:[#allocation8 + $0x2c] sm:$0xf] %vm994_vm1, %v1141_v29  ;;  %996 = vst.msk [vmem:[#allocation8 + $0x4] sm:$0xf] %vm994_vm1, %v1131_v50  ;;  %v908_v58 = vadd.f32 %v1308_v56, %v811_v21  ;;  %v868_v60 = vadd.f32 %v867_v57, %v1603_v59  ;;  %v899_v62 = vpop.f32.mrb[37].mxu1  ;;  %v1301_v63 = vpop.f32.mrb[38].mxu0 }
 0x178   :  { %1004 = vst.msk [vmem:[#allocation8 + $0x24] sm:$0xf] %vm994_vm1, %v1139_v32  ;;  %v920_v0 = vmax.f32 %v876_v55, 0.0  ;;  %v900_v1 = vadd.f32 %v899_v62, %v1621_v2  ;;  %v879_v3 = vadd.f32 %v1301_v63, %v1611_v13  ;;  %v1309_v5 = vpop.f32.mrb[38].mxu1  ;;  %v870_v11 = vpop.f32.mrb[39].mxu0 }
 0x179   :  { %v928_v6 = vmax.f32 %v908_v58, 0.0  ;;  %v918_v7 = vmax.f32 %v868_v60, 0.0  ;;  %v911_v8 = vadd.f32 %v1309_v5, %v814_v23  ;;  %v871_v9 = vadd.f32 %v870_v11, %v1605_v61  ;;  %v902_v10 = vpop.f32.mrb[39].mxu1 }
 0x17a   :  { %v1136_v12 = vpack.c.bf16 %v920_v0, %v920_v0  ;;  %v926_v15 = vmax.f32 %v900_v1, 0.0  ;;  %v921_v59 = vmax.f32 %v879_v3, 0.0  ;;  %v903_v16 = vadd.f32 %v902_v10, %v1623_v4 }
 0x17b   :  { %v1144_v17 = vpack.c.bf16 %v928_v6, %v928_v6  ;;  %v1134_v18 = vpack.c.bf16 %v918_v7, %v918_v7  ;;  %v929_v19 = vmax.f32 %v911_v8, 0.0  ;;  %v919_v20 = vmax.f32 %v871_v9, 0.0 }
 0x17c   :  { %1001 = vst.msk [vmem:[#allocation8 + $0x18] sm:$0xf] %vm994_vm1, %v1136_v12  ;;  %v1142_v13 = vpack.c.bf16 %v926_v15, %v926_v15  ;;  %v1137_v2 = vpack.c.bf16 %v921_v59, %v921_v59  ;;  %v927_v21 = vmax.f32 %v903_v16, 0.0 }
 0x17d   :  { %1009 = vst.msk [vmem:[#allocation8 + $0x38] sm:$0xf] %vm994_vm1, %v1144_v17  ;;  %999 = vst.msk [vmem:[#allocation8 + $0x10] sm:$0xf] %vm994_vm1, %v1134_v18  ;;  %v1145_v61 = vpack.c.bf16 %v929_v19, %v929_v19  ;;  %v1135_v22 = vpack.c.bf16 %v919_v20, %v919_v20 }
 0x17e   :  { %1007 = vst.msk [vmem:[#allocation8 + $0x30] sm:$0xf] %vm994_vm1, %v1142_v13  ;;  %1002 = vst.msk [vmem:[#allocation8 + $0x1c] sm:$0xf] %vm994_vm1, %v1137_v2  ;;  %v1143_v4 = vpack.c.bf16 %v927_v21, %v927_v21 }
 0x17f   :  { %1010 = vst.msk [vmem:[#allocation8 + $0x3c] sm:$0xf] %vm994_vm1, %v1145_v61  ;;  %1000 = vst.msk [vmem:[#allocation8 + $0x14] sm:$0xf] %vm994_vm1, %v1135_v22 }
 0x180   :  { %1008 = vst.msk [vmem:[#allocation8 + $0x34] sm:$0xf] %vm994_vm1, %v1143_v4 }
 0x181   :  { %1495 = shalt.err (!%p1492_p0)
}
 0x182   :  { %s1496_s30 = scalar_lea.hbm %s1672_s3, 1024 }
 0x183   :  { %p1497_p1 = scmp.ne.s32.totalorder %s1672_s3, %s1496_s30  ;;  %p1500_p2 = scmp.lt.u32.totalorder %s1496_s30, %s1672_s3 }
 0x185   :  { %p1502_p3 = pnand %p1500_p2, %p1497_p1 }
 0x187   :  { %1505 = shalt.err (!%p1502_p3)
}
 0x188   :  { %1022 = dma.vmem_to_hbm [thread:$0]  %s1017_s26, 1024, %s1672_s3, [#allocation4], %s1513_s22, %s1513_s22, %s1514_s23  }
 0x189   :  { %1510 = dma.done.wait [#allocation4], 1024  }
 0x18a   :  { %1511 = vsyncadd [#allocation4], 4294966272 }
 0x18b   :  { %1026 = vsyncpa [#allocation3], 1 }
 0x18c   :  { %1027 = vsyncpa [#allocation6], 1 }
 0x18d   :  { %1028 = vsyncpa [#allocation4], 1 }

// kernel: _lambda_.15
= control target key start
LH: loop header
LB: loop body
LE: loop exit
PB: predicated region body
PF: predicated region fallthrough
CT: control target
= control target key end

     0   :  { %8 = vsyncpa [#allocation3], 0  ;;  %s710_s0 = inlined_call_operand.hbm [shape: bf16[128,64], index: 0, kind: input, shape index: {}]   ;;  %s711_s1 = inlined_call_operand.hbm [shape: bf16[64,8], index: 1, kind: input, shape index: {}]   ;;  %s712_s2 = inlined_call_operand.hbm [shape: f32[1,8], index: 2, kind: input, shape index: {}]   ;;  %s713_s3 = inlined_call_operand.hbm [shape: bf16[128,8], index: 3, kind: output, shape index: {}]  }
   0x1   :  { %9 = vsyncpa [#allocation6], 0 }
   0x2   :  { %10 = vsyncpa [#allocation4], 0  ;;  %s596_s12 = smov [#allocation5]   ;;  %s597_s14 = smov [#allocation2]  }
   0x3   :  { %s28_s13 = sshll.u32 %s596_s12, 4  ;;  %s16_s15 = sshll.u32 %s597_s14, 4  ;;  %s29_s13 = int_to_ptr.vmem [resolvable:$true] %s28_s13  ;;  %s622_s15 = int_to_ptr.vmem [resolvable:$true] %s16_s15 }
   0x4   :  { %s502_s18 = scalar_lea.hbm %s711_s1, 512 }
   0x5   :  { %p503_p0 = scmp.ne.s32.totalorder %s711_s1, %s502_s18  ;;  %p506_p1 = scmp.lt.u32.totalorder %s502_s18, %s711_s1 }
   0x7   :  { %p508_p2 = pnand %p506_p1, %p503_p0 }
   0x9   :  { %511 = shalt.err (!%p508_p2)
}
   0xa   :  { %s512_s23 = scalar_lea.vmem %s29_s13, 512  ;;  %p517_p4 = scmp.lt.s32.totalorder %s29_s13, %s29_s13 }
   0xb   :  { %p513_p3 = scmp.ne.s32.totalorder %s29_s13, %s512_s23  ;;  %p518_p5 = scmp.lt.s32.totalorder %s512_s23, %s512_s23 }
   0xd   :  { %p519_p6 = por %p518_p5, %p517_p4 }
   0xf   :  { %p520_p7 = pnand %p519_p6, %p513_p3 }
  0x11   :  { %523 = shalt.err (!%p520_p7)
}
  0x12   :  { %s598_s24 = smov 64   ;;  %s599_s25 = smov 4  }
  0x13   :  { %34 = dma.hbm_to_vmem [thread:$0]  %s711_s1, 512, %s29_s13, [#allocation6], %s598_s24, %s598_s24, %s599_s25  }
  0x14   :  { %s524_s30 = scalar_lea.hbm %s710_s0, 1024 }
  0x15   :  { %p525_p8 = scmp.ne.s32.totalorder %s710_s0, %s524_s30  ;;  %p528_p9 = scmp.lt.u32.totalorder %s524_s30, %s710_s0 }
  0x17   :  { %p530_p10 = pnand %p528_p9, %p525_p8 }
  0x19   :  { %533 = shalt.err (!%p530_p10)
}
  0x1a   :  { %s534_s8 = scalar_lea.vmem %s622_s15, 1024  ;;  %p539_p12 = scmp.lt.s32.totalorder %s622_s15, %s622_s15 }
  0x1b   :  { %p535_p11 = scmp.ne.s32.totalorder %s622_s15, %s534_s8  ;;  %p540_p13 = scmp.lt.s32.totalorder %s534_s8, %s534_s8 }
  0x1d   :  { %p541_p0 = por %p540_p13, %p539_p12 }
  0x1f   :  { %p542_p1 = pnand %p541_p0, %p535_p11 }
  0x21   :  { %545 = shalt.err (!%p542_p1)
}
  0x22   :  { %22 = dma.hbm_to_vmem [thread:$0]  %s710_s0, 1024, %s622_s15, [#allocation3], %s598_s24, %s598_s24, %s599_s25  }
  0x23   :  { %s600_s10 = smov [#allocation7]   ;;  %s546_s14 = scalar_lea.hbm %s712_s2, 16 }
  0x24   :  { %s41_s11 = sshll.u32 %s600_s10, 4  ;;  %p547_p2 = scmp.ne.s32.totalorder %s712_s2, %s546_s14  ;;  %s42_s11 = int_to_ptr.vmem [resolvable:$true] %s41_s11 }
  0x25   :  { %p550_p3 = scmp.lt.u32.totalorder %s546_s14, %s712_s2 }
  0x27   :  { %p552_p4 = pnand %p550_p3, %p547_p2 }
  0x29   :  { %555 = shalt.err (!%p552_p4)
}
  0x2a   :  { %s556_s20 = scalar_lea.vmem %s42_s11, 16  ;;  %s560_s0 = scalar_lea.vmem %s42_s11, 32 }
  0x2b   :  { %p557_p5 = scmp.ne.s32.totalorder %s42_s11, %s556_s20  ;;  %p561_p6 = scmp.lt.s32.totalorder %s42_s11, %s42_s11 }
  0x2c   :  { %p562_p7 = scmp.lt.s32.totalorder %s560_s0, %s556_s20 }
  0x2e   :  { %p563_p8 = por %p562_p7, %p561_p6 }
  0x30   :  { %p564_p9 = pnand %p563_p8, %p557_p5 }
  0x32   :  { %567 = shalt.err (!%p564_p9)
}
  0x33   :  { %44 = dma.hbm_to_vmem [thread:$0]  %s712_s2, 16, %s42_s11, [#allocation6]  }
  0x34   :  { %590 = dma.done.wait [#allocation3], 1024  }
  0x35   :  { %591 = vsyncadd [#allocation3], 4294966272 }
  0x36   :  { %592 = dma.done.wait [#allocation6], 528  }
  0x37   :  { %593 = vsyncadd [#allocation6], 4294966768  ;;  %v490_v0 = vld [vmem:[#allocation5] sm:$0xff]   ;;  %v491_v1 = vld [vmem:[#allocation5 + $0x8] sm:$0xff]   ;;  %vm150_vm0 = vcmask 523264   ;;  %vm352_vm1 = vcmask 60416  }
  0x38   :  { %452 = vmatprep.subr.bf16.mxu0 %v490_v0  ;;  %476 = vmatprep.subr.bf16.mxu1 %v490_v0  ;;  %v492_v2 = vld [vmem:[#allocation5 + $0x10] sm:$0xff]   ;;  %v494_v3 = vld [vmem:[#allocation2] sm:$0xff]   ;;  %v493_v5 = vld [vmem:[#allocation5 + $0x18] sm:$0xff]   ;;  %s601_s2 = smov [#allocation8]  }
  0x39   :  { %453 = vmatpush3.bf16.msra.mxu0 %v490_v0  ;;  %480 = vmatpush3.bf16.msra.mxu1 %v490_v0  ;;  %v495_v4 = vld [vmem:[#allocation2 + $0x20] sm:$0xff]   ;;  %v496_v6 = vld [vmem:[#allocation2 + $0x8] sm:$0xff]   ;;  %v498_v8 = vld [vmem:[#allocation2 + $0x10] sm:$0xff]   ;;  %s374_s22 = sshll.u32 %s601_s2, 4  ;;  %s375_s22 = int_to_ptr.vmem [resolvable:$true] %s374_s22 }
  0x3a   :  { %454 = vmatprep.subr.bf16.mxu0 %v491_v1  ;;  %477 = vmatprep.subr.bf16.mxu1 %v491_v1  ;;  %v497_v7 = vld [vmem:[#allocation2 + $0x28] sm:$0xff]   ;;  %v499_v9 = vld [vmem:[#allocation2 + $0x30] sm:$0xff]   ;;  %v500_v10 = vld [vmem:[#allocation2 + $0x18] sm:$0xff]   ;;  %s568_s23 = scalar_lea.vmem %s375_s22, 1024  ;;  %p573_p11 = scmp.lt.s32.totalorder %s375_s22, %s375_s22 }
  0x3b   :  { %460 = vmatprep.mubr.msk.bf16.mxu0 %vm150_vm0, %v494_v3  ;;  %468 = vmatprep.mubr.msk.bf16.mxu1 %vm150_vm0, %v495_v4  ;;  %v501_v11 = vld [vmem:[#allocation2 + $0x38] sm:$0xff]   ;;  %v387_v12 = vld [vmem:[#allocation7] ss:$0 sm:$0xff]  ;;  %p569_p10 = scmp.ne.s32.totalorder %s375_s22, %s568_s23  ;;  %p574_p12 = scmp.lt.s32.totalorder %s568_s23, %s568_s23 }
  0x3d   :  { %455 = vmatpush3.bf16.msra.mxu0 %v491_v1  ;;  %481 = vmatpush3.bf16.msra.mxu1 %v491_v1  ;;  %p575_p13 = por %p574_p12, %p573_p11 }
  0x3e   :  { %456 = vmatprep.subr.bf16.mxu0 %v492_v2  ;;  %478 = vmatprep.subr.bf16.mxu1 %v492_v2 }
  0x3f   :  { %p576_p0 = pnand %p575_p13, %p569_p10 }
  0x41   :  { %457 = vmatpush3.bf16.msra.mxu0 %v492_v2  ;;  %482 = vmatpush3.bf16.msra.mxu1 %v492_v2 }
  0x42   :  { %458 = vmatprep.subr.bf16.mxu0 %v493_v5  ;;  %479 = vmatprep.subr.bf16.mxu1 %v493_v5 }
  0x45   :  { %459 = vmatpush3.bf16.msra.mxu0 %v493_v5  ;;  %483 = vmatpush3.bf16.msra.mxu1 %v493_v5 }
  0x48   :  { %461 = vmatmul.mubr.msk.bf16.vlgmr.msra.gmra.mrb[0].mxu0 %vm150_vm0, %v496_v6  ;;  %469 = vmatmul.mubr.msk.bf16.vlgmr.msra.gmra.mrb[0].mxu1 %vm150_vm0, %v497_v7 }
  0x49   :  { %464 = vmatprep.mubr.msk.bf16.mxu0 %vm150_vm0, %v498_v8  ;;  %472 = vmatprep.mubr.msk.bf16.mxu1 %vm150_vm0, %v499_v9 }
  0x50   :  { %465 = vmatmul.mubr.msk.bf16.gmra.mrb[4].mxu0 %vm150_vm0, %v500_v10  ;;  %473 = vmatmul.mubr.msk.bf16.gmra.mrb[4].mxu1 %vm150_vm0, %v501_v11 }
 0x11b   :  { %v462_v13 = vpop.f32.mrb[0].mxu0  ;;  %v470_v14 = vpop.f32.mrb[0].mxu1 }
 0x11c   :  { %v218_v15 = vadd.f32 %v462_v13, %v387_v12  ;;  %v250_v16 = vadd.f32 %v470_v14, %v387_v12  ;;  %v209_v17 = vpop.f32.mrb[1].mxu0  ;;  %v241_v18 = vpop.f32.mrb[1].mxu1 }
 0x11d   :  { %v210_v19 = vadd.f32 %v387_v12, %v209_v17  ;;  %v242_v20 = vadd.f32 %v387_v12, %v241_v18  ;;  %v463_v21 = vpop.f32.mrb[2].mxu0  ;;  %v471_v22 = vpop.f32.mrb[2].mxu1 }
 0x11e   :  { %v274_v23 = vmax.f32 %v218_v15, 0.0  ;;  %v282_v24 = vmax.f32 %v250_v16, 0.0  ;;  %v221_v25 = vadd.f32 %v463_v21, %v387_v12  ;;  %v253_v26 = vadd.f32 %v471_v22, %v387_v12  ;;  %v212_v27 = vpop.f32.mrb[3].mxu0  ;;  %v244_v28 = vpop.f32.mrb[3].mxu1 }
 0x11f   :  { %v272_v29 = vmax.f32 %v210_v19, 0.0  ;;  %v280_v30 = vmax.f32 %v242_v20, 0.0  ;;  %v213_v31 = vadd.f32 %v387_v12, %v212_v27  ;;  %v245_v32 = vadd.f32 %v387_v12, %v244_v28 }
 0x120   :  { %v426_v33 = vpack.c.bf16 %v274_v23, %v274_v23  ;;  %v434_v34 = vpack.c.bf16 %v282_v24, %v282_v24  ;;  %v275_v35 = vmax.f32 %v221_v25, 0.0  ;;  %v283_v36 = vmax.f32 %v253_v26, 0.0 }
 0x121   :  { %v424_v37 = vpack.c.bf16 %v272_v29, %v272_v29  ;;  %v432_v38 = vpack.c.bf16 %v280_v30, %v280_v30  ;;  %v273_v39 = vmax.f32 %v213_v31, 0.0  ;;  %v281_v40 = vmax.f32 %v245_v32, 0.0 }
 0x122   :  { %355 = vst.msk [vmem:[#allocation8 + $0x8] sm:$0xf] %vm352_vm1, %v426_v33  ;;  %363 = vst.msk [vmem:[#allocation8 + $0x28] sm:$0xf] %vm352_vm1, %v434_v34  ;;  %v427_v41 = vpack.c.bf16 %v275_v35, %v275_v35  ;;  %v435_v42 = vpack.c.bf16 %v283_v36, %v283_v36 }
 0x123   :  { %353 = vst.msk [vmem:[#allocation8] sm:$0xf] %vm352_vm1, %v424_v37  ;;  %361 = vst.msk [vmem:[#allocation8 + $0x20] sm:$0xf] %vm352_vm1, %v432_v38  ;;  %v425_v43 = vpack.c.bf16 %v273_v39, %v273_v39  ;;  %v433_v44 = vpack.c.bf16 %v281_v40, %v281_v40  ;;  %v466_v45 = vpop.f32.mrb[4].mxu0  ;;  %v474_v46 = vpop.f32.mrb[4].mxu1 }
 0x124   :  { %356 = vst.msk [vmem:[#allocation8 + $0xc] sm:$0xf] %vm352_vm1, %v427_v41  ;;  %364 = vst.msk [vmem:[#allocation8 + $0x2c] sm:$0xf] %vm352_vm1, %v435_v42  ;;  %v234_v47 = vadd.f32 %v466_v45, %v387_v12  ;;  %v266_v48 = vadd.f32 %v474_v46, %v387_v12  ;;  %v225_v49 = vpop.f32.mrb[5].mxu0  ;;  %v257_v50 = vpop.f32.mrb[5].mxu1 }
 0x125   :  { %354 = vst.msk [vmem:[#allocation8 + $0x4] sm:$0xf] %vm352_vm1, %v425_v43  ;;  %362 = vst.msk [vmem:[#allocation8 + $0x24] sm:$0xf] %vm352_vm1, %v433_v44  ;;  %v226_v51 = vadd.f32 %v387_v12, %v225_v49  ;;  %v258_v52 = vadd.f32 %v387_v12, %v257_v50  ;;  %v467_v53 = vpop.f32.mrb[6].mxu0  ;;  %v475_v54 = vpop.f32.mrb[6].mxu1 }
 0x126   :  { %v278_v55 = vmax.f32 %v234_v47, 0.0  ;;  %v286_v56 = vmax.f32 %v266_v48, 0.0  ;;  %v237_v57 = vadd.f32 %v467_v53, %v387_v12  ;;  %v269_v58 = vadd.f32 %v475_v54, %v387_v12  ;;  %v228_v59 = vpop.f32.mrb[7].mxu0  ;;  %v260_v60 = vpop.f32.mrb[7].mxu1 }
 0x127   :  { %v276_v61 = vmax.f32 %v226_v51, 0.0  ;;  %v284_v62 = vmax.f32 %v258_v52, 0.0  ;;  %v229_v63 = vadd.f32 %v387_v12, %v228_v59  ;;  %v261_v0 = vadd.f32 %v387_v12, %v260_v60 }
 0x128   :  { %v430_v1 = vpack.c.bf16 %v278_v55, %v278_v55  ;;  %v438_v2 = vpack.c.bf16 %v286_v56, %v286_v56  ;;  %v279_v3 = vmax.f32 %v237_v57, 0.0  ;;  %v287_v4 = vmax.f32 %v269_v58, 0.0 }
 0x129   :  { %v428_v5 = vpack.c.bf16 %v276_v61, %v276_v61  ;;  %v436_v6 = vpack.c.bf16 %v284_v62, %v284_v62  ;;  %v277_v7 = vmax.f32 %v229_v63, 0.0  ;;  %v285_v8 = vmax.f32 %v261_v0, 0.0 }
 0x12a   :  { %359 = vst.msk [vmem:[#allocation8 + $0x18] sm:$0xf] %vm352_vm1, %v430_v1  ;;  %367 = vst.msk [vmem:[#allocation8 + $0x38] sm:$0xf] %vm352_vm1, %v438_v2  ;;  %v431_v9 = vpack.c.bf16 %v279_v3, %v279_v3  ;;  %v439_v10 = vpack.c.bf16 %v287_v4, %v287_v4 }
 0x12b   :  { %357 = vst.msk [vmem:[#allocation8 + $0x10] sm:$0xf] %vm352_vm1, %v428_v5  ;;  %365 = vst.msk [vmem:[#allocation8 + $0x30] sm:$0xf] %vm352_vm1, %v436_v6  ;;  %v429_v11 = vpack.c.bf16 %v277_v7, %v277_v7  ;;  %v437_v12 = vpack.c.bf16 %v285_v8, %v285_v8 }
 0x12c   :  { %360 = vst.msk [vmem:[#allocation8 + $0x1c] sm:$0xf] %vm352_vm1, %v431_v9  ;;  %368 = vst.msk [vmem:[#allocation8 + $0x3c] sm:$0xf] %vm352_vm1, %v439_v10 }
 0x12d   :  { %358 = vst.msk [vmem:[#allocation8 + $0x14] sm:$0xf] %vm352_vm1, %v429_v11  ;;  %366 = vst.msk [vmem:[#allocation8 + $0x34] sm:$0xf] %vm352_vm1, %v437_v12 }
 0x12e   :  { %579 = shalt.err (!%p576_p0)
}
 0x12f   :  { %s580_s28 = scalar_lea.hbm %s713_s3, 1024 }
 0x130   :  { %p581_p1 = scmp.ne.s32.totalorder %s713_s3, %s580_s28  ;;  %p584_p2 = scmp.lt.u32.totalorder %s580_s28, %s713_s3 }
 0x132   :  { %p586_p3 = pnand %p584_p2, %p581_p1 }
 0x134   :  { %589 = shalt.err (!%p586_p3)
}
 0x135   :  { %380 = dma.vmem_to_hbm [thread:$0]  %s375_s22, 1024, %s713_s3, [#allocation4], %s598_s24, %s598_s24, %s599_s25  }
 0x136   :  { %594 = dma.done.wait [#allocation4], 1024  }
 0x137   :  { %595 = vsyncadd [#allocation4], 4294966272 }
 0x138   :  { %384 = vsyncpa [#allocation3], 1 }
 0x139   :  { %385 = vsyncpa [#allocation6], 1 }
 0x13a   :  { %386 = vsyncpa [#allocation4], 1 }

// kernel: _lambda_.17
= control target key start
LH: loop header
LB: loop body
LE: loop exit
PB: predicated region body
PF: predicated region fallthrough
CT: control target
= control target key end

     0   :  { %8 = vsyncpa [#allocation3], 0  ;;  %s694_s0 = inlined_call_operand.hbm [shape: bf16[128,64], index: 0, kind: input, shape index: {}]   ;;  %s695_s1 = inlined_call_operand.hbm [shape: bf16[64,32], index: 1, kind: input, shape index: {}]   ;;  %s696_s2 = inlined_call_operand.hbm [shape: f32[1,32], index: 2, kind: input, shape index: {}]   ;;  %s697_s3 = inlined_call_operand.hbm [shape: bf16[128,32], index: 3, kind: output, shape index: {}]  }
   0x1   :  { %9 = vsyncpa [#allocation6], 0 }
   0x2   :  { %10 = vsyncpa [#allocation4], 0  ;;  %s580_s12 = smov [#allocation5]   ;;  %s581_s14 = smov [#allocation2]  }
   0x3   :  { %s28_s13 = sshll.u32 %s580_s12, 4  ;;  %s16_s15 = sshll.u32 %s581_s14, 4  ;;  %s29_s13 = int_to_ptr.vmem [resolvable:$true] %s28_s13  ;;  %s606_s15 = int_to_ptr.vmem [resolvable:$true] %s16_s15 }
   0x4   :  { %s486_s18 = scalar_lea.hbm %s695_s1, 512 }
   0x5   :  { %p487_p0 = scmp.ne.s32.totalorder %s695_s1, %s486_s18  ;;  %p490_p1 = scmp.lt.u32.totalorder %s486_s18, %s695_s1 }
   0x7   :  { %p492_p2 = pnand %p490_p1, %p487_p0 }
   0x9   :  { %495 = shalt.err (!%p492_p2)
}
   0xa   :  { %s496_s23 = scalar_lea.vmem %s29_s13, 512  ;;  %p501_p4 = scmp.lt.s32.totalorder %s29_s13, %s29_s13 }
   0xb   :  { %p497_p3 = scmp.ne.s32.totalorder %s29_s13, %s496_s23  ;;  %p502_p5 = scmp.lt.s32.totalorder %s496_s23, %s496_s23 }
   0xd   :  { %p503_p6 = por %p502_p5, %p501_p4 }
   0xf   :  { %p504_p7 = pnand %p503_p6, %p497_p3 }
  0x11   :  { %507 = shalt.err (!%p504_p7)
}
  0x12   :  { %s582_s24 = smov 64   ;;  %s583_s25 = smov 4  }
  0x13   :  { %34 = dma.hbm_to_vmem [thread:$0]  %s695_s1, 512, %s29_s13, [#allocation6], %s582_s24, %s582_s24, %s583_s25  }
  0x14   :  { %s508_s30 = scalar_lea.hbm %s694_s0, 1024 }
  0x15   :  { %p509_p8 = scmp.ne.s32.totalorder %s694_s0, %s508_s30  ;;  %p512_p9 = scmp.lt.u32.totalorder %s508_s30, %s694_s0 }
  0x17   :  { %p514_p10 = pnand %p512_p9, %p509_p8 }
  0x19   :  { %517 = shalt.err (!%p514_p10)
}
  0x1a   :  { %s518_s8 = scalar_lea.vmem %s606_s15, 1024  ;;  %p523_p12 = scmp.lt.s32.totalorder %s606_s15, %s606_s15 }
  0x1b   :  { %p519_p11 = scmp.ne.s32.totalorder %s606_s15, %s518_s8  ;;  %p524_p13 = scmp.lt.s32.totalorder %s518_s8, %s518_s8 }
  0x1d   :  { %p525_p0 = por %p524_p13, %p523_p12 }
  0x1f   :  { %p526_p1 = pnand %p525_p0, %p519_p11 }
  0x21   :  { %529 = shalt.err (!%p526_p1)
}
  0x22   :  { %22 = dma.hbm_to_vmem [thread:$0]  %s694_s0, 1024, %s606_s15, [#allocation3], %s582_s24, %s582_s24, %s583_s25  }
  0x23   :  { %s584_s10 = smov [#allocation7]   ;;  %s530_s14 = scalar_lea.hbm %s696_s2, 16 }
  0x24   :  { %s41_s11 = sshll.u32 %s584_s10, 4  ;;  %p531_p2 = scmp.ne.s32.totalorder %s696_s2, %s530_s14  ;;  %s42_s11 = int_to_ptr.vmem [resolvable:$true] %s41_s11 }
  0x25   :  { %p534_p3 = scmp.lt.u32.totalorder %s530_s14, %s696_s2 }
  0x27   :  { %p536_p4 = pnand %p534_p3, %p531_p2 }
  0x29   :  { %539 = shalt.err (!%p536_p4)
}
  0x2a   :  { %s540_s20 = scalar_lea.vmem %s42_s11, 16  ;;  %s544_s0 = scalar_lea.vmem %s42_s11, 32 }
  0x2b   :  { %p541_p5 = scmp.ne.s32.totalorder %s42_s11, %s540_s20  ;;  %p545_p6 = scmp.lt.s32.totalorder %s42_s11, %s42_s11 }
  0x2c   :  { %p546_p7 = scmp.lt.s32.totalorder %s544_s0, %s540_s20 }
  0x2e   :  { %p547_p8 = por %p546_p7, %p545_p6 }
  0x30   :  { %p548_p9 = pnand %p547_p8, %p541_p5 }
  0x32   :  { %551 = shalt.err (!%p548_p9)
}
  0x33   :  { %44 = dma.hbm_to_vmem [thread:$0]  %s696_s2, 16, %s42_s11, [#allocation6]  }
  0x34   :  { %574 = dma.done.wait [#allocation3], 1024  }
  0x35   :  { %575 = vsyncadd [#allocation3], 4294966272 }
  0x36   :  { %576 = dma.done.wait [#allocation6], 528  }
  0x37   :  { %577 = vsyncadd [#allocation6], 4294966768  ;;  %v474_v0 = vld [vmem:[#allocation5] sm:$0xff]   ;;  %v475_v1 = vld [vmem:[#allocation5 + $0x8] sm:$0xff]   ;;  %vm150_vm0 = vcmask 523264   ;;  %vm336_vm1 = vcmask 257024  }
  0x38   :  { %436 = vmatprep.subr.bf16.mxu0 %v474_v0  ;;  %460 = vmatprep.subr.bf16.mxu1 %v474_v0  ;;  %v476_v2 = vld [vmem:[#allocation5 + $0x10] sm:$0xff]   ;;  %v478_v3 = vld [vmem:[#allocation2] sm:$0xff]   ;;  %v477_v5 = vld [vmem:[#allocation5 + $0x18] sm:$0xff]   ;;  %s585_s2 = smov [#allocation8]  }
  0x39   :  { %437 = vmatpush3.bf16.msra.mxu0 %v474_v0  ;;  %464 = vmatpush3.bf16.msra.mxu1 %v474_v0  ;;  %v479_v4 = vld [vmem:[#allocation2 + $0x20] sm:$0xff]   ;;  %v480_v6 = vld [vmem:[#allocation2 + $0x8] sm:$0xff]   ;;  %v482_v8 = vld [vmem:[#allocation2 + $0x10] sm:$0xff]   ;;  %s358_s22 = sshll.u32 %s585_s2, 4  ;;  %s359_s22 = int_to_ptr.vmem [resolvable:$true] %s358_s22 }
  0x3a   :  { %438 = vmatprep.subr.bf16.mxu0 %v475_v1  ;;  %461 = vmatprep.subr.bf16.mxu1 %v475_v1  ;;  %v481_v7 = vld [vmem:[#allocation2 + $0x28] sm:$0xff]   ;;  %v483_v9 = vld [vmem:[#allocation2 + $0x30] sm:$0xff]   ;;  %v484_v10 = vld [vmem:[#allocation2 + $0x18] sm:$0xff]   ;;  %s552_s23 = scalar_lea.vmem %s359_s22, 1024  ;;  %p557_p11 = scmp.lt.s32.totalorder %s359_s22, %s359_s22 }
  0x3b   :  { %444 = vmatprep.mubr.msk.bf16.mxu0 %vm150_vm0, %v478_v3  ;;  %452 = vmatprep.mubr.msk.bf16.mxu1 %vm150_vm0, %v479_v4  ;;  %v485_v11 = vld [vmem:[#allocation2 + $0x38] sm:$0xff]   ;;  %v371_v12 = vld [vmem:[#allocation7] ss:$0 sm:$0xff]  ;;  %p553_p10 = scmp.ne.s32.totalorder %s359_s22, %s552_s23  ;;  %p558_p12 = scmp.lt.s32.totalorder %s552_s23, %s552_s23 }
  0x3d   :  { %439 = vmatpush3.bf16.msra.mxu0 %v475_v1  ;;  %465 = vmatpush3.bf16.msra.mxu1 %v475_v1  ;;  %p559_p13 = por %p558_p12, %p557_p11 }
  0x3e   :  { %440 = vmatprep.subr.bf16.mxu0 %v476_v2  ;;  %462 = vmatprep.subr.bf16.mxu1 %v476_v2 }
  0x3f   :  { %p560_p0 = pnand %p559_p13, %p553_p10 }
  0x41   :  { %441 = vmatpush3.bf16.msra.mxu0 %v476_v2  ;;  %466 = vmatpush3.bf16.msra.mxu1 %v476_v2 }
  0x42   :  { %442 = vmatprep.subr.bf16.mxu0 %v477_v5  ;;  %463 = vmatprep.subr.bf16.mxu1 %v477_v5 }
  0x45   :  { %443 = vmatpush3.bf16.msra.mxu0 %v477_v5  ;;  %467 = vmatpush3.bf16.msra.mxu1 %v477_v5 }
  0x48   :  { %445 = vmatmul.mubr.msk.bf16.vlgmr.msra.gmra.mrb[0].mxu0 %vm150_vm0, %v480_v6  ;;  %453 = vmatmul.mubr.msk.bf16.vlgmr.msra.gmra.mrb[0].mxu1 %vm150_vm0, %v481_v7 }
  0x49   :  { %448 = vmatprep.mubr.msk.bf16.mxu0 %vm150_vm0, %v482_v8  ;;  %456 = vmatprep.mubr.msk.bf16.mxu1 %vm150_vm0, %v483_v9 }
  0x50   :  { %449 = vmatmul.mubr.msk.bf16.gmra.mrb[4].mxu0 %vm150_vm0, %v484_v10  ;;  %457 = vmatmul.mubr.msk.bf16.gmra.mrb[4].mxu1 %vm150_vm0, %v485_v11 }
 0x11b   :  { %v446_v13 = vpop.f32.mrb[0].mxu0  ;;  %v454_v14 = vpop.f32.mrb[0].mxu1 }
 0x11c   :  { %v218_v15 = vadd.f32 %v446_v13, %v371_v12  ;;  %v250_v16 = vadd.f32 %v454_v14, %v371_v12  ;;  %v209_v17 = vpop.f32.mrb[1].mxu0  ;;  %v241_v18 = vpop.f32.mrb[1].mxu1 }
 0x11d   :  { %v210_v19 = vadd.f32 %v371_v12, %v209_v17  ;;  %v242_v20 = vadd.f32 %v371_v12, %v241_v18  ;;  %v447_v21 = vpop.f32.mrb[2].mxu0  ;;  %v455_v22 = vpop.f32.mrb[2].mxu1 }
 0x11e   :  { %v410_v23 = vpack.c.bf16 %v218_v15, %v218_v15  ;;  %v418_v24 = vpack.c.bf16 %v250_v16, %v250_v16  ;;  %v221_v25 = vadd.f32 %v447_v21, %v371_v12  ;;  %v253_v26 = vadd.f32 %v455_v22, %v371_v12  ;;  %v212_v27 = vpop.f32.mrb[3].mxu0  ;;  %v244_v28 = vpop.f32.mrb[3].mxu1 }
 0x11f   :  { %v408_v29 = vpack.c.bf16 %v210_v19, %v210_v19  ;;  %v416_v30 = vpack.c.bf16 %v242_v20, %v242_v20  ;;  %v213_v31 = vadd.f32 %v371_v12, %v212_v27  ;;  %v245_v32 = vadd.f32 %v371_v12, %v244_v28 }
 0x120   :  { %339 = vst.msk [vmem:[#allocation8 + $0x8] sm:$0xf] %vm336_vm1, %v410_v23  ;;  %347 = vst.msk [vmem:[#allocation8 + $0x28] sm:$0xf] %vm336_vm1, %v418_v24  ;;  %v411_v33 = vpack.c.bf16 %v221_v25, %v221_v25  ;;  %v419_v34 = vpack.c.bf16 %v253_v26, %v253_v26 }
 0x121   :  { %337 = vst.msk [vmem:[#allocation8] sm:$0xf] %vm336_vm1, %v408_v29  ;;  %345 = vst.msk [vmem:[#allocation8 + $0x20] sm:$0xf] %vm336_vm1, %v416_v30  ;;  %v409_v35 = vpack.c.bf16 %v213_v31, %v213_v31  ;;  %v417_v36 = vpack.c.bf16 %v245_v32, %v245_v32 }
 0x122   :  { %340 = vst.msk [vmem:[#allocation8 + $0xc] sm:$0xf] %vm336_vm1, %v411_v33  ;;  %348 = vst.msk [vmem:[#allocation8 + $0x2c] sm:$0xf] %vm336_vm1, %v419_v34 }
 0x123   :  { %338 = vst.msk [vmem:[#allocation8 + $0x4] sm:$0xf] %vm336_vm1, %v409_v35  ;;  %346 = vst.msk [vmem:[#allocation8 + $0x24] sm:$0xf] %vm336_vm1, %v417_v36  ;;  %v450_v37 = vpop.f32.mrb[4].mxu0  ;;  %v458_v38 = vpop.f32.mrb[4].mxu1 }
 0x124   :  { %v234_v39 = vadd.f32 %v450_v37, %v371_v12  ;;  %v266_v40 = vadd.f32 %v458_v38, %v371_v12  ;;  %v225_v41 = vpop.f32.mrb[5].mxu0  ;;  %v257_v42 = vpop.f32.mrb[5].mxu1 }
 0x125   :  { %v226_v43 = vadd.f32 %v371_v12, %v225_v41  ;;  %v258_v44 = vadd.f32 %v371_v12, %v257_v42  ;;  %v451_v45 = vpop.f32.mrb[6].mxu0  ;;  %v459_v46 = vpop.f32.mrb[6].mxu1 }
 0x126   :  { %v414_v47 = vpack.c.bf16 %v234_v39, %v234_v39  ;;  %v422_v48 = vpack.c.bf16 %v266_v40, %v266_v40  ;;  %v237_v49 = vadd.f32 %v451_v45, %v371_v12  ;;  %v269_v50 = vadd.f32 %v459_v46, %v371_v12  ;;  %v228_v51 = vpop.f32.mrb[7].mxu0  ;;  %v260_v52 = vpop.f32.mrb[7].mxu1 }
 0x127   :  { %v412_v53 = vpack.c.bf16 %v226_v43, %v226_v43  ;;  %v420_v54 = vpack.c.bf16 %v258_v44, %v258_v44  ;;  %v229_v55 = vadd.f32 %v371_v12, %v228_v51  ;;  %v261_v56 = vadd.f32 %v371_v12, %v260_v52 }
 0x128   :  { %343 = vst.msk [vmem:[#allocation8 + $0x18] sm:$0xf] %vm336_vm1, %v414_v47  ;;  %351 = vst.msk [vmem:[#allocation8 + $0x38] sm:$0xf] %vm336_vm1, %v422_v48  ;;  %v415_v57 = vpack.c.bf16 %v237_v49, %v237_v49  ;;  %v423_v58 = vpack.c.bf16 %v269_v50, %v269_v50 }
 0x129   :  { %341 = vst.msk [vmem:[#allocation8 + $0x10] sm:$0xf] %vm336_vm1, %v412_v53  ;;  %349 = vst.msk [vmem:[#allocation8 + $0x30] sm:$0xf] %vm336_vm1, %v420_v54  ;;  %v413_v59 = vpack.c.bf16 %v229_v55, %v229_v55  ;;  %v421_v60 = vpack.c.bf16 %v261_v56, %v261_v56 }
 0x12a   :  { %344 = vst.msk [vmem:[#allocation8 + $0x1c] sm:$0xf] %vm336_vm1, %v415_v57  ;;  %352 = vst.msk [vmem:[#allocation8 + $0x3c] sm:$0xf] %vm336_vm1, %v423_v58 }
 0x12b   :  { %342 = vst.msk [vmem:[#allocation8 + $0x14] sm:$0xf] %vm336_vm1, %v413_v59  ;;  %350 = vst.msk [vmem:[#allocation8 + $0x34] sm:$0xf] %vm336_vm1, %v421_v60 }
 0x12c   :  { %563 = shalt.err (!%p560_p0)
}
 0x12d   :  { %s564_s28 = scalar_lea.hbm %s697_s3, 1024 }
 0x12e   :  { %p565_p1 = scmp.ne.s32.totalorder %s697_s3, %s564_s28  ;;  %p568_p2 = scmp.lt.u32.totalorder %s564_s28, %s697_s3 }
 0x130   :  { %p570_p3 = pnand %p568_p2, %p565_p1 }
 0x132   :  { %573 = shalt.err (!%p570_p3)
}
 0x133   :  { %364 = dma.vmem_to_hbm [thread:$0]  %s359_s22, 1024, %s697_s3, [#allocation4], %s582_s24, %s582_s24, %s583_s25  }
 0x134   :  { %578 = dma.done.wait [#allocation4], 1024  }
 0x135   :  { %579 = vsyncadd [#allocation4], 4294966272 }
 0x136   :  { %368 = vsyncpa [#allocation3], 1 }
 0x137   :  { %369 = vsyncpa [#allocation6], 1 }
 0x138   :  { %370 = vsyncpa [#allocation4], 1 }

// kernel: _lambda_.18
= control target key start
LH: loop header
LB: loop body
LE: loop exit
PB: predicated region body
PF: predicated region fallthrough
CT: control target
= control target key end

     0   :  { %9 = vsyncpa [#allocation3], 0  ;;  %s863_s0 = inlined_call_operand.hbm [shape: bf16[128,8], index: 0, kind: input, shape index: {}]   ;;  %s864_s1 = inlined_call_operand.hbm [shape: bf16[8,32], index: 1, kind: input, shape index: {}]   ;;  %s865_s2 = inlined_call_operand.hbm [shape: f32[1,32], index: 2, kind: input, shape index: {}]   ;;  %s866_s3 = inlined_call_operand.hbm [shape: bf16[128,32], index: 3, kind: input, shape index: {}, may-alias: {3,4}]   ;;  %s867_s4 = inlined_call_operand.hbm [shape: bf16[128,32], index: 4, kind: output, shape index: {}, may-alias: {3,4}]  }
   0x1   :  { %10 = vsyncpa [#allocation6], 0 }
   0x2   :  { %11 = vsyncpa [#allocation9], 0 }
   0x3   :  { %12 = vsyncpa [#allocation4], 0  ;;  %s676_s15 = smov [#allocation5]   ;;  %s677_s17 = smov [#allocation2]  }
   0x4   :  { %s31_s16 = sshll.u32 %s676_s15, 4  ;;  %s18_s18 = sshll.u32 %s677_s17, 4  ;;  %s32_s16 = int_to_ptr.vmem [resolvable:$true] %s31_s16  ;;  %s708_s18 = int_to_ptr.vmem [resolvable:$true] %s18_s18 }
   0x5   :  { %s558_s21 = scalar_lea.hbm %s864_s1, 64 }
   0x6   :  { %p559_p0 = scmp.ne.s32.totalorder %s864_s1, %s558_s21  ;;  %p562_p1 = scmp.lt.u32.totalorder %s558_s21, %s864_s1 }
   0x8   :  { %p564_p2 = pnand %p562_p1, %p559_p0 }
   0xa   :  { %567 = shalt.err (!%p564_p2)
}
   0xb   :  { %s568_s26 = scalar_lea.vmem %s32_s16, 64  ;;  %p573_p4 = scmp.lt.s32.totalorder %s32_s16, %s32_s16 }
   0xc   :  { %p569_p3 = scmp.ne.s32.totalorder %s32_s16, %s568_s26  ;;  %p574_p5 = scmp.lt.s32.totalorder %s568_s26, %s568_s26 }
   0xe   :  { %p575_p6 = por %p574_p5, %p573_p4 }
  0x10   :  { %p576_p7 = pnand %p575_p6, %p569_p3 }
  0x12   :  { %579 = shalt.err (!%p576_p7)
}
  0x13   :  { %34 = dma.hbm_to_vmem [thread:$0]  %s864_s1, 64, %s32_s16, [#allocation6]  }
  0x14   :  { %s580_s5 = scalar_lea.hbm %s863_s0, 1024 }
  0x15   :  { %p581_p8 = scmp.ne.s32.totalorder %s863_s0, %s580_s5  ;;  %p584_p9 = scmp.lt.u32.totalorder %s580_s5, %s863_s0 }
  0x17   :  { %p586_p10 = pnand %p584_p9, %p581_p8 }
  0x19   :  { %589 = shalt.err (!%p586_p10)
}
  0x1a   :  { %s590_s10 = scalar_lea.vmem %s708_s18, 1024  ;;  %p595_p12 = scmp.lt.s32.totalorder %s708_s18, %s708_s18 }
  0x1b   :  { %p591_p11 = scmp.ne.s32.totalorder %s708_s18, %s590_s10  ;;  %p596_p13 = scmp.lt.s32.totalorder %s590_s10, %s590_s10 }
  0x1d   :  { %p597_p0 = por %p596_p13, %p595_p12 }
  0x1f   :  { %p598_p1 = pnand %p597_p0, %p591_p11 }
  0x21   :  { %601 = shalt.err (!%p598_p1)
}
  0x22   :  { %s678_s1 = smov 64   ;;  %s679_s11 = smov 4  }
  0x23   :  { %24 = dma.hbm_to_vmem [thread:$0]  %s863_s0, 1024, %s708_s18, [#allocation3], %s678_s1, %s678_s1, %s679_s11  }
  0x24   :  { %s680_s14 = smov [#allocation7]   ;;  %s681_s16 = smov [#allocation8]  }
  0x25   :  { %s41_s15 = sshll.u32 %s680_s14, 4  ;;  %s50_s17 = sshll.u32 %s681_s16, 4  ;;  %s42_s15 = int_to_ptr.vmem [resolvable:$true] %s41_s15  ;;  %s742_s17 = int_to_ptr.vmem [resolvable:$true] %s50_s17 }
  0x26   :  { %s602_s21 = scalar_lea.hbm %s865_s2, 16 }
  0x27   :  { %p603_p2 = scmp.ne.s32.totalorder %s865_s2, %s602_s21  ;;  %p606_p3 = scmp.lt.u32.totalorder %s602_s21, %s865_s2 }
  0x29   :  { %p608_p4 = pnand %p606_p3, %p603_p2 }
  0x2b   :  { %611 = shalt.err (!%p608_p4)
}
  0x2c   :  { %s612_s0 = scalar_lea.vmem %s42_s15, 16  ;;  %s616_s18 = scalar_lea.vmem %s42_s15, 32 }
  0x2d   :  { %p613_p5 = scmp.ne.s32.totalorder %s42_s15, %s612_s0  ;;  %p617_p6 = scmp.lt.s32.totalorder %s42_s15, %s42_s15 }
  0x2e   :  { %p618_p7 = scmp.lt.s32.totalorder %s616_s18, %s612_s0 }
  0x30   :  { %p619_p8 = por %p618_p7, %p617_p6 }
  0x32   :  { %p620_p9 = pnand %p619_p8, %p613_p5 }
  0x34   :  { %623 = shalt.err (!%p620_p9)
}
  0x35   :  { %44 = dma.hbm_to_vmem [thread:$0]  %s865_s2, 16, %s42_s15, [#allocation6]  }
  0x36   :  { %s624_s30 = scalar_lea.hbm %s866_s3, 1024 }
  0x37   :  { %p625_p10 = scmp.ne.s32.totalorder %s866_s3, %s624_s30  ;;  %p628_p11 = scmp.lt.u32.totalorder %s624_s30, %s866_s3 }
  0x39   :  { %p630_p12 = pnand %p628_p11, %p625_p10 }
  0x3b   :  { %633 = shalt.err (!%p630_p12)
}
  0x3c   :  { %s634_s9 = scalar_lea.vmem %s742_s17, 1024  ;;  %p639_p0 = scmp.lt.s32.totalorder %s742_s17, %s742_s17 }
  0x3d   :  { %p635_p13 = scmp.ne.s32.totalorder %s742_s17, %s634_s9  ;;  %p640_p1 = scmp.lt.s32.totalorder %s634_s9, %s634_s9 }
  0x3f   :  { %p641_p2 = por %p640_p1, %p639_p0 }
  0x41   :  { %p642_p3 = pnand %p641_p2, %p635_p13 }
  0x43   :  { %645 = shalt.err (!%p642_p3)
}
  0x44   :  { %56 = dma.hbm_to_vmem [thread:$0]  %s866_s3, 1024, %s742_s17, [#allocation9], %s678_s1, %s678_s1, %s679_s11  }
  0x45   :  { %668 = dma.done.wait [#allocation3], 1024  }
  0x46   :  { %669 = vsyncadd [#allocation3], 4294966272 }
  0x47   :  { %670 = dma.done.wait [#allocation6], 80  }
  0x48   :  { %671 = vsyncadd [#allocation6], 4294967216 }
  0x49   :  { %672 = dma.done.wait [#allocation9], 1024  }
  0x4a   :  { %673 = vsyncadd [#allocation9], 4294966272  ;;  %vm159_vm0 = vcmask 1043456   ;;  %vm134_vm1 = vcmask 64512   ;;  %v86_v0 = vld [vmem:[#allocation5] sm:$0xf] }
  0x4b   :  { %541 = vmatprep.subr.msk.bf16.mxu0 %vm159_vm0, %v86_v0  ;;  %542 = vmatprep.subr.msk.bf16.mxu1 %vm159_vm0, %v86_v0  ;;  %v161_v1 = vsel %vm159_vm0, %v86_v0, 0  ;;  %v550_v2 = vld [vmem:[#allocation2] sm:$0xff]   ;;  %v552_v4 = vld [vmem:[#allocation2 + $0x8] sm:$0xff]   ;;  %v554_v6 = vld [vmem:[#allocation2 + $0x10] sm:$0xff]   ;;  %vm388_vm2 = vcmask 257024   ;;  %s682_s3 = smov [#allocation10]  }
  0x4c   :  { %522 = vmatpush3.bf16.msra.mxu0 %v161_v1  ;;  %540 = vmatpush3.bf16.msra.mxu1 %v161_v1  ;;  %v551_v3 = vld [vmem:[#allocation2 + $0x20] sm:$0xff]   ;;  %v553_v5 = vld [vmem:[#allocation2 + $0x28] sm:$0xff]   ;;  %v555_v7 = vld [vmem:[#allocation2 + $0x30] sm:$0xff]   ;;  %s410_s12 = sshll.u32 %s682_s3, 4  ;;  %s411_s12 = int_to_ptr.vmem [resolvable:$true] %s410_s12 }
  0x4d   :  { %523 = vmatprep.mubr.msk.bf16.mxu0 %vm134_vm1, %v550_v2  ;;  %531 = vmatprep.mubr.msk.bf16.mxu1 %vm134_vm1, %v551_v3  ;;  %v556_v8 = vld [vmem:[#allocation2 + $0x18] sm:$0xff]   ;;  %v505_v10 = vld [vmem:[#allocation8 + $0x8] sm:$0xff]   ;;  %v474_v12 = vld [vmem:[#allocation8] sm:$0xff]   ;;  %s646_s13 = scalar_lea.vmem %s411_s12, 1024  ;;  %p651_p5 = scmp.lt.s32.totalorder %s411_s12, %s411_s12 }
  0x4e   :  { %v557_v9 = vld [vmem:[#allocation2 + $0x38] sm:$0xff]   ;;  %v509_v11 = vld [vmem:[#allocation8 + $0x28] sm:$0xff]   ;;  %v508_v13 = vld [vmem:[#allocation8 + $0x20] sm:$0xff]   ;;  %v479_v17 = vunpack.c.l.bf16 %v505_v10  ;;  %v475_v19 = vunpack.c.l.bf16 %v474_v12  ;;  %v480_v23 = vunpack.c.h.bf16 %v505_v10  ;;  %v476_v25 = vunpack.c.h.bf16 %v474_v12  ;;  %p647_p4 = scmp.ne.s32.totalorder %s411_s12, %s646_s13  ;;  %p652_p6 = scmp.lt.s32.totalorder %s646_s13, %s646_s13 }
  0x4f   :  { %524 = vmatmul.mubr.msk.bf16.vlgmr.msra.gmra.mrb[0].mxu0 %vm134_vm1, %v552_v4  ;;  %532 = vmatmul.mubr.msk.bf16.vlgmr.msra.gmra.mrb[0].mxu1 %vm134_vm1, %v553_v5  ;;  %v784_v14 = vld [vmem:[#allocation8 + $0x18] sm:$0xff]   ;;  %v495_v18 = vunpack.c.l.bf16 %v509_v11  ;;  %v790_v20 = vld [vmem:[#allocation8 + $0x10] sm:$0xff]   ;;  %v491_v22 = vunpack.c.l.bf16 %v508_v13  ;;  %v496_v24 = vunpack.c.h.bf16 %v509_v11  ;;  %v492_v27 = vunpack.c.h.bf16 %v508_v13 }
  0x50   :  { %527 = vmatprep.mubr.msk.bf16.mxu0 %vm134_vm1, %v554_v6  ;;  %535 = vmatprep.mubr.msk.bf16.mxu1 %vm134_vm1, %v555_v7  ;;  %v786_v15 = vld [vmem:[#allocation8 + $0x38] sm:$0xff]   ;;  %v792_v21 = vld [vmem:[#allocation8 + $0x30] sm:$0xff]   ;;  %v487_v28 = vunpack.c.l.bf16 %v784_v14  ;;  %v483_v33 = vunpack.c.l.bf16 %v790_v20  ;;  %v488_v35 = vunpack.c.h.bf16 %v784_v14  ;;  %v484_v41 = vunpack.c.h.bf16 %v790_v20  ;;  %p653_p7 = por %p652_p6, %p651_p5 }
  0x51   :  { %v788_v16 = vld [vmem:[#allocation7] ss:$0 sm:$0xff]  ;;  %v503_v29 = vunpack.c.l.bf16 %v786_v15  ;;  %v499_v34 = vunpack.c.l.bf16 %v792_v21  ;;  %v504_v40 = vunpack.c.h.bf16 %v786_v15  ;;  %v500_v47 = vunpack.c.h.bf16 %v792_v21 }
  0x52   :  { %p654_p8 = pnand %p653_p7, %p647_p4 }
  0x57   :  { %528 = vmatmul.mubr.msk.bf16.gmra.mrb[4].mxu0 %vm134_vm1, %v556_v8  ;;  %536 = vmatmul.mubr.msk.bf16.gmra.mrb[4].mxu1 %vm134_vm1, %v557_v9 }
 0x122   :  { %v525_v26 = vpop.f32.mrb[0].mxu0  ;;  %v533_v31 = vpop.f32.mrb[0].mxu1 }
 0x123   :  { %v206_v30 = vadd.f32 %v525_v26, %v788_v16  ;;  %v197_v32 = vpop.f32.mrb[1].mxu0  ;;  %v238_v36 = vadd.f32 %v533_v31, %v788_v16  ;;  %v229_v38 = vpop.f32.mrb[1].mxu1 }
 0x124   :  { %v198_v37 = vadd.f32 %v788_v16, %v197_v32  ;;  %v526_v39 = vpop.f32.mrb[2].mxu0  ;;  %v230_v43 = vadd.f32 %v788_v16, %v229_v38  ;;  %v534_v45 = vpop.f32.mrb[2].mxu1 }
 0x125   :  { %v294_v42 = vadd.f32 %v479_v17, %v206_v30  ;;  %v209_v44 = vadd.f32 %v526_v39, %v788_v16  ;;  %v200_v46 = vpop.f32.mrb[3].mxu0  ;;  %v302_v48 = vadd.f32 %v495_v18, %v238_v36  ;;  %v241_v50 = vadd.f32 %v534_v45, %v788_v16  ;;  %v232_v52 = vpop.f32.mrb[3].mxu1 }
 0x126   :  { %v292_v49 = vadd.f32 %v475_v19, %v198_v37  ;;  %v201_v51 = vadd.f32 %v788_v16, %v200_v46  ;;  %v300_v54 = vadd.f32 %v491_v22, %v230_v43  ;;  %v233_v56 = vadd.f32 %v788_v16, %v232_v52 }
 0x127   :  { %v310_v53 = vmax.f32 %v294_v42, 0.0  ;;  %v295_v55 = vadd.f32 %v480_v23, %v209_v44  ;;  %v318_v57 = vmax.f32 %v302_v48, 0.0  ;;  %v303_v59 = vadd.f32 %v496_v24, %v241_v50 }
 0x128   :  { %v308_v58 = vmax.f32 %v292_v49, 0.0  ;;  %v293_v60 = vadd.f32 %v476_v25, %v201_v51  ;;  %v316_v62 = vmax.f32 %v300_v54, 0.0  ;;  %v301_v0 = vadd.f32 %v492_v27, %v233_v56 }
 0x129   :  { %v459_v61 = vpack.c.bf16 %v310_v53, %v310_v53  ;;  %v311_v63 = vmax.f32 %v295_v55, 0.0  ;;  %v467_v1 = vpack.c.bf16 %v318_v57, %v318_v57  ;;  %v319_v3 = vmax.f32 %v303_v59, 0.0 }
 0x12a   :  { %v457_v2 = vpack.c.bf16 %v308_v58, %v308_v58  ;;  %v309_v4 = vmax.f32 %v293_v60, 0.0  ;;  %v529_v5 = vpop.f32.mrb[4].mxu0  ;;  %v465_v6 = vpack.c.bf16 %v316_v62, %v316_v62  ;;  %v317_v8 = vmax.f32 %v301_v0, 0.0  ;;  %v537_v10 = vpop.f32.mrb[4].mxu1 }
 0x12b   :  { %391 = vst.msk [vmem:[#allocation10 + $0x8] sm:$0xf] %vm388_vm2, %v459_v61  ;;  %v460_v7 = vpack.c.bf16 %v311_v63, %v311_v63  ;;  %v222_v9 = vadd.f32 %v529_v5, %v788_v16  ;;  %v213_v11 = vpop.f32.mrb[5].mxu0  ;;  %399 = vst.msk [vmem:[#allocation10 + $0x28] sm:$0xf] %vm388_vm2, %v467_v1  ;;  %v468_v12 = vpack.c.bf16 %v319_v3, %v319_v3  ;;  %v245_v19 = vpop.f32.mrb[5].mxu1 }
 0x12c   :  { %389 = vst.msk [vmem:[#allocation10] sm:$0xf] %vm388_vm2, %v457_v2  ;;  %v458_v13 = vpack.c.bf16 %v309_v4, %v309_v4  ;;  %v254_v17 = vadd.f32 %v537_v10, %v788_v16  ;;  %v214_v18 = vadd.f32 %v788_v16, %v213_v11  ;;  %v530_v22 = vpop.f32.mrb[6].mxu0  ;;  %397 = vst.msk [vmem:[#allocation10 + $0x20] sm:$0xf] %vm388_vm2, %v465_v6  ;;  %v538_v27 = vpop.f32.mrb[6].mxu1 }
 0x12d   :  { %392 = vst.msk [vmem:[#allocation10 + $0xc] sm:$0xf] %vm388_vm2, %v460_v7  ;;  %v466_v23 = vpack.c.bf16 %v317_v8, %v317_v8  ;;  %v298_v24 = vadd.f32 %v487_v28, %v222_v9  ;;  %v246_v25 = vadd.f32 %v788_v16, %v245_v19  ;;  %v225_v26 = vadd.f32 %v530_v22, %v788_v16  ;;  %v216_v30 = vpop.f32.mrb[7].mxu0  ;;  %v248_v37 = vpop.f32.mrb[7].mxu1 }
 0x12e   :  { %400 = vst.msk [vmem:[#allocation10 + $0x2c] sm:$0xf] %vm388_vm2, %v468_v12  ;;  %390 = vst.msk [vmem:[#allocation10 + $0x4] sm:$0xf] %vm388_vm2, %v458_v13  ;;  %v306_v31 = vadd.f32 %v503_v29, %v254_v17  ;;  %v296_v32 = vadd.f32 %v483_v33, %v214_v18  ;;  %v257_v36 = vadd.f32 %v538_v27, %v788_v16 }
 0x12f   :  { %v217_v28 = vadd.f32 %v788_v16, %v216_v30  ;;  %398 = vst.msk [vmem:[#allocation10 + $0x24] sm:$0xf] %vm388_vm2, %v466_v23  ;;  %v314_v38 = vmax.f32 %v298_v24, 0.0  ;;  %v304_v39 = vadd.f32 %v499_v34, %v246_v25  ;;  %v299_v42 = vadd.f32 %v488_v35, %v225_v26 }
 0x130   :  { %v249_v43 = vadd.f32 %v788_v16, %v248_v37  ;;  %v322_v29 = vmax.f32 %v306_v31, 0.0  ;;  %v312_v44 = vmax.f32 %v296_v32, 0.0  ;;  %v307_v33 = vadd.f32 %v504_v40, %v257_v36 }
 0x131   :  { %v297_v45 = vadd.f32 %v484_v41, %v217_v28  ;;  %v463_v46 = vpack.c.bf16 %v314_v38, %v314_v38  ;;  %v320_v48 = vmax.f32 %v304_v39, 0.0  ;;  %v315_v49 = vmax.f32 %v299_v42, 0.0 }
 0x132   :  { %v305_v50 = vadd.f32 %v500_v47, %v249_v43  ;;  %v471_v34 = vpack.c.bf16 %v322_v29, %v322_v29  ;;  %v461_v51 = vpack.c.bf16 %v312_v44, %v312_v44  ;;  %v323_v14 = vmax.f32 %v307_v33, 0.0 }
 0x133   :  { %v313_v35 = vmax.f32 %v297_v45, 0.0  ;;  %395 = vst.msk [vmem:[#allocation10 + $0x18] sm:$0xf] %vm388_vm2, %v463_v46  ;;  %v469_v16 = vpack.c.bf16 %v320_v48, %v320_v48  ;;  %v464_v15 = vpack.c.bf16 %v315_v49, %v315_v49 }
 0x134   :  { %v321_v40 = vmax.f32 %v305_v50, 0.0  ;;  %403 = vst.msk [vmem:[#allocation10 + $0x38] sm:$0xf] %vm388_vm2, %v471_v34  ;;  %393 = vst.msk [vmem:[#allocation10 + $0x10] sm:$0xf] %vm388_vm2, %v461_v51  ;;  %v472_v20 = vpack.c.bf16 %v323_v14, %v323_v14 }
 0x135   :  { %v462_v41 = vpack.c.bf16 %v313_v35, %v313_v35  ;;  %401 = vst.msk [vmem:[#allocation10 + $0x30] sm:$0xf] %vm388_vm2, %v469_v16  ;;  %396 = vst.msk [vmem:[#allocation10 + $0x1c] sm:$0xf] %vm388_vm2, %v464_v15 }
 0x136   :  { %v470_v21 = vpack.c.bf16 %v321_v40, %v321_v40  ;;  %404 = vst.msk [vmem:[#allocation10 + $0x3c] sm:$0xf] %vm388_vm2, %v472_v20 }
 0x137   :  { %394 = vst.msk [vmem:[#allocation10 + $0x14] sm:$0xf] %vm388_vm2, %v462_v41 }
 0x138   :  { %402 = vst.msk [vmem:[#allocation10 + $0x34] sm:$0xf] %vm388_vm2, %v470_v21 }
 0x139   :  { %657 = shalt.err (!%p654_p8)
}
 0x13a   :  { %s658_s16 = scalar_lea.hbm %s867_s4, 1024 }
 0x13b   :  { %p659_p9 = scmp.ne.s32.totalorder %s867_s4, %s658_s16  ;;  %p662_p10 = scmp.lt.u32.totalorder %s658_s16, %s867_s4 }
 0x13d   :  { %p664_p11 = pnand %p662_p10, %p659_p9 }
 0x13f   :  { %667 = shalt.err (!%p664_p11)
}
 0x140   :  { %416 = dma.vmem_to_hbm [thread:$0]  %s411_s12, 1024, %s867_s4, [#allocation4], %s678_s1, %s678_s1, %s679_s11  }
 0x141   :  { %674 = dma.done.wait [#allocation4], 1024  }
 0x142   :  { %675 = vsyncadd [#allocation4], 4294966272 }
 0x143   :  { %420 = vsyncpa [#allocation3], 1 }
 0x144   :  { %421 = vsyncpa [#allocation6], 1 }
 0x145   :  { %422 = vsyncpa [#allocation9], 1 }
 0x146   :  { %423 = vsyncpa [#allocation4], 1 }

// kernel: _lambda_.16
= control target key start
LH: loop header
LB: loop body
LE: loop exit
PB: predicated region body
PF: predicated region fallthrough
CT: control target
= control target key end

     0   :  { %9 = vsyncpa [#allocation3], 0  ;;  %s4688_s0 = inlined_call_operand.hbm [shape: bf16[400,8], index: 0, kind: input, shape index: {}, may-alias: {0,1}]   ;;  %s4689_s1 = inlined_call_operand.hbm [shape: bf16[400,8], index: 1, kind: input, shape index: {}, may-alias: {0,1}]   ;;  %s4690_s2 = inlined_call_operand.hbm [shape: bf16[9,8,8], index: 2, kind: input, shape index: {}]   ;;  %s4691_s3 = inlined_call_operand.hbm [shape: f32[1,8], index: 3, kind: input, shape index: {}]   ;;  %s4692_s4 = inlined_call_operand.hbm [shape: bf16[200,8], index: 4, kind: output, shape index: {}]  }
   0x1   :  { %10 = vsyncpa [#allocation6], 0 }
   0x2   :  { %11 = vsyncpa [#allocation9], 0 }
   0x3   :  { %12 = vsyncpa [#allocation4], 0  ;;  %s2517_s17 = scalar_lea.hbm %s4689_s1, 1600  ;;  %s3472_s18 = smov [#allocation5]  }
   0x4   :  { %s34_s19 = sshll.u32 %s3472_s18, 4  ;;  %s3473_s20 = smov [#allocation2]   ;;  %s35_s19 = int_to_ptr.vmem [resolvable:$true] %s34_s19 }
   0x5   :  { %s18_s21 = sshll.u32 %s3473_s20, 4  ;;  %s3375_s24 = scalar_lea.hbm %s4689_s1, 3200  ;;  %s19_s21 = int_to_ptr.vmem [resolvable:$true] %s18_s21 }
   0x6   :  { %p3352_p0 = scmp.ne.s32.totalorder %s2517_s17, %s3375_s24  ;;  %p3354_p1 = scmp.lt.u32.totalorder %s2517_s17, %s4689_s1 }
   0x7   :  { %p3355_p2 = scmp.lt.u32.totalorder %s3375_s24, %s3375_s24  ;;  %p3357_p4 = scmp.lt.u32.totalorder %s3375_s24, %s2517_s17 }
   0x9   :  { %p3356_p3 = por %p3355_p2, %p3354_p1 }
   0xb   :  { %p3358_p5 = por %p3357_p4, %p3356_p3 }
   0xd   :  { %p3359_p6 = pnand %p3358_p5, %p3352_p0 }
   0xf   :  { %3362 = shalt.err (!%p3359_p6)
}
  0x10   :  { %s3363_s27 = scalar_lea.vmem %s35_s19, 1600  ;;  %p3368_p8 = scmp.lt.s32.totalorder %s35_s19, %s35_s19 }
  0x11   :  { %p3364_p7 = scmp.ne.s32.totalorder %s35_s19, %s3363_s27  ;;  %p3369_p9 = scmp.lt.s32.totalorder %s3363_s27, %s3363_s27 }
  0x13   :  { %p3370_p10 = por %p3369_p9, %p3368_p8 }
  0x15   :  { %p3371_p11 = pnand %p3370_p10, %p3364_p7 }
  0x17   :  { %3374 = shalt.err (!%p3371_p11)
}
  0x18   :  { %s3474_s28 = smov 64   ;;  %s3475_s29 = smov 4  }
  0x19   :  { %40 = dma.hbm_to_vmem [thread:$0]  %s2517_s17, 1600, %s35_s19, [#allocation6], %s3474_s28, %s3474_s28, %s3475_s29  }
  0x1a   :  { %s3376_s5 = scalar_lea.hbm %s4688_s0, 1600  ;;  %s3378_s10 = scalar_lea.hbm %s4688_s0, 3200 }
  0x1b   :  { %p3377_p12 = scmp.ne.s32.totalorder %s4688_s0, %s3376_s5  ;;  %p3379_p13 = scmp.lt.u32.totalorder %s3378_s10, %s3376_s5 }
  0x1c   :  { %p3380_p0 = scmp.lt.u32.totalorder %s3376_s5, %s4688_s0 }
  0x1e   :  { %p3381_p1 = por %p3380_p0, %p3379_p13 }
  0x20   :  { %p3382_p2 = pnand %p3381_p1, %p3377_p12 }
  0x22   :  { %3385 = shalt.err (!%p3382_p2)
}
  0x23   :  { %s3386_s13 = scalar_lea.vmem %s19_s21, 1600  ;;  %p3391_p4 = scmp.lt.s32.totalorder %s19_s21, %s19_s21 }
  0x24   :  { %p3387_p3 = scmp.ne.s32.totalorder %s19_s21, %s3386_s13  ;;  %p3392_p5 = scmp.lt.s32.totalorder %s3386_s13, %s3386_s13 }
  0x26   :  { %p3393_p6 = por %p3392_p5, %p3391_p4 }
  0x28   :  { %p3394_p7 = pnand %p3393_p6, %p3387_p3 }
  0x2a   :  { %3397 = shalt.err (!%p3394_p7)
}
  0x2b   :  { %24 = dma.hbm_to_vmem [thread:$0]  %s4688_s0, 1600, %s19_s21, [#allocation3], %s3474_s28, %s3474_s28, %s3475_s29  }
  0x2c   :  { %s3476_s16 = smov [#allocation7]   ;;  %s3477_s18 = smov [#allocation8]  }
  0x2d   :  { %s46_s17 = sshll.u32 %s3476_s16, 4  ;;  %s59_s19 = sshll.u32 %s3477_s18, 4  ;;  %s47_s17 = int_to_ptr.vmem [resolvable:$true] %s46_s17  ;;  %s60_s19 = int_to_ptr.vmem [resolvable:$true] %s59_s19 }
  0x2e   :  { %s3398_s23 = scalar_lea.hbm %s4690_s2, 576 }
  0x2f   :  { %p3399_p8 = scmp.ne.s32.totalorder %s4690_s2, %s3398_s23  ;;  %p3402_p9 = scmp.lt.u32.totalorder %s3398_s23, %s4690_s2 }
  0x31   :  { %p3404_p10 = pnand %p3402_p9, %p3399_p8 }
  0x33   :  { %3407 = shalt.err (!%p3404_p10)
}
  0x34   :  { %s3408_s0 = scalar_lea.vmem %s47_s17, 576  ;;  %p3413_p12 = scmp.lt.s32.totalorder %s47_s17, %s47_s17 }
  0x35   :  { %p3409_p11 = scmp.ne.s32.totalorder %s47_s17, %s3408_s0  ;;  %p3414_p13 = scmp.lt.s32.totalorder %s3408_s0, %s3408_s0 }
  0x37   :  { %p3415_p0 = por %p3414_p13, %p3413_p12 }
  0x39   :  { %p3416_p1 = pnand %p3415_p0, %p3409_p11 }
  0x3b   :  { %3419 = shalt.err (!%p3416_p1)
}
  0x3c   :  { %52 = dma.hbm_to_vmem [thread:$0]  %s4690_s2, 576, %s47_s17, [#allocation6], %s3474_s28, %s3474_s28, %s3475_s29  }
  0x3d   :  { %s3420_s6 = scalar_lea.hbm %s4691_s3, 16 }
  0x3e   :  { %p3421_p2 = scmp.ne.s32.totalorder %s4691_s3, %s3420_s6  ;;  %p3424_p3 = scmp.lt.u32.totalorder %s3420_s6, %s4691_s3 }
  0x40   :  { %p3426_p4 = pnand %p3424_p3, %p3421_p2 }
  0x42   :  { %3429 = shalt.err (!%p3426_p4)
}
  0x43   :  { %s3430_s11 = scalar_lea.vmem %s60_s19, 16  ;;  %s3434_s12 = scalar_lea.vmem %s60_s19, 32 }
  0x44   :  { %p3431_p5 = scmp.ne.s32.totalorder %s60_s19, %s3430_s11  ;;  %p3435_p6 = scmp.lt.s32.totalorder %s60_s19, %s60_s19 }
  0x45   :  { %p3436_p7 = scmp.lt.s32.totalorder %s3434_s12, %s3430_s11 }
  0x47   :  { %p3437_p8 = por %p3436_p7, %p3435_p6 }
  0x49   :  { %p3438_p9 = pnand %p3437_p8, %p3431_p5 }
  0x4b   :  { %3441 = shalt.err (!%p3438_p9)
}
  0x4c   :  { %62 = dma.hbm_to_vmem [thread:$0]  %s4691_s3, 16, %s60_s19, [#allocation9]  }
  0x4d   :  { %3464 = dma.done.wait [#allocation3], 1600  }
  0x4e   :  { %3465 = vsyncadd [#allocation3], 4294965696 }
  0x4f   :  { %3466 = dma.done.wait [#allocation6], 2176  }
  0x50   :  { %3467 = vsyncadd [#allocation6], 4294965120 }
  0x51   :  { %3468 = dma.done.wait [#allocation9], 16  }
  0x52   :  { %3469 = vsyncadd [#allocation9], 4294967280  ;;  %v4694_v0 = vmov 0.0   ;;  %vm3479_vm0 = vmmov 0   ;;  %vm177_vm1 = vcmask 1043456   ;;  %v3570_v3 = vld [vmem:[#allocation2] sm:$0xff]  }
  0x53   :  { %2827 = vmatprep.subr.bf16.mxu0 %v4694_v0  ;;  %3313 = vmatprep.subr.bf16.mxu1 %v4694_v0  ;;  %v183_v1 = vld [vmem:[#allocation7 + $0x4] sm:$0xf]  ;;  %v186_v5 = vshrl.u32 %v3570_v3, 16  ;;  %v188_v6 = vshll.u32 %v3570_v3, 16  ;;  %v3581_v8 = vld [vmem:[#allocation2 + $0x38] sm:$0xff]   ;;  %v3583_v9 = vld [vmem:[#allocation2 + $0x40] sm:$0xff]  }
  0x54   :  { %2829 = vmatprep.mubr.msk.bf16.mxu0 %vm3479_vm0, %v4694_v0  ;;  %2857 = vmatprep.mubr.msk.bf16.mxu1 %vm3479_vm0, %v4694_v0  ;;  %v328_v2 = vsel %vm177_vm1, %v183_v1, 0  ;;  %v3572_v4 = vld [vmem:[#allocation2 + $0x8] sm:$0xff]   ;;  %vm184_vm2 = vsmask.f32 7424  ;;  %vm287_vm3 = vcmask 64512   ;;  %v3589_v13 = vshll.u32 %v3581_v8, 16 }
  0x55   :  { %2828 = vmatpush3.bf16.msra.mxu0 %v328_v2  ;;  %3314 = vmatpush3.bf16.msra.mxu1 %v328_v2  ;;  %v3579_v7 = vshll.u32 %v3572_v4, 16  ;;  %v190_v10 = vrot.slane %v188_v6, 1  ;;  %v632_v11 = vld [vmem:[#allocation7 + $0x8] sm:$0xf]  ;;  %v3592_v14 = vshrl.u32 %v3581_v8, 16  ;;  %v3595_v15 = vshll.u32 %v3583_v9, 16 }
  0x56   :  { %2935 = vmatprep.subr.bf16.mxu0 %v4694_v0  ;;  %2881 = vmatprep.subr.bf16.mxu1 %v4694_v0  ;;  %v181_v16 = vld [vmem:[#allocation7] sm:$0xf]  ;;  %v3599_v18 = vld [vmem:[#allocation2 + $0x10] sm:$0xff]   ;;  %v3602_v19 = vshrl.u32 %v3572_v4, 16  ;;  %v243_v20 = vrot.slane %v3589_v13, 1  ;;  %v700_v22 = vsel %vm177_vm1, %v632_v11, 0 }
  0x57   :  { %v195_v12 = vrot.slane %v3579_v7, 1  ;;  %v191_v17 = vor.u32 %v190_v10, %v186_v5  ;;  %v251_v21 = vrot.slane %v3595_v15, 1  ;;  %v3607_v23 = vld [vmem:[#allocation2 + $0x48] sm:$0xff]   ;;  %v3611_v25 = vshll.u32 %v3599_v18, 16  ;;  %v3628_v32 = vld [vmem:[#allocation2 + $0x18] sm:$0xff]   ;;  %v3637_v36 = vld [vmem:[#allocation2 + $0x50] sm:$0xff]  }
  0x58   :  { %v247_v26 = vor.u32 %v3592_v14, %v243_v20  ;;  %v3618_v27 = vshrl.u32 %v3583_v9, 16  ;;  %v3621_v28 = vshll.u32 %v3607_v23, 16  ;;  %v493_v29 = vsel %vm177_vm1, %v181_v16, 0  ;;  %v3659_v45 = vld [vmem:[#allocation2 + $0x20] sm:$0xff]   ;;  %v3666_v48 = vld [vmem:[#allocation2 + $0x58] sm:$0xff]   ;;  %v3687_v57 = vld [vmem:[#allocation2 + $0x28] sm:$0xff]  }
  0x59   :  { %v196_v24 = vsel %vm184_vm2, %v191_v17, %v195_v12  ;;  %v199_v30 = vor.u32 %v3602_v19, %v195_v12  ;;  %v203_v31 = vrot.slane %v3611_v25, 1  ;;  %v3641_v38 = vshrl.u32 %v3599_v18, 16  ;;  %v3335_v58 = vld [vmem:[#allocation2 + $0x60] ss:$0 sps:$4 sm:$0xff]   ;;  %v3336_v59 = vld [vmem:[#allocation5] ss:$0 sps:$4 sm:$0xff]  }
  0x5a   :  { %2830 = vmatmul.mubr.msk.bf16.vlgmr.msra.gmra.mrb[0].mxu0 %vm287_vm3, %v196_v24  ;;  %4706 = vst [vmem:[#allocation15_spill] sm:$0xff] %v3621_v28  ;;  %v252_v33 = vsel %vm184_vm2, %v247_v26, %v251_v21  ;;  %v255_v34 = vor.u32 %v3618_v27, %v251_v21  ;;  %v259_v35 = vrot.slane %v3621_v28, 1  ;;  %v3644_v39 = vshll.u32 %v3628_v32, 16  ;;  %v3716_v21 = vld [vmem:[#allocation2 + $0x30] sm:$0xff]   ;;  %s3480_s3 = smov [#allocation10]  }
  0x5b   :  { %2936 = vmatpush3.bf16.msra.mxu0 %v700_v22  ;;  %2833 = vmatprep.mubr.msk.bf16.mxu0 %vm3479_vm0, %v4694_v0  ;;  %v204_v37 = vsel %vm184_vm2, %v199_v30, %v203_v31  ;;  %v3650_v41 = vshrl.u32 %v3607_v23, 16  ;;  %v3653_v42 = vshll.u32 %v3637_v36, 16  ;;  %v207_v43 = vor.u32 %v3641_v38, %v203_v31  ;;  %s2503_s14 = sshll.u32 %s3480_s3, 4  ;;  %s2504_s14 = int_to_ptr.vmem [resolvable:$true] %s2503_s14 }
  0x5c   :  { %3043 = vmatprep.subr.bf16.mxu0 %v4694_v0  ;;  %2858 = vmatmul.mubr.msk.bf16.vlgmr.msra.gmra.mrb[0].mxu1 %vm287_vm3, %v252_v33  ;;  %v260_v40 = vsel %vm184_vm2, %v255_v34, %v259_v35  ;;  %v211_v44 = vrot.slane %v3644_v39, 1  ;;  %v3670_v50 = vshrl.u32 %v3628_v32, 16  ;;  %v3673_v51 = vshll.u32 %v3659_v45, 16  ;;  %s3442_s15 = scalar_lea.vmem %s2504_s14, 1600  ;;  %p3447_p11 = scmp.lt.s32.totalorder %s2504_s14, %s2504_s14 }
  0x5d   :  { %2882 = vmatpush3.bf16.msra.mxu1 %v493_v29  ;;  %2861 = vmatprep.mubr.msk.bf16.mxu1 %vm3479_vm0, %v4694_v0  ;;  %4707 = vst [vmem:[#allocation16_spill] sm:$0xff] %v3653_v42  ;;  %v263_v46 = vor.u32 %v3650_v41, %v259_v35  ;;  %v267_v47 = vrot.slane %v3653_v42, 1  ;;  %v3678_v53 = vshrl.u32 %v3637_v36, 16  ;;  %v3681_v54 = vshll.u32 %v3666_v48, 16  ;;  %p3443_p10 = scmp.ne.s32.totalorder %s2504_s14, %s3442_s15  ;;  %p3448_p12 = scmp.lt.s32.totalorder %s3442_s15, %s3442_s15 }
  0x5e   :  { %2989 = vmatprep.subr.bf16.mxu1 %v4694_v0  ;;  %v212_v49 = vsel %vm184_vm2, %v207_v43, %v211_v44  ;;  %v215_v55 = vor.u32 %v3670_v50, %v211_v44  ;;  %v219_v56 = vrot.slane %v3673_v51, 1  ;;  %v3696_v63 = vshrl.u32 %v3659_v45, 16 }
  0x5f   :  { %v268_v52 = vsel %vm184_vm2, %v263_v46, %v267_v47  ;;  %4708 = vst [vmem:[#allocation17_spill] sm:$0xff] %v3678_v53  ;;  %4709 = vst [vmem:[#allocation18_spill] sm:$0xff] %v3681_v54  ;;  %v271_v60 = vor.u32 %v3678_v53, %v267_v47  ;;  %v275_v61 = vrot.slane %v3681_v54, 1  ;;  %v3699_v1 = vshll.u32 %v3687_v57, 16  ;;  %p3449_p13 = por %p3448_p12, %p3447_p11 }
  0x60   :  { %v220_v62 = vsel %vm184_vm2, %v215_v55, %v219_v56  ;;  %v3702_v2 = vsel %vm177_vm1, %v3335_v58, %v3336_v59  ;;  %v3707_v11 = vshrl.u32 %v3666_v48, 16  ;;  %v223_v16 = vor.u32 %v3696_v63, %v219_v56  ;;  %v1097_v58 = vld [vmem:[#allocation7 + $0x10] sm:$0xf] }
  0x61   :  { %4710 = vst [vmem:[#allocation19_spill] sm:$0xff] %v3702_v2  ;;  %v276_v10 = vsel %vm184_vm2, %v271_v60, %v275_v61  ;;  %v3710_v12 = vshll.u32 %v3702_v2, 16  ;;  %v227_v17 = vrot.slane %v3699_v1, 1  ;;  %v3721_v22 = vrot.slane %v186_v5, 5  ;;  %p3450_p0 = pnand %p3449_p13, %p3443_p10 }
  0x62   :  { %2834 = vmatmul.mubr.msk.bf16.gmra.mrb[4].mxu0 %vm287_vm3, %v204_v37  ;;  %4711 = vst [vmem:[#allocation20_spill] sm:$0xff] %v3707_v11  ;;  %v3725_v24 = vrot.slane %v188_v6, 6  ;;  %v279_v26 = vor.u32 %v3707_v11, %v275_v61  ;;  %v3733_v31 = vshrl.u32 %v3687_v57, 16  ;;  %v3736_v33 = vshll.u32 %v3716_v21, 16 }
  0x63   :  { %2837 = vmatprep.mubr.msk.bf16.mxu0 %vm3479_vm0, %v4694_v0  ;;  %4712 = vst [vmem:[#allocation21_spill] sm:$0xff] %v3710_v12  ;;  %v282_v29 = vrot.slane %v3710_v12, 1  ;;  %v228_v30 = vsel %vm184_vm2, %v223_v16, %v227_v17  ;;  %v3748_v37 = vshrl.u32 %v3702_v2, 16  ;;  %v3754_v43 = vshrl.u32 %v3716_v21, 16 }
  0x64   :  { %2862 = vmatmul.mubr.msk.bf16.gmra.mrb[4].mxu1 %vm287_vm3, %v260_v40  ;;  %v1101_v6 = vor.u32 %v3725_v24, %v3721_v22  ;;  %v231_v34 = vor.u32 %v3733_v31, %v227_v17  ;;  %v235_v35 = vrot.slane %v3736_v33, 1  ;;  %v635_v55 = vrot.slane %v3570_v3, 1 }
  0x65   :  { %2865 = vmatprep.mubr.msk.bf16.mxu1 %vm3479_vm0, %v4694_v0  ;;  %v283_v5 = vsel %vm184_vm2, %v279_v26, %v282_v29  ;;  %4713 = vst [vmem:[#allocation22_spill] sm:$0xff] %v3748_v37  ;;  %v286_v44 = vor.u32 %v3748_v37, %v282_v29  ;;  %v636_v56 = vrot.slane %v3572_v4, 1  ;;  %vm634_vm4 = vcmask 1046528  }
  0x66   :  { %v236_v40 = vsel %vm184_vm2, %v231_v34, %v235_v35  ;;  %v239_v46 = vor.u32 %v3754_v43, %v235_v35  ;;  %v1199_v59 = vsel %vm177_vm1, %v1097_v58, 0  ;;  %v638_v60 = vrot.slane %v3599_v18, 1 }
  0x67   :  { %v642_v16 = vrot.slane %v3659_v45, 1  ;;  %v644_v26 = vrot.slane %v3687_v57, 1  ;;  %v648_v34 = vrot.slane %v3581_v8, 1  ;;  %v658_v58 = vrot.slane %v3702_v2, 1 }
  0x68   :  { %v244_v47 = vsel %vm184_vm2, %v239_v46, %v243_v20  ;;  %v637_v20 = vsel %vm634_vm4, %v635_v55, %v636_v56  ;;  %v639_v61 = vsel %vm634_vm4, %v636_v56, %v638_v60  ;;  %v652_v46 = vrot.slane %v3607_v23, 1 }
  0x69   :  { %v645_v29 = vsel %vm634_vm4, %v642_v16, %v644_v26  ;;  %v656_v55 = vrot.slane %v3666_v48, 1  ;;  %vm865_vm5 = vcmask 1042432   ;;  %vm1098_vm6 = vsmask.f32 2304 }
  0x6a   :  { %2838 = vmatmul.mubr.msk.bf16.gmra.mrb[8].mxu0 %vm287_vm3, %v212_v49  ;;  %v864_v49 = vld [vmem:[#allocation7 + $0xc] sm:$0xf]  ;;  %v871_v22 = vrot.slane %v3628_v32, 5  ;;  %vm1364_vm7 = vcmask 1041408   ;;  %vm1597_vm8 = vcmask 1045504   ;;  %vm2085_vm10 = vcmask 1044480  }
  0x6b   :  { %2841 = vmatprep.mubr.msk.bf16.mxu0 %vm3479_vm0, %v4694_v0  ;;  %vm1828_vm9 = vsmask.f32 5376  ;;  %vm2472_vm11 = vcmask 60416  }
  0x6c   :  { %2866 = vmatmul.mubr.msk.bf16.gmra.mrb[8].mxu1 %vm287_vm3, %v268_v52  ;;  %v933_v52 = vsel %vm177_vm1, %v864_v49, 0  ;;  %v654_v49 = vrot.slane %v3637_v36, 1 }
  0x6d   :  { %2869 = vmatprep.mubr.msk.bf16.mxu1 %vm3479_vm0, %v4694_v0 }
  0x6e   :  { %v657_v56 = vsel %vm634_vm4, %v654_v49, %v656_v55 }
  0x72   :  { %2842 = vmatmul.mubr.msk.bf16.gmra.mrb[12].mxu0 %vm287_vm3, %v220_v62  ;;  %v640_v62 = vrot.slane %v3628_v32, 1 }
  0x73   :  { %2845 = vmatprep.mubr.msk.bf16.mxu0 %vm3479_vm0, %v4694_v0 }
  0x74   :  { %2870 = vmatmul.mubr.msk.bf16.gmra.mrb[12].mxu1 %vm287_vm3, %v276_v10  ;;  %v641_v10 = vsel %vm634_vm4, %v638_v60, %v640_v62  ;;  %v643_v17 = vsel %vm634_vm4, %v640_v62, %v642_v16  ;;  %v867_v60 = vrot.slane %v3572_v4, 5  ;;  %v1103_v62 = vrot.slane %v3579_v7, 6 }
  0x75   :  { %2873 = vmatprep.mubr.msk.bf16.mxu1 %vm3479_vm0, %v4694_v0 }
  0x7a   :  { %2846 = vmatmul.mubr.msk.bf16.gmra.mrb[16].mxu0 %vm287_vm3, %v228_v30  ;;  %v646_v30 = vrot.slane %v3716_v21, 1 }
  0x7b   :  { %2849 = vmatprep.mubr.msk.bf16.mxu0 %vm3479_vm0, %v4694_v0 }
  0x7c   :  { %2874 = vmatmul.mubr.msk.bf16.gmra.mrb[16].mxu1 %vm287_vm3, %v283_v5  ;;  %v647_v5 = vsel %vm634_vm4, %v644_v26, %v646_v30  ;;  %v649_v35 = vsel %vm634_vm4, %v646_v30, %v648_v34  ;;  %v869_v30 = vrot.slane %v3599_v18, 5 }
  0x7d   :  { %2877 = vmatprep.mubr.msk.bf16.mxu1 %vm3479_vm0, %v4694_v0 }
  0x82   :  { %2850 = vmatmul.mubr.msk.bf16.gmra.mrb[20].mxu0 %vm287_vm3, %v236_v40  ;;  %v650_v40 = vrot.slane %v3583_v9, 1 }
  0x83   :  { %2853 = vmatprep.mubr.msk.bf16.mxu0 %vm3479_vm0, %v4694_v0 }
  0x84   :  { %2878 = vmatmul.mubr.msk.bf16.gmra.mrb[20].mxu1 %vm287_vm3, %v286_v44  ;;  %v651_v44 = vsel %vm634_vm4, %v648_v34, %v650_v40  ;;  %v1106_v34 = vrot.slane %v3641_v38, 5 }
  0x85   :  { %2883 = vmatprep.mubr.msk.bf16.mxu1 %vm3479_vm0, %v4694_v0 }
  0x8a   :  { %2854 = vmatmul.mubr.msk.bf16.gmra.mrb[24].mxu0 %vm287_vm3, %v244_v47  ;;  %v653_v47 = vsel %vm634_vm4, %v650_v40, %v652_v46 }
  0x8b   :  { %2937 = vmatprep.mubr.msk.bf16.mxu0 %vm3479_vm0, %v4694_v0 }
  0x8c   :  { %2884 = vmatmul.mubr.msk.bf16.vlgmr.msra.gmra.mrb[24].mxu1 %vm287_vm3, %v3570_v3 }
  0x8d   :  { %2990 = vmatpush3.bf16.msra.mxu1 %v933_v52  ;;  %2887 = vmatprep.mubr.msk.bf16.mxu1 %vm3479_vm0, %v4694_v0  ;;  %v655_v52 = vsel %vm634_vm4, %v652_v46, %v654_v49  ;;  %v872_v49 = vsel %vm865_vm5, %v869_v30, %v871_v22 }
  0x8e   :  { %3097 = vmatprep.subr.bf16.mxu1 %v4694_v0 }
  0x92   :  { %2938 = vmatmul.mubr.msk.bf16.vlgmr.msra.gmra.mrb[28].mxu0 %vm287_vm3, %v637_v20  ;;  %v659_v20 = vsel %vm634_vm4, %v656_v55, %v658_v58  ;;  %v873_v55 = vrot.slane %v3659_v45, 5 }
  0x93   :  { %3044 = vmatpush3.bf16.msra.mxu0 %v1199_v59  ;;  %2941 = vmatprep.mubr.msk.bf16.mxu0 %vm3479_vm0, %v4694_v0  ;;  %v866_v59 = vrot.slane %v3570_v3, 5 }
  0x94   :  { %3151 = vmatprep.subr.bf16.mxu0 %v4694_v0  ;;  %2888 = vmatmul.mubr.msk.bf16.gmra.mrb[28].mxu1 %vm287_vm3, %v3572_v4 }
  0x95   :  { %2891 = vmatprep.mubr.msk.bf16.mxu1 %vm3479_vm0, %v4694_v0  ;;  %v868_v16 = vsel %vm865_vm5, %v866_v59, %v867_v60  ;;  %v874_v59 = vsel %vm865_vm5, %v871_v22, %v873_v55  ;;  %v1126_v22 = vrot.slane %v3592_v14, 5 }
  0x9a   :  { %2942 = vmatmul.mubr.msk.bf16.gmra.mrb[32].mxu0 %vm287_vm3, %v639_v61  ;;  %v1102_v61 = vrot.slane %v3602_v19, 5 }
  0x9b   :  { %2945 = vmatprep.mubr.msk.bf16.mxu0 %vm3479_vm0, %v4694_v0 }
  0x9c   :  { %2892 = vmatmul.mubr.msk.bf16.gmra.mrb[32].mxu1 %vm287_vm3, %v3599_v18  ;;  %v1104_v26 = vor.u32 %v1103_v62, %v1102_v61  ;;  %v875_v61 = vrot.slane %v3687_v57, 5 }
  0x9d   :  { %2895 = vmatprep.mubr.msk.bf16.mxu1 %vm3479_vm0, %v4694_v0 }
  0xa2   :  { %2946 = vmatmul.mubr.msk.bf16.gmra.mrb[36].mxu0 %vm287_vm3, %v641_v10  ;;  %v1363_v10 = vld [vmem:[#allocation7 + $0x14] sm:$0xf] }
  0xa3   :  { %2949 = vmatprep.mubr.msk.bf16.mxu0 %vm3479_vm0, %v4694_v0 }
  0xa4   :  { %2896 = vmatmul.mubr.msk.bf16.gmra.mrb[36].mxu1 %vm287_vm3, %v3628_v32 }
  0xa5   :  { %2899 = vmatprep.mubr.msk.bf16.mxu1 %vm3479_vm0, %v4694_v0 }
  0xaa   :  { %2950 = vmatmul.mubr.msk.bf16.gmra.mrb[40].mxu0 %vm287_vm3, %v643_v17  ;;  %v1432_v17 = vsel %vm177_vm1, %v1363_v10, 0  ;;  %v1118_v10 = vrot.slane %v3733_v31, 5 }
  0xab   :  { %2953 = vmatprep.mubr.msk.bf16.mxu0 %vm3479_vm0, %v4694_v0 }
  0xac   :  { %2900 = vmatmul.mubr.msk.bf16.gmra.mrb[40].mxu1 %vm287_vm3, %v3659_v45 }
  0xad   :  { %2903 = vmatprep.mubr.msk.bf16.mxu1 %vm3479_vm0, %v4694_v0 }
  0xb2   :  { %2954 = vmatmul.mubr.msk.bf16.gmra.mrb[44].mxu0 %vm287_vm3, %v645_v29  ;;  %v1596_v29 = vld [vmem:[#allocation7 + $0x18] sm:$0xf] }
  0xb3   :  { %2957 = vmatprep.mubr.msk.bf16.mxu0 %vm3479_vm0, %v4694_v0  ;;  %v1663_v40 = vsel %vm177_vm1, %v1596_v29, 0  ;;  %v877_v29 = vrot.slane %v3716_v21, 5 }
  0xb4   :  { %2904 = vmatmul.mubr.msk.bf16.gmra.mrb[44].mxu1 %vm287_vm3, %v3687_v57 }
  0xb5   :  { %2907 = vmatprep.mubr.msk.bf16.mxu1 %vm3479_vm0, %v4694_v0 }
  0xba   :  { %2958 = vmatmul.mubr.msk.bf16.gmra.mrb[48].mxu0 %vm287_vm3, %v647_v5  ;;  %v1105_v5 = vsel %vm1098_vm6, %v1101_v6, %v1104_v26  ;;  %v1110_v6 = vrot.slane %v3670_v50, 5 }
  0xbb   :  { %2961 = vmatprep.mubr.msk.bf16.mxu0 %vm3479_vm0, %v4694_v0 }
  0xbc   :  { %2908 = vmatmul.mubr.msk.bf16.gmra.mrb[48].mxu1 %vm287_vm3, %v3716_v21 }
  0xbd   :  { %2911 = vmatprep.mubr.msk.bf16.mxu1 %vm3479_vm0, %v4694_v0 }
  0xc2   :  { %2962 = vmatmul.mubr.msk.bf16.gmra.mrb[52].mxu0 %vm287_vm3, %v649_v35  ;;  %v1107_v35 = vrot.slane %v3611_v25, 6 }
  0xc3   :  { %2965 = vmatprep.mubr.msk.bf16.mxu0 %vm3479_vm0, %v4694_v0 }
  0xc4   :  { %2912 = vmatmul.mubr.msk.bf16.gmra.mrb[52].mxu1 %vm287_vm3, %v3581_v8  ;;  %v1108_v46 = vor.u32 %v1107_v35, %v1106_v34  ;;  %v1123_v34 = vrot.slane %v3736_v33, 6  ;;  %v878_v35 = vsel %vm865_vm5, %v875_v61, %v877_v29 }
  0xc5   :  { %2915 = vmatprep.mubr.msk.bf16.mxu1 %vm3479_vm0, %v4694_v0 }
  0xc6   :  { %v1109_v24 = vsel %vm1098_vm6, %v1104_v26, %v1108_v46 }
  0xca   :  { %2966 = vmatmul.mubr.msk.bf16.gmra.mrb[56].mxu0 %vm287_vm3, %v651_v44  ;;  %v870_v44 = vsel %vm865_vm5, %v867_v60, %v869_v30 }
  0xcb   :  { %2969 = vmatprep.mubr.msk.bf16.mxu0 %vm3479_vm0, %v4694_v0 }
  0xcc   :  { %2916 = vmatmul.mubr.msk.bf16.gmra.mrb[56].mxu1 %vm287_vm3, %v3583_v9 }
  0xcd   :  { %2919 = vmatprep.mubr.msk.bf16.mxu1 %vm3479_vm0, %v4694_v0 }
  0xd2   :  { %2970 = vmatmul.mubr.msk.bf16.gmra.mrb[60].mxu0 %vm287_vm3, %v653_v47  ;;  %v1111_v47 = vrot.slane %v3644_v39, 6 }
  0xd3   :  { %2973 = vmatprep.mubr.msk.bf16.mxu0 %vm3479_vm0, %v4694_v0 }
  0xd4   :  { %2920 = vmatmul.mubr.msk.bf16.gmra.mrb[60].mxu1 %vm287_vm3, %v3607_v23 }
  0xd5   :  { %2923 = vmatprep.mubr.msk.bf16.mxu1 %vm3479_vm0, %v4694_v0 }
  0xda   :  { %2974 = vmatmul.mubr.msk.bf16.gmra.mrb[64].mxu0 %vm287_vm3, %v655_v52  ;;  %v1112_v52 = vor.u32 %v1111_v47, %v1110_v6 }
  0xdb   :  { %2977 = vmatprep.mubr.msk.bf16.mxu0 %vm3479_vm0, %v4694_v0 }
  0xdc   :  { %2924 = vmatmul.mubr.msk.bf16.gmra.mrb[64].mxu1 %vm287_vm3, %v3637_v36 }
  0xdd   :  { %2927 = vmatprep.mubr.msk.bf16.mxu1 %vm3479_vm0, %v4694_v0 }
  0xe2   :  { %2978 = vmatmul.mubr.msk.bf16.gmra.mrb[68].mxu0 %vm287_vm3, %v657_v56  ;;  %v1113_v56 = vsel %vm1098_vm6, %v1108_v46, %v1112_v52 }
  0xe3   :  { %2981 = vmatprep.mubr.msk.bf16.mxu0 %vm3479_vm0, %v4694_v0 }
  0xe4   :  { %2928 = vmatmul.mubr.msk.bf16.gmra.mrb[68].mxu1 %vm287_vm3, %v3666_v48 }
  0xe5   :  { %2931 = vmatprep.mubr.msk.bf16.mxu1 %vm3479_vm0, %v4694_v0 }
  0xea   :  { %2982 = vmatmul.mubr.msk.bf16.gmra.mrb[72].mxu0 %vm287_vm3, %v659_v20  ;;  %v1115_v20 = vrot.slane %v3673_v51, 6 }
  0xeb   :  { %2985 = vmatprep.mubr.msk.bf16.mxu0 %vm3479_vm0, %v4694_v0 }
  0xec   :  { %2932 = vmatmul.mubr.msk.bf16.gmra.mrb[72].mxu1 %vm287_vm3, %v3702_v2 }
  0xed   :  { %2991 = vmatprep.mubr.msk.bf16.mxu1 %vm3479_vm0, %v4694_v0 }
  0xf2   :  { %2986 = vmatmul.mubr.msk.bf16.gmra.mrb[76].mxu0 %vm287_vm3, %v658_v58  ;;  %v1114_v58 = vrot.slane %v3696_v63, 5 }
  0xf3   :  { %3045 = vmatprep.mubr.msk.bf16.mxu0 %vm3479_vm0, %v4694_v0 }
  0xf4   :  { %2992 = vmatmul.mubr.msk.bf16.vlgmr.msra.gmra.mrb[76].mxu1 %vm287_vm3, %v868_v16  ;;  %v1116_v60 = vor.u32 %v1115_v20, %v1114_v58  ;;  %v1119_v16 = vrot.slane %v3699_v1, 6 }
  0xf5   :  { %3098 = vmatpush3.bf16.msra.mxu1 %v1432_v17  ;;  %2995 = vmatprep.mubr.msk.bf16.mxu1 %vm3479_vm0, %v4694_v0  ;;  %v876_v17 = vsel %vm865_vm5, %v873_v55, %v875_v61  ;;  %v1131_v55 = vrot.slane %v3595_v15, 6 }
  0xf6   :  { %3205 = vmatprep.subr.bf16.mxu1 %v4694_v0  ;;  %v1117_v62 = vsel %vm1098_vm6, %v1112_v52, %v1116_v60  ;;  %v1120_v26 = vor.u32 %v1119_v16, %v1118_v10  ;;  %v1130_v52 = vrot.slane %v3618_v27, 5  ;;  %v1135_v10 = vrot.slane %v3621_v28, 6 }
  0xf8   :  { %v1121_v30 = vsel %vm1098_vm6, %v1116_v60, %v1120_v26  ;;  %v1132_v58 = vor.u32 %v1131_v55, %v1130_v52 }
  0xfa   :  { %3046 = vmatmul.mubr.msk.bf16.vlgmr.msra.gmra.mrb[80].mxu0 %vm287_vm3, %v1105_v5  ;;  %v1122_v5 = vrot.slane %v3754_v43, 5 }
  0xfb   :  { %3152 = vmatpush3.bf16.msra.mxu0 %v1663_v40  ;;  %3049 = vmatprep.mubr.msk.bf16.mxu0 %vm3479_vm0, %v4694_v0 }
  0xfc   :  { %3259 = vmatprep.subr.bf16.mxu0 %v4694_v0  ;;  %2996 = vmatmul.mubr.msk.bf16.gmra.mrb[80].mxu1 %vm287_vm3, %v870_v44  ;;  %v1124_v40 = vor.u32 %v1123_v34, %v1122_v5  ;;  %v879_v44 = vrot.slane %v3581_v8, 5  ;;  %v881_v8 = vrot.slane %v3583_v9, 5  ;;  %v883_v9 = vrot.slane %v3607_v23, 5 }
  0xfd   :  { %2999 = vmatprep.mubr.msk.bf16.mxu1 %vm3479_vm0, %v4694_v0 }
  0xfe   :  { %v1125_v46 = vsel %vm1098_vm6, %v1120_v26, %v1124_v40  ;;  %v880_v6 = vsel %vm865_vm5, %v877_v29, %v879_v44 }
 0x102   :  { %3050 = vmatmul.mubr.msk.bf16.gmra.mrb[84].mxu0 %vm287_vm3, %v1109_v24  ;;  %v1127_v24 = vrot.slane %v3589_v13, 6 }
 0x103   :  { %3053 = vmatprep.mubr.msk.bf16.mxu0 %vm3479_vm0, %v4694_v0 }
 0x104   :  { %3000 = vmatmul.mubr.msk.bf16.gmra.mrb[84].mxu1 %vm287_vm3, %v872_v49  ;;  %v1128_v47 = vor.u32 %v1127_v24, %v1126_v22  ;;  %v1138_v22 = vrot.slane %v3678_v53, 5  ;;  %v1139_v24 = vrot.slane %v3653_v42, 6  ;;  %v1598_v42 = vrot.slane %v3572_v4, 2 }
 0x105   :  { %3003 = vmatprep.mubr.msk.bf16.mxu1 %vm3479_vm0, %v4694_v0 }
 0x106   :  { %v1129_v49 = vsel %vm1098_vm6, %v1124_v40, %v1128_v47  ;;  %v1133_v61 = vsel %vm1098_vm6, %v1128_v47, %v1132_v58  ;;  %v885_v40 = vrot.slane %v3637_v36, 5  ;;  %v1140_v36 = vor.u32 %v1139_v24, %v1138_v22 }
 0x107   :  { %v889_v24 = vrot.slane %v3702_v2, 5 }
 0x108   :  { %v886_v52 = vsel %vm865_vm5, %v883_v9, %v885_v40 }
 0x10a   :  { %3054 = vmatmul.mubr.msk.bf16.gmra.mrb[88].mxu0 %vm287_vm3, %v1113_v56  ;;  %v882_v56 = vsel %vm865_vm5, %v879_v44, %v881_v8 }
 0x10b   :  { %3057 = vmatprep.mubr.msk.bf16.mxu0 %vm3479_vm0, %v4694_v0 }
 0x10c   :  { %3004 = vmatmul.mubr.msk.bf16.gmra.mrb[88].mxu1 %vm287_vm3, %v874_v59 }
 0x10d   :  { %3007 = vmatprep.mubr.msk.bf16.mxu1 %vm3479_vm0, %v4694_v0 }
 0x112   :  { %3058 = vmatmul.mubr.msk.bf16.gmra.mrb[92].mxu0 %vm287_vm3, %v1117_v62  ;;  %v1134_v62 = vrot.slane %v3650_v41, 5 }
 0x113   :  { %3061 = vmatprep.mubr.msk.bf16.mxu0 %vm3479_vm0, %v4694_v0 }
 0x114   :  { %3008 = vmatmul.mubr.msk.bf16.gmra.mrb[92].mxu1 %vm287_vm3, %v876_v17  ;;  %v1136_v23 = vor.u32 %v1135_v10, %v1134_v62  ;;  %v1142_v62 = vrot.slane %v3707_v11, 5  ;;  %v1143_v10 = vrot.slane %v3681_v54, 6  ;;  %v4714_v54 = vmov 0.0  }
 0x115   :  { %3011 = vmatprep.mubr.msk.bf16.mxu1 %vm3479_vm0, %v4694_v0 }
 0x11a   :  { %3062 = vmatmul.mubr.msk.bf16.gmra.mrb[96].mxu0 %vm287_vm3, %v1121_v30  ;;  %v884_v30 = vsel %vm865_vm5, %v881_v8, %v883_v9  ;;  %v1141_v9 = vsel %vm1098_vm6, %v1136_v23, %v1140_v36 }
 0x11b   :  { %3065 = vmatprep.mubr.msk.bf16.mxu0 %vm3479_vm0, %v4694_v0 }
 0x11c   :  { %3012 = vmatmul.mubr.msk.bf16.gmra.mrb[96].mxu1 %vm287_vm3, %v878_v35 }
 0x11d   :  { %3015 = vmatprep.mubr.msk.bf16.mxu1 %vm3479_vm0, %v4694_v0 }
 0x122   :  { %3066 = vmatmul.mubr.msk.bf16.gmra.mrb[100].mxu0 %vm287_vm3, %v1125_v46  ;;  %v1137_v46 = vsel %vm1098_vm6, %v1132_v58, %v1136_v23 }
 0x123   :  { %3069 = vmatprep.mubr.msk.bf16.mxu0 %vm3479_vm0, %v4694_v0 }
 0x124   :  { %3016 = vmatmul.mubr.msk.bf16.gmra.mrb[100].mxu1 %vm287_vm3, %v880_v6 }
 0x125   :  { %3019 = vmatprep.mubr.msk.bf16.mxu1 %vm3479_vm0, %v4694_v0 }
 0x12a   :  { %3070 = vmatmul.mubr.msk.bf16.gmra.mrb[104].mxu0 %vm287_vm3, %v1129_v49 }
 0x12b   :  { %3073 = vmatprep.mubr.msk.bf16.mxu0 %vm3479_vm0, %v4694_v0 }
 0x12c   :  { %3020 = vmatmul.mubr.msk.bf16.gmra.mrb[104].mxu1 %vm287_vm3, %v882_v56 }
 0x12d   :  { %v3980_v20 = vpop.f32.mrb[0].mxu0  ;;  %3023 = vmatprep.mubr.msk.bf16.mxu1 %vm3479_vm0, %v4694_v0 }
 0x12e   :  { %v2831_v59 = vpop.f32.mrb[1].mxu0 }
 0x12f   :  { %v3985_v60 = vpop.f32.mrb[2].mxu0  ;;  %v3990_v17 = vpop.f32.mrb[0].mxu1  ;;  %v887_v59 = vrot.slane %v3666_v48, 5  ;;  %v1144_v48 = vor.u32 %v1143_v10, %v1142_v62  ;;  %v4049_v62 = vld [vmem:[#allocation5 + $0x4] sm:$0xff]  }
 0x130   :  { %v2832_v16 = vpop.f32.mrb[3].mxu0  ;;  %v2859_v26 = vpop.f32.mrb[1].mxu1 }
 0x131   :  { %v3992_v29 = vpop.f32.mrb[2].mxu1 }
 0x132   :  { %3074 = vmatmul.mubr.msk.bf16.gmra.mrb[108].mxu0 %vm287_vm3, %v1133_v61  ;;  %v2860_v5 = vpop.f32.mrb[3].mxu1 }
 0x133   :  { %3077 = vmatprep.mubr.msk.bf16.mxu0 %vm3479_vm0, %v4694_v0 }
 0x134   :  { %3024 = vmatmul.mubr.msk.bf16.gmra.mrb[108].mxu1 %vm287_vm3, %v884_v30 }
 0x135   :  { %v3999_v34 = vpop.f32.mrb[4].mxu0  ;;  %3027 = vmatprep.mubr.msk.bf16.mxu1 %vm3479_vm0, %v4694_v0 }
 0x136   :  { %v2835_v35 = vpop.f32.mrb[5].mxu0 }
 0x137   :  { %v4004_v44 = vpop.f32.mrb[6].mxu0  ;;  %v4009_v47 = vpop.f32.mrb[4].mxu1  ;;  %v888_v35 = vsel %vm865_vm5, %v885_v40, %v887_v59  ;;  %v1145_v40 = vsel %vm1098_vm6, %v1140_v36, %v1144_v48 }
 0x138   :  { %v2836_v6 = vpop.f32.mrb[7].mxu0  ;;  %v2863_v8 = vpop.f32.mrb[5].mxu1 }
 0x139   :  { %v4011_v49 = vpop.f32.mrb[6].mxu1  ;;  %v1146_v8 = vrot.slane %v3748_v37, 5 }
 0x13a   :  { %3078 = vmatmul.mubr.msk.bf16.gmra.mrb[112].mxu0 %vm287_vm3, %v1137_v46  ;;  %v2864_v55 = vpop.f32.mrb[7].mxu1 }
 0x13b   :  { %3081 = vmatprep.mubr.msk.bf16.mxu0 %vm3479_vm0, %v4694_v0 }
 0x13c   :  { %3028 = vmatmul.mubr.msk.bf16.gmra.mrb[112].mxu1 %vm287_vm3, %v886_v52  ;;  %v1147_v52 = vrot.slane %v3710_v12, 6 }
 0x13d   :  { %v4018_v56 = vpop.f32.mrb[8].mxu0  ;;  %3031 = vmatprep.mubr.msk.bf16.mxu1 %vm3479_vm0, %v4694_v0 }
 0x13e   :  { %v2839_v58 = vpop.f32.mrb[9].mxu0  ;;  %v1148_v36 = vor.u32 %v1147_v52, %v1146_v8 }
 0x13f   :  { %v4023_v61 = vpop.f32.mrb[10].mxu0  ;;  %v4028_v26 = vpop.f32.mrb[8].mxu1 }
 0x140   :  { %v2840_v16 = vpop.f32.mrb[11].mxu0  ;;  %v2867_v30 = vpop.f32.mrb[9].mxu1 }
 0x141   :  { %v4030_v5 = vpop.f32.mrb[10].mxu1  ;;  %v890_v16 = vsel %vm865_vm5, %v887_v59, %v889_v24  ;;  %v891_v59 = vrot.slane %v4049_v62, 5 }
 0x142   :  { %3082 = vmatmul.mubr.msk.bf16.gmra.mrb[116].mxu0 %vm287_vm3, %v1141_v9  ;;  %v2868_v46 = vpop.f32.mrb[11].mxu1 }
 0x143   :  { %3085 = vmatprep.mubr.msk.bf16.mxu0 %vm3479_vm0, %v4694_v0  ;;  %v4699_v46 = vshll.u32 %v4049_v62, 16 }
 0x144   :  { %3032 = vmatmul.mubr.msk.bf16.gmra.mrb[116].mxu1 %vm287_vm3, %v888_v35  ;;  %v4698_v35 = vshrl.u32 %v4049_v62, 16 }
 0x145   :  { %v4037_v23 = vpop.f32.mrb[12].mxu0  ;;  %3035 = vmatprep.mubr.msk.bf16.mxu1 %vm3479_vm0, %v4694_v0  ;;  %v1156_v52 = vrot.slane %v4699_v46, 6 }
 0x146   :  { %v2843_v22 = vpop.f32.mrb[13].mxu0  ;;  %v1153_v8 = vrot.slane %v4698_v35, 5 }
 0x147   :  { %v4042_v6 = vpop.f32.mrb[14].mxu0  ;;  %v4047_v58 = vpop.f32.mrb[12].mxu1 }
 0x148   :  { %v2844_v55 = vpop.f32.mrb[15].mxu0  ;;  %v2871_v9 = vpop.f32.mrb[13].mxu1 }
 0x149   :  { %v4051_v10 = vpop.f32.mrb[14].mxu1  ;;  %v1149_v9 = vsel %vm1098_vm6, %v1144_v48, %v1148_v36  ;;  %v1157_v48 = vor.u32 %v1156_v52, %v1153_v8  ;;  %v1827_v8 = vld [vmem:[#allocation7 + $0x1c] sm:$0xf] }
 0x14a   :  { %3086 = vmatmul.mubr.msk.bf16.gmra.mrb[120].mxu0 %vm287_vm3, %v1145_v40  ;;  %v2872_v30 = vpop.f32.mrb[15].mxu1 }
 0x14b   :  { %3089 = vmatprep.mubr.msk.bf16.mxu0 %vm3479_vm0, %v4694_v0 }
 0x14c   :  { %3036 = vmatmul.mubr.msk.bf16.gmra.mrb[120].mxu1 %vm287_vm3, %v890_v16 }
 0x14d   :  { %v4060_v22 = vpop.f32.mrb[16].mxu0  ;;  %3039 = vmatprep.mubr.msk.bf16.mxu1 %vm3479_vm0, %v4694_v0  ;;  %v892_v0 = vsel %vm865_vm5, %v889_v24, %v891_v59 }
 0x14e   :  { %v2847_v55 = vpop.f32.mrb[17].mxu0 }
 0x14f   :  { %v4065_v40 = vpop.f32.mrb[18].mxu0  ;;  %v4072_v16 = vpop.f32.mrb[16].mxu1 }
 0x150   :  { %v2848_v30 = vpop.f32.mrb[19].mxu0  ;;  %v2875_v12 = vpop.f32.mrb[17].mxu1 }
 0x151   :  { %v4074_v55 = vpop.f32.mrb[18].mxu1  ;;  %v1365_v12 = vrot.slane %v3570_v3, 6  ;;  %v1366_v30 = vrot.slane %v3572_v4, 6  ;;  %v1920_v3 = vsel %vm177_vm1, %v1827_v8, 0 }
 0x152   :  { %3090 = vmatmul.mubr.msk.bf16.gmra.mrb[124].mxu0 %vm287_vm3, %v1149_v9  ;;  %v2876_v37 = vpop.f32.mrb[19].mxu1 }
 0x153   :  { %3093 = vmatprep.mubr.msk.bf16.mxu0 %vm3479_vm0, %v4714_v54  ;;  %v1158_v37 = vsel %vm1098_vm6, %v1148_v36, %v1157_v48  ;;  %v1599_v36 = vrot.slane %v3599_v18, 2 }
 0x154   :  { %3040 = vmatmul.mubr.msk.bf16.gmra.mrb[124].mxu1 %vm287_vm3, %v892_v0 }
 0x155   :  { %v4081_v35 = vpop.f32.mrb[20].mxu0  ;;  %3099 = vmatprep.mubr.msk.bf16.mxu1 %vm3479_vm0, %v4714_v54 }
 0x156   :  { %v2851_v46 = vpop.f32.mrb[21].mxu0 }
 0x157   :  { %v4087_v24 = vpop.f32.mrb[22].mxu0  ;;  %v4090_v9 = vpop.f32.mrb[20].mxu1  ;;  %v1367_v46 = vsel %vm1364_vm7, %v1365_v12, %v1366_v30 }
 0x158   :  { %v2852_v59 = vpop.f32.mrb[23].mxu0  ;;  %v2879_v0 = vpop.f32.mrb[21].mxu1 }
 0x159   :  { %v463_v52 = vpop.f32.mrb[22].mxu1  ;;  %v2084_v59 = vld [vmem:[#allocation7 + $0x20] sm:$0xf] }
 0x15a   :  { %3094 = vmatmul.mubr.msk.bf16.gmra.mrb[128].mxu0 %vm287_vm3, %v1158_v37  ;;  %v2880_v11 = vpop.f32.mrb[23].mxu1  ;;  %v1600_v37 = vsel %vm1597_vm8, %v1598_v42, %v1599_v36  ;;  %v2151_v52 = vsel %vm177_vm1, %v2084_v59, 0  ;;  %v1601_v42 = vrot.slane %v3628_v32, 2 }
 0x15b   :  { %3153 = vmatprep.mubr.msk.bf16.mxu0 %vm3479_vm0, %v4714_v54  ;;  %v1368_v11 = vrot.slane %v3599_v18, 6 }
 0x15c   :  { %3100 = vmatmul.mubr.msk.bf16.vlgmr.msra.gmra.mrb[128].mxu1 %vm287_vm3, %v1367_v46 }
 0x15d   :  { %v4100_v48 = vpop.f32.mrb[24].mxu0  ;;  %3206 = vmatpush3.bf16.msra.mxu1 %v1920_v3  ;;  %3103 = vmatprep.mubr.msk.bf16.mxu1 %vm3479_vm0, %v4714_v54 }
 0x15e   :  { %v2855_v0 = vpop.f32.mrb[25].mxu0 }
 0x15f   :  { %v4105_v12 = vpop.f32.mrb[26].mxu0  ;;  %v529_v4 = vpop.f32.mrb[24].mxu1  ;;  %v1369_v0 = vsel %vm1364_vm7, %v1366_v30, %v1368_v11 }
 0x160   :  { %v2856_v8 = vpop.f32.mrb[27].mxu0  ;;  %v530_v46 = vadd.f32 %v529_v4, %v3980_v20  ;;  %v2885_v53 = vpop.f32.mrb[25].mxu1  ;;  %v1370_v20 = vrot.slane %v3628_v32, 6  ;;  %v1603_v32 = vrot.slane %v3659_v45, 2 }
 0x161   :  { %v532_v28 = vpop.f32.mrb[26].mxu1 }
 0x162   :  { %3154 = vmatmul.mubr.msk.bf16.vlgmr.msra.gmra.mrb[132].mxu0 %vm287_vm3, %v1600_v37  ;;  %v533_v3 = vadd.f32 %v532_v28, %v3985_v60  ;;  %v2886_v18 = vpop.f32.mrb[27].mxu1  ;;  %v1602_v28 = vsel %vm1597_vm8, %v1599_v36, %v1601_v42 }
 0x163   :  { %3260 = vmatpush3.bf16.msra.mxu0 %v2151_v52  ;;  %3157 = vmatprep.mubr.msk.bf16.mxu0 %vm3479_vm0, %v4714_v54 }
 0x164   :  { %3104 = vmatmul.mubr.msk.bf16.gmra.mrb[132].mxu1 %vm287_vm3, %v1369_v0 }
 0x165   :  { %v736_v59 = vpop.f32.mrb[28].mxu0  ;;  %3107 = vmatprep.mubr.msk.bf16.mxu1 %vm3479_vm0, %v4714_v54 }
 0x166   :  { %v4117_v8 = vadd.f32 %v736_v59, %v530_v46  ;;  %v2939_v53 = vpop.f32.mrb[29].mxu0  ;;  %v1371_v46 = vsel %vm1364_vm7, %v1368_v11, %v1370_v20  ;;  %v1372_v11 = vrot.slane %v3659_v45, 6  ;;  %v1605_v45 = vrot.slane %v3687_v57, 2 }
 0x167   :  { %v739_v30 = vpop.f32.mrb[30].mxu0  ;;  %v537_v60 = vpop.f32.mrb[28].mxu1 }
 0x168   :  { %v4123_v37 = vadd.f32 %v739_v30, %v533_v3  ;;  %v2940_v4 = vpop.f32.mrb[31].mxu0  ;;  %v538_v52 = vadd.f32 %v537_v60, %v3999_v34  ;;  %v2889_v18 = vpop.f32.mrb[29].mxu1 }
 0x169   :  { %v540_v0 = vpop.f32.mrb[30].mxu1 }
 0x16a   :  { %3158 = vmatmul.mubr.msk.bf16.gmra.mrb[136].mxu0 %vm287_vm3, %v1602_v28  ;;  %v541_v59 = vadd.f32 %v540_v0, %v4004_v44  ;;  %v2890_v53 = vpop.f32.mrb[31].mxu1  ;;  %v1604_v44 = vsel %vm1597_vm8, %v1601_v42, %v1603_v32 }
 0x16b   :  { %3161 = vmatprep.mubr.msk.bf16.mxu0 %vm3479_vm0, %v4714_v54 }
 0x16c   :  { %3108 = vmatmul.mubr.msk.bf16.gmra.mrb[136].mxu1 %vm287_vm3, %v1371_v46 }
 0x16d   :  { %v744_v36 = vpop.f32.mrb[32].mxu0  ;;  %3111 = vmatprep.mubr.msk.bf16.mxu1 %vm3479_vm0, %v4714_v54 }
 0x16e   :  { %v4133_v3 = vadd.f32 %v744_v36, %v538_v52  ;;  %v2943_v34 = vpop.f32.mrb[33].mxu0  ;;  %v1373_v52 = vsel %vm1364_vm7, %v1370_v20, %v1372_v11  ;;  %v1374_v20 = vrot.slane %v3687_v57, 6  ;;  %v1607_v57 = vrot.slane %v3716_v21, 2 }
 0x16f   :  { %v747_v30 = vpop.f32.mrb[34].mxu0  ;;  %v545_v28 = vpop.f32.mrb[32].mxu1 }
 0x170   :  { %v4139_v60 = vadd.f32 %v747_v30, %v541_v59  ;;  %v2944_v4 = vpop.f32.mrb[35].mxu0  ;;  %v546_v18 = vadd.f32 %v545_v28, %v4018_v56  ;;  %v2893_v0 = vpop.f32.mrb[33].mxu1 }
 0x171   :  { %v548_v46 = vpop.f32.mrb[34].mxu1 }
 0x172   :  { %3162 = vmatmul.mubr.msk.bf16.gmra.mrb[140].mxu0 %vm287_vm3, %v1604_v44  ;;  %v549_v53 = vadd.f32 %v548_v46, %v4023_v61  ;;  %v2894_v36 = vpop.f32.mrb[35].mxu1  ;;  %v1606_v61 = vsel %vm1597_vm8, %v1603_v32, %v1605_v45 }
 0x173   :  { %3165 = vmatprep.mubr.msk.bf16.mxu0 %vm3479_vm0, %v4714_v54 }
 0x174   :  { %3112 = vmatmul.mubr.msk.bf16.gmra.mrb[140].mxu1 %vm287_vm3, %v1373_v52 }
 0x175   :  { %v752_v42 = vpop.f32.mrb[36].mxu0  ;;  %3115 = vmatprep.mubr.msk.bf16.mxu1 %vm3479_vm0, %v4714_v54 }
 0x176   :  { %v4149_v59 = vadd.f32 %v752_v42, %v546_v18  ;;  %v2947_v56 = vpop.f32.mrb[37].mxu0  ;;  %v1375_v18 = vsel %vm1364_vm7, %v1372_v11, %v1374_v20  ;;  %v1376_v11 = vrot.slane %v3716_v21, 6  ;;  %v4179_v21 = vld [vmem:[#allocation2 + $0x38] sm:$0xff]  }
 0x177   :  { %v755_v34 = vpop.f32.mrb[38].mxu0  ;;  %v553_v30 = vpop.f32.mrb[36].mxu1 }
 0x178   :  { %v4155_v44 = vadd.f32 %v755_v34, %v549_v53  ;;  %v2948_v28 = vpop.f32.mrb[39].mxu0  ;;  %v554_v4 = vadd.f32 %v553_v30, %v4037_v23  ;;  %v2897_v0 = vpop.f32.mrb[37].mxu1 }
 0x179   :  { %v556_v46 = vpop.f32.mrb[38].mxu1 }
 0x17a   :  { %3166 = vmatmul.mubr.msk.bf16.gmra.mrb[144].mxu0 %vm287_vm3, %v1606_v61  ;;  %v557_v52 = vadd.f32 %v556_v46, %v4042_v6  ;;  %v2898_v36 = vpop.f32.mrb[39].mxu1  ;;  %v1608_v6 = vsel %vm1597_vm8, %v1605_v45, %v1607_v57  ;;  %v1609_v45 = vrot.slane %v4179_v21, 2 }
 0x17b   :  { %3169 = vmatprep.mubr.msk.bf16.mxu0 %vm3479_vm0, %v4714_v54 }
 0x17c   :  { %3116 = vmatmul.mubr.msk.bf16.gmra.mrb[144].mxu1 %vm287_vm3, %v1375_v18 }
 0x17d   :  { %v760_v32 = vpop.f32.mrb[40].mxu0  ;;  %3119 = vmatprep.mubr.msk.bf16.mxu1 %vm3479_vm0, %v4714_v54 }
 0x17e   :  { %v4165_v53 = vadd.f32 %v760_v32, %v554_v4  ;;  %v2951_v23 = vpop.f32.mrb[41].mxu0  ;;  %v1377_v4 = vsel %vm1364_vm7, %v1374_v20, %v1376_v11  ;;  %v1378_v20 = vrot.slane %v4179_v21, 6  ;;  %v1610_v32 = vsel %vm1597_vm8, %v1607_v57, %v1609_v45 }
 0x17f   :  { %v763_v42 = vpop.f32.mrb[42].mxu0  ;;  %v561_v56 = vpop.f32.mrb[40].mxu1 }
 0x180   :  { %v4171_v34 = vadd.f32 %v763_v42, %v557_v52  ;;  %v2952_v61 = vpop.f32.mrb[43].mxu0  ;;  %v562_v30 = vadd.f32 %v561_v56, %v4060_v22  ;;  %v2901_v28 = vpop.f32.mrb[41].mxu1 }
 0x181   :  { %v564_v0 = vpop.f32.mrb[42].mxu1 }
 0x182   :  { %3170 = vmatmul.mubr.msk.bf16.gmra.mrb[148].mxu0 %vm287_vm3, %v1608_v6  ;;  %v565_v46 = vadd.f32 %v564_v0, %v4065_v40  ;;  %v2902_v18 = vpop.f32.mrb[43].mxu1 }
 0x183   :  { %3173 = vmatprep.mubr.msk.bf16.mxu0 %vm3479_vm0, %v4714_v54  ;;  %v4197_v18 = vld [vmem:[#allocation2 + $0x40] sm:$0xff]  }
 0x184   :  { %3120 = vmatmul.mubr.msk.bf16.gmra.mrb[148].mxu1 %vm287_vm3, %v1377_v4  ;;  %v1611_v57 = vrot.slane %v4197_v18, 2 }
 0x185   :  { %v768_v52 = vpop.f32.mrb[44].mxu0  ;;  %3123 = vmatprep.mubr.msk.bf16.mxu1 %vm3479_vm0, %v4714_v54 }
 0x186   :  { %v4183_v22 = vadd.f32 %v768_v52, %v562_v30  ;;  %v2955_v36 = vpop.f32.mrb[45].mxu0  ;;  %v1379_v30 = vsel %vm1364_vm7, %v1376_v11, %v1378_v20  ;;  %v1380_v11 = vrot.slane %v4197_v18, 6 }
 0x187   :  { %v771_v40 = vpop.f32.mrb[46].mxu0  ;;  %v569_v23 = vpop.f32.mrb[44].mxu1  ;;  %v1612_v36 = vsel %vm1597_vm8, %v1609_v45, %v1611_v57 }
 0x188   :  { %v4189_v42 = vadd.f32 %v771_v40, %v565_v46  ;;  %v2956_v6 = vpop.f32.mrb[47].mxu0  ;;  %v570_v56 = vadd.f32 %v569_v23, %v4081_v35  ;;  %v2905_v61 = vpop.f32.mrb[45].mxu1 }
 0x189   :  { %v572_v28 = vpop.f32.mrb[46].mxu1 }
 0x18a   :  { %3174 = vmatmul.mubr.msk.bf16.gmra.mrb[152].mxu0 %vm287_vm3, %v1610_v32  ;;  %v573_v0 = vadd.f32 %v572_v28, %v4087_v24  ;;  %v2906_v4 = vpop.f32.mrb[47].mxu1 }
 0x18b   :  { %3177 = vmatprep.mubr.msk.bf16.mxu0 %vm3479_vm0, %v4714_v54 }
 0x18c   :  { %3124 = vmatmul.mubr.msk.bf16.gmra.mrb[152].mxu1 %vm287_vm3, %v1379_v30 }
 0x18d   :  { %v776_v46 = vpop.f32.mrb[48].mxu0  ;;  %3127 = vmatprep.mubr.msk.bf16.mxu1 %vm3479_vm0, %v4714_v54 }
 0x18e   :  { %v4201_v35 = vadd.f32 %v776_v46, %v570_v56  ;;  %v2959_v52 = vpop.f32.mrb[49].mxu0  ;;  %v1381_v56 = vsel %vm1364_vm7, %v1378_v20, %v1380_v11  ;;  %v4215_v46 = vld [vmem:[#allocation2 + $0x48] sm:$0xff]  }
 0x18f   :  { %v779_v24 = vpop.f32.mrb[50].mxu0  ;;  %v577_v40 = vpop.f32.mrb[48].mxu1  ;;  %v1613_v45 = vrot.slane %v4215_v46, 2  ;;  %v1382_v20 = vrot.slane %v4215_v46, 6 }
 0x190   :  { %v4207_v32 = vadd.f32 %v779_v24, %v573_v0  ;;  %v2960_v23 = vpop.f32.mrb[51].mxu0  ;;  %v578_v6 = vadd.f32 %v577_v40, %v4100_v48  ;;  %v2909_v61 = vpop.f32.mrb[49].mxu1 }
 0x191   :  { %v580_v28 = vpop.f32.mrb[50].mxu1  ;;  %v1614_v24 = vsel %vm1597_vm8, %v1611_v57, %v1613_v45 }
 0x192   :  { %3178 = vmatmul.mubr.msk.bf16.gmra.mrb[156].mxu0 %vm287_vm3, %v1612_v36  ;;  %v581_v30 = vadd.f32 %v580_v28, %v4105_v12  ;;  %v2910_v4 = vpop.f32.mrb[51].mxu1 }
 0x193   :  { %3181 = vmatprep.mubr.msk.bf16.mxu0 %vm3479_vm0, %v4714_v54 }
 0x194   :  { %3128 = vmatmul.mubr.msk.bf16.gmra.mrb[156].mxu1 %vm287_vm3, %v1381_v56 }
 0x195   :  { %v784_v0 = vpop.f32.mrb[52].mxu0  ;;  %3131 = vmatprep.mubr.msk.bf16.mxu1 %vm3479_vm0, %v4714_v54 }
 0x196   :  { %v4219_v48 = vadd.f32 %v784_v0, %v578_v6  ;;  %v2963_v52 = vpop.f32.mrb[53].mxu0  ;;  %v1383_v6 = vsel %vm1364_vm7, %v1380_v11, %v1382_v20 }
 0x197   :  { %v787_v12 = vpop.f32.mrb[54].mxu0  ;;  %v585_v36 = vpop.f32.mrb[52].mxu1  ;;  %v4233_v52 = vld [vmem:[#allocation2 + $0x50] sm:$0xff]  }
 0x198   :  { %v4225_v40 = vadd.f32 %v787_v12, %v581_v30  ;;  %v2964_v23 = vpop.f32.mrb[55].mxu0  ;;  %v586_v61 = vadd.f32 %v585_v36, %v3990_v17  ;;  %v2913_v28 = vpop.f32.mrb[53].mxu1  ;;  %4715 = vst [vmem:[#allocation23_spill] sm:$0xff] %v4233_v52  ;;  %v1615_v57 = vrot.slane %v4233_v52, 2  ;;  %v1384_v11 = vrot.slane %v4233_v52, 6  ;;  %v4251_v52 = vld [vmem:[#allocation2 + $0x58] sm:$0xff]  }
 0x199   :  { %v588_v56 = vpop.f32.mrb[54].mxu1 }
 0x19a   :  { %3182 = vmatmul.mubr.msk.bf16.gmra.mrb[160].mxu0 %vm287_vm3, %v1614_v24  ;;  %v589_v4 = vadd.f32 %v588_v56, %v3992_v29  ;;  %v2914_v0 = vpop.f32.mrb[55].mxu1  ;;  %v1616_v24 = vsel %vm1597_vm8, %v1613_v45, %v1615_v57  ;;  %v1617_v45 = vrot.slane %v4251_v52, 2 }
 0x19b   :  { %3185 = vmatprep.mubr.msk.bf16.mxu0 %vm3479_vm0, %v4714_v54 }
 0x19c   :  { %3132 = vmatmul.mubr.msk.bf16.gmra.mrb[160].mxu1 %vm287_vm3, %v1383_v6 }
 0x19d   :  { %v792_v30 = vpop.f32.mrb[56].mxu0  ;;  %3135 = vmatprep.mubr.msk.bf16.mxu1 %vm3479_vm0, %v4714_v54 }
 0x19e   :  { %v4237_v17 = vadd.f32 %v792_v30, %v586_v61  ;;  %v2967_v12 = vpop.f32.mrb[57].mxu0  ;;  %v1385_v61 = vsel %vm1364_vm7, %v1382_v20, %v1384_v11  ;;  %v1386_v20 = vrot.slane %v4251_v52, 6 }
 0x19f   :  { %v795_v29 = vpop.f32.mrb[58].mxu0  ;;  %v593_v36 = vpop.f32.mrb[56].mxu1 }
 0x1a0   :  { %v4243_v23 = vadd.f32 %v795_v29, %v589_v4  ;;  %v2968_v28 = vpop.f32.mrb[59].mxu0  ;;  %v594_v56 = vadd.f32 %v593_v36, %v4009_v47  ;;  %v2917_v0 = vpop.f32.mrb[57].mxu1 }
 0x1a1   :  { %v596_v6 = vpop.f32.mrb[58].mxu1 }
 0x1a2   :  { %3186 = vmatmul.mubr.msk.bf16.gmra.mrb[164].mxu0 %vm287_vm3, %v1616_v24  ;;  %v597_v30 = vadd.f32 %v596_v6, %v4011_v49  ;;  %v2918_v12 = vpop.f32.mrb[59].mxu1  ;;  %v1618_v24 = vsel %vm1597_vm8, %v1615_v57, %v1617_v45  ;;  %v1619_v57 = vrot.slane %v3702_v2, 2 }
 0x1a3   :  { %3189 = vmatprep.mubr.msk.bf16.mxu0 %vm3479_vm0, %v4714_v54 }
 0x1a4   :  { %3136 = vmatmul.mubr.msk.bf16.gmra.mrb[164].mxu1 %vm287_vm3, %v1385_v61 }
 0x1a5   :  { %v800_v4 = vpop.f32.mrb[60].mxu0  ;;  %3139 = vmatprep.mubr.msk.bf16.mxu1 %vm3479_vm0, %v4714_v54 }
 0x1a6   :  { %v4255_v47 = vadd.f32 %v800_v4, %v594_v56  ;;  %v2971_v29 = vpop.f32.mrb[61].mxu0  ;;  %v1387_v56 = vsel %vm1364_vm7, %v1384_v11, %v1386_v20  ;;  %v1388_v11 = vrot.slane %v3702_v2, 6 }
 0x1a7   :  { %v803_v49 = vpop.f32.mrb[62].mxu0  ;;  %v601_v36 = vpop.f32.mrb[60].mxu1 }
 0x1a8   :  { %v4261_v28 = vadd.f32 %v803_v49, %v597_v30  ;;  %v2972_v0 = vpop.f32.mrb[63].mxu0  ;;  %v602_v6 = vadd.f32 %v601_v36, %v4028_v26  ;;  %v2921_v12 = vpop.f32.mrb[61].mxu1 }
 0x1a9   :  { %v604_v61 = vpop.f32.mrb[62].mxu1 }
 0x1aa   :  { %3190 = vmatmul.mubr.msk.bf16.gmra.mrb[168].mxu0 %vm287_vm3, %v1618_v24  ;;  %v605_v4 = vadd.f32 %v604_v61, %v4030_v5  ;;  %v2922_v29 = vpop.f32.mrb[63].mxu1  ;;  %v1620_v5 = vsel %vm1597_vm8, %v1617_v45, %v1619_v57  ;;  %v1621_v45 = vrot.slane %v4049_v62, 2 }
 0x1ab   :  { %3193 = vmatprep.mubr.msk.bf16.mxu0 %vm3479_vm0, %v4714_v54 }
 0x1ac   :  { %3140 = vmatmul.mubr.msk.bf16.gmra.mrb[168].mxu1 %vm287_vm3, %v1387_v56 }
 0x1ad   :  { %v808_v30 = vpop.f32.mrb[64].mxu0  ;;  %3143 = vmatprep.mubr.msk.bf16.mxu1 %vm3479_vm0, %v4714_v54 }
 0x1ae   :  { %v4271_v49 = vadd.f32 %v808_v30, %v602_v6  ;;  %v2975_v26 = vpop.f32.mrb[65].mxu0  ;;  %v1389_v6 = vsel %vm1364_vm7, %v1386_v20, %v1388_v11 }
 0x1af   :  { %v811_v24 = vpop.f32.mrb[66].mxu0  ;;  %v609_v36 = vpop.f32.mrb[64].mxu1 }
 0x1b0   :  { %v4277_v0 = vadd.f32 %v811_v24, %v605_v4  ;;  %v2976_v12 = vpop.f32.mrb[67].mxu0  ;;  %v610_v61 = vadd.f32 %v609_v36, %v4047_v58  ;;  %v2925_v29 = vpop.f32.mrb[65].mxu1  ;;  %v1390_v24 = vrot.slane %v4049_v62, 6 }
 0x1b1   :  { %v612_v56 = vpop.f32.mrb[66].mxu1 }
 0x1b2   :  { %3194 = vmatmul.mubr.msk.bf16.gmra.mrb[172].mxu0 %vm287_vm3, %v1620_v5  ;;  %v613_v30 = vadd.f32 %v612_v56, %v4051_v10  ;;  %v2926_v26 = vpop.f32.mrb[67].mxu1  ;;  %v1622_v10 = vsel %vm1597_vm8, %v1619_v57, %v1621_v45  ;;  %v1833_v57 = vrot.slane %v3611_v25, 3 }
 0x1b3   :  { %3197 = vmatprep.mubr.msk.bf16.mxu0 %vm3479_vm0, %v4714_v54 }
 0x1b4   :  { %3144 = vmatmul.mubr.msk.bf16.gmra.mrb[172].mxu1 %vm287_vm3, %v1389_v6  ;;  %v1391_v6 = vsel %vm1364_vm7, %v1388_v11, %v1390_v24 }
 0x1b5   :  { %v816_v4 = vpop.f32.mrb[68].mxu0  ;;  %3147 = vmatprep.mubr.msk.bf16.mxu1 %vm3479_vm0, %v4714_v54 }
 0x1b6   :  { %v4288_v58 = vadd.f32 %v816_v4, %v610_v61  ;;  %v2979_v36 = vpop.f32.mrb[69].mxu0  ;;  %v1829_v61 = vrot.slane %v3602_v19, 2  ;;  %v1830_v4 = vrot.slane %v3579_v7, 3 }
 0x1b7   :  { %v819_v20 = vpop.f32.mrb[70].mxu0  ;;  %v617_v5 = vpop.f32.mrb[68].mxu1  ;;  %v1832_v36 = vrot.slane %v3641_v38, 2 }
 0x1b8   :  { %v4293_v12 = vadd.f32 %v819_v20, %v613_v30  ;;  %v2980_v29 = vpop.f32.mrb[71].mxu0  ;;  %v618_v56 = vadd.f32 %v617_v5, %v4072_v16  ;;  %v2929_v26 = vpop.f32.mrb[69].mxu1  ;;  %v1831_v7 = vor.u32 %v1830_v4, %v1829_v61  ;;  %v3344_v4 = vld [vmem:[#allocation2 + $0x8] sm:$0xff]  }
 0x1b9   :  { %v620_v2 = vpop.f32.mrb[70].mxu1  ;;  %v1834_v19 = vor.u32 %v1833_v57, %v1832_v36  ;;  %v1836_v26 = vrot.slane %v3670_v50, 2  ;;  %v2086_v36 = vrot.slane %v3344_v4, 3  ;;  %v3345_v57 = vld [vmem:[#allocation2 + $0x10] sm:$0xff]  }
 0x1ba   :  { %3198 = vmatmul.mubr.msk.bf16.gmra.mrb[176].mxu0 %vm287_vm3, %v1622_v10  ;;  %v621_v30 = vadd.f32 %v620_v2, %v4074_v55  ;;  %v2930_v20 = vpop.f32.mrb[71].mxu1 }
 0x1bb   :  { %3201 = vmatprep.mubr.msk.bf16.mxu0 %vm3479_vm0, %v4714_v54 }
 0x1bc   :  { %3148 = vmatmul.mubr.msk.bf16.gmra.mrb[176].mxu1 %vm287_vm3, %v1391_v6  ;;  %v1837_v6 = vrot.slane %v3644_v39, 3 }
 0x1bd   :  { %v824_v16 = vpop.f32.mrb[72].mxu0  ;;  %3207 = vmatprep.mubr.msk.bf16.mxu1 %vm3479_vm0, %v4714_v54 }
 0x1be   :  { %v4306_v11 = vadd.f32 %v824_v16, %v618_v56  ;;  %v2983_v24 = vpop.f32.mrb[73].mxu0  ;;  %v1835_v56 = vsel %vm1828_vm9, %v1831_v7, %v1834_v19  ;;  %v1838_v50 = vor.u32 %v1837_v6, %v1836_v26  ;;  %v3346_v6 = vld [vmem:[#allocation2 + $0x18] sm:$0xff]  }
 0x1bf   :  { %v827_v38 = vpop.f32.mrb[74].mxu0  ;;  %v625_v25 = vpop.f32.mrb[72].mxu1 }
 0x1c0   :  { %v4310_v10 = vadd.f32 %v827_v38, %v621_v30  ;;  %v2984_v2 = vpop.f32.mrb[75].mxu0  ;;  %v626_v55 = vadd.f32 %v625_v25, %v4090_v9  ;;  %v2933_v5 = vpop.f32.mrb[73].mxu1  ;;  %v2087_v30 = vrot.slane %v3345_v57, 3 }
 0x1c1   :  { %v628_v29 = vpop.f32.mrb[74].mxu1  ;;  %v1839_v5 = vsel %vm1828_vm9, %v1834_v19, %v1838_v50 }
 0x1c2   :  { %3202 = vmatmul.mubr.msk.bf16.gmra.mrb[180].mxu0 %vm287_vm3, %v1621_v45  ;;  %v2934_v61 = vpop.f32.mrb[75].mxu1  ;;  %v2088_v16 = vsel %vm2085_vm10, %v2086_v36, %v2087_v30  ;;  %v1841_v29 = vrot.slane %v3673_v51, 3 }
 0x1c3   :  { %3261 = vmatprep.mubr.msk.bf16.mxu0 %vm3479_vm0, %v4714_v54  ;;  %v2089_v61 = vrot.slane %v3346_v6, 3 }
 0x1c4   :  { %3208 = vmatmul.mubr.msk.bf16.vlgmr.msra.gmra.mrb[180].mxu1 %vm287_vm3, %v1835_v56 }
 0x1c5   :  { %v832_v9 = vpop.f32.mrb[76].mxu0  ;;  %3211 = vmatprep.mubr.msk.bf16.mxu1 %vm3479_vm0, %v4714_v54  ;;  %v2090_v51 = vsel %vm2085_vm10, %v2087_v30, %v2089_v61  ;;  %v3347_v30 = vld [vmem:[#allocation2 + $0x20] sm:$0xff]  }
 0x1c6   :  { %v4320_v20 = vadd.f32 %v832_v9, %v626_v55  ;;  %v2987_v45 = vpop.f32.mrb[77].mxu0  ;;  %v1840_v55 = vrot.slane %v3696_v63, 2 }
 0x1c7   :  { %v835_v39 = vpop.f32.mrb[78].mxu0  ;;  %v969_v24 = vpop.f32.mrb[76].mxu1 }
 0x1c8   :  { %v2988_v7 = vpop.f32.mrb[79].mxu0  ;;  %v1071_v38 = vadd.f32 %v969_v24, %v4117_v8  ;;  %v2993_v25 = vpop.f32.mrb[77].mxu1  ;;  %v1842_v63 = vor.u32 %v1841_v29, %v1840_v55 }
 0x1c9   :  { %v972_v2 = vpop.f32.mrb[78].mxu1  ;;  %v1844_v7 = vrot.slane %v3733_v31, 2 }
 0x1ca   :  { %3262 = vmatmul.mubr.msk.bf16.vlgmr.msra.gmra.mrb[184].mxu0 %vm287_vm3, %v2088_v16  ;;  %v1072_v56 = vadd.f32 %v972_v2, %v4123_v37  ;;  %v2994_v26 = vpop.f32.mrb[79].mxu1  ;;  %v1843_v24 = vsel %vm1828_vm9, %v1838_v50, %v1842_v63 }
 0x1cb   :  { %3265 = vmatprep.mubr.msk.bf16.mxu0 %vm3479_vm0, %v4714_v54 }
 0x1cc   :  { %3212 = vmatmul.mubr.msk.bf16.gmra.mrb[184].mxu1 %vm287_vm3, %v1839_v5  ;;  %v2091_v5 = vrot.slane %v3347_v30, 3 }
 0x1cd   :  { %v1235_v8 = vpop.f32.mrb[80].mxu0  ;;  %3215 = vmatprep.mubr.msk.bf16.mxu1 %vm3479_vm0, %v4714_v54 }
 0x1ce   :  { %v4334_v4 = vadd.f32 %v1235_v8, %v1071_v38  ;;  %v3047_v19 = vpop.f32.mrb[81].mxu0  ;;  %v1845_v38 = vrot.slane %v3699_v1, 3  ;;  %v2092_v1 = vsel %vm2085_vm10, %v2089_v61, %v2091_v5  ;;  %v3348_v61 = vld [vmem:[#allocation2 + $0x28] sm:$0xff]  }
 0x1cf   :  { %v1238_v36 = vpop.f32.mrb[82].mxu0  ;;  %v977_v37 = vpop.f32.mrb[80].mxu1 }
 0x1d0   :  { %v4339_v57 = vadd.f32 %v1238_v36, %v1072_v56  ;;  %v3048_v9 = vpop.f32.mrb[83].mxu0  ;;  %v1073_v45 = vadd.f32 %v977_v37, %v4133_v3  ;;  %v2997_v39 = vpop.f32.mrb[81].mxu1  ;;  %v1846_v31 = vor.u32 %v1845_v38, %v1844_v7  ;;  %v1849_v37 = vrot.slane %v3736_v33, 3 }
 0x1d1   :  { %v980_v16 = vpop.f32.mrb[82].mxu1  ;;  %v2093_v39 = vrot.slane %v3348_v61, 3  ;;  %v1856_v61 = vrot.slane %v3618_v27, 2 }
 0x1d2   :  { %3266 = vmatmul.mubr.msk.bf16.gmra.mrb[188].mxu0 %vm287_vm3, %v2090_v51  ;;  %v1074_v25 = vadd.f32 %v980_v16, %v4139_v60  ;;  %v2998_v2 = vpop.f32.mrb[83].mxu1  ;;  %v1847_v36 = vsel %vm1828_vm9, %v1842_v63, %v1846_v31  ;;  %v1848_v51 = vrot.slane %v3754_v43, 2 }
 0x1d3   :  { %3269 = vmatprep.mubr.msk.bf16.mxu0 %vm3479_vm0, %v4714_v54  ;;  %v2094_v33 = vsel %vm2085_vm10, %v2091_v5, %v2093_v39  ;;  %v3349_v5 = vld [vmem:[#allocation2 + $0x30] sm:$0xff]  }
 0x1d4   :  { %3216 = vmatmul.mubr.msk.bf16.gmra.mrb[188].mxu1 %vm287_vm3, %v1843_v24  ;;  %v1850_v43 = vor.u32 %v1849_v37, %v1848_v51 }
 0x1d5   :  { %v1243_v3 = vpop.f32.mrb[84].mxu0  ;;  %3219 = vmatprep.mubr.msk.bf16.mxu1 %vm3479_vm0, %v4714_v54 }
 0x1d6   :  { %v4350_v55 = vadd.f32 %v1243_v3, %v1073_v45  ;;  %v3051_v50 = vpop.f32.mrb[85].mxu0  ;;  %v1851_v3 = vsel %vm1828_vm9, %v1846_v31, %v1850_v43 }
 0x1d7   :  { %v1246_v29 = vpop.f32.mrb[86].mxu0  ;;  %v985_v60 = vpop.f32.mrb[84].mxu1  ;;  %v1852_v50 = vrot.slane %v3592_v14, 2 }
 0x1d8   :  { %v4355_v56 = vadd.f32 %v1246_v29, %v1074_v25  ;;  %v3052_v26 = vpop.f32.mrb[87].mxu0  ;;  %v1075_v6 = vadd.f32 %v985_v60, %v4149_v59  ;;  %v3001_v8 = vpop.f32.mrb[85].mxu1  ;;  %v1853_v29 = vrot.slane %v3589_v13, 3 }
 0x1d9   :  { %v988_v19 = vpop.f32.mrb[86].mxu1  ;;  %v2095_v26 = vrot.slane %v3349_v5, 3 }
 0x1da   :  { %3270 = vmatmul.mubr.msk.bf16.gmra.mrb[192].mxu0 %vm287_vm3, %v2092_v1  ;;  %v1076_v9 = vadd.f32 %v988_v19, %v4155_v44  ;;  %v3002_v45 = vpop.f32.mrb[87].mxu1  ;;  %v1854_v14 = vor.u32 %v1853_v29, %v1852_v50  ;;  %v1860_v50 = vrot.slane %v3650_v41, 2  ;;  %v4716_v29 = vld [vmem:[#allocation15_spill] sm:$0xff] }
 0x1db   :  { %3273 = vmatprep.mubr.msk.bf16.mxu0 %vm3479_vm0, %v4714_v54  ;;  %v2096_v13 = vsel %vm2085_vm10, %v2093_v39, %v2095_v26  ;;  %v2097_v39 = vrot.slane %v4179_v21, 3 }
 0x1dc   :  { %3220 = vmatmul.mubr.msk.bf16.gmra.mrb[192].mxu1 %vm287_vm3, %v1847_v36  ;;  %v1855_v45 = vsel %vm1828_vm9, %v1850_v43, %v1854_v14 }
 0x1dd   :  { %v1251_v59 = vpop.f32.mrb[88].mxu0  ;;  %3223 = vmatprep.mubr.msk.bf16.mxu1 %vm3479_vm0, %v4714_v54 }
 0x1de   :  { %v4366_v16 = vadd.f32 %v1251_v59, %v1075_v6  ;;  %v3055_v63 = vpop.f32.mrb[89].mxu0  ;;  %v1857_v59 = vrot.slane %v3595_v15, 3  ;;  %v2098_v15 = vsel %vm2085_vm10, %v2095_v26, %v2097_v39  ;;  %v2099_v26 = vrot.slane %v4197_v18, 3 }
 0x1df   :  { %v1254_v24 = vpop.f32.mrb[90].mxu0  ;;  %v993_v44 = vpop.f32.mrb[88].mxu1 }
 0x1e0   :  { %v4371_v7 = vadd.f32 %v1254_v24, %v1076_v9  ;;  %v3056_v38 = vpop.f32.mrb[91].mxu0  ;;  %v1077_v25 = vadd.f32 %v993_v44, %v4165_v53  ;;  %v3005_v2 = vpop.f32.mrb[89].mxu1  ;;  %v1858_v27 = vor.u32 %v1857_v59, %v1856_v61  ;;  %v4718_v61 = vld [vmem:[#allocation16_spill] sm:$0xff] }
 0x1e1   :  { %v996_v30 = vpop.f32.mrb[90].mxu1  ;;  %v1865_v59 = vrot.slane %v4718_v61, 3 }
 0x1e2   :  { %3274 = vmatmul.mubr.msk.bf16.gmra.mrb[196].mxu0 %vm287_vm3, %v2094_v33  ;;  %v1078_v1 = vadd.f32 %v996_v30, %v4171_v34  ;;  %v3006_v60 = vpop.f32.mrb[91].mxu1 }
 0x1e3   :  { %3277 = vmatprep.mubr.msk.bf16.mxu0 %vm3479_vm0, %v4714_v54 }
 0x1e4   :  { %3224 = vmatmul.mubr.msk.bf16.gmra.mrb[196].mxu1 %vm287_vm3, %v1851_v3  ;;  %v1859_v3 = vsel %vm1828_vm9, %v1854_v14, %v1858_v27 }
 0x1e5   :  { %v1259_v53 = vpop.f32.mrb[92].mxu0  ;;  %3227 = vmatprep.mubr.msk.bf16.mxu1 %vm3479_vm0, %v4714_v54 }
 0x1e6   :  { %v4382_v6 = vadd.f32 %v1259_v53, %v1077_v25  ;;  %v3059_v31 = vpop.f32.mrb[93].mxu0 }
 0x1e7   :  { %v1262_v8 = vpop.f32.mrb[94].mxu0  ;;  %v1001_v34 = vpop.f32.mrb[92].mxu1 }
 0x1e8   :  { %v4387_v19 = vadd.f32 %v1262_v8, %v1078_v1  ;;  %v3060_v36 = vpop.f32.mrb[95].mxu0  ;;  %v1079_v51 = vadd.f32 %v1001_v34, %v4183_v22  ;;  %v3009_v37 = vpop.f32.mrb[93].mxu1  ;;  %v1861_v1 = vrot.slane %v4716_v29, 3  ;;  %v2100_v8 = vsel %vm2085_vm10, %v2097_v39, %v2099_v26  ;;  %v4720_v29 = vld [vmem:[#allocation18_spill] sm:$0xff] }
 0x1e9   :  { %v1004_v9 = vpop.f32.mrb[94].mxu1  ;;  %v2101_v39 = vrot.slane %v4215_v46, 3 }
 0x1ea   :  { %3278 = vmatmul.mubr.msk.bf16.gmra.mrb[200].mxu0 %vm287_vm3, %v2096_v13  ;;  %v1080_v63 = vadd.f32 %v1004_v9, %v4189_v42  ;;  %v3010_v24 = vpop.f32.mrb[95].mxu1  ;;  %v1862_v41 = vor.u32 %v1861_v1, %v1860_v50  ;;  %v4717_v9 = vld [vmem:[#allocation17_spill] sm:$0xff]  ;;  %v1869_v1 = vrot.slane %v4720_v29, 3  ;;  %v4725_v29 = vshll.u32 %v4049_v62, 16 }
 0x1eb   :  { %3281 = vmatprep.mubr.msk.bf16.mxu0 %vm3479_vm0, %v4714_v54 }
 0x1ec   :  { %3228 = vmatmul.mubr.msk.bf16.gmra.mrb[200].mxu1 %vm287_vm3, %v1855_v45  ;;  %v1863_v37 = vsel %vm1828_vm9, %v1858_v27, %v1862_v41  ;;  %v1864_v45 = vrot.slane %v4717_v9, 2 }
 0x1ed   :  { %v1267_v22 = vpop.f32.mrb[96].mxu0  ;;  %3231 = vmatprep.mubr.msk.bf16.mxu1 %vm3479_vm0, %v4714_v54 }
 0x1ee   :  { %v4399_v33 = vadd.f32 %v1267_v22, %v1079_v51  ;;  %v3063_v43 = vpop.f32.mrb[97].mxu0  ;;  %v1866_v27 = vor.u32 %v1865_v59, %v1864_v45  ;;  %v4722_v45 = vld [vmem:[#allocation22_spill] sm:$0xff]  ;;  %v4723_v59 = vld [vmem:[#allocation21_spill] sm:$0xff] }
 0x1ef   :  { %v1270_v44 = vpop.f32.mrb[98].mxu0  ;;  %v1009_v42 = vpop.f32.mrb[96].mxu1  ;;  %v1872_v61 = vrot.slane %v4722_v45, 2 }
 0x1f0   :  { %v4404_v38 = vadd.f32 %v1270_v44, %v1080_v63  ;;  %v3064_v25 = vpop.f32.mrb[99].mxu0  ;;  %v1081_v2 = vadd.f32 %v1009_v42, %v4201_v35  ;;  %v3013_v21 = vpop.f32.mrb[97].mxu1 }
 0x1f1   :  { %v1012_v30 = vpop.f32.mrb[98].mxu1 }
 0x1f2   :  { %3282 = vmatmul.mubr.msk.bf16.gmra.mrb[204].mxu0 %vm287_vm3, %v2098_v15  ;;  %v1082_v60 = vadd.f32 %v1012_v30, %v4207_v32  ;;  %v3014_v5 = vpop.f32.mrb[99].mxu1  ;;  %v2102_v15 = vsel %vm2085_vm10, %v2099_v26, %v2101_v39  ;;  %v1867_v30 = vsel %vm1828_vm9, %v1862_v41, %v1866_v27  ;;  %v4721_v26 = vld [vmem:[#allocation23_spill] sm:$0xff] }
 0x1f3   :  { %3285 = vmatprep.mubr.msk.bf16.mxu0 %vm3479_vm0, %v4714_v54 }
 0x1f4   :  { %3232 = vmatmul.mubr.msk.bf16.gmra.mrb[204].mxu1 %vm287_vm3, %v1859_v3  ;;  %v4719_v3 = vld [vmem:[#allocation20_spill] sm:$0xff] }
 0x1f5   :  { %v1275_v35 = vpop.f32.mrb[100].mxu0  ;;  %3235 = vmatprep.mubr.msk.bf16.mxu1 %vm3479_vm0, %v4714_v54  ;;  %v1868_v50 = vrot.slane %v4719_v3, 2  ;;  %v4724_v3 = vshrl.u32 %v4049_v62, 16 }
 0x1f6   :  { %v4416_v53 = vadd.f32 %v1275_v35, %v1081_v2  ;;  %v3067_v31 = vpop.f32.mrb[101].mxu0  ;;  %v2103_v35 = vrot.slane %v4721_v26, 3  ;;  %v4726_v26 = vld [vmem:[#allocation19_spill] sm:$0xff] }
 0x1f7   :  { %v1278_v14 = vpop.f32.mrb[102].mxu0  ;;  %v1017_v32 = vpop.f32.mrb[100].mxu1 }
 0x1f8   :  { %v4421_v13 = vadd.f32 %v1278_v14, %v1082_v60  ;;  %v3068_v34 = vpop.f32.mrb[103].mxu0  ;;  %v1083_v36 = vadd.f32 %v1017_v32, %v4219_v48  ;;  %v3017_v18 = vpop.f32.mrb[101].mxu1  ;;  %v1870_v14 = vor.u32 %v1869_v1, %v1868_v50  ;;  %v2104_v32 = vsel %vm2085_vm10, %v2101_v39, %v2103_v35 }
 0x1f9   :  { %v1020_v51 = vpop.f32.mrb[102].mxu1  ;;  %v2105_v39 = vrot.slane %v4251_v52, 3  ;;  %v1876_v50 = vrot.slane %v4724_v3, 2  ;;  %v1877_v1 = vrot.slane %v4725_v29, 3 }
 0x1fa   :  { %3286 = vmatmul.mubr.msk.bf16.gmra.mrb[208].mxu0 %vm287_vm3, %v2100_v8  ;;  %v1084_v63 = vadd.f32 %v1020_v51, %v4225_v40  ;;  %v3018_v24 = vpop.f32.mrb[103].mxu1  ;;  %v1871_v9 = vsel %vm1828_vm9, %v1866_v27, %v1870_v14 }
 0x1fb   :  { %3289 = vmatprep.mubr.msk.bf16.mxu0 %vm3479_vm0, %v4714_v54 }
 0x1fc   :  { %3236 = vmatmul.mubr.msk.bf16.gmra.mrb[208].mxu1 %vm287_vm3, %v1863_v37 }
 0x1fd   :  { %v1283_v48 = vpop.f32.mrb[104].mxu0  ;;  %3239 = vmatprep.mubr.msk.bf16.mxu1 %vm3479_vm0, %v4714_v54 }
 0x1fe   :  { %v4433_v22 = vadd.f32 %v1283_v48, %v1083_v36  ;;  %v3071_v43 = vpop.f32.mrb[105].mxu0 }
 0x1ff   :  { %v1286_v44 = vpop.f32.mrb[106].mxu0  ;;  %v1025_v40 = vpop.f32.mrb[104].mxu1 }
 0x200   :  { %v4438_v42 = vadd.f32 %v1286_v44, %v1084_v63  ;;  %v3072_v25 = vpop.f32.mrb[107].mxu0  ;;  %v1085_v2 = vadd.f32 %v1025_v40, %v4237_v17  ;;  %v3021_v46 = vpop.f32.mrb[105].mxu1  ;;  %v1873_v63 = vrot.slane %v4723_v59, 3  ;;  %v2106_v40 = vsel %vm2085_vm10, %v2103_v35, %v2105_v39 }
 0x201   :  { %v1028_v21 = vpop.f32.mrb[106].mxu1 }
 0x202   :  { %3290 = vmatmul.mubr.msk.bf16.gmra.mrb[212].mxu0 %vm287_vm3, %v2102_v15  ;;  %v1086_v60 = vadd.f32 %v1028_v21, %v4243_v23  ;;  %v3022_v5 = vpop.f32.mrb[107].mxu1  ;;  %v1874_v44 = vor.u32 %v1873_v63, %v1872_v61  ;;  %v3350_v61 = vld [vmem:[#allocation5 + $0x4] sm:$0xff]  }
 0x203   :  { %3293 = vmatprep.mubr.msk.bf16.mxu0 %vm3479_vm0, %v4714_v54  ;;  %v2109_v59 = vrot.slane %v3350_v61, 3 }
 0x204   :  { %3240 = vmatmul.mubr.msk.bf16.gmra.mrb[212].mxu1 %vm287_vm3, %v1867_v30  ;;  %v1875_v30 = vsel %vm1828_vm9, %v1870_v14, %v1874_v44  ;;  %v1878_v14 = vor.u32 %v1877_v1, %v1876_v50 }
 0x205   :  { %v1291_v17 = vpop.f32.mrb[108].mxu0  ;;  %3243 = vmatprep.mubr.msk.bf16.mxu1 %vm3479_vm0, %v4714_v54 }
 0x206   :  { %v4450_v31 = vadd.f32 %v1291_v17, %v1085_v2  ;;  %v3075_v41 = vpop.f32.mrb[109].mxu0 }
 0x207   :  { %v1294_v8 = vpop.f32.mrb[110].mxu0  ;;  %v1033_v23 = vpop.f32.mrb[108].mxu1 }
 0x208   :  { %v4455_v34 = vadd.f32 %v1294_v8, %v1086_v60  ;;  %v3076_v36 = vpop.f32.mrb[111].mxu0  ;;  %v1087_v18 = vadd.f32 %v1033_v23, %v4255_v47  ;;  %v3025_v51 = vpop.f32.mrb[109].mxu1 }
 0x209   :  { %v1036_v37 = vpop.f32.mrb[110].mxu1 }
 0x20a   :  { %3294 = vmatmul.mubr.msk.bf16.gmra.mrb[216].mxu0 %vm287_vm3, %v2104_v32  ;;  %v1088_v24 = vadd.f32 %v1036_v37, %v4261_v28  ;;  %v3026_v48 = vpop.f32.mrb[111].mxu1  ;;  %v1879_v37 = vsel %vm1828_vm9, %v1874_v44, %v1878_v14 }
 0x20b   :  { %3297 = vmatprep.mubr.msk.bf16.mxu0 %vm3479_vm0, %v4714_v54 }
 0x20c   :  { %3244 = vmatmul.mubr.msk.bf16.gmra.mrb[216].mxu1 %vm287_vm3, %v1871_v9 }
 0x20d   :  { %v1299_v47 = vpop.f32.mrb[112].mxu0  ;;  %3247 = vmatprep.mubr.msk.bf16.mxu1 %vm3479_vm0, %v4714_v54 }
 0x20e   :  { %v4467_v43 = vadd.f32 %v1299_v47, %v1087_v18  ;;  %v3079_v27 = vpop.f32.mrb[113].mxu0 }
 0x20f   :  { %v1302_v15 = vpop.f32.mrb[114].mxu0  ;;  %v1041_v28 = vpop.f32.mrb[112].mxu1 }
 0x210   :  { %v4472_v25 = vadd.f32 %v1302_v15, %v1088_v24  ;;  %v3080_v2 = vpop.f32.mrb[115].mxu0  ;;  %v1089_v46 = vadd.f32 %v1041_v28, %v4271_v49  ;;  %v3029_v52 = vpop.f32.mrb[113].mxu1  ;;  %v2107_v49 = vrot.slane %v4726_v26, 3 }
 0x211   :  { %v1044_v21 = vpop.f32.mrb[114].mxu1 }
 0x212   :  { %3298 = vmatmul.mubr.msk.bf16.gmra.mrb[220].mxu0 %vm287_vm3, %v2106_v40  ;;  %v1090_v60 = vadd.f32 %v1044_v21, %v4277_v0  ;;  %v3030_v5 = vpop.f32.mrb[115].mxu1  ;;  %v2108_v8 = vsel %vm2085_vm10, %v2105_v39, %v2107_v49  ;;  %v2110_v39 = vsel %vm2085_vm10, %v2107_v49, %v2109_v59 }
 0x213   :  { %3301 = vmatprep.mubr.msk.bf16.mxu0 %vm3479_vm0, %v4714_v54 }
 0x214   :  { %3248 = vmatmul.mubr.msk.bf16.gmra.mrb[220].mxu1 %vm287_vm3, %v1875_v30 }
 0x215   :  { %v1307_v35 = vpop.f32.mrb[116].mxu0  ;;  %3251 = vmatprep.mubr.msk.bf16.mxu1 %vm3479_vm0, %v4714_v54 }
 0x216   :  { %v4486_v17 = vadd.f32 %v1307_v35, %v1089_v46  ;;  %v3083_v41 = vpop.f32.mrb[117].mxu0 }
 0x217   :  { %v1310_v62 = vpop.f32.mrb[118].mxu0  ;;  %v1049_v0 = vpop.f32.mrb[116].mxu1 }
 0x218   :  { %v4491_v32 = vadd.f32 %v1310_v62, %v1090_v60  ;;  %v3084_v23 = vpop.f32.mrb[119].mxu0  ;;  %v1091_v36 = vadd.f32 %v1049_v0, %v4288_v58  ;;  %v3033_v18 = vpop.f32.mrb[117].mxu1 }
 0x219   :  { %v1052_v51 = vpop.f32.mrb[118].mxu1 }
 0x21a   :  { %3302 = vmatmul.mubr.msk.bf16.gmra.mrb[224].mxu0 %vm287_vm3, %v2108_v8  ;;  %v1092_v9 = vadd.f32 %v1052_v51, %v4293_v12  ;;  %v3034_v45 = vpop.f32.mrb[119].mxu1 }
 0x21b   :  { %3305 = vmatprep.mubr.msk.bf16.mxu0 %vm3479_vm0, %v4714_v54 }
 0x21c   :  { %3252 = vmatmul.mubr.msk.bf16.gmra.mrb[224].mxu1 %vm287_vm3, %v1879_v37 }
 0x21d   :  { %v1315_v63 = vpop.f32.mrb[120].mxu0  ;;  %3255 = vmatprep.mubr.msk.bf16.mxu1 %vm3479_vm0, %v4714_v54 }
 0x21e   :  { %v4500_v24 = vadd.f32 %v1315_v63, %v1091_v36  ;;  %v3087_v58 = vpop.f32.mrb[121].mxu0 }
 0x21f   :  { %v1318_v48 = vpop.f32.mrb[122].mxu0  ;;  %v1057_v47 = vpop.f32.mrb[120].mxu1 }
 0x220   :  { %v4505_v12 = vadd.f32 %v1318_v48, %v1092_v9  ;;  %v3088_v27 = vpop.f32.mrb[123].mxu0  ;;  %v1093_v44 = vadd.f32 %v1057_v47, %v4306_v11  ;;  %v3037_v15 = vpop.f32.mrb[121].mxu1 }
 0x221   :  { %v1060_v40 = vpop.f32.mrb[122].mxu1 }
 0x222   :  { %3306 = vmatmul.mubr.msk.bf16.gmra.mrb[228].mxu0 %vm287_vm3, %v2110_v39  ;;  %v1094_v28 = vadd.f32 %v1060_v40, %v4310_v10  ;;  %v3038_v2 = vpop.f32.mrb[123].mxu1 }
 0x223   :  { %3309 = vmatprep.mubr.msk.bf16.mxu0 %vm3479_vm0, %v4714_v54 }
 0x224   :  { %3256 = vmatmul.mubr.msk.bf16.gmra.mrb[228].mxu1 %vm287_vm3, %v1878_v14 }
 0x225   :  { %v1323_v46 = vpop.f32.mrb[124].mxu0 }
 0x226   :  { %v4513_v52 = vadd.f32 %v1323_v46, %v1093_v44  ;;  %v3091_v21 = vpop.f32.mrb[125].mxu0 }
 0x227   :  { %v1326_v30 = vpop.f32.mrb[126].mxu0  ;;  %v1065_v3 = vpop.f32.mrb[124].mxu1 }
 0x228   :  { %v4515_v50 = vadd.f32 %v1326_v30, %v1094_v28  ;;  %v3092_v11 = vpop.f32.mrb[127].mxu0  ;;  %v1095_v29 = vadd.f32 %v1065_v3, %v4320_v20  ;;  %v3041_v1 = vpop.f32.mrb[125].mxu1 }
 0x229   :  { %v1068_v60 = vpop.f32.mrb[126].mxu1 }
 0x22a   :  { %3310 = vmatmul.mubr.msk.bf16.gmra.mrb[232].mxu0 %vm287_vm3, %v2109_v59  ;;  %v3042_v10 = vpop.f32.mrb[127].mxu1 }
 0x22d   :  { %v1331_v5 = vpop.f32.mrb[128].mxu0 }
 0x22e   :  { %v4519_v54 = vadd.f32 %v1331_v5, %v1095_v29  ;;  %v3095_v26 = vpop.f32.mrb[129].mxu0 }
 0x22f   :  { %v1334_v49 = vpop.f32.mrb[130].mxu0  ;;  %v1468_v35 = vpop.f32.mrb[128].mxu1 }
 0x230   :  { %v3096_v41 = vpop.f32.mrb[131].mxu0  ;;  %v1570_v14 = vadd.f32 %v1468_v35, %v4334_v4  ;;  %v3101_v62 = vpop.f32.mrb[129].mxu1 }
 0x231   :  { %v1471_v8 = vpop.f32.mrb[130].mxu1 }
 0x232   :  { %v1571_v0 = vadd.f32 %v1471_v8, %v4339_v57  ;;  %v3102_v23 = vpop.f32.mrb[131].mxu1 }
 0x235   :  { %v1699_v20 = vpop.f32.mrb[132].mxu0 }
 0x236   :  { %v4523_v36 = vadd.f32 %v1699_v20, %v1570_v14  ;;  %v3155_v18 = vpop.f32.mrb[133].mxu0 }
 0x237   :  { %v1702_v51 = vpop.f32.mrb[134].mxu0  ;;  %v1476_v37 = vpop.f32.mrb[132].mxu1 }
 0x238   :  { %v4525_v9 = vadd.f32 %v1702_v51, %v1571_v0  ;;  %v3156_v45 = vpop.f32.mrb[135].mxu0  ;;  %v1572_v61 = vadd.f32 %v1476_v37, %v4350_v55  ;;  %v3105_v59 = vpop.f32.mrb[133].mxu1 }
 0x239   :  { %v1479_v63 = vpop.f32.mrb[134].mxu1 }
 0x23a   :  { %v1573_v4 = vadd.f32 %v1479_v63, %v4355_v56  ;;  %v3106_v58 = vpop.f32.mrb[135].mxu1 }
 0x23d   :  { %v1707_v48 = vpop.f32.mrb[136].mxu0 }
 0x23e   :  { %v4529_v39 = vadd.f32 %v1707_v48, %v1572_v61  ;;  %v3159_v57 = vpop.f32.mrb[137].mxu0 }
 0x23f   :  { %v1710_v47 = vpop.f32.mrb[138].mxu0  ;;  %v1484_v27 = vpop.f32.mrb[136].mxu1 }
 0x240   :  { %v4531_v44 = vadd.f32 %v1710_v47, %v1573_v4  ;;  %v3160_v15 = vpop.f32.mrb[139].mxu0  ;;  %v1574_v40 = vadd.f32 %v1484_v27, %v4366_v16  ;;  %v3109_v28 = vpop.f32.mrb[137].mxu1 }
 0x241   :  { %v1487_v2 = vpop.f32.mrb[138].mxu1 }
 0x242   :  { %v1575_v55 = vadd.f32 %v1487_v2, %v4371_v7  ;;  %v3110_v46 = vpop.f32.mrb[139].mxu1 }
 0x245   :  { %v1715_v21 = vpop.f32.mrb[140].mxu0 }
 0x246   :  { %v4535_v30 = vadd.f32 %v1715_v21, %v1574_v40  ;;  %v3163_v56 = vpop.f32.mrb[141].mxu0 }
 0x247   :  { %v1718_v3 = vpop.f32.mrb[142].mxu0  ;;  %v1492_v11 = vpop.f32.mrb[140].mxu1 }
 0x248   :  { %v4537_v29 = vadd.f32 %v1718_v3, %v1575_v55  ;;  %v3164_v1 = vpop.f32.mrb[143].mxu0  ;;  %v1576_v60 = vadd.f32 %v1492_v11, %v4382_v6  ;;  %v3113_v10 = vpop.f32.mrb[141].mxu1 }
 0x249   :  { %v1495_v5 = vpop.f32.mrb[142].mxu1 }
 0x24a   :  { %v1577_v16 = vadd.f32 %v1495_v5, %v4387_v19  ;;  %v3114_v26 = vpop.f32.mrb[143].mxu1 }
 0x24d   :  { %v1723_v49 = vpop.f32.mrb[144].mxu0 }
 0x24e   :  { %v4541_v35 = vadd.f32 %v1723_v49, %v1576_v60  ;;  %v3167_v7 = vpop.f32.mrb[145].mxu0 }
 0x24f   :  { %v1726_v41 = vpop.f32.mrb[146].mxu0  ;;  %v1500_v14 = vpop.f32.mrb[144].mxu1 }
 0x250   :  { %v4543_v62 = vadd.f32 %v1726_v41, %v1577_v16  ;;  %v3168_v8 = vpop.f32.mrb[147].mxu0  ;;  %v1578_v0 = vadd.f32 %v1500_v14, %v4399_v33  ;;  %v3117_v23 = vpop.f32.mrb[145].mxu1 }
 0x251   :  { %v1503_v20 = vpop.f32.mrb[146].mxu1 }
 0x252   :  { %v1579_v6 = vadd.f32 %v1503_v20, %v4404_v38  ;;  %v3118_v18 = vpop.f32.mrb[147].mxu1 }
 0x255   :  { %v1731_v51 = vpop.f32.mrb[148].mxu0 }
 0x256   :  { %v4547_v37 = vadd.f32 %v1731_v51, %v1578_v0  ;;  %v3171_v19 = vpop.f32.mrb[149].mxu0 }
 0x257   :  { %v1734_v45 = vpop.f32.mrb[150].mxu0  ;;  %v1508_v61 = vpop.f32.mrb[148].mxu1 }
 0x258   :  { %v4549_v59 = vadd.f32 %v1734_v45, %v1579_v6  ;;  %v3172_v63 = vpop.f32.mrb[151].mxu0  ;;  %v1580_v4 = vadd.f32 %v1508_v61, %v4416_v53  ;;  %v3121_v58 = vpop.f32.mrb[149].mxu1 }
 0x259   :  { %v1511_v48 = vpop.f32.mrb[150].mxu1 }
 0x25a   :  { %v1581_v33 = vadd.f32 %v1511_v48, %v4421_v13  ;;  %v3122_v57 = vpop.f32.mrb[151].mxu1 }
 0x25d   :  { %v1739_v47 = vpop.f32.mrb[152].mxu0 }
 0x25e   :  { %v4553_v27 = vadd.f32 %v1739_v47, %v1580_v4  ;;  %v3175_v38 = vpop.f32.mrb[153].mxu0 }
 0x25f   :  { %v1742_v15 = vpop.f32.mrb[154].mxu0  ;;  %v1516_v40 = vpop.f32.mrb[152].mxu1 }
 0x260   :  { %v4555_v28 = vadd.f32 %v1742_v15, %v1581_v33  ;;  %v3176_v2 = vpop.f32.mrb[155].mxu0  ;;  %v1582_v55 = vadd.f32 %v1516_v40, %v4433_v22  ;;  %v3125_v46 = vpop.f32.mrb[153].mxu1 }
 0x261   :  { %v1519_v21 = vpop.f32.mrb[154].mxu1 }
 0x262   :  { %v1583_v53 = vadd.f32 %v1519_v21, %v4438_v42  ;;  %v3126_v56 = vpop.f32.mrb[155].mxu1 }
 0x265   :  { %v1747_v3 = vpop.f32.mrb[156].mxu0 }
 0x266   :  { %v4559_v11 = vadd.f32 %v1747_v3, %v1582_v55  ;;  %v3179_v13 = vpop.f32.mrb[157].mxu0 }
 0x267   :  { %v1750_v1 = vpop.f32.mrb[158].mxu0  ;;  %v1524_v60 = vpop.f32.mrb[156].mxu1 }
 0x268   :  { %v4561_v10 = vadd.f32 %v1750_v1, %v1583_v53  ;;  %v3180_v5 = vpop.f32.mrb[159].mxu0  ;;  %v1584_v16 = vadd.f32 %v1524_v60, %v4450_v31  ;;  %v3129_v26 = vpop.f32.mrb[157].mxu1 }
 0x269   :  { %v1527_v49 = vpop.f32.mrb[158].mxu1 }
 0x26a   :  { %v1585_v22 = vadd.f32 %v1527_v49, %v4455_v34  ;;  %v3130_v7 = vpop.f32.mrb[159].mxu1 }
 0x26d   :  { %v1755_v41 = vpop.f32.mrb[160].mxu0 }
 0x26e   :  { %v4565_v14 = vadd.f32 %v1755_v41, %v1584_v16  ;;  %v3183_v42 = vpop.f32.mrb[161].mxu0 }
 0x26f   :  { %v1758_v8 = vpop.f32.mrb[162].mxu0  ;;  %v1532_v0 = vpop.f32.mrb[160].mxu1 }
 0x270   :  { %v4567_v23 = vadd.f32 %v1758_v8, %v1585_v22  ;;  %v3184_v20 = vpop.f32.mrb[163].mxu0  ;;  %v1586_v6 = vadd.f32 %v1532_v0, %v4467_v43  ;;  %v3133_v18 = vpop.f32.mrb[161].mxu1 }
 0x271   :  { %v1535_v51 = vpop.f32.mrb[162].mxu1 }
 0x272   :  { %v1587_v31 = vadd.f32 %v1535_v51, %v4472_v25  ;;  %v3134_v19 = vpop.f32.mrb[163].mxu1 }
 0x275   :  { %v1763_v45 = vpop.f32.mrb[164].mxu0 }
 0x276   :  { %v4571_v61 = vadd.f32 %v1763_v45, %v1586_v6  ;;  %v3187_v34 = vpop.f32.mrb[165].mxu0 }
 0x277   :  { %v1766_v63 = vpop.f32.mrb[166].mxu0  ;;  %v1540_v4 = vpop.f32.mrb[164].mxu1 }
 0x278   :  { %v4573_v58 = vadd.f32 %v1766_v63, %v1587_v31  ;;  %v3188_v48 = vpop.f32.mrb[167].mxu0  ;;  %v1588_v33 = vadd.f32 %v1540_v4, %v4486_v17  ;;  %v3137_v57 = vpop.f32.mrb[165].mxu1 }
 0x279   :  { %v1543_v47 = vpop.f32.mrb[166].mxu1 }
 0x27a   :  { %v1589_v43 = vadd.f32 %v1543_v47, %v4491_v32  ;;  %v3138_v38 = vpop.f32.mrb[167].mxu1 }
 0x27d   :  { %v1771_v15 = vpop.f32.mrb[168].mxu0 }
 0x27e   :  { %v4577_v40 = vadd.f32 %v1771_v15, %v1588_v33  ;;  %v3191_v25 = vpop.f32.mrb[169].mxu0 }
 0x27f   :  { %v1774_v2 = vpop.f32.mrb[170].mxu0  ;;  %v1548_v55 = vpop.f32.mrb[168].mxu1 }
 0x280   :  { %v4579_v46 = vadd.f32 %v1774_v2, %v1589_v43  ;;  %v3192_v21 = vpop.f32.mrb[171].mxu0  ;;  %v1590_v53 = vadd.f32 %v1548_v55, %v4500_v24  ;;  %v3141_v56 = vpop.f32.mrb[169].mxu1  ;;  %v4598_v2 = vld [vmem:[#allocation8] ss:$0 sm:$0xff] }
 0x281   :  { %v1551_v3 = vpop.f32.mrb[170].mxu1 }
 0x282   :  { %v1591_v17 = vadd.f32 %v1551_v3, %v4505_v12  ;;  %v3142_v13 = vpop.f32.mrb[171].mxu1 }
 0x285   :  { %v1779_v1 = vpop.f32.mrb[172].mxu0 }
 0x286   :  { %v4583_v60 = vadd.f32 %v1779_v1, %v1590_v53  ;;  %v3195_v32 = vpop.f32.mrb[173].mxu0 }
 0x287   :  { %v1782_v5 = vpop.f32.mrb[174].mxu0  ;;  %v1556_v16 = vpop.f32.mrb[172].mxu1 }
 0x288   :  { %v4585_v26 = vadd.f32 %v1782_v5, %v1591_v17  ;;  %v3196_v49 = vpop.f32.mrb[175].mxu0  ;;  %v1592_v22 = vadd.f32 %v1556_v16, %v4513_v52  ;;  %v3145_v7 = vpop.f32.mrb[173].mxu1 }
 0x289   :  { %v1559_v41 = vpop.f32.mrb[174].mxu1 }
 0x28a   :  { %v1593_v24 = vadd.f32 %v1559_v41, %v4515_v50  ;;  %v3146_v42 = vpop.f32.mrb[175].mxu1 }
 0x28d   :  { %v1787_v8 = vpop.f32.mrb[176].mxu0 }
 0x28e   :  { %v4589_v0 = vadd.f32 %v1787_v8, %v1592_v22  ;;  %v3199_v12 = vpop.f32.mrb[177].mxu0 }
 0x28f   :  { %v1790_v20 = vpop.f32.mrb[178].mxu0  ;;  %v1564_v6 = vpop.f32.mrb[176].mxu1 }
 0x290   :  { %v4591_v18 = vadd.f32 %v1790_v20, %v1593_v24  ;;  %v3200_v51 = vpop.f32.mrb[179].mxu0  ;;  %v1594_v31 = vadd.f32 %v1564_v6, %v4519_v54  ;;  %v3149_v19 = vpop.f32.mrb[177].mxu1 }
 0x291   :  { %v1567_v45 = vpop.f32.mrb[178].mxu1 }
 0x292   :  { %v3150_v34 = vpop.f32.mrb[179].mxu1 }
 0x295   :  { %v1795_v52 = vpop.f32.mrb[180].mxu0 }
 0x296   :  { %v4594_v63 = vadd.f32 %v1795_v52, %v1594_v31  ;;  %v3203_v4 = vpop.f32.mrb[181].mxu0 }
 0x297   :  { %v1798_v50 = vpop.f32.mrb[182].mxu0  ;;  %v1956_v48 = vpop.f32.mrb[180].mxu1 }
 0x298   :  { %v3204_v33 = vpop.f32.mrb[183].mxu0  ;;  %v2058_v57 = vadd.f32 %v1956_v48, %v4523_v36  ;;  %v3209_v47 = vpop.f32.mrb[181].mxu1 }
 0x299   :  { %v1959_v43 = vpop.f32.mrb[182].mxu1 }
 0x29a   :  { %v2059_v38 = vadd.f32 %v1959_v43, %v4525_v9  ;;  %v3210_v15 = vpop.f32.mrb[183].mxu1 }
 0x29d   :  { %v2187_v25 = vpop.f32.mrb[184].mxu0 }
 0x29e   :  { %v2289_v54 = vadd.f32 %v2187_v25, %v2058_v57  ;;  %v3263_v55 = vpop.f32.mrb[185].mxu0 }
 0x29f   :  { %v2190_v21 = vpop.f32.mrb[186].mxu0  ;;  %v1964_v53 = vpop.f32.mrb[184].mxu1 }
 0x2a0   :  { %v2321_v56 = vadd.f32 %v4598_v2, %v2289_v54  ;;  %v2290_v3 = vadd.f32 %v2190_v21, %v2059_v38  ;;  %v3264_v17 = vpop.f32.mrb[187].mxu0  ;;  %v2060_v13 = vadd.f32 %v1964_v53, %v4529_v39  ;;  %v3213_v1 = vpop.f32.mrb[185].mxu1 }
 0x2a1   :  { %v1967_v32 = vpop.f32.mrb[186].mxu1 }
 0x2a2   :  { %v2346_v36 = vmax.f32 %v2321_v56, 0.0  ;;  %v2322_v5 = vadd.f32 %v4598_v2, %v2290_v3  ;;  %v2061_v9 = vadd.f32 %v1967_v32, %v4531_v44  ;;  %v3214_v16 = vpop.f32.mrb[187].mxu1 }
 0x2a4   :  { %v2676_v49 = vpack.c.bf16 %v2346_v36, %v2346_v36  ;;  %v2347_v22 = vmax.f32 %v2322_v5, 0.0 }
 0x2a5   :  { %v2195_v7 = vpop.f32.mrb[188].mxu0 }
 0x2a6   :  { %2473 = vst.msk [vmem:[#allocation10] sm:$0xf] %vm2472_vm11, %v2676_v49  ;;  %v2677_v41 = vpack.c.bf16 %v2347_v22, %v2347_v22  ;;  %v2291_v24 = vadd.f32 %v2195_v7, %v2060_v13  ;;  %v3267_v42 = vpop.f32.mrb[189].mxu0 }
 0x2a7   :  { %v2198_v8 = vpop.f32.mrb[190].mxu0  ;;  %v1972_v39 = vpop.f32.mrb[188].mxu1 }
 0x2a8   :  { %2474 = vst.msk [vmem:[#allocation10 + $0x4] sm:$0xf] %vm2472_vm11, %v2677_v41  ;;  %v2323_v12 = vadd.f32 %v4598_v2, %v2291_v24  ;;  %v2292_v20 = vadd.f32 %v2198_v8, %v2061_v9  ;;  %v3268_v6 = vpop.f32.mrb[191].mxu0  ;;  %v2062_v51 = vadd.f32 %v1972_v39, %v4535_v30  ;;  %v3217_v44 = vpop.f32.mrb[189].mxu1 }
 0x2a9   :  { %v1975_v19 = vpop.f32.mrb[190].mxu1 }
 0x2aa   :  { %v2348_v31 = vmax.f32 %v2323_v12, 0.0  ;;  %v2324_v45 = vadd.f32 %v4598_v2, %v2292_v20  ;;  %v2063_v34 = vadd.f32 %v1975_v19, %v4537_v29  ;;  %v3218_v52 = vpop.f32.mrb[191].mxu1 }
 0x2ac   :  { %v2678_v4 = vpack.c.bf16 %v2348_v31, %v2348_v31  ;;  %v2349_v50 = vmax.f32 %v2324_v45, 0.0 }
 0x2ad   :  { %v2203_v48 = vpop.f32.mrb[192].mxu0 }
 0x2ae   :  { %2475 = vst.msk [vmem:[#allocation10 + $0x8] sm:$0xf] %vm2472_vm11, %v2678_v4  ;;  %v2679_v33 = vpack.c.bf16 %v2349_v50, %v2349_v50  ;;  %v2293_v57 = vadd.f32 %v2203_v48, %v2062_v51  ;;  %v3271_v47 = vpop.f32.mrb[193].mxu0 }
 0x2af   :  { %v2206_v43 = vpop.f32.mrb[194].mxu0  ;;  %v1980_v30 = vpop.f32.mrb[192].mxu1 }
 0x2b0   :  { %2476 = vst.msk [vmem:[#allocation10 + $0xc] sm:$0xf] %vm2472_vm11, %v2679_v33  ;;  %v2325_v38 = vadd.f32 %v4598_v2, %v2293_v57  ;;  %v2294_v15 = vadd.f32 %v2206_v43, %v2063_v34  ;;  %v3272_v25 = vpop.f32.mrb[195].mxu0  ;;  %v2064_v54 = vadd.f32 %v1980_v30, %v4541_v35  ;;  %v3221_v29 = vpop.f32.mrb[193].mxu1 }
 0x2b1   :  { %v1983_v21 = vpop.f32.mrb[194].mxu1 }
 0x2b2   :  { %v2350_v55 = vmax.f32 %v2325_v38, 0.0  ;;  %v2326_v53 = vadd.f32 %v4598_v2, %v2294_v15  ;;  %v2065_v56 = vadd.f32 %v1983_v21, %v4543_v62  ;;  %v3222_v3 = vpop.f32.mrb[195].mxu1 }
 0x2b4   :  { %v2680_v17 = vpack.c.bf16 %v2350_v55, %v2350_v55  ;;  %v2351_v13 = vmax.f32 %v2326_v53, 0.0 }
 0x2b5   :  { %v2211_v1 = vpop.f32.mrb[196].mxu0 }
 0x2b6   :  { %2477 = vst.msk [vmem:[#allocation10 + $0x10] sm:$0xf] %vm2472_vm11, %v2680_v17  ;;  %v2681_v36 = vpack.c.bf16 %v2351_v13, %v2351_v13  ;;  %v2295_v32 = vadd.f32 %v2211_v1, %v2064_v54  ;;  %v3275_v5 = vpop.f32.mrb[197].mxu0 }
 0x2b7   :  { %v2214_v9 = vpop.f32.mrb[198].mxu0  ;;  %v1988_v35 = vpop.f32.mrb[196].mxu1 }
 0x2b8   :  { %2478 = vst.msk [vmem:[#allocation10 + $0x14] sm:$0xf] %vm2472_vm11, %v2681_v36  ;;  %v2327_v16 = vadd.f32 %v4598_v2, %v2295_v32  ;;  %v2296_v49 = vadd.f32 %v2214_v9, %v2065_v56  ;;  %v3276_v22 = vpop.f32.mrb[199].mxu0  ;;  %v2066_v7 = vadd.f32 %v1988_v35, %v4547_v37  ;;  %v3225_v62 = vpop.f32.mrb[197].mxu1 }
 0x2b9   :  { %v1991_v24 = vpop.f32.mrb[198].mxu1 }
 0x2ba   :  { %v2352_v41 = vmax.f32 %v2327_v16, 0.0  ;;  %v2328_v42 = vadd.f32 %v4598_v2, %v2296_v49  ;;  %v2067_v8 = vadd.f32 %v1991_v24, %v4549_v59  ;;  %v3226_v39 = vpop.f32.mrb[199].mxu1 }
 0x2bc   :  { %v2682_v12 = vpack.c.bf16 %v2352_v41, %v2352_v41  ;;  %v2353_v20 = vmax.f32 %v2328_v42, 0.0 }
 0x2bd   :  { %v2219_v6 = vpop.f32.mrb[200].mxu0 }
 0x2be   :  { %2479 = vst.msk [vmem:[#allocation10 + $0x18] sm:$0xf] %vm2472_vm11, %v2682_v12  ;;  %v2683_v51 = vpack.c.bf16 %v2353_v20, %v2353_v20  ;;  %v2297_v44 = vadd.f32 %v2219_v6, %v2066_v7  ;;  %v3279_v31 = vpop.f32.mrb[201].mxu0 }
 0x2bf   :  { %v2222_v19 = vpop.f32.mrb[202].mxu0  ;;  %v1996_v37 = vpop.f32.mrb[200].mxu1 }
 0x2c0   :  { %2480 = vst.msk [vmem:[#allocation10 + $0x1c] sm:$0xf] %vm2472_vm11, %v2683_v51  ;;  %v2329_v45 = vadd.f32 %v4598_v2, %v2297_v44  ;;  %v2298_v34 = vadd.f32 %v2222_v19, %v2067_v8  ;;  %v3280_v52 = vpop.f32.mrb[203].mxu0  ;;  %v2068_v4 = vadd.f32 %v1996_v37, %v4553_v27  ;;  %v3229_v59 = vpop.f32.mrb[201].mxu1 }
 0x2c1   :  { %v1999_v48 = vpop.f32.mrb[202].mxu1 }
 0x2c2   :  { %v2354_v50 = vmax.f32 %v2329_v45, 0.0  ;;  %v2330_v33 = vadd.f32 %v4598_v2, %v2298_v34  ;;  %v2069_v57 = vadd.f32 %v1999_v48, %v4555_v28  ;;  %v3230_v47 = vpop.f32.mrb[203].mxu1 }
 0x2c4   :  { %v2684_v43 = vpack.c.bf16 %v2354_v50, %v2354_v50  ;;  %v2355_v30 = vmax.f32 %v2330_v33, 0.0 }
 0x2c5   :  { %v2227_v38 = vpop.f32.mrb[204].mxu0 }
 0x2c6   :  { %2481 = vst.msk [vmem:[#allocation10 + $0x20] sm:$0xf] %vm2472_vm11, %v2684_v43  ;;  %v2685_v15 = vpack.c.bf16 %v2355_v30, %v2355_v30  ;;  %v2299_v25 = vadd.f32 %v2227_v38, %v2068_v4  ;;  %v3283_v54 = vpop.f32.mrb[205].mxu0 }
 0x2c7   :  { %v2230_v29 = vpop.f32.mrb[206].mxu0  ;;  %v2004_v27 = vpop.f32.mrb[204].mxu1 }
 0x2c8   :  { %2482 = vst.msk [vmem:[#allocation10 + $0x24] sm:$0xf] %vm2472_vm11, %v2685_v15  ;;  %v2331_v55 = vadd.f32 %v4598_v2, %v2299_v25  ;;  %v2300_v21 = vadd.f32 %v2230_v29, %v2069_v57  ;;  %v3284_v53 = vpop.f32.mrb[207].mxu0  ;;  %v2070_v56 = vadd.f32 %v2004_v27, %v4559_v11  ;;  %v3233_v28 = vpop.f32.mrb[205].mxu1 }
 0x2c9   :  { %v2007_v17 = vpop.f32.mrb[206].mxu1 }
 0x2ca   :  { %v2356_v3 = vmax.f32 %v2331_v55, 0.0  ;;  %v2332_v13 = vadd.f32 %v4598_v2, %v2300_v21  ;;  %v2071_v1 = vadd.f32 %v2007_v17, %v4561_v10  ;;  %v3234_v36 = vpop.f32.mrb[207].mxu1 }
 0x2cc   :  { %v2686_v32 = vpack.c.bf16 %v2356_v3, %v2356_v3  ;;  %v2357_v5 = vmax.f32 %v2332_v13, 0.0 }
 0x2cd   :  { %v2235_v9 = vpop.f32.mrb[208].mxu0 }
 0x2ce   :  { %2483 = vst.msk [vmem:[#allocation10 + $0x28] sm:$0xf] %vm2472_vm11, %v2686_v32  ;;  %v2687_v35 = vpack.c.bf16 %v2357_v5, %v2357_v5  ;;  %v2301_v16 = vadd.f32 %v2235_v9, %v2070_v56  ;;  %v3287_v49 = vpop.f32.mrb[209].mxu0 }
 0x2cf   :  { %v2238_v22 = vpop.f32.mrb[210].mxu0  ;;  %v2012_v11 = vpop.f32.mrb[208].mxu1 }
 0x2d0   :  { %2484 = vst.msk [vmem:[#allocation10 + $0x2c] sm:$0xf] %vm2472_vm11, %v2687_v35  ;;  %v2333_v7 = vadd.f32 %v4598_v2, %v2301_v16  ;;  %v2302_v62 = vadd.f32 %v2238_v22, %v2071_v1  ;;  %v3288_v41 = vpop.f32.mrb[211].mxu0  ;;  %v2072_v24 = vadd.f32 %v2012_v11, %v4565_v14  ;;  %v3237_v10 = vpop.f32.mrb[209].mxu1 }
 0x2d1   :  { %v2015_v8 = vpop.f32.mrb[210].mxu1 }
 0x2d2   :  { %v2358_v42 = vmax.f32 %v2333_v7, 0.0  ;;  %v2334_v39 = vadd.f32 %v4598_v2, %v2302_v62  ;;  %v2073_v12 = vadd.f32 %v2015_v8, %v4567_v23  ;;  %v3238_v20 = vpop.f32.mrb[211].mxu1 }
 0x2d4   :  { %v2688_v6 = vpack.c.bf16 %v2358_v42, %v2358_v42  ;;  %v2359_v51 = vmax.f32 %v2334_v39, 0.0 }
 0x2d5   :  { %v2243_v44 = vpop.f32.mrb[212].mxu0 }
 0x2d6   :  { %2485 = vst.msk [vmem:[#allocation10 + $0x30] sm:$0xf] %vm2472_vm11, %v2688_v6  ;;  %v2689_v31 = vpack.c.bf16 %v2359_v51, %v2359_v51  ;;  %v2303_v19 = vadd.f32 %v2243_v44, %v2072_v24  ;;  %v3291_v37 = vpop.f32.mrb[213].mxu0 }
 0x2d7   :  { %v2246_v45 = vpop.f32.mrb[214].mxu0  ;;  %v2020_v14 = vpop.f32.mrb[212].mxu1 }
 0x2d8   :  { %2486 = vst.msk [vmem:[#allocation10 + $0x34] sm:$0xf] %vm2472_vm11, %v2689_v31  ;;  %v2335_v34 = vadd.f32 %v4598_v2, %v2303_v19  ;;  %v2304_v52 = vadd.f32 %v2246_v45, %v2073_v12  ;;  %v3292_v4 = vpop.f32.mrb[215].mxu0  ;;  %v2074_v59 = vadd.f32 %v2020_v14, %v4571_v61  ;;  %v3241_v23 = vpop.f32.mrb[213].mxu1 }
 0x2d9   :  { %v2023_v48 = vpop.f32.mrb[214].mxu1 }
 0x2da   :  { %v2360_v50 = vmax.f32 %v2335_v34, 0.0  ;;  %v2336_v33 = vadd.f32 %v4598_v2, %v2304_v52  ;;  %v2075_v57 = vadd.f32 %v2023_v48, %v4573_v58  ;;  %v3242_v47 = vpop.f32.mrb[215].mxu1 }
 0x2dc   :  { %v2690_v43 = vpack.c.bf16 %v2360_v50, %v2360_v50  ;;  %v2361_v30 = vmax.f32 %v2336_v33, 0.0 }
 0x2dd   :  { %v2251_v38 = vpop.f32.mrb[216].mxu0 }
 0x2de   :  { %2487 = vst.msk [vmem:[#allocation10 + $0x38] sm:$0xf] %vm2472_vm11, %v2690_v43  ;;  %v2691_v15 = vpack.c.bf16 %v2361_v30, %v2361_v30  ;;  %v2305_v25 = vadd.f32 %v2251_v38, %v2074_v59  ;;  %v3295_v54 = vpop.f32.mrb[217].mxu0 }
 0x2df   :  { %v2254_v29 = vpop.f32.mrb[218].mxu0  ;;  %v2028_v61 = vpop.f32.mrb[216].mxu1 }
 0x2e0   :  { %2488 = vst.msk [vmem:[#allocation10 + $0x3c] sm:$0xf] %vm2472_vm11, %v2691_v15  ;;  %v2337_v27 = vadd.f32 %v4598_v2, %v2305_v25  ;;  %v2306_v55 = vadd.f32 %v2254_v29, %v2075_v57  ;;  %v3296_v21 = vpop.f32.mrb[219].mxu0  ;;  %v2076_v53 = vadd.f32 %v2028_v61, %v4577_v40  ;;  %v3245_v58 = vpop.f32.mrb[217].mxu1 }
 0x2e1   :  { %v2031_v28 = vpop.f32.mrb[218].mxu1 }
 0x2e2   :  { %v2362_v56 = vmax.f32 %v2337_v27, 0.0  ;;  %v2338_v3 = vadd.f32 %v4598_v2, %v2306_v55  ;;  %v2077_v17 = vadd.f32 %v2031_v28, %v4579_v46  ;;  %v3246_v13 = vpop.f32.mrb[219].mxu1 }
 0x2e4   :  { %v2692_v1 = vpack.c.bf16 %v2362_v56, %v2362_v56  ;;  %v2363_v36 = vmax.f32 %v2338_v3, 0.0 }
 0x2e5   :  { %v2259_v32 = vpop.f32.mrb[220].mxu0 }
 0x2e6   :  { %2489 = vst.msk [vmem:[#allocation10 + $0x40] sm:$0xf] %vm2472_vm11, %v2692_v1  ;;  %v2693_v5 = vpack.c.bf16 %v2363_v36, %v2363_v36  ;;  %v2307_v9 = vadd.f32 %v2259_v32, %v2076_v53  ;;  %v3299_v35 = vpop.f32.mrb[221].mxu0 }
 0x2e7   :  { %v2262_v16 = vpop.f32.mrb[222].mxu0  ;;  %v2036_v40 = vpop.f32.mrb[220].mxu1 }
 0x2e8   :  { %2490 = vst.msk [vmem:[#allocation10 + $0x44] sm:$0xf] %vm2472_vm11, %v2693_v5  ;;  %v2339_v49 = vadd.f32 %v4598_v2, %v2307_v9  ;;  %v2308_v22 = vadd.f32 %v2262_v16, %v2077_v17  ;;  %v3300_v11 = vpop.f32.mrb[223].mxu0  ;;  %v2078_v7 = vadd.f32 %v2036_v40, %v4583_v60  ;;  %v3249_v46 = vpop.f32.mrb[221].mxu1 }
 0x2e9   :  { %v2039_v41 = vpop.f32.mrb[222].mxu1 }
 0x2ea   :  { %v2364_v62 = vmax.f32 %v2339_v49, 0.0  ;;  %v2340_v24 = vadd.f32 %v4598_v2, %v2308_v22  ;;  %v2079_v10 = vadd.f32 %v2039_v41, %v4585_v26  ;;  %v3250_v42 = vpop.f32.mrb[223].mxu1 }
 0x2ec   :  { %v2694_v8 = vpack.c.bf16 %v2364_v62, %v2364_v62  ;;  %v2365_v39 = vmax.f32 %v2340_v24, 0.0 }
 0x2ed   :  { %v2267_v12 = vpop.f32.mrb[224].mxu0 }
 0x2ee   :  { %2491 = vst.msk [vmem:[#allocation10 + $0x48] sm:$0xf] %vm2472_vm11, %v2694_v8  ;;  %v2695_v20 = vpack.c.bf16 %v2365_v39, %v2365_v39  ;;  %v2309_v6 = vadd.f32 %v2267_v12, %v2078_v7  ;;  %v3303_v51 = vpop.f32.mrb[225].mxu0 }
 0x2ef   :  { %v2270_v44 = vpop.f32.mrb[226].mxu0  ;;  %v2044_v60 = vpop.f32.mrb[224].mxu1 }
 0x2f0   :  { %2492 = vst.msk [vmem:[#allocation10 + $0x4c] sm:$0xf] %vm2472_vm11, %v2695_v20  ;;  %v2341_v31 = vadd.f32 %v4598_v2, %v2309_v6  ;;  %v2310_v19 = vadd.f32 %v2270_v44, %v2079_v10  ;;  %v3304_v37 = vpop.f32.mrb[227].mxu0  ;;  %v2080_v45 = vadd.f32 %v2044_v60, %v4589_v0  ;;  %v3253_v26 = vpop.f32.mrb[225].mxu1 }
 0x2f1   :  { %v2047_v34 = vpop.f32.mrb[226].mxu1 }
 0x2f2   :  { %v2366_v14 = vmax.f32 %v2341_v31, 0.0  ;;  %v2342_v52 = vadd.f32 %v4598_v2, %v2310_v19  ;;  %v2081_v4 = vadd.f32 %v2047_v34, %v4591_v18  ;;  %v3254_v59 = vpop.f32.mrb[227].mxu1 }
 0x2f4   :  { %v2696_v23 = vpack.c.bf16 %v2366_v14, %v2366_v14  ;;  %v2367_v50 = vmax.f32 %v2342_v52, 0.0 }
 0x2f5   :  { %v2275_v48 = vpop.f32.mrb[228].mxu0 }
 0x2f6   :  { %2493 = vst.msk [vmem:[#allocation10 + $0x50] sm:$0xf] %vm2472_vm11, %v2696_v23  ;;  %v2697_v33 = vpack.c.bf16 %v2367_v50, %v2367_v50  ;;  %v2311_v57 = vadd.f32 %v2275_v48, %v2080_v45  ;;  %v3307_v47 = vpop.f32.mrb[229].mxu0 }
 0x2f7   :  { %v2278_v43 = vpop.f32.mrb[230].mxu0  ;;  %v2052_v0 = vpop.f32.mrb[228].mxu1 }
 0x2f8   :  { %2494 = vst.msk [vmem:[#allocation10 + $0x54] sm:$0xf] %vm2472_vm11, %v2697_v33  ;;  %v2343_v30 = vadd.f32 %v4598_v2, %v2311_v57  ;;  %v2312_v38 = vadd.f32 %v2278_v43, %v2081_v4  ;;  %v3308_v15 = vpop.f32.mrb[231].mxu0  ;;  %v2082_v25 = vadd.f32 %v2052_v0, %v4594_v63  ;;  %v3257_v18 = vpop.f32.mrb[229].mxu1 }
 0x2f9   :  { %v2055_v61 = vpop.f32.mrb[230].mxu1 }
 0x2fa   :  { %v2368_v54 = vmax.f32 %v2343_v30, 0.0  ;;  %v2344_v29 = vadd.f32 %v4598_v2, %v2312_v38  ;;  %v3258_v27 = vpop.f32.mrb[231].mxu1 }
 0x2fc   :  { %v2698_v55 = vpack.c.bf16 %v2368_v54, %v2368_v54  ;;  %v2369_v21 = vmax.f32 %v2344_v29, 0.0 }
 0x2fd   :  { %v2283_v53 = vpop.f32.mrb[232].mxu0 }
 0x2fe   :  { %2495 = vst.msk [vmem:[#allocation10 + $0x58] sm:$0xf] %vm2472_vm11, %v2698_v55  ;;  %v2699_v58 = vpack.c.bf16 %v2369_v21, %v2369_v21  ;;  %v2313_v56 = vadd.f32 %v2283_v53, %v2082_v25  ;;  %v3311_v28 = vpop.f32.mrb[233].mxu0 }
 0x2ff   :  { %v2286_v3 = vpop.f32.mrb[234].mxu0 }
 0x300   :  { %2496 = vst.msk [vmem:[#allocation10 + $0x5c] sm:$0xf] %vm2472_vm11, %v2699_v58  ;;  %v2345_v17 = vadd.f32 %v4598_v2, %v2313_v56  ;;  %v3312_v63 = vpop.f32.mrb[235].mxu0 }
 0x302   :  { %v2370_v13 = vmax.f32 %v2345_v17, 0.0 }
 0x304   :  { %v2700_v1 = vpack.c.bf16 %v2370_v13, %v2370_v13 }
 0x306   :  { %2497 = vst.msk [vmem:[#allocation10 + $0x60] sm:$0xf] %vm2472_vm11, %v2700_v1 }
 0x307   :  { %3453 = shalt.err (!%p3450_p0)
}
 0x308   :  { %s3454_s18 = scalar_lea.hbm %s4692_s4, 1600 }
 0x309   :  { %p3455_p1 = scmp.ne.s32.totalorder %s4692_s4, %s3454_s18  ;;  %p3458_p2 = scmp.lt.u32.totalorder %s3454_s18, %s4692_s4 }
 0x30b   :  { %p3460_p3 = pnand %p3458_p2, %p3455_p1 }
 0x30d   :  { %3463 = shalt.err (!%p3460_p3)
}
 0x30e   :  { %2509 = dma.vmem_to_hbm [thread:$0]  %s2504_s14, 1600, %s4692_s4, [#allocation4], %s3474_s28, %s3474_s28, %s3475_s29  }
 0x30f   :  { %3470 = dma.done.wait [#allocation4], 1600  }
 0x310   :  { %3471 = vsyncadd [#allocation4], 4294965696 }
 0x311   :  { %2513 = vsyncpa [#allocation3], 1 }
 0x312   :  { %2514 = vsyncpa [#allocation6], 1 }
 0x313   :  { %2515 = vsyncpa [#allocation9], 1 }
 0x314   :  { %2516 = vsyncpa [#allocation4], 1 }

// kernel: _lambda_.21
= control target key start
LH: loop header
LB: loop body
LE: loop exit
PB: predicated region body
PF: predicated region fallthrough
CT: control target
= control target key end

     0   :  { %10 = vsyncpa [#allocation3], 0  ;;  %s4882_s0 = inlined_call_operand.hbm [shape: bf16[400,8], index: 0, kind: input, shape index: {}, may-alias: {0,1}]   ;;  %s4883_s1 = inlined_call_operand.hbm [shape: bf16[400,8], index: 1, kind: input, shape index: {}, may-alias: {0,1}]   ;;  %s4884_s2 = inlined_call_operand.hbm [shape: bf16[9,8,8], index: 2, kind: input, shape index: {}]   ;;  %s4885_s3 = inlined_call_operand.hbm [shape: f32[1,8], index: 3, kind: input, shape index: {}]   ;;  %s4886_s4 = inlined_call_operand.hbm [shape: bf16[200,8], index: 4, kind: input, shape index: {}, may-alias: {4,5}]   ;;  %s4887_s5 = inlined_call_operand.hbm [shape: bf16[200,8], index: 5, kind: output, shape index: {}, may-alias: {4,5}]  }
   0x1   :  { %11 = vsyncpa [#allocation6], 0 }
   0x2   :  { %12 = vsyncpa [#allocation9], 0 }
   0x3   :  { %13 = vsyncpa [#allocation4], 0  ;;  %s2608_s20 = scalar_lea.hbm %s4883_s1, 1600  ;;  %s3645_s21 = smov [#allocation5]  }
   0x4   :  { %s35_s22 = sshll.u32 %s3645_s21, 4  ;;  %s3646_s23 = smov [#allocation8]   ;;  %s36_s22 = int_to_ptr.vmem [resolvable:$true] %s35_s22 }
   0x5   :  { %s60_s24 = sshll.u32 %s3646_s23, 4  ;;  %s3526_s27 = scalar_lea.hbm %s4883_s1, 3200  ;;  %s61_s24 = int_to_ptr.vmem [resolvable:$true] %s60_s24 }
   0x6   :  { %p3503_p0 = scmp.ne.s32.totalorder %s2608_s20, %s3526_s27  ;;  %p3505_p1 = scmp.lt.u32.totalorder %s2608_s20, %s4883_s1 }
   0x7   :  { %p3506_p2 = scmp.lt.u32.totalorder %s3526_s27, %s3526_s27  ;;  %p3508_p4 = scmp.lt.u32.totalorder %s3526_s27, %s2608_s20 }
   0x9   :  { %p3507_p3 = por %p3506_p2, %p3505_p1 }
   0xb   :  { %p3509_p5 = por %p3508_p4, %p3507_p3 }
   0xd   :  { %p3510_p6 = pnand %p3509_p5, %p3503_p0 }
   0xf   :  { %3513 = shalt.err (!%p3510_p6)
}
  0x10   :  { %s3514_s30 = scalar_lea.vmem %s36_s22, 1600  ;;  %p3519_p8 = scmp.lt.s32.totalorder %s36_s22, %s36_s22 }
  0x11   :  { %p3515_p7 = scmp.ne.s32.totalorder %s36_s22, %s3514_s30  ;;  %p3520_p9 = scmp.lt.s32.totalorder %s3514_s30, %s3514_s30 }
  0x13   :  { %p3521_p10 = por %p3520_p9, %p3519_p8 }
  0x15   :  { %p3522_p11 = pnand %p3521_p10, %p3515_p7 }
  0x17   :  { %3525 = shalt.err (!%p3522_p11)
}
  0x18   :  { %s3647_s6 = smov 64   ;;  %s3648_s7 = smov 4  }
  0x19   :  { %41 = dma.hbm_to_vmem [thread:$0]  %s2608_s20, 1600, %s36_s22, [#allocation6], %s3647_s6, %s3647_s6, %s3648_s7  }
  0x1a   :  { %s3527_s9 = scalar_lea.hbm %s4885_s3, 16 }
  0x1b   :  { %p3528_p12 = scmp.ne.s32.totalorder %s4885_s3, %s3527_s9  ;;  %p3531_p13 = scmp.lt.u32.totalorder %s3527_s9, %s4885_s3 }
  0x1d   :  { %p3533_p0 = pnand %p3531_p13, %p3528_p12 }
  0x1f   :  { %3536 = shalt.err (!%p3533_p0)
}
  0x20   :  { %s3537_s14 = scalar_lea.vmem %s61_s24, 16  ;;  %s3541_s15 = scalar_lea.vmem %s61_s24, 32 }
  0x21   :  { %p3538_p1 = scmp.ne.s32.totalorder %s61_s24, %s3537_s14  ;;  %p3542_p2 = scmp.lt.s32.totalorder %s61_s24, %s61_s24 }
  0x22   :  { %p3543_p3 = scmp.lt.s32.totalorder %s3541_s15, %s3537_s14 }
  0x24   :  { %p3544_p4 = por %p3543_p3, %p3542_p2 }
  0x26   :  { %p3545_p5 = pnand %p3544_p4, %p3538_p1 }
  0x28   :  { %3548 = shalt.err (!%p3545_p5)
}
  0x29   :  { %63 = dma.hbm_to_vmem [thread:$0]  %s4885_s3, 16, %s61_s24, [#allocation9]  }
  0x2a   :  { %s3649_s18 = smov [#allocation2]   ;;  %s3650_s20 = smov [#allocation7]  }
  0x2b   :  { %s19_s19 = sshll.u32 %s3649_s18, 4  ;;  %s47_s21 = sshll.u32 %s3650_s20, 4  ;;  %s20_s19 = int_to_ptr.vmem [resolvable:$true] %s19_s19  ;;  %s48_s21 = int_to_ptr.vmem [resolvable:$true] %s47_s21 }
  0x2c   :  { %s3549_s25 = scalar_lea.hbm %s4882_s0, 1600  ;;  %s3551_s30 = scalar_lea.hbm %s4882_s0, 3200 }
  0x2d   :  { %p3550_p6 = scmp.ne.s32.totalorder %s4882_s0, %s3549_s25  ;;  %p3552_p7 = scmp.lt.u32.totalorder %s3551_s30, %s3549_s25 }
  0x2e   :  { %p3553_p8 = scmp.lt.u32.totalorder %s3549_s25, %s4882_s0 }
  0x30   :  { %p3554_p9 = por %p3553_p8, %p3552_p7 }
  0x32   :  { %p3555_p10 = pnand %p3554_p9, %p3550_p6 }
  0x34   :  { %3558 = shalt.err (!%p3555_p10)
}
  0x35   :  { %s3559_s24 = scalar_lea.vmem %s20_s19, 1600  ;;  %p3564_p12 = scmp.lt.s32.totalorder %s20_s19, %s20_s19 }
  0x36   :  { %p3560_p11 = scmp.ne.s32.totalorder %s20_s19, %s3559_s24  ;;  %p3565_p13 = scmp.lt.s32.totalorder %s3559_s24, %s3559_s24 }
  0x38   :  { %p3566_p0 = por %p3565_p13, %p3564_p12 }
  0x3a   :  { %p3567_p1 = pnand %p3566_p0, %p3560_p11 }
  0x3c   :  { %3570 = shalt.err (!%p3567_p1)
}
  0x3d   :  { %25 = dma.hbm_to_vmem [thread:$0]  %s4882_s0, 1600, %s20_s19, [#allocation3], %s3647_s6, %s3647_s6, %s3648_s7  }
  0x3e   :  { %s3571_s12 = scalar_lea.hbm %s4884_s2, 576 }
  0x3f   :  { %p3572_p2 = scmp.ne.s32.totalorder %s4884_s2, %s3571_s12  ;;  %p3575_p3 = scmp.lt.u32.totalorder %s3571_s12, %s4884_s2 }
  0x41   :  { %p3577_p4 = pnand %p3575_p3, %p3572_p2 }
  0x43   :  { %3580 = shalt.err (!%p3577_p4)
}
  0x44   :  { %s3581_s17 = scalar_lea.vmem %s48_s21, 576  ;;  %p3586_p6 = scmp.lt.s32.totalorder %s48_s21, %s48_s21 }
  0x45   :  { %p3582_p5 = scmp.ne.s32.totalorder %s48_s21, %s3581_s17  ;;  %p3587_p7 = scmp.lt.s32.totalorder %s3581_s17, %s3581_s17 }
  0x47   :  { %p3588_p8 = por %p3587_p7, %p3586_p6 }
  0x49   :  { %p3589_p9 = pnand %p3588_p8, %p3582_p5 }
  0x4b   :  { %3592 = shalt.err (!%p3589_p9)
}
  0x4c   :  { %53 = dma.hbm_to_vmem [thread:$0]  %s4884_s2, 576, %s48_s21, [#allocation6], %s3647_s6, %s3647_s6, %s3648_s7  }
  0x4d   :  { %s3651_s19 = smov [#allocation10]   ;;  %s3593_s25 = scalar_lea.hbm %s4886_s4, 1600 }
  0x4e   :  { %s69_s20 = sshll.u32 %s3651_s19, 4  ;;  %p3594_p10 = scmp.ne.s32.totalorder %s4886_s4, %s3593_s25  ;;  %s70_s20 = int_to_ptr.vmem [resolvable:$true] %s69_s20 }
  0x4f   :  { %p3597_p11 = scmp.lt.u32.totalorder %s3593_s25, %s4886_s4 }
  0x51   :  { %p3599_p12 = pnand %p3597_p11, %p3594_p10 }
  0x53   :  { %3602 = shalt.err (!%p3599_p12)
}
  0x54   :  { %s3603_s30 = scalar_lea.vmem %s70_s20, 1600  ;;  %p3608_p0 = scmp.lt.s32.totalorder %s70_s20, %s70_s20 }
  0x55   :  { %p3604_p13 = scmp.ne.s32.totalorder %s70_s20, %s3603_s30  ;;  %p3609_p1 = scmp.lt.s32.totalorder %s3603_s30, %s3603_s30 }
  0x57   :  { %p3610_p2 = por %p3609_p1, %p3608_p0 }
  0x59   :  { %p3611_p3 = pnand %p3610_p2, %p3604_p13 }
  0x5b   :  { %3614 = shalt.err (!%p3611_p3)
}
  0x5c   :  { %75 = dma.hbm_to_vmem [thread:$0]  %s4886_s4, 1600, %s70_s20, [#allocation9], %s3647_s6, %s3647_s6, %s3648_s7  }
  0x5d   :  { %3637 = dma.done.wait [#allocation3], 1600  }
  0x5e   :  { %3638 = vsyncadd [#allocation3], 4294965696 }
  0x5f   :  { %3639 = dma.done.wait [#allocation6], 2176  }
  0x60   :  { %3640 = vsyncadd [#allocation6], 4294965120 }
  0x61   :  { %3641 = dma.done.wait [#allocation9], 1616  }
  0x62   :  { %3642 = vsyncadd [#allocation9], 4294965680  ;;  %v4889_v0 = vmov 0.0   ;;  %vm3653_vm0 = vmmov 0   ;;  %vm193_vm1 = vcmask 1043456   ;;  %v3764_v3 = vld [vmem:[#allocation2] sm:$0xff]  }
  0x63   :  { %2977 = vmatprep.subr.bf16.mxu0 %v4889_v0  ;;  %3463 = vmatprep.subr.bf16.mxu1 %v4889_v0  ;;  %v199_v1 = vld [vmem:[#allocation7 + $0x4] sm:$0xf]  ;;  %v202_v5 = vshrl.u32 %v3764_v3, 16  ;;  %v204_v6 = vshll.u32 %v3764_v3, 16  ;;  %v3775_v8 = vld [vmem:[#allocation2 + $0x38] sm:$0xff]   ;;  %v3777_v9 = vld [vmem:[#allocation2 + $0x40] sm:$0xff]  }
  0x64   :  { %2979 = vmatprep.mubr.msk.bf16.mxu0 %vm3653_vm0, %v4889_v0  ;;  %3007 = vmatprep.mubr.msk.bf16.mxu1 %vm3653_vm0, %v4889_v0  ;;  %v344_v2 = vsel %vm193_vm1, %v199_v1, 0  ;;  %v3766_v4 = vld [vmem:[#allocation2 + $0x8] sm:$0xff]   ;;  %vm200_vm2 = vsmask.f32 7424  ;;  %vm303_vm3 = vcmask 64512   ;;  %v3783_v13 = vshll.u32 %v3775_v8, 16 }
  0x65   :  { %2978 = vmatpush3.bf16.msra.mxu0 %v344_v2  ;;  %3464 = vmatpush3.bf16.msra.mxu1 %v344_v2  ;;  %v3773_v7 = vshll.u32 %v3766_v4, 16  ;;  %v206_v10 = vrot.slane %v204_v6, 1  ;;  %v648_v11 = vld [vmem:[#allocation7 + $0x8] sm:$0xf]  ;;  %v3786_v14 = vshrl.u32 %v3775_v8, 16  ;;  %v3789_v15 = vshll.u32 %v3777_v9, 16 }
  0x66   :  { %3085 = vmatprep.subr.bf16.mxu0 %v4889_v0  ;;  %3031 = vmatprep.subr.bf16.mxu1 %v4889_v0  ;;  %v197_v16 = vld [vmem:[#allocation7] sm:$0xf]  ;;  %v3793_v18 = vld [vmem:[#allocation2 + $0x10] sm:$0xff]   ;;  %v3796_v19 = vshrl.u32 %v3766_v4, 16  ;;  %v259_v20 = vrot.slane %v3783_v13, 1  ;;  %v716_v22 = vsel %vm193_vm1, %v648_v11, 0 }
  0x67   :  { %v211_v12 = vrot.slane %v3773_v7, 1  ;;  %v207_v17 = vor.u32 %v206_v10, %v202_v5  ;;  %v267_v21 = vrot.slane %v3789_v15, 1  ;;  %v3801_v23 = vld [vmem:[#allocation2 + $0x48] sm:$0xff]   ;;  %v3805_v25 = vshll.u32 %v3793_v18, 16  ;;  %v3822_v32 = vld [vmem:[#allocation2 + $0x18] sm:$0xff]   ;;  %v3831_v36 = vld [vmem:[#allocation2 + $0x50] sm:$0xff]  }
  0x68   :  { %v263_v26 = vor.u32 %v3786_v14, %v259_v20  ;;  %v3812_v27 = vshrl.u32 %v3777_v9, 16  ;;  %v3815_v28 = vshll.u32 %v3801_v23, 16  ;;  %v509_v29 = vsel %vm193_vm1, %v197_v16, 0  ;;  %v3853_v45 = vld [vmem:[#allocation2 + $0x20] sm:$0xff]   ;;  %v3860_v48 = vld [vmem:[#allocation2 + $0x58] sm:$0xff]   ;;  %v3881_v57 = vld [vmem:[#allocation2 + $0x28] sm:$0xff]  }
  0x69   :  { %v212_v24 = vsel %vm200_vm2, %v207_v17, %v211_v12  ;;  %v215_v30 = vor.u32 %v3796_v19, %v211_v12  ;;  %v219_v31 = vrot.slane %v3805_v25, 1  ;;  %v3835_v38 = vshrl.u32 %v3793_v18, 16  ;;  %v3486_v58 = vld [vmem:[#allocation2 + $0x60] ss:$0 sps:$4 sm:$0xff]   ;;  %v3487_v59 = vld [vmem:[#allocation5] ss:$0 sps:$4 sm:$0xff]  }
  0x6a   :  { %2980 = vmatmul.mubr.msk.bf16.vlgmr.msra.gmra.mrb[0].mxu0 %vm303_vm3, %v212_v24  ;;  %4901 = vst [vmem:[#allocation16_spill] sm:$0xff] %v3815_v28  ;;  %v268_v33 = vsel %vm200_vm2, %v263_v26, %v267_v21  ;;  %v271_v34 = vor.u32 %v3812_v27, %v267_v21  ;;  %v275_v35 = vrot.slane %v3815_v28, 1  ;;  %v3838_v39 = vshll.u32 %v3822_v32, 16  ;;  %v3910_v21 = vld [vmem:[#allocation2 + $0x30] sm:$0xff]   ;;  %s3654_s4 = smov [#allocation11]  }
  0x6b   :  { %3086 = vmatpush3.bf16.msra.mxu0 %v716_v22  ;;  %2983 = vmatprep.mubr.msk.bf16.mxu0 %vm3653_vm0, %v4889_v0  ;;  %v220_v37 = vsel %vm200_vm2, %v215_v30, %v219_v31  ;;  %v3844_v41 = vshrl.u32 %v3801_v23, 16  ;;  %v3847_v42 = vshll.u32 %v3831_v36, 16  ;;  %v223_v43 = vor.u32 %v3835_v38, %v219_v31  ;;  %s2594_s1 = sshll.u32 %s3654_s4, 4  ;;  %s2595_s1 = int_to_ptr.vmem [resolvable:$true] %s2594_s1 }
  0x6c   :  { %3193 = vmatprep.subr.bf16.mxu0 %v4889_v0  ;;  %3008 = vmatmul.mubr.msk.bf16.vlgmr.msra.gmra.mrb[0].mxu1 %vm303_vm3, %v268_v33  ;;  %v276_v40 = vsel %vm200_vm2, %v271_v34, %v275_v35  ;;  %v227_v44 = vrot.slane %v3838_v39, 1  ;;  %v3864_v50 = vshrl.u32 %v3822_v32, 16  ;;  %v3867_v51 = vshll.u32 %v3853_v45, 16  ;;  %s3615_s3 = scalar_lea.vmem %s2595_s1, 1600  ;;  %p3620_p5 = scmp.lt.s32.totalorder %s2595_s1, %s2595_s1 }
  0x6d   :  { %3032 = vmatpush3.bf16.msra.mxu1 %v509_v29  ;;  %3011 = vmatprep.mubr.msk.bf16.mxu1 %vm3653_vm0, %v4889_v0  ;;  %4902 = vst [vmem:[#allocation17_spill] sm:$0xff] %v3847_v42  ;;  %v279_v46 = vor.u32 %v3844_v41, %v275_v35  ;;  %v283_v47 = vrot.slane %v3847_v42, 1  ;;  %v3872_v53 = vshrl.u32 %v3831_v36, 16  ;;  %v3875_v54 = vshll.u32 %v3860_v48, 16  ;;  %p3616_p4 = scmp.ne.s32.totalorder %s2595_s1, %s3615_s3  ;;  %p3621_p6 = scmp.lt.s32.totalorder %s3615_s3, %s3615_s3 }
  0x6e   :  { %3139 = vmatprep.subr.bf16.mxu1 %v4889_v0  ;;  %v228_v49 = vsel %vm200_vm2, %v223_v43, %v227_v44  ;;  %v231_v55 = vor.u32 %v3864_v50, %v227_v44  ;;  %v235_v56 = vrot.slane %v3867_v51, 1  ;;  %v3890_v63 = vshrl.u32 %v3853_v45, 16 }
  0x6f   :  { %v284_v52 = vsel %vm200_vm2, %v279_v46, %v283_v47  ;;  %4903 = vst [vmem:[#allocation18_spill] sm:$0xff] %v3872_v53  ;;  %4904 = vst [vmem:[#allocation19_spill] sm:$0xff] %v3875_v54  ;;  %v287_v60 = vor.u32 %v3872_v53, %v283_v47  ;;  %v291_v61 = vrot.slane %v3875_v54, 1  ;;  %v3893_v1 = vshll.u32 %v3881_v57, 16  ;;  %p3622_p7 = por %p3621_p6, %p3620_p5 }
  0x70   :  { %v236_v62 = vsel %vm200_vm2, %v231_v55, %v235_v56  ;;  %v3896_v2 = vsel %vm193_vm1, %v3486_v58, %v3487_v59  ;;  %v3901_v11 = vshrl.u32 %v3860_v48, 16  ;;  %v239_v16 = vor.u32 %v3890_v63, %v235_v56  ;;  %v1113_v58 = vld [vmem:[#allocation7 + $0x10] sm:$0xf] }
  0x71   :  { %4905 = vst [vmem:[#allocation20_spill] sm:$0xff] %v3896_v2  ;;  %v292_v10 = vsel %vm200_vm2, %v287_v60, %v291_v61  ;;  %v3904_v12 = vshll.u32 %v3896_v2, 16  ;;  %v243_v17 = vrot.slane %v3893_v1, 1  ;;  %v3915_v22 = vrot.slane %v202_v5, 5  ;;  %p3623_p8 = pnand %p3622_p7, %p3616_p4 }
  0x72   :  { %2984 = vmatmul.mubr.msk.bf16.gmra.mrb[4].mxu0 %vm303_vm3, %v220_v37  ;;  %4906 = vst [vmem:[#allocation21_spill] sm:$0xff] %v3901_v11  ;;  %v3919_v24 = vrot.slane %v204_v6, 6  ;;  %v295_v26 = vor.u32 %v3901_v11, %v291_v61  ;;  %v3927_v31 = vshrl.u32 %v3881_v57, 16  ;;  %v3930_v33 = vshll.u32 %v3910_v21, 16 }
  0x73   :  { %2987 = vmatprep.mubr.msk.bf16.mxu0 %vm3653_vm0, %v4889_v0  ;;  %4907 = vst [vmem:[#allocation22_spill] sm:$0xff] %v3904_v12  ;;  %v298_v29 = vrot.slane %v3904_v12, 1  ;;  %v244_v30 = vsel %vm200_vm2, %v239_v16, %v243_v17  ;;  %v3942_v37 = vshrl.u32 %v3896_v2, 16  ;;  %v3948_v43 = vshrl.u32 %v3910_v21, 16 }
  0x74   :  { %3012 = vmatmul.mubr.msk.bf16.gmra.mrb[4].mxu1 %vm303_vm3, %v276_v40  ;;  %v1117_v6 = vor.u32 %v3919_v24, %v3915_v22  ;;  %v247_v34 = vor.u32 %v3927_v31, %v243_v17  ;;  %v251_v35 = vrot.slane %v3930_v33, 1  ;;  %v651_v55 = vrot.slane %v3764_v3, 1 }
  0x75   :  { %3015 = vmatprep.mubr.msk.bf16.mxu1 %vm3653_vm0, %v4889_v0  ;;  %v299_v5 = vsel %vm200_vm2, %v295_v26, %v298_v29  ;;  %4908 = vst [vmem:[#allocation23_spill] sm:$0xff] %v3942_v37  ;;  %v302_v44 = vor.u32 %v3942_v37, %v298_v29  ;;  %v652_v56 = vrot.slane %v3766_v4, 1  ;;  %vm650_vm4 = vcmask 1046528  }
  0x76   :  { %v252_v40 = vsel %vm200_vm2, %v247_v34, %v251_v35  ;;  %v255_v46 = vor.u32 %v3948_v43, %v251_v35  ;;  %v1215_v59 = vsel %vm193_vm1, %v1113_v58, 0  ;;  %v654_v60 = vrot.slane %v3793_v18, 1 }
  0x77   :  { %v658_v16 = vrot.slane %v3853_v45, 1  ;;  %v660_v26 = vrot.slane %v3881_v57, 1  ;;  %v664_v34 = vrot.slane %v3775_v8, 1  ;;  %v674_v58 = vrot.slane %v3896_v2, 1 }
  0x78   :  { %v260_v47 = vsel %vm200_vm2, %v255_v46, %v259_v20  ;;  %v653_v20 = vsel %vm650_vm4, %v651_v55, %v652_v56  ;;  %v655_v61 = vsel %vm650_vm4, %v652_v56, %v654_v60  ;;  %v668_v46 = vrot.slane %v3801_v23, 1 }
  0x79   :  { %v661_v29 = vsel %vm650_vm4, %v658_v16, %v660_v26  ;;  %v672_v55 = vrot.slane %v3860_v48, 1  ;;  %vm881_vm5 = vcmask 1042432   ;;  %vm1114_vm6 = vsmask.f32 2304 }
  0x7a   :  { %2988 = vmatmul.mubr.msk.bf16.gmra.mrb[8].mxu0 %vm303_vm3, %v228_v49  ;;  %v880_v49 = vld [vmem:[#allocation7 + $0xc] sm:$0xf]  ;;  %v887_v22 = vrot.slane %v3822_v32, 5  ;;  %vm1380_vm7 = vcmask 1041408   ;;  %vm1613_vm8 = vcmask 1045504   ;;  %vm2101_vm10 = vcmask 1044480  }
  0x7b   :  { %2991 = vmatprep.mubr.msk.bf16.mxu0 %vm3653_vm0, %v4889_v0  ;;  %vm1844_vm9 = vsmask.f32 5376  ;;  %vm2563_vm11 = vcmask 60416  }
  0x7c   :  { %3016 = vmatmul.mubr.msk.bf16.gmra.mrb[8].mxu1 %vm303_vm3, %v284_v52  ;;  %v949_v52 = vsel %vm193_vm1, %v880_v49, 0  ;;  %v670_v49 = vrot.slane %v3831_v36, 1 }
  0x7d   :  { %3019 = vmatprep.mubr.msk.bf16.mxu1 %vm3653_vm0, %v4889_v0 }
  0x7e   :  { %v673_v56 = vsel %vm650_vm4, %v670_v49, %v672_v55 }
  0x82   :  { %2992 = vmatmul.mubr.msk.bf16.gmra.mrb[12].mxu0 %vm303_vm3, %v236_v62  ;;  %v656_v62 = vrot.slane %v3822_v32, 1 }
  0x83   :  { %2995 = vmatprep.mubr.msk.bf16.mxu0 %vm3653_vm0, %v4889_v0 }
  0x84   :  { %3020 = vmatmul.mubr.msk.bf16.gmra.mrb[12].mxu1 %vm303_vm3, %v292_v10  ;;  %v657_v10 = vsel %vm650_vm4, %v654_v60, %v656_v62  ;;  %v659_v17 = vsel %vm650_vm4, %v656_v62, %v658_v16  ;;  %v883_v60 = vrot.slane %v3766_v4, 5  ;;  %v1119_v62 = vrot.slane %v3773_v7, 6 }
  0x85   :  { %3023 = vmatprep.mubr.msk.bf16.mxu1 %vm3653_vm0, %v4889_v0 }
  0x8a   :  { %2996 = vmatmul.mubr.msk.bf16.gmra.mrb[16].mxu0 %vm303_vm3, %v244_v30  ;;  %v662_v30 = vrot.slane %v3910_v21, 1 }
  0x8b   :  { %2999 = vmatprep.mubr.msk.bf16.mxu0 %vm3653_vm0, %v4889_v0 }
  0x8c   :  { %3024 = vmatmul.mubr.msk.bf16.gmra.mrb[16].mxu1 %vm303_vm3, %v299_v5  ;;  %v663_v5 = vsel %vm650_vm4, %v660_v26, %v662_v30  ;;  %v665_v35 = vsel %vm650_vm4, %v662_v30, %v664_v34  ;;  %v885_v30 = vrot.slane %v3793_v18, 5 }
  0x8d   :  { %3027 = vmatprep.mubr.msk.bf16.mxu1 %vm3653_vm0, %v4889_v0 }
  0x92   :  { %3000 = vmatmul.mubr.msk.bf16.gmra.mrb[20].mxu0 %vm303_vm3, %v252_v40  ;;  %v666_v40 = vrot.slane %v3777_v9, 1 }
  0x93   :  { %3003 = vmatprep.mubr.msk.bf16.mxu0 %vm3653_vm0, %v4889_v0 }
  0x94   :  { %3028 = vmatmul.mubr.msk.bf16.gmra.mrb[20].mxu1 %vm303_vm3, %v302_v44  ;;  %v667_v44 = vsel %vm650_vm4, %v664_v34, %v666_v40  ;;  %v1122_v34 = vrot.slane %v3835_v38, 5 }
  0x95   :  { %3033 = vmatprep.mubr.msk.bf16.mxu1 %vm3653_vm0, %v4889_v0 }
  0x9a   :  { %3004 = vmatmul.mubr.msk.bf16.gmra.mrb[24].mxu0 %vm303_vm3, %v260_v47  ;;  %v669_v47 = vsel %vm650_vm4, %v666_v40, %v668_v46 }
  0x9b   :  { %3087 = vmatprep.mubr.msk.bf16.mxu0 %vm3653_vm0, %v4889_v0 }
  0x9c   :  { %3034 = vmatmul.mubr.msk.bf16.vlgmr.msra.gmra.mrb[24].mxu1 %vm303_vm3, %v3764_v3 }
  0x9d   :  { %3140 = vmatpush3.bf16.msra.mxu1 %v949_v52  ;;  %3037 = vmatprep.mubr.msk.bf16.mxu1 %vm3653_vm0, %v4889_v0  ;;  %v671_v52 = vsel %vm650_vm4, %v668_v46, %v670_v49  ;;  %v888_v49 = vsel %vm881_vm5, %v885_v30, %v887_v22 }
  0x9e   :  { %3247 = vmatprep.subr.bf16.mxu1 %v4889_v0 }
  0xa2   :  { %3088 = vmatmul.mubr.msk.bf16.vlgmr.msra.gmra.mrb[28].mxu0 %vm303_vm3, %v653_v20  ;;  %v675_v20 = vsel %vm650_vm4, %v672_v55, %v674_v58  ;;  %v889_v55 = vrot.slane %v3853_v45, 5 }
  0xa3   :  { %3194 = vmatpush3.bf16.msra.mxu0 %v1215_v59  ;;  %3091 = vmatprep.mubr.msk.bf16.mxu0 %vm3653_vm0, %v4889_v0  ;;  %v882_v59 = vrot.slane %v3764_v3, 5 }
  0xa4   :  { %3301 = vmatprep.subr.bf16.mxu0 %v4889_v0  ;;  %3038 = vmatmul.mubr.msk.bf16.gmra.mrb[28].mxu1 %vm303_vm3, %v3766_v4 }
  0xa5   :  { %3041 = vmatprep.mubr.msk.bf16.mxu1 %vm3653_vm0, %v4889_v0  ;;  %v884_v16 = vsel %vm881_vm5, %v882_v59, %v883_v60  ;;  %v890_v59 = vsel %vm881_vm5, %v887_v22, %v889_v55  ;;  %v1142_v22 = vrot.slane %v3786_v14, 5 }
  0xaa   :  { %3092 = vmatmul.mubr.msk.bf16.gmra.mrb[32].mxu0 %vm303_vm3, %v655_v61  ;;  %v1118_v61 = vrot.slane %v3796_v19, 5 }
  0xab   :  { %3095 = vmatprep.mubr.msk.bf16.mxu0 %vm3653_vm0, %v4889_v0 }
  0xac   :  { %3042 = vmatmul.mubr.msk.bf16.gmra.mrb[32].mxu1 %vm303_vm3, %v3793_v18  ;;  %v1120_v26 = vor.u32 %v1119_v62, %v1118_v61  ;;  %v891_v61 = vrot.slane %v3881_v57, 5 }
  0xad   :  { %3045 = vmatprep.mubr.msk.bf16.mxu1 %vm3653_vm0, %v4889_v0 }
  0xb2   :  { %3096 = vmatmul.mubr.msk.bf16.gmra.mrb[36].mxu0 %vm303_vm3, %v657_v10  ;;  %v1379_v10 = vld [vmem:[#allocation7 + $0x14] sm:$0xf] }
  0xb3   :  { %3099 = vmatprep.mubr.msk.bf16.mxu0 %vm3653_vm0, %v4889_v0 }
  0xb4   :  { %3046 = vmatmul.mubr.msk.bf16.gmra.mrb[36].mxu1 %vm303_vm3, %v3822_v32 }
  0xb5   :  { %3049 = vmatprep.mubr.msk.bf16.mxu1 %vm3653_vm0, %v4889_v0 }
  0xba   :  { %3100 = vmatmul.mubr.msk.bf16.gmra.mrb[40].mxu0 %vm303_vm3, %v659_v17  ;;  %v1448_v17 = vsel %vm193_vm1, %v1379_v10, 0  ;;  %v1134_v10 = vrot.slane %v3927_v31, 5 }
  0xbb   :  { %3103 = vmatprep.mubr.msk.bf16.mxu0 %vm3653_vm0, %v4889_v0 }
  0xbc   :  { %3050 = vmatmul.mubr.msk.bf16.gmra.mrb[40].mxu1 %vm303_vm3, %v3853_v45 }
  0xbd   :  { %3053 = vmatprep.mubr.msk.bf16.mxu1 %vm3653_vm0, %v4889_v0 }
  0xc2   :  { %3104 = vmatmul.mubr.msk.bf16.gmra.mrb[44].mxu0 %vm303_vm3, %v661_v29  ;;  %v1612_v29 = vld [vmem:[#allocation7 + $0x18] sm:$0xf] }
  0xc3   :  { %3107 = vmatprep.mubr.msk.bf16.mxu0 %vm3653_vm0, %v4889_v0  ;;  %v1679_v40 = vsel %vm193_vm1, %v1612_v29, 0  ;;  %v893_v29 = vrot.slane %v3910_v21, 5 }
  0xc4   :  { %3054 = vmatmul.mubr.msk.bf16.gmra.mrb[44].mxu1 %vm303_vm3, %v3881_v57 }
  0xc5   :  { %3057 = vmatprep.mubr.msk.bf16.mxu1 %vm3653_vm0, %v4889_v0 }
  0xca   :  { %3108 = vmatmul.mubr.msk.bf16.gmra.mrb[48].mxu0 %vm303_vm3, %v663_v5  ;;  %v1121_v5 = vsel %vm1114_vm6, %v1117_v6, %v1120_v26  ;;  %v1126_v6 = vrot.slane %v3864_v50, 5 }
  0xcb   :  { %3111 = vmatprep.mubr.msk.bf16.mxu0 %vm3653_vm0, %v4889_v0 }
  0xcc   :  { %3058 = vmatmul.mubr.msk.bf16.gmra.mrb[48].mxu1 %vm303_vm3, %v3910_v21 }
  0xcd   :  { %3061 = vmatprep.mubr.msk.bf16.mxu1 %vm3653_vm0, %v4889_v0 }
  0xd2   :  { %3112 = vmatmul.mubr.msk.bf16.gmra.mrb[52].mxu0 %vm303_vm3, %v665_v35  ;;  %v1123_v35 = vrot.slane %v3805_v25, 6 }
  0xd3   :  { %3115 = vmatprep.mubr.msk.bf16.mxu0 %vm3653_vm0, %v4889_v0 }
  0xd4   :  { %3062 = vmatmul.mubr.msk.bf16.gmra.mrb[52].mxu1 %vm303_vm3, %v3775_v8  ;;  %v1124_v46 = vor.u32 %v1123_v35, %v1122_v34  ;;  %v1139_v34 = vrot.slane %v3930_v33, 6  ;;  %v894_v35 = vsel %vm881_vm5, %v891_v61, %v893_v29 }
  0xd5   :  { %3065 = vmatprep.mubr.msk.bf16.mxu1 %vm3653_vm0, %v4889_v0 }
  0xd6   :  { %v1125_v24 = vsel %vm1114_vm6, %v1120_v26, %v1124_v46 }
  0xda   :  { %3116 = vmatmul.mubr.msk.bf16.gmra.mrb[56].mxu0 %vm303_vm3, %v667_v44  ;;  %v886_v44 = vsel %vm881_vm5, %v883_v60, %v885_v30 }
  0xdb   :  { %3119 = vmatprep.mubr.msk.bf16.mxu0 %vm3653_vm0, %v4889_v0 }
  0xdc   :  { %3066 = vmatmul.mubr.msk.bf16.gmra.mrb[56].mxu1 %vm303_vm3, %v3777_v9 }
  0xdd   :  { %3069 = vmatprep.mubr.msk.bf16.mxu1 %vm3653_vm0, %v4889_v0 }
  0xe2   :  { %3120 = vmatmul.mubr.msk.bf16.gmra.mrb[60].mxu0 %vm303_vm3, %v669_v47  ;;  %v1127_v47 = vrot.slane %v3838_v39, 6 }
  0xe3   :  { %3123 = vmatprep.mubr.msk.bf16.mxu0 %vm3653_vm0, %v4889_v0 }
  0xe4   :  { %3070 = vmatmul.mubr.msk.bf16.gmra.mrb[60].mxu1 %vm303_vm3, %v3801_v23 }
  0xe5   :  { %3073 = vmatprep.mubr.msk.bf16.mxu1 %vm3653_vm0, %v4889_v0 }
  0xea   :  { %3124 = vmatmul.mubr.msk.bf16.gmra.mrb[64].mxu0 %vm303_vm3, %v671_v52  ;;  %v1128_v52 = vor.u32 %v1127_v47, %v1126_v6 }
  0xeb   :  { %3127 = vmatprep.mubr.msk.bf16.mxu0 %vm3653_vm0, %v4889_v0 }
  0xec   :  { %3074 = vmatmul.mubr.msk.bf16.gmra.mrb[64].mxu1 %vm303_vm3, %v3831_v36 }
  0xed   :  { %3077 = vmatprep.mubr.msk.bf16.mxu1 %vm3653_vm0, %v4889_v0 }
  0xf2   :  { %3128 = vmatmul.mubr.msk.bf16.gmra.mrb[68].mxu0 %vm303_vm3, %v673_v56  ;;  %v1129_v56 = vsel %vm1114_vm6, %v1124_v46, %v1128_v52 }
  0xf3   :  { %3131 = vmatprep.mubr.msk.bf16.mxu0 %vm3653_vm0, %v4889_v0 }
  0xf4   :  { %3078 = vmatmul.mubr.msk.bf16.gmra.mrb[68].mxu1 %vm303_vm3, %v3860_v48 }
  0xf5   :  { %3081 = vmatprep.mubr.msk.bf16.mxu1 %vm3653_vm0, %v4889_v0 }
  0xfa   :  { %3132 = vmatmul.mubr.msk.bf16.gmra.mrb[72].mxu0 %vm303_vm3, %v675_v20  ;;  %v1131_v20 = vrot.slane %v3867_v51, 6 }
  0xfb   :  { %3135 = vmatprep.mubr.msk.bf16.mxu0 %vm3653_vm0, %v4889_v0 }
  0xfc   :  { %3082 = vmatmul.mubr.msk.bf16.gmra.mrb[72].mxu1 %vm303_vm3, %v3896_v2 }
  0xfd   :  { %3141 = vmatprep.mubr.msk.bf16.mxu1 %vm3653_vm0, %v4889_v0 }
 0x102   :  { %3136 = vmatmul.mubr.msk.bf16.gmra.mrb[76].mxu0 %vm303_vm3, %v674_v58  ;;  %v1130_v58 = vrot.slane %v3890_v63, 5 }
 0x103   :  { %3195 = vmatprep.mubr.msk.bf16.mxu0 %vm3653_vm0, %v4889_v0 }
 0x104   :  { %3142 = vmatmul.mubr.msk.bf16.vlgmr.msra.gmra.mrb[76].mxu1 %vm303_vm3, %v884_v16  ;;  %v1132_v60 = vor.u32 %v1131_v20, %v1130_v58  ;;  %v1135_v16 = vrot.slane %v3893_v1, 6 }
 0x105   :  { %3248 = vmatpush3.bf16.msra.mxu1 %v1448_v17  ;;  %3145 = vmatprep.mubr.msk.bf16.mxu1 %vm3653_vm0, %v4889_v0  ;;  %v892_v17 = vsel %vm881_vm5, %v889_v55, %v891_v61  ;;  %v1147_v55 = vrot.slane %v3789_v15, 6 }
 0x106   :  { %3355 = vmatprep.subr.bf16.mxu1 %v4889_v0  ;;  %v1133_v62 = vsel %vm1114_vm6, %v1128_v52, %v1132_v60  ;;  %v1136_v26 = vor.u32 %v1135_v16, %v1134_v10  ;;  %v1146_v52 = vrot.slane %v3812_v27, 5  ;;  %v1151_v10 = vrot.slane %v3815_v28, 6 }
 0x108   :  { %v1137_v30 = vsel %vm1114_vm6, %v1132_v60, %v1136_v26  ;;  %v1148_v58 = vor.u32 %v1147_v55, %v1146_v52 }
 0x10a   :  { %3196 = vmatmul.mubr.msk.bf16.vlgmr.msra.gmra.mrb[80].mxu0 %vm303_vm3, %v1121_v5  ;;  %v1138_v5 = vrot.slane %v3948_v43, 5 }
 0x10b   :  { %3302 = vmatpush3.bf16.msra.mxu0 %v1679_v40  ;;  %3199 = vmatprep.mubr.msk.bf16.mxu0 %vm3653_vm0, %v4889_v0 }
 0x10c   :  { %3409 = vmatprep.subr.bf16.mxu0 %v4889_v0  ;;  %3146 = vmatmul.mubr.msk.bf16.gmra.mrb[80].mxu1 %vm303_vm3, %v886_v44  ;;  %v1140_v40 = vor.u32 %v1139_v34, %v1138_v5  ;;  %v895_v44 = vrot.slane %v3775_v8, 5  ;;  %v897_v8 = vrot.slane %v3777_v9, 5  ;;  %v899_v9 = vrot.slane %v3801_v23, 5 }
 0x10d   :  { %3149 = vmatprep.mubr.msk.bf16.mxu1 %vm3653_vm0, %v4889_v0 }
 0x10e   :  { %v1141_v46 = vsel %vm1114_vm6, %v1136_v26, %v1140_v40  ;;  %v896_v6 = vsel %vm881_vm5, %v893_v29, %v895_v44 }
 0x112   :  { %3200 = vmatmul.mubr.msk.bf16.gmra.mrb[84].mxu0 %vm303_vm3, %v1125_v24  ;;  %v1143_v24 = vrot.slane %v3783_v13, 6 }
 0x113   :  { %3203 = vmatprep.mubr.msk.bf16.mxu0 %vm3653_vm0, %v4889_v0 }
 0x114   :  { %3150 = vmatmul.mubr.msk.bf16.gmra.mrb[84].mxu1 %vm303_vm3, %v888_v49  ;;  %v1144_v47 = vor.u32 %v1143_v24, %v1142_v22  ;;  %v1154_v22 = vrot.slane %v3872_v53, 5  ;;  %v1155_v24 = vrot.slane %v3847_v42, 6  ;;  %v1614_v42 = vrot.slane %v3766_v4, 2 }
 0x115   :  { %3153 = vmatprep.mubr.msk.bf16.mxu1 %vm3653_vm0, %v4889_v0 }
 0x116   :  { %v1145_v49 = vsel %vm1114_vm6, %v1140_v40, %v1144_v47  ;;  %v1149_v61 = vsel %vm1114_vm6, %v1144_v47, %v1148_v58  ;;  %v901_v40 = vrot.slane %v3831_v36, 5  ;;  %v1156_v36 = vor.u32 %v1155_v24, %v1154_v22 }
 0x117   :  { %v905_v24 = vrot.slane %v3896_v2, 5 }
 0x118   :  { %v902_v52 = vsel %vm881_vm5, %v899_v9, %v901_v40 }
 0x11a   :  { %3204 = vmatmul.mubr.msk.bf16.gmra.mrb[88].mxu0 %vm303_vm3, %v1129_v56  ;;  %v898_v56 = vsel %vm881_vm5, %v895_v44, %v897_v8 }
 0x11b   :  { %3207 = vmatprep.mubr.msk.bf16.mxu0 %vm3653_vm0, %v4889_v0 }
 0x11c   :  { %3154 = vmatmul.mubr.msk.bf16.gmra.mrb[88].mxu1 %vm303_vm3, %v890_v59 }
 0x11d   :  { %3157 = vmatprep.mubr.msk.bf16.mxu1 %vm3653_vm0, %v4889_v0 }
 0x122   :  { %3208 = vmatmul.mubr.msk.bf16.gmra.mrb[92].mxu0 %vm303_vm3, %v1133_v62  ;;  %v1150_v62 = vrot.slane %v3844_v41, 5 }
 0x123   :  { %3211 = vmatprep.mubr.msk.bf16.mxu0 %vm3653_vm0, %v4889_v0 }
 0x124   :  { %3158 = vmatmul.mubr.msk.bf16.gmra.mrb[92].mxu1 %vm303_vm3, %v892_v17  ;;  %v1152_v23 = vor.u32 %v1151_v10, %v1150_v62  ;;  %v1158_v62 = vrot.slane %v3901_v11, 5  ;;  %v1159_v10 = vrot.slane %v3875_v54, 6  ;;  %v4909_v54 = vmov 0.0  }
 0x125   :  { %3161 = vmatprep.mubr.msk.bf16.mxu1 %vm3653_vm0, %v4889_v0 }
 0x12a   :  { %3212 = vmatmul.mubr.msk.bf16.gmra.mrb[96].mxu0 %vm303_vm3, %v1137_v30  ;;  %v900_v30 = vsel %vm881_vm5, %v897_v8, %v899_v9  ;;  %v1157_v9 = vsel %vm1114_vm6, %v1152_v23, %v1156_v36 }
 0x12b   :  { %3215 = vmatprep.mubr.msk.bf16.mxu0 %vm3653_vm0, %v4889_v0 }
 0x12c   :  { %3162 = vmatmul.mubr.msk.bf16.gmra.mrb[96].mxu1 %vm303_vm3, %v894_v35 }
 0x12d   :  { %3165 = vmatprep.mubr.msk.bf16.mxu1 %vm3653_vm0, %v4889_v0 }
 0x132   :  { %3216 = vmatmul.mubr.msk.bf16.gmra.mrb[100].mxu0 %vm303_vm3, %v1141_v46  ;;  %v1153_v46 = vsel %vm1114_vm6, %v1148_v58, %v1152_v23 }
 0x133   :  { %3219 = vmatprep.mubr.msk.bf16.mxu0 %vm3653_vm0, %v4889_v0 }
 0x134   :  { %3166 = vmatmul.mubr.msk.bf16.gmra.mrb[100].mxu1 %vm303_vm3, %v896_v6 }
 0x135   :  { %3169 = vmatprep.mubr.msk.bf16.mxu1 %vm3653_vm0, %v4889_v0 }
 0x13a   :  { %3220 = vmatmul.mubr.msk.bf16.gmra.mrb[104].mxu0 %vm303_vm3, %v1145_v49 }
 0x13b   :  { %3223 = vmatprep.mubr.msk.bf16.mxu0 %vm3653_vm0, %v4889_v0 }
 0x13c   :  { %3170 = vmatmul.mubr.msk.bf16.gmra.mrb[104].mxu1 %vm303_vm3, %v898_v56 }
 0x13d   :  { %v4174_v20 = vpop.f32.mrb[0].mxu0  ;;  %3173 = vmatprep.mubr.msk.bf16.mxu1 %vm3653_vm0, %v4889_v0 }
 0x13e   :  { %v2981_v59 = vpop.f32.mrb[1].mxu0 }
 0x13f   :  { %v4179_v60 = vpop.f32.mrb[2].mxu0  ;;  %v4184_v17 = vpop.f32.mrb[0].mxu1  ;;  %v903_v59 = vrot.slane %v3860_v48, 5  ;;  %v1160_v48 = vor.u32 %v1159_v10, %v1158_v62  ;;  %v4243_v62 = vld [vmem:[#allocation5 + $0x4] sm:$0xff]  }
 0x140   :  { %v2982_v16 = vpop.f32.mrb[3].mxu0  ;;  %v3009_v26 = vpop.f32.mrb[1].mxu1 }
 0x141   :  { %v4186_v29 = vpop.f32.mrb[2].mxu1 }
 0x142   :  { %3224 = vmatmul.mubr.msk.bf16.gmra.mrb[108].mxu0 %vm303_vm3, %v1149_v61  ;;  %v3010_v5 = vpop.f32.mrb[3].mxu1 }
 0x143   :  { %3227 = vmatprep.mubr.msk.bf16.mxu0 %vm3653_vm0, %v4889_v0 }
 0x144   :  { %3174 = vmatmul.mubr.msk.bf16.gmra.mrb[108].mxu1 %vm303_vm3, %v900_v30 }
 0x145   :  { %v4193_v34 = vpop.f32.mrb[4].mxu0  ;;  %3177 = vmatprep.mubr.msk.bf16.mxu1 %vm3653_vm0, %v4889_v0 }
 0x146   :  { %v2985_v35 = vpop.f32.mrb[5].mxu0 }
 0x147   :  { %v4198_v44 = vpop.f32.mrb[6].mxu0  ;;  %v4203_v47 = vpop.f32.mrb[4].mxu1  ;;  %v904_v35 = vsel %vm881_vm5, %v901_v40, %v903_v59  ;;  %v1161_v40 = vsel %vm1114_vm6, %v1156_v36, %v1160_v48 }
 0x148   :  { %v2986_v6 = vpop.f32.mrb[7].mxu0  ;;  %v3013_v8 = vpop.f32.mrb[5].mxu1 }
 0x149   :  { %v4205_v49 = vpop.f32.mrb[6].mxu1  ;;  %v1162_v8 = vrot.slane %v3942_v37, 5 }
 0x14a   :  { %3228 = vmatmul.mubr.msk.bf16.gmra.mrb[112].mxu0 %vm303_vm3, %v1153_v46  ;;  %v3014_v55 = vpop.f32.mrb[7].mxu1 }
 0x14b   :  { %3231 = vmatprep.mubr.msk.bf16.mxu0 %vm3653_vm0, %v4889_v0 }
 0x14c   :  { %3178 = vmatmul.mubr.msk.bf16.gmra.mrb[112].mxu1 %vm303_vm3, %v902_v52  ;;  %v1163_v52 = vrot.slane %v3904_v12, 6 }
 0x14d   :  { %v4212_v56 = vpop.f32.mrb[8].mxu0  ;;  %3181 = vmatprep.mubr.msk.bf16.mxu1 %vm3653_vm0, %v4889_v0 }
 0x14e   :  { %v2989_v58 = vpop.f32.mrb[9].mxu0  ;;  %v1164_v36 = vor.u32 %v1163_v52, %v1162_v8 }
 0x14f   :  { %v4217_v61 = vpop.f32.mrb[10].mxu0  ;;  %v4222_v26 = vpop.f32.mrb[8].mxu1 }
 0x150   :  { %v2990_v16 = vpop.f32.mrb[11].mxu0  ;;  %v3017_v30 = vpop.f32.mrb[9].mxu1 }
 0x151   :  { %v4224_v5 = vpop.f32.mrb[10].mxu1  ;;  %v906_v16 = vsel %vm881_vm5, %v903_v59, %v905_v24  ;;  %v907_v59 = vrot.slane %v4243_v62, 5 }
 0x152   :  { %3232 = vmatmul.mubr.msk.bf16.gmra.mrb[116].mxu0 %vm303_vm3, %v1157_v9  ;;  %v3018_v46 = vpop.f32.mrb[11].mxu1 }
 0x153   :  { %3235 = vmatprep.mubr.msk.bf16.mxu0 %vm3653_vm0, %v4889_v0  ;;  %v4894_v46 = vshll.u32 %v4243_v62, 16 }
 0x154   :  { %3182 = vmatmul.mubr.msk.bf16.gmra.mrb[116].mxu1 %vm303_vm3, %v904_v35  ;;  %v4893_v35 = vshrl.u32 %v4243_v62, 16 }
 0x155   :  { %v4231_v23 = vpop.f32.mrb[12].mxu0  ;;  %3185 = vmatprep.mubr.msk.bf16.mxu1 %vm3653_vm0, %v4889_v0  ;;  %v1172_v52 = vrot.slane %v4894_v46, 6 }
 0x156   :  { %v2993_v22 = vpop.f32.mrb[13].mxu0  ;;  %v1169_v8 = vrot.slane %v4893_v35, 5 }
 0x157   :  { %v4236_v6 = vpop.f32.mrb[14].mxu0  ;;  %v4241_v58 = vpop.f32.mrb[12].mxu1 }
 0x158   :  { %v2994_v55 = vpop.f32.mrb[15].mxu0  ;;  %v3021_v9 = vpop.f32.mrb[13].mxu1 }
 0x159   :  { %v4245_v10 = vpop.f32.mrb[14].mxu1  ;;  %v1165_v9 = vsel %vm1114_vm6, %v1160_v48, %v1164_v36  ;;  %v1173_v48 = vor.u32 %v1172_v52, %v1169_v8  ;;  %v1843_v8 = vld [vmem:[#allocation7 + $0x1c] sm:$0xf] }
 0x15a   :  { %3236 = vmatmul.mubr.msk.bf16.gmra.mrb[120].mxu0 %vm303_vm3, %v1161_v40  ;;  %v3022_v30 = vpop.f32.mrb[15].mxu1 }
 0x15b   :  { %3239 = vmatprep.mubr.msk.bf16.mxu0 %vm3653_vm0, %v4889_v0 }
 0x15c   :  { %3186 = vmatmul.mubr.msk.bf16.gmra.mrb[120].mxu1 %vm303_vm3, %v906_v16 }
 0x15d   :  { %v4254_v22 = vpop.f32.mrb[16].mxu0  ;;  %3189 = vmatprep.mubr.msk.bf16.mxu1 %vm3653_vm0, %v4889_v0  ;;  %v908_v0 = vsel %vm881_vm5, %v905_v24, %v907_v59 }
 0x15e   :  { %v2997_v55 = vpop.f32.mrb[17].mxu0 }
 0x15f   :  { %v4259_v40 = vpop.f32.mrb[18].mxu0  ;;  %v4266_v16 = vpop.f32.mrb[16].mxu1 }
 0x160   :  { %v2998_v30 = vpop.f32.mrb[19].mxu0  ;;  %v3025_v12 = vpop.f32.mrb[17].mxu1 }
 0x161   :  { %v4268_v55 = vpop.f32.mrb[18].mxu1  ;;  %v1381_v12 = vrot.slane %v3764_v3, 6  ;;  %v1382_v30 = vrot.slane %v3766_v4, 6  ;;  %v1936_v3 = vsel %vm193_vm1, %v1843_v8, 0 }
 0x162   :  { %3240 = vmatmul.mubr.msk.bf16.gmra.mrb[124].mxu0 %vm303_vm3, %v1165_v9  ;;  %v3026_v37 = vpop.f32.mrb[19].mxu1 }
 0x163   :  { %3243 = vmatprep.mubr.msk.bf16.mxu0 %vm3653_vm0, %v4909_v54  ;;  %v1174_v37 = vsel %vm1114_vm6, %v1164_v36, %v1173_v48  ;;  %v1615_v36 = vrot.slane %v3793_v18, 2 }
 0x164   :  { %3190 = vmatmul.mubr.msk.bf16.gmra.mrb[124].mxu1 %vm303_vm3, %v908_v0 }
 0x165   :  { %v4275_v35 = vpop.f32.mrb[20].mxu0  ;;  %3249 = vmatprep.mubr.msk.bf16.mxu1 %vm3653_vm0, %v4909_v54 }
 0x166   :  { %v3001_v46 = vpop.f32.mrb[21].mxu0 }
 0x167   :  { %v4281_v24 = vpop.f32.mrb[22].mxu0  ;;  %v4284_v9 = vpop.f32.mrb[20].mxu1  ;;  %v1383_v46 = vsel %vm1380_vm7, %v1381_v12, %v1382_v30 }
 0x168   :  { %v3002_v59 = vpop.f32.mrb[23].mxu0  ;;  %v3029_v0 = vpop.f32.mrb[21].mxu1 }
 0x169   :  { %v479_v52 = vpop.f32.mrb[22].mxu1  ;;  %v2100_v59 = vld [vmem:[#allocation7 + $0x20] sm:$0xf] }
 0x16a   :  { %3244 = vmatmul.mubr.msk.bf16.gmra.mrb[128].mxu0 %vm303_vm3, %v1174_v37  ;;  %v3030_v11 = vpop.f32.mrb[23].mxu1  ;;  %v1616_v37 = vsel %vm1613_vm8, %v1614_v42, %v1615_v36  ;;  %v2167_v52 = vsel %vm193_vm1, %v2100_v59, 0  ;;  %v1617_v42 = vrot.slane %v3822_v32, 2 }
 0x16b   :  { %3303 = vmatprep.mubr.msk.bf16.mxu0 %vm3653_vm0, %v4909_v54  ;;  %v1384_v11 = vrot.slane %v3793_v18, 6 }
 0x16c   :  { %3250 = vmatmul.mubr.msk.bf16.vlgmr.msra.gmra.mrb[128].mxu1 %vm303_vm3, %v1383_v46 }
 0x16d   :  { %v4294_v48 = vpop.f32.mrb[24].mxu0  ;;  %3356 = vmatpush3.bf16.msra.mxu1 %v1936_v3  ;;  %3253 = vmatprep.mubr.msk.bf16.mxu1 %vm3653_vm0, %v4909_v54 }
 0x16e   :  { %v3005_v0 = vpop.f32.mrb[25].mxu0 }
 0x16f   :  { %v4299_v12 = vpop.f32.mrb[26].mxu0  ;;  %v545_v4 = vpop.f32.mrb[24].mxu1  ;;  %v1385_v0 = vsel %vm1380_vm7, %v1382_v30, %v1384_v11 }
 0x170   :  { %v3006_v8 = vpop.f32.mrb[27].mxu0  ;;  %v546_v46 = vadd.f32 %v545_v4, %v4174_v20  ;;  %v3035_v53 = vpop.f32.mrb[25].mxu1  ;;  %v1386_v20 = vrot.slane %v3822_v32, 6  ;;  %v1619_v32 = vrot.slane %v3853_v45, 2 }
 0x171   :  { %v548_v28 = vpop.f32.mrb[26].mxu1 }
 0x172   :  { %3304 = vmatmul.mubr.msk.bf16.vlgmr.msra.gmra.mrb[132].mxu0 %vm303_vm3, %v1616_v37  ;;  %v549_v3 = vadd.f32 %v548_v28, %v4179_v60  ;;  %v3036_v18 = vpop.f32.mrb[27].mxu1  ;;  %v1618_v28 = vsel %vm1613_vm8, %v1615_v36, %v1617_v42 }
 0x173   :  { %3410 = vmatpush3.bf16.msra.mxu0 %v2167_v52  ;;  %3307 = vmatprep.mubr.msk.bf16.mxu0 %vm3653_vm0, %v4909_v54 }
 0x174   :  { %3254 = vmatmul.mubr.msk.bf16.gmra.mrb[132].mxu1 %vm303_vm3, %v1385_v0 }
 0x175   :  { %v752_v59 = vpop.f32.mrb[28].mxu0  ;;  %3257 = vmatprep.mubr.msk.bf16.mxu1 %vm3653_vm0, %v4909_v54 }
 0x176   :  { %v4311_v8 = vadd.f32 %v752_v59, %v546_v46  ;;  %v3089_v53 = vpop.f32.mrb[29].mxu0  ;;  %v1387_v46 = vsel %vm1380_vm7, %v1384_v11, %v1386_v20  ;;  %v1388_v11 = vrot.slane %v3853_v45, 6  ;;  %v1621_v45 = vrot.slane %v3881_v57, 2 }
 0x177   :  { %v755_v30 = vpop.f32.mrb[30].mxu0  ;;  %v553_v60 = vpop.f32.mrb[28].mxu1 }
 0x178   :  { %v4317_v37 = vadd.f32 %v755_v30, %v549_v3  ;;  %v3090_v4 = vpop.f32.mrb[31].mxu0  ;;  %v554_v52 = vadd.f32 %v553_v60, %v4193_v34  ;;  %v3039_v18 = vpop.f32.mrb[29].mxu1 }
 0x179   :  { %v556_v0 = vpop.f32.mrb[30].mxu1 }
 0x17a   :  { %3308 = vmatmul.mubr.msk.bf16.gmra.mrb[136].mxu0 %vm303_vm3, %v1618_v28  ;;  %v557_v59 = vadd.f32 %v556_v0, %v4198_v44  ;;  %v3040_v53 = vpop.f32.mrb[31].mxu1  ;;  %v1620_v44 = vsel %vm1613_vm8, %v1617_v42, %v1619_v32 }
 0x17b   :  { %3311 = vmatprep.mubr.msk.bf16.mxu0 %vm3653_vm0, %v4909_v54 }
 0x17c   :  { %3258 = vmatmul.mubr.msk.bf16.gmra.mrb[136].mxu1 %vm303_vm3, %v1387_v46 }
 0x17d   :  { %v760_v36 = vpop.f32.mrb[32].mxu0  ;;  %3261 = vmatprep.mubr.msk.bf16.mxu1 %vm3653_vm0, %v4909_v54 }
 0x17e   :  { %v4327_v3 = vadd.f32 %v760_v36, %v554_v52  ;;  %v3093_v34 = vpop.f32.mrb[33].mxu0  ;;  %v1389_v52 = vsel %vm1380_vm7, %v1386_v20, %v1388_v11  ;;  %v1390_v20 = vrot.slane %v3881_v57, 6  ;;  %v1623_v57 = vrot.slane %v3910_v21, 2 }
 0x17f   :  { %v763_v30 = vpop.f32.mrb[34].mxu0  ;;  %v561_v28 = vpop.f32.mrb[32].mxu1 }
 0x180   :  { %v4333_v60 = vadd.f32 %v763_v30, %v557_v59  ;;  %v3094_v4 = vpop.f32.mrb[35].mxu0  ;;  %v562_v18 = vadd.f32 %v561_v28, %v4212_v56  ;;  %v3043_v0 = vpop.f32.mrb[33].mxu1 }
 0x181   :  { %v564_v46 = vpop.f32.mrb[34].mxu1 }
 0x182   :  { %3312 = vmatmul.mubr.msk.bf16.gmra.mrb[140].mxu0 %vm303_vm3, %v1620_v44  ;;  %v565_v53 = vadd.f32 %v564_v46, %v4217_v61  ;;  %v3044_v36 = vpop.f32.mrb[35].mxu1  ;;  %v1622_v61 = vsel %vm1613_vm8, %v1619_v32, %v1621_v45 }
 0x183   :  { %3315 = vmatprep.mubr.msk.bf16.mxu0 %vm3653_vm0, %v4909_v54 }
 0x184   :  { %3262 = vmatmul.mubr.msk.bf16.gmra.mrb[140].mxu1 %vm303_vm3, %v1389_v52 }
 0x185   :  { %v768_v42 = vpop.f32.mrb[36].mxu0  ;;  %3265 = vmatprep.mubr.msk.bf16.mxu1 %vm3653_vm0, %v4909_v54 }
 0x186   :  { %v4343_v59 = vadd.f32 %v768_v42, %v562_v18  ;;  %v3097_v56 = vpop.f32.mrb[37].mxu0  ;;  %v1391_v18 = vsel %vm1380_vm7, %v1388_v11, %v1390_v20  ;;  %v1392_v11 = vrot.slane %v3910_v21, 6  ;;  %v4373_v21 = vld [vmem:[#allocation2 + $0x38] sm:$0xff]  }
 0x187   :  { %v771_v34 = vpop.f32.mrb[38].mxu0  ;;  %v569_v30 = vpop.f32.mrb[36].mxu1 }
 0x188   :  { %v4349_v44 = vadd.f32 %v771_v34, %v565_v53  ;;  %v3098_v28 = vpop.f32.mrb[39].mxu0  ;;  %v570_v4 = vadd.f32 %v569_v30, %v4231_v23  ;;  %v3047_v0 = vpop.f32.mrb[37].mxu1 }
 0x189   :  { %v572_v46 = vpop.f32.mrb[38].mxu1 }
 0x18a   :  { %3316 = vmatmul.mubr.msk.bf16.gmra.mrb[144].mxu0 %vm303_vm3, %v1622_v61  ;;  %v573_v52 = vadd.f32 %v572_v46, %v4236_v6  ;;  %v3048_v36 = vpop.f32.mrb[39].mxu1  ;;  %v1624_v6 = vsel %vm1613_vm8, %v1621_v45, %v1623_v57  ;;  %v1625_v45 = vrot.slane %v4373_v21, 2 }
 0x18b   :  { %3319 = vmatprep.mubr.msk.bf16.mxu0 %vm3653_vm0, %v4909_v54 }
 0x18c   :  { %3266 = vmatmul.mubr.msk.bf16.gmra.mrb[144].mxu1 %vm303_vm3, %v1391_v18 }
 0x18d   :  { %v776_v32 = vpop.f32.mrb[40].mxu0  ;;  %3269 = vmatprep.mubr.msk.bf16.mxu1 %vm3653_vm0, %v4909_v54 }
 0x18e   :  { %v4359_v53 = vadd.f32 %v776_v32, %v570_v4  ;;  %v3101_v23 = vpop.f32.mrb[41].mxu0  ;;  %v1393_v4 = vsel %vm1380_vm7, %v1390_v20, %v1392_v11  ;;  %v1394_v20 = vrot.slane %v4373_v21, 6  ;;  %v1626_v32 = vsel %vm1613_vm8, %v1623_v57, %v1625_v45 }
 0x18f   :  { %v779_v42 = vpop.f32.mrb[42].mxu0  ;;  %v577_v56 = vpop.f32.mrb[40].mxu1 }
 0x190   :  { %v4365_v34 = vadd.f32 %v779_v42, %v573_v52  ;;  %v3102_v61 = vpop.f32.mrb[43].mxu0  ;;  %v578_v30 = vadd.f32 %v577_v56, %v4254_v22  ;;  %v3051_v28 = vpop.f32.mrb[41].mxu1 }
 0x191   :  { %v580_v0 = vpop.f32.mrb[42].mxu1 }
 0x192   :  { %3320 = vmatmul.mubr.msk.bf16.gmra.mrb[148].mxu0 %vm303_vm3, %v1624_v6  ;;  %v581_v46 = vadd.f32 %v580_v0, %v4259_v40  ;;  %v3052_v18 = vpop.f32.mrb[43].mxu1 }
 0x193   :  { %3323 = vmatprep.mubr.msk.bf16.mxu0 %vm3653_vm0, %v4909_v54  ;;  %v4391_v18 = vld [vmem:[#allocation2 + $0x40] sm:$0xff]  }
 0x194   :  { %3270 = vmatmul.mubr.msk.bf16.gmra.mrb[148].mxu1 %vm303_vm3, %v1393_v4  ;;  %v1627_v57 = vrot.slane %v4391_v18, 2 }
 0x195   :  { %v784_v52 = vpop.f32.mrb[44].mxu0  ;;  %3273 = vmatprep.mubr.msk.bf16.mxu1 %vm3653_vm0, %v4909_v54 }
 0x196   :  { %v4377_v22 = vadd.f32 %v784_v52, %v578_v30  ;;  %v3105_v36 = vpop.f32.mrb[45].mxu0  ;;  %v1395_v30 = vsel %vm1380_vm7, %v1392_v11, %v1394_v20  ;;  %v1396_v11 = vrot.slane %v4391_v18, 6 }
 0x197   :  { %v787_v40 = vpop.f32.mrb[46].mxu0  ;;  %v585_v23 = vpop.f32.mrb[44].mxu1  ;;  %v1628_v36 = vsel %vm1613_vm8, %v1625_v45, %v1627_v57 }
 0x198   :  { %v4383_v42 = vadd.f32 %v787_v40, %v581_v46  ;;  %v3106_v6 = vpop.f32.mrb[47].mxu0  ;;  %v586_v56 = vadd.f32 %v585_v23, %v4275_v35  ;;  %v3055_v61 = vpop.f32.mrb[45].mxu1 }
 0x199   :  { %v588_v28 = vpop.f32.mrb[46].mxu1 }
 0x19a   :  { %3324 = vmatmul.mubr.msk.bf16.gmra.mrb[152].mxu0 %vm303_vm3, %v1626_v32  ;;  %v589_v0 = vadd.f32 %v588_v28, %v4281_v24  ;;  %v3056_v4 = vpop.f32.mrb[47].mxu1 }
 0x19b   :  { %3327 = vmatprep.mubr.msk.bf16.mxu0 %vm3653_vm0, %v4909_v54 }
 0x19c   :  { %3274 = vmatmul.mubr.msk.bf16.gmra.mrb[152].mxu1 %vm303_vm3, %v1395_v30 }
 0x19d   :  { %v792_v46 = vpop.f32.mrb[48].mxu0  ;;  %3277 = vmatprep.mubr.msk.bf16.mxu1 %vm3653_vm0, %v4909_v54 }
 0x19e   :  { %v4395_v35 = vadd.f32 %v792_v46, %v586_v56  ;;  %v3109_v52 = vpop.f32.mrb[49].mxu0  ;;  %v1397_v56 = vsel %vm1380_vm7, %v1394_v20, %v1396_v11  ;;  %v4409_v46 = vld [vmem:[#allocation2 + $0x48] sm:$0xff]  }
 0x19f   :  { %v795_v24 = vpop.f32.mrb[50].mxu0  ;;  %v593_v40 = vpop.f32.mrb[48].mxu1  ;;  %v1629_v45 = vrot.slane %v4409_v46, 2  ;;  %v1398_v20 = vrot.slane %v4409_v46, 6 }
 0x1a0   :  { %v4401_v32 = vadd.f32 %v795_v24, %v589_v0  ;;  %v3110_v23 = vpop.f32.mrb[51].mxu0  ;;  %v594_v6 = vadd.f32 %v593_v40, %v4294_v48  ;;  %v3059_v61 = vpop.f32.mrb[49].mxu1 }
 0x1a1   :  { %v596_v28 = vpop.f32.mrb[50].mxu1  ;;  %v1630_v24 = vsel %vm1613_vm8, %v1627_v57, %v1629_v45 }
 0x1a2   :  { %3328 = vmatmul.mubr.msk.bf16.gmra.mrb[156].mxu0 %vm303_vm3, %v1628_v36  ;;  %v597_v30 = vadd.f32 %v596_v28, %v4299_v12  ;;  %v3060_v4 = vpop.f32.mrb[51].mxu1 }
 0x1a3   :  { %3331 = vmatprep.mubr.msk.bf16.mxu0 %vm3653_vm0, %v4909_v54 }
 0x1a4   :  { %3278 = vmatmul.mubr.msk.bf16.gmra.mrb[156].mxu1 %vm303_vm3, %v1397_v56 }
 0x1a5   :  { %v800_v0 = vpop.f32.mrb[52].mxu0  ;;  %3281 = vmatprep.mubr.msk.bf16.mxu1 %vm3653_vm0, %v4909_v54 }
 0x1a6   :  { %v4413_v48 = vadd.f32 %v800_v0, %v594_v6  ;;  %v3113_v52 = vpop.f32.mrb[53].mxu0  ;;  %v1399_v6 = vsel %vm1380_vm7, %v1396_v11, %v1398_v20 }
 0x1a7   :  { %v803_v12 = vpop.f32.mrb[54].mxu0  ;;  %v601_v36 = vpop.f32.mrb[52].mxu1  ;;  %v4427_v52 = vld [vmem:[#allocation2 + $0x50] sm:$0xff]  }
 0x1a8   :  { %v4419_v40 = vadd.f32 %v803_v12, %v597_v30  ;;  %v3114_v23 = vpop.f32.mrb[55].mxu0  ;;  %v602_v61 = vadd.f32 %v601_v36, %v4184_v17  ;;  %v3063_v28 = vpop.f32.mrb[53].mxu1  ;;  %4910 = vst [vmem:[#allocation24_spill] sm:$0xff] %v4427_v52  ;;  %v1631_v57 = vrot.slane %v4427_v52, 2  ;;  %v1400_v11 = vrot.slane %v4427_v52, 6  ;;  %v4445_v52 = vld [vmem:[#allocation2 + $0x58] sm:$0xff]  }
 0x1a9   :  { %v604_v56 = vpop.f32.mrb[54].mxu1 }
 0x1aa   :  { %3332 = vmatmul.mubr.msk.bf16.gmra.mrb[160].mxu0 %vm303_vm3, %v1630_v24  ;;  %v605_v4 = vadd.f32 %v604_v56, %v4186_v29  ;;  %v3064_v0 = vpop.f32.mrb[55].mxu1  ;;  %v1632_v24 = vsel %vm1613_vm8, %v1629_v45, %v1631_v57  ;;  %v1633_v45 = vrot.slane %v4445_v52, 2 }
 0x1ab   :  { %3335 = vmatprep.mubr.msk.bf16.mxu0 %vm3653_vm0, %v4909_v54 }
 0x1ac   :  { %3282 = vmatmul.mubr.msk.bf16.gmra.mrb[160].mxu1 %vm303_vm3, %v1399_v6 }
 0x1ad   :  { %v808_v30 = vpop.f32.mrb[56].mxu0  ;;  %3285 = vmatprep.mubr.msk.bf16.mxu1 %vm3653_vm0, %v4909_v54 }
 0x1ae   :  { %v4431_v17 = vadd.f32 %v808_v30, %v602_v61  ;;  %v3117_v12 = vpop.f32.mrb[57].mxu0  ;;  %v1401_v61 = vsel %vm1380_vm7, %v1398_v20, %v1400_v11  ;;  %v1402_v20 = vrot.slane %v4445_v52, 6 }
 0x1af   :  { %v811_v29 = vpop.f32.mrb[58].mxu0  ;;  %v609_v36 = vpop.f32.mrb[56].mxu1 }
 0x1b0   :  { %v4437_v23 = vadd.f32 %v811_v29, %v605_v4  ;;  %v3118_v28 = vpop.f32.mrb[59].mxu0  ;;  %v610_v56 = vadd.f32 %v609_v36, %v4203_v47  ;;  %v3067_v0 = vpop.f32.mrb[57].mxu1 }
 0x1b1   :  { %v612_v6 = vpop.f32.mrb[58].mxu1 }
 0x1b2   :  { %3336 = vmatmul.mubr.msk.bf16.gmra.mrb[164].mxu0 %vm303_vm3, %v1632_v24  ;;  %v613_v30 = vadd.f32 %v612_v6, %v4205_v49  ;;  %v3068_v12 = vpop.f32.mrb[59].mxu1  ;;  %v1634_v24 = vsel %vm1613_vm8, %v1631_v57, %v1633_v45  ;;  %v1635_v57 = vrot.slane %v3896_v2, 2 }
 0x1b3   :  { %3339 = vmatprep.mubr.msk.bf16.mxu0 %vm3653_vm0, %v4909_v54 }
 0x1b4   :  { %3286 = vmatmul.mubr.msk.bf16.gmra.mrb[164].mxu1 %vm303_vm3, %v1401_v61 }
 0x1b5   :  { %v816_v4 = vpop.f32.mrb[60].mxu0  ;;  %3289 = vmatprep.mubr.msk.bf16.mxu1 %vm3653_vm0, %v4909_v54 }
 0x1b6   :  { %v4449_v47 = vadd.f32 %v816_v4, %v610_v56  ;;  %v3121_v29 = vpop.f32.mrb[61].mxu0  ;;  %v1403_v56 = vsel %vm1380_vm7, %v1400_v11, %v1402_v20  ;;  %v1404_v11 = vrot.slane %v3896_v2, 6 }
 0x1b7   :  { %v819_v49 = vpop.f32.mrb[62].mxu0  ;;  %v617_v36 = vpop.f32.mrb[60].mxu1 }
 0x1b8   :  { %v4455_v28 = vadd.f32 %v819_v49, %v613_v30  ;;  %v3122_v0 = vpop.f32.mrb[63].mxu0  ;;  %v618_v6 = vadd.f32 %v617_v36, %v4222_v26  ;;  %v3071_v12 = vpop.f32.mrb[61].mxu1 }
 0x1b9   :  { %v620_v61 = vpop.f32.mrb[62].mxu1 }
 0x1ba   :  { %3340 = vmatmul.mubr.msk.bf16.gmra.mrb[168].mxu0 %vm303_vm3, %v1634_v24  ;;  %v621_v4 = vadd.f32 %v620_v61, %v4224_v5  ;;  %v3072_v29 = vpop.f32.mrb[63].mxu1  ;;  %v1636_v5 = vsel %vm1613_vm8, %v1633_v45, %v1635_v57  ;;  %v1637_v45 = vrot.slane %v4243_v62, 2 }
 0x1bb   :  { %3343 = vmatprep.mubr.msk.bf16.mxu0 %vm3653_vm0, %v4909_v54 }
 0x1bc   :  { %3290 = vmatmul.mubr.msk.bf16.gmra.mrb[168].mxu1 %vm303_vm3, %v1403_v56 }
 0x1bd   :  { %v824_v30 = vpop.f32.mrb[64].mxu0  ;;  %3293 = vmatprep.mubr.msk.bf16.mxu1 %vm3653_vm0, %v4909_v54 }
 0x1be   :  { %v4465_v49 = vadd.f32 %v824_v30, %v618_v6  ;;  %v3125_v26 = vpop.f32.mrb[65].mxu0  ;;  %v1405_v6 = vsel %vm1380_vm7, %v1402_v20, %v1404_v11 }
 0x1bf   :  { %v827_v24 = vpop.f32.mrb[66].mxu0  ;;  %v625_v36 = vpop.f32.mrb[64].mxu1 }
 0x1c0   :  { %v4471_v0 = vadd.f32 %v827_v24, %v621_v4  ;;  %v3126_v12 = vpop.f32.mrb[67].mxu0  ;;  %v626_v61 = vadd.f32 %v625_v36, %v4241_v58  ;;  %v3075_v29 = vpop.f32.mrb[65].mxu1  ;;  %v1406_v24 = vrot.slane %v4243_v62, 6 }
 0x1c1   :  { %v628_v56 = vpop.f32.mrb[66].mxu1 }
 0x1c2   :  { %3344 = vmatmul.mubr.msk.bf16.gmra.mrb[172].mxu0 %vm303_vm3, %v1636_v5  ;;  %v629_v30 = vadd.f32 %v628_v56, %v4245_v10  ;;  %v3076_v26 = vpop.f32.mrb[67].mxu1  ;;  %v1638_v10 = vsel %vm1613_vm8, %v1635_v57, %v1637_v45  ;;  %v1849_v57 = vrot.slane %v3805_v25, 3 }
 0x1c3   :  { %3347 = vmatprep.mubr.msk.bf16.mxu0 %vm3653_vm0, %v4909_v54 }
 0x1c4   :  { %3294 = vmatmul.mubr.msk.bf16.gmra.mrb[172].mxu1 %vm303_vm3, %v1405_v6  ;;  %v1407_v6 = vsel %vm1380_vm7, %v1404_v11, %v1406_v24 }
 0x1c5   :  { %v832_v4 = vpop.f32.mrb[68].mxu0  ;;  %3297 = vmatprep.mubr.msk.bf16.mxu1 %vm3653_vm0, %v4909_v54 }
 0x1c6   :  { %v4482_v58 = vadd.f32 %v832_v4, %v626_v61  ;;  %v3129_v36 = vpop.f32.mrb[69].mxu0  ;;  %v1845_v61 = vrot.slane %v3796_v19, 2  ;;  %v1846_v4 = vrot.slane %v3773_v7, 3 }
 0x1c7   :  { %v835_v20 = vpop.f32.mrb[70].mxu0  ;;  %v633_v5 = vpop.f32.mrb[68].mxu1  ;;  %v1848_v36 = vrot.slane %v3835_v38, 2 }
 0x1c8   :  { %v4487_v12 = vadd.f32 %v835_v20, %v629_v30  ;;  %v3130_v29 = vpop.f32.mrb[71].mxu0  ;;  %v634_v56 = vadd.f32 %v633_v5, %v4266_v16  ;;  %v3079_v26 = vpop.f32.mrb[69].mxu1  ;;  %v1847_v7 = vor.u32 %v1846_v4, %v1845_v61  ;;  %v3495_v4 = vld [vmem:[#allocation2 + $0x8] sm:$0xff]  }
 0x1c9   :  { %v636_v2 = vpop.f32.mrb[70].mxu1  ;;  %v1850_v19 = vor.u32 %v1849_v57, %v1848_v36  ;;  %v1852_v26 = vrot.slane %v3864_v50, 2  ;;  %v2102_v36 = vrot.slane %v3495_v4, 3  ;;  %v3496_v57 = vld [vmem:[#allocation2 + $0x10] sm:$0xff]  }
 0x1ca   :  { %3348 = vmatmul.mubr.msk.bf16.gmra.mrb[176].mxu0 %vm303_vm3, %v1638_v10  ;;  %v637_v30 = vadd.f32 %v636_v2, %v4268_v55  ;;  %v3080_v20 = vpop.f32.mrb[71].mxu1 }
 0x1cb   :  { %3351 = vmatprep.mubr.msk.bf16.mxu0 %vm3653_vm0, %v4909_v54 }
 0x1cc   :  { %3298 = vmatmul.mubr.msk.bf16.gmra.mrb[176].mxu1 %vm303_vm3, %v1407_v6  ;;  %v1853_v6 = vrot.slane %v3838_v39, 3 }
 0x1cd   :  { %v840_v16 = vpop.f32.mrb[72].mxu0  ;;  %3357 = vmatprep.mubr.msk.bf16.mxu1 %vm3653_vm0, %v4909_v54 }
 0x1ce   :  { %v4500_v11 = vadd.f32 %v840_v16, %v634_v56  ;;  %v3133_v24 = vpop.f32.mrb[73].mxu0  ;;  %v1851_v56 = vsel %vm1844_vm9, %v1847_v7, %v1850_v19  ;;  %v1854_v50 = vor.u32 %v1853_v6, %v1852_v26  ;;  %v3497_v6 = vld [vmem:[#allocation2 + $0x18] sm:$0xff]  }
 0x1cf   :  { %v843_v38 = vpop.f32.mrb[74].mxu0  ;;  %v641_v25 = vpop.f32.mrb[72].mxu1 }
 0x1d0   :  { %v4504_v10 = vadd.f32 %v843_v38, %v637_v30  ;;  %v3134_v2 = vpop.f32.mrb[75].mxu0  ;;  %v642_v55 = vadd.f32 %v641_v25, %v4284_v9  ;;  %v3083_v5 = vpop.f32.mrb[73].mxu1  ;;  %v2103_v30 = vrot.slane %v3496_v57, 3 }
 0x1d1   :  { %v644_v29 = vpop.f32.mrb[74].mxu1  ;;  %v1855_v5 = vsel %vm1844_vm9, %v1850_v19, %v1854_v50 }
 0x1d2   :  { %3352 = vmatmul.mubr.msk.bf16.gmra.mrb[180].mxu0 %vm303_vm3, %v1637_v45  ;;  %v3084_v61 = vpop.f32.mrb[75].mxu1  ;;  %v2104_v16 = vsel %vm2101_vm10, %v2102_v36, %v2103_v30  ;;  %v1857_v29 = vrot.slane %v3867_v51, 3 }
 0x1d3   :  { %3411 = vmatprep.mubr.msk.bf16.mxu0 %vm3653_vm0, %v4909_v54  ;;  %v2105_v61 = vrot.slane %v3497_v6, 3 }
 0x1d4   :  { %3358 = vmatmul.mubr.msk.bf16.vlgmr.msra.gmra.mrb[180].mxu1 %vm303_vm3, %v1851_v56 }
 0x1d5   :  { %v848_v9 = vpop.f32.mrb[76].mxu0  ;;  %3361 = vmatprep.mubr.msk.bf16.mxu1 %vm3653_vm0, %v4909_v54  ;;  %v2106_v51 = vsel %vm2101_vm10, %v2103_v30, %v2105_v61  ;;  %v3498_v30 = vld [vmem:[#allocation2 + $0x20] sm:$0xff]  }
 0x1d6   :  { %v4514_v20 = vadd.f32 %v848_v9, %v642_v55  ;;  %v3137_v45 = vpop.f32.mrb[77].mxu0  ;;  %v1856_v55 = vrot.slane %v3890_v63, 2 }
 0x1d7   :  { %v851_v39 = vpop.f32.mrb[78].mxu0  ;;  %v985_v24 = vpop.f32.mrb[76].mxu1 }
 0x1d8   :  { %v3138_v7 = vpop.f32.mrb[79].mxu0  ;;  %v1087_v38 = vadd.f32 %v985_v24, %v4311_v8  ;;  %v3143_v25 = vpop.f32.mrb[77].mxu1  ;;  %v1858_v63 = vor.u32 %v1857_v29, %v1856_v55 }
 0x1d9   :  { %v988_v2 = vpop.f32.mrb[78].mxu1  ;;  %v1860_v7 = vrot.slane %v3927_v31, 2 }
 0x1da   :  { %3412 = vmatmul.mubr.msk.bf16.vlgmr.msra.gmra.mrb[184].mxu0 %vm303_vm3, %v2104_v16  ;;  %v1088_v56 = vadd.f32 %v988_v2, %v4317_v37  ;;  %v3144_v26 = vpop.f32.mrb[79].mxu1  ;;  %v1859_v24 = vsel %vm1844_vm9, %v1854_v50, %v1858_v63 }
 0x1db   :  { %3415 = vmatprep.mubr.msk.bf16.mxu0 %vm3653_vm0, %v4909_v54 }
 0x1dc   :  { %3362 = vmatmul.mubr.msk.bf16.gmra.mrb[184].mxu1 %vm303_vm3, %v1855_v5  ;;  %v2107_v5 = vrot.slane %v3498_v30, 3 }
 0x1dd   :  { %v1251_v8 = vpop.f32.mrb[80].mxu0  ;;  %3365 = vmatprep.mubr.msk.bf16.mxu1 %vm3653_vm0, %v4909_v54 }
 0x1de   :  { %v4528_v4 = vadd.f32 %v1251_v8, %v1087_v38  ;;  %v3197_v19 = vpop.f32.mrb[81].mxu0  ;;  %v1861_v38 = vrot.slane %v3893_v1, 3  ;;  %v2108_v1 = vsel %vm2101_vm10, %v2105_v61, %v2107_v5  ;;  %v3499_v61 = vld [vmem:[#allocation2 + $0x28] sm:$0xff]  }
 0x1df   :  { %v1254_v36 = vpop.f32.mrb[82].mxu0  ;;  %v993_v37 = vpop.f32.mrb[80].mxu1 }
 0x1e0   :  { %v4533_v57 = vadd.f32 %v1254_v36, %v1088_v56  ;;  %v3198_v9 = vpop.f32.mrb[83].mxu0  ;;  %v1089_v45 = vadd.f32 %v993_v37, %v4327_v3  ;;  %v3147_v39 = vpop.f32.mrb[81].mxu1  ;;  %v1862_v31 = vor.u32 %v1861_v38, %v1860_v7  ;;  %v1865_v37 = vrot.slane %v3930_v33, 3 }
 0x1e1   :  { %v996_v16 = vpop.f32.mrb[82].mxu1  ;;  %v2109_v39 = vrot.slane %v3499_v61, 3  ;;  %v1872_v61 = vrot.slane %v3812_v27, 2 }
 0x1e2   :  { %3416 = vmatmul.mubr.msk.bf16.gmra.mrb[188].mxu0 %vm303_vm3, %v2106_v51  ;;  %v1090_v25 = vadd.f32 %v996_v16, %v4333_v60  ;;  %v3148_v2 = vpop.f32.mrb[83].mxu1  ;;  %v1863_v36 = vsel %vm1844_vm9, %v1858_v63, %v1862_v31  ;;  %v1864_v51 = vrot.slane %v3948_v43, 2 }
 0x1e3   :  { %3419 = vmatprep.mubr.msk.bf16.mxu0 %vm3653_vm0, %v4909_v54  ;;  %v2110_v33 = vsel %vm2101_vm10, %v2107_v5, %v2109_v39  ;;  %v3500_v5 = vld [vmem:[#allocation2 + $0x30] sm:$0xff]  }
 0x1e4   :  { %3366 = vmatmul.mubr.msk.bf16.gmra.mrb[188].mxu1 %vm303_vm3, %v1859_v24  ;;  %v1866_v43 = vor.u32 %v1865_v37, %v1864_v51 }
 0x1e5   :  { %v1259_v3 = vpop.f32.mrb[84].mxu0  ;;  %3369 = vmatprep.mubr.msk.bf16.mxu1 %vm3653_vm0, %v4909_v54 }
 0x1e6   :  { %v4544_v55 = vadd.f32 %v1259_v3, %v1089_v45  ;;  %v3201_v50 = vpop.f32.mrb[85].mxu0  ;;  %v1867_v3 = vsel %vm1844_vm9, %v1862_v31, %v1866_v43 }
 0x1e7   :  { %v1262_v29 = vpop.f32.mrb[86].mxu0  ;;  %v1001_v60 = vpop.f32.mrb[84].mxu1  ;;  %v1868_v50 = vrot.slane %v3786_v14, 2 }
 0x1e8   :  { %v4549_v56 = vadd.f32 %v1262_v29, %v1090_v25  ;;  %v3202_v26 = vpop.f32.mrb[87].mxu0  ;;  %v1091_v6 = vadd.f32 %v1001_v60, %v4343_v59  ;;  %v3151_v8 = vpop.f32.mrb[85].mxu1  ;;  %v1869_v29 = vrot.slane %v3783_v13, 3 }
 0x1e9   :  { %v1004_v19 = vpop.f32.mrb[86].mxu1  ;;  %v2111_v26 = vrot.slane %v3500_v5, 3 }
 0x1ea   :  { %3420 = vmatmul.mubr.msk.bf16.gmra.mrb[192].mxu0 %vm303_vm3, %v2108_v1  ;;  %v1092_v9 = vadd.f32 %v1004_v19, %v4349_v44  ;;  %v3152_v45 = vpop.f32.mrb[87].mxu1  ;;  %v1870_v14 = vor.u32 %v1869_v29, %v1868_v50  ;;  %v1876_v50 = vrot.slane %v3844_v41, 2  ;;  %v4911_v29 = vld [vmem:[#allocation16_spill] sm:$0xff] }
 0x1eb   :  { %3423 = vmatprep.mubr.msk.bf16.mxu0 %vm3653_vm0, %v4909_v54  ;;  %v2112_v13 = vsel %vm2101_vm10, %v2109_v39, %v2111_v26  ;;  %v2113_v39 = vrot.slane %v4373_v21, 3 }
 0x1ec   :  { %3370 = vmatmul.mubr.msk.bf16.gmra.mrb[192].mxu1 %vm303_vm3, %v1863_v36  ;;  %v1871_v45 = vsel %vm1844_vm9, %v1866_v43, %v1870_v14 }
 0x1ed   :  { %v1267_v59 = vpop.f32.mrb[88].mxu0  ;;  %3373 = vmatprep.mubr.msk.bf16.mxu1 %vm3653_vm0, %v4909_v54 }
 0x1ee   :  { %v4560_v16 = vadd.f32 %v1267_v59, %v1091_v6  ;;  %v3205_v63 = vpop.f32.mrb[89].mxu0  ;;  %v1873_v59 = vrot.slane %v3789_v15, 3  ;;  %v2114_v15 = vsel %vm2101_vm10, %v2111_v26, %v2113_v39  ;;  %v2115_v26 = vrot.slane %v4391_v18, 3 }
 0x1ef   :  { %v1270_v24 = vpop.f32.mrb[90].mxu0  ;;  %v1009_v44 = vpop.f32.mrb[88].mxu1 }
 0x1f0   :  { %v4565_v7 = vadd.f32 %v1270_v24, %v1092_v9  ;;  %v3206_v38 = vpop.f32.mrb[91].mxu0  ;;  %v1093_v25 = vadd.f32 %v1009_v44, %v4359_v53  ;;  %v3155_v2 = vpop.f32.mrb[89].mxu1  ;;  %v1874_v27 = vor.u32 %v1873_v59, %v1872_v61  ;;  %v4913_v61 = vld [vmem:[#allocation17_spill] sm:$0xff] }
 0x1f1   :  { %v1012_v30 = vpop.f32.mrb[90].mxu1  ;;  %v1881_v59 = vrot.slane %v4913_v61, 3 }
 0x1f2   :  { %3424 = vmatmul.mubr.msk.bf16.gmra.mrb[196].mxu0 %vm303_vm3, %v2110_v33  ;;  %v1094_v1 = vadd.f32 %v1012_v30, %v4365_v34  ;;  %v3156_v60 = vpop.f32.mrb[91].mxu1 }
 0x1f3   :  { %3427 = vmatprep.mubr.msk.bf16.mxu0 %vm3653_vm0, %v4909_v54 }
 0x1f4   :  { %3374 = vmatmul.mubr.msk.bf16.gmra.mrb[196].mxu1 %vm303_vm3, %v1867_v3  ;;  %v1875_v3 = vsel %vm1844_vm9, %v1870_v14, %v1874_v27 }
 0x1f5   :  { %v1275_v53 = vpop.f32.mrb[92].mxu0  ;;  %3377 = vmatprep.mubr.msk.bf16.mxu1 %vm3653_vm0, %v4909_v54 }
 0x1f6   :  { %v4576_v6 = vadd.f32 %v1275_v53, %v1093_v25  ;;  %v3209_v31 = vpop.f32.mrb[93].mxu0 }
 0x1f7   :  { %v1278_v8 = vpop.f32.mrb[94].mxu0  ;;  %v1017_v34 = vpop.f32.mrb[92].mxu1 }
 0x1f8   :  { %v4581_v19 = vadd.f32 %v1278_v8, %v1094_v1  ;;  %v3210_v36 = vpop.f32.mrb[95].mxu0  ;;  %v1095_v51 = vadd.f32 %v1017_v34, %v4377_v22  ;;  %v3159_v37 = vpop.f32.mrb[93].mxu1  ;;  %v1877_v1 = vrot.slane %v4911_v29, 3  ;;  %v2116_v8 = vsel %vm2101_vm10, %v2113_v39, %v2115_v26  ;;  %v4915_v29 = vld [vmem:[#allocation19_spill] sm:$0xff] }
 0x1f9   :  { %v1020_v9 = vpop.f32.mrb[94].mxu1  ;;  %v2117_v39 = vrot.slane %v4409_v46, 3 }
 0x1fa   :  { %3428 = vmatmul.mubr.msk.bf16.gmra.mrb[200].mxu0 %vm303_vm3, %v2112_v13  ;;  %v1096_v63 = vadd.f32 %v1020_v9, %v4383_v42  ;;  %v3160_v24 = vpop.f32.mrb[95].mxu1  ;;  %v1878_v41 = vor.u32 %v1877_v1, %v1876_v50  ;;  %v4912_v9 = vld [vmem:[#allocation18_spill] sm:$0xff]  ;;  %v1885_v1 = vrot.slane %v4915_v29, 3  ;;  %v4920_v29 = vshll.u32 %v4243_v62, 16 }
 0x1fb   :  { %3431 = vmatprep.mubr.msk.bf16.mxu0 %vm3653_vm0, %v4909_v54 }
 0x1fc   :  { %3378 = vmatmul.mubr.msk.bf16.gmra.mrb[200].mxu1 %vm303_vm3, %v1871_v45  ;;  %v1879_v37 = vsel %vm1844_vm9, %v1874_v27, %v1878_v41  ;;  %v1880_v45 = vrot.slane %v4912_v9, 2 }
 0x1fd   :  { %v1283_v22 = vpop.f32.mrb[96].mxu0  ;;  %3381 = vmatprep.mubr.msk.bf16.mxu1 %vm3653_vm0, %v4909_v54 }
 0x1fe   :  { %v4593_v33 = vadd.f32 %v1283_v22, %v1095_v51  ;;  %v3213_v43 = vpop.f32.mrb[97].mxu0  ;;  %v1882_v27 = vor.u32 %v1881_v59, %v1880_v45  ;;  %v4917_v45 = vld [vmem:[#allocation23_spill] sm:$0xff]  ;;  %v4918_v59 = vld [vmem:[#allocation22_spill] sm:$0xff] }
 0x1ff   :  { %v1286_v44 = vpop.f32.mrb[98].mxu0  ;;  %v1025_v42 = vpop.f32.mrb[96].mxu1  ;;  %v1888_v61 = vrot.slane %v4917_v45, 2 }
 0x200   :  { %v4598_v38 = vadd.f32 %v1286_v44, %v1096_v63  ;;  %v3214_v25 = vpop.f32.mrb[99].mxu0  ;;  %v1097_v2 = vadd.f32 %v1025_v42, %v4395_v35  ;;  %v3163_v21 = vpop.f32.mrb[97].mxu1 }
 0x201   :  { %v1028_v30 = vpop.f32.mrb[98].mxu1 }
 0x202   :  { %3432 = vmatmul.mubr.msk.bf16.gmra.mrb[204].mxu0 %vm303_vm3, %v2114_v15  ;;  %v1098_v60 = vadd.f32 %v1028_v30, %v4401_v32  ;;  %v3164_v5 = vpop.f32.mrb[99].mxu1  ;;  %v2118_v15 = vsel %vm2101_vm10, %v2115_v26, %v2117_v39  ;;  %v1883_v30 = vsel %vm1844_vm9, %v1878_v41, %v1882_v27  ;;  %v4916_v26 = vld [vmem:[#allocation24_spill] sm:$0xff] }
 0x203   :  { %3435 = vmatprep.mubr.msk.bf16.mxu0 %vm3653_vm0, %v4909_v54 }
 0x204   :  { %3382 = vmatmul.mubr.msk.bf16.gmra.mrb[204].mxu1 %vm303_vm3, %v1875_v3  ;;  %v4914_v3 = vld [vmem:[#allocation21_spill] sm:$0xff] }
 0x205   :  { %v1291_v35 = vpop.f32.mrb[100].mxu0  ;;  %3385 = vmatprep.mubr.msk.bf16.mxu1 %vm3653_vm0, %v4909_v54  ;;  %v1884_v50 = vrot.slane %v4914_v3, 2  ;;  %v4919_v3 = vshrl.u32 %v4243_v62, 16 }
 0x206   :  { %v4610_v53 = vadd.f32 %v1291_v35, %v1097_v2  ;;  %v3217_v31 = vpop.f32.mrb[101].mxu0  ;;  %v2119_v35 = vrot.slane %v4916_v26, 3  ;;  %v4921_v26 = vld [vmem:[#allocation20_spill] sm:$0xff] }
 0x207   :  { %v1294_v14 = vpop.f32.mrb[102].mxu0  ;;  %v1033_v32 = vpop.f32.mrb[100].mxu1 }
 0x208   :  { %v4615_v13 = vadd.f32 %v1294_v14, %v1098_v60  ;;  %v3218_v34 = vpop.f32.mrb[103].mxu0  ;;  %v1099_v36 = vadd.f32 %v1033_v32, %v4413_v48  ;;  %v3167_v18 = vpop.f32.mrb[101].mxu1  ;;  %v1886_v14 = vor.u32 %v1885_v1, %v1884_v50  ;;  %v2120_v32 = vsel %vm2101_vm10, %v2117_v39, %v2119_v35 }
 0x209   :  { %v1036_v51 = vpop.f32.mrb[102].mxu1  ;;  %v2121_v39 = vrot.slane %v4445_v52, 3  ;;  %v1892_v50 = vrot.slane %v4919_v3, 2  ;;  %v1893_v1 = vrot.slane %v4920_v29, 3 }
 0x20a   :  { %3436 = vmatmul.mubr.msk.bf16.gmra.mrb[208].mxu0 %vm303_vm3, %v2116_v8  ;;  %v1100_v63 = vadd.f32 %v1036_v51, %v4419_v40  ;;  %v3168_v24 = vpop.f32.mrb[103].mxu1  ;;  %v1887_v9 = vsel %vm1844_vm9, %v1882_v27, %v1886_v14 }
 0x20b   :  { %3439 = vmatprep.mubr.msk.bf16.mxu0 %vm3653_vm0, %v4909_v54 }
 0x20c   :  { %3386 = vmatmul.mubr.msk.bf16.gmra.mrb[208].mxu1 %vm303_vm3, %v1879_v37 }
 0x20d   :  { %v1299_v48 = vpop.f32.mrb[104].mxu0  ;;  %3389 = vmatprep.mubr.msk.bf16.mxu1 %vm3653_vm0, %v4909_v54 }
 0x20e   :  { %v4627_v22 = vadd.f32 %v1299_v48, %v1099_v36  ;;  %v3221_v43 = vpop.f32.mrb[105].mxu0 }
 0x20f   :  { %v1302_v44 = vpop.f32.mrb[106].mxu0  ;;  %v1041_v40 = vpop.f32.mrb[104].mxu1 }
 0x210   :  { %v4632_v42 = vadd.f32 %v1302_v44, %v1100_v63  ;;  %v3222_v25 = vpop.f32.mrb[107].mxu0  ;;  %v1101_v2 = vadd.f32 %v1041_v40, %v4431_v17  ;;  %v3171_v46 = vpop.f32.mrb[105].mxu1  ;;  %v1889_v63 = vrot.slane %v4918_v59, 3  ;;  %v2122_v40 = vsel %vm2101_vm10, %v2119_v35, %v2121_v39 }
 0x211   :  { %v1044_v21 = vpop.f32.mrb[106].mxu1 }
 0x212   :  { %3440 = vmatmul.mubr.msk.bf16.gmra.mrb[212].mxu0 %vm303_vm3, %v2118_v15  ;;  %v1102_v60 = vadd.f32 %v1044_v21, %v4437_v23  ;;  %v3172_v5 = vpop.f32.mrb[107].mxu1  ;;  %v1890_v44 = vor.u32 %v1889_v63, %v1888_v61  ;;  %v3501_v61 = vld [vmem:[#allocation5 + $0x4] sm:$0xff]  }
 0x213   :  { %3443 = vmatprep.mubr.msk.bf16.mxu0 %vm3653_vm0, %v4909_v54  ;;  %v2125_v59 = vrot.slane %v3501_v61, 3 }
 0x214   :  { %3390 = vmatmul.mubr.msk.bf16.gmra.mrb[212].mxu1 %vm303_vm3, %v1883_v30  ;;  %v1891_v30 = vsel %vm1844_vm9, %v1886_v14, %v1890_v44  ;;  %v1894_v14 = vor.u32 %v1893_v1, %v1892_v50 }
 0x215   :  { %v1307_v17 = vpop.f32.mrb[108].mxu0  ;;  %3393 = vmatprep.mubr.msk.bf16.mxu1 %vm3653_vm0, %v4909_v54 }
 0x216   :  { %v4644_v31 = vadd.f32 %v1307_v17, %v1101_v2  ;;  %v3225_v41 = vpop.f32.mrb[109].mxu0 }
 0x217   :  { %v1310_v8 = vpop.f32.mrb[110].mxu0  ;;  %v1049_v23 = vpop.f32.mrb[108].mxu1 }
 0x218   :  { %v4649_v34 = vadd.f32 %v1310_v8, %v1102_v60  ;;  %v3226_v36 = vpop.f32.mrb[111].mxu0  ;;  %v1103_v18 = vadd.f32 %v1049_v23, %v4449_v47  ;;  %v3175_v51 = vpop.f32.mrb[109].mxu1 }
 0x219   :  { %v1052_v37 = vpop.f32.mrb[110].mxu1 }
 0x21a   :  { %3444 = vmatmul.mubr.msk.bf16.gmra.mrb[216].mxu0 %vm303_vm3, %v2120_v32  ;;  %v1104_v24 = vadd.f32 %v1052_v37, %v4455_v28  ;;  %v3176_v48 = vpop.f32.mrb[111].mxu1  ;;  %v1895_v37 = vsel %vm1844_vm9, %v1890_v44, %v1894_v14 }
 0x21b   :  { %3447 = vmatprep.mubr.msk.bf16.mxu0 %vm3653_vm0, %v4909_v54 }
 0x21c   :  { %3394 = vmatmul.mubr.msk.bf16.gmra.mrb[216].mxu1 %vm303_vm3, %v1887_v9 }
 0x21d   :  { %v1315_v47 = vpop.f32.mrb[112].mxu0  ;;  %3397 = vmatprep.mubr.msk.bf16.mxu1 %vm3653_vm0, %v4909_v54 }
 0x21e   :  { %v4661_v43 = vadd.f32 %v1315_v47, %v1103_v18  ;;  %v3229_v27 = vpop.f32.mrb[113].mxu0 }
 0x21f   :  { %v1318_v15 = vpop.f32.mrb[114].mxu0  ;;  %v1057_v28 = vpop.f32.mrb[112].mxu1 }
 0x220   :  { %v4666_v25 = vadd.f32 %v1318_v15, %v1104_v24  ;;  %v3230_v2 = vpop.f32.mrb[115].mxu0  ;;  %v1105_v46 = vadd.f32 %v1057_v28, %v4465_v49  ;;  %v3179_v52 = vpop.f32.mrb[113].mxu1  ;;  %v2123_v49 = vrot.slane %v4921_v26, 3 }
 0x221   :  { %v1060_v21 = vpop.f32.mrb[114].mxu1 }
 0x222   :  { %3448 = vmatmul.mubr.msk.bf16.gmra.mrb[220].mxu0 %vm303_vm3, %v2122_v40  ;;  %v1106_v60 = vadd.f32 %v1060_v21, %v4471_v0  ;;  %v3180_v5 = vpop.f32.mrb[115].mxu1  ;;  %v2124_v8 = vsel %vm2101_vm10, %v2121_v39, %v2123_v49  ;;  %v2126_v39 = vsel %vm2101_vm10, %v2123_v49, %v2125_v59 }
 0x223   :  { %3451 = vmatprep.mubr.msk.bf16.mxu0 %vm3653_vm0, %v4909_v54 }
 0x224   :  { %3398 = vmatmul.mubr.msk.bf16.gmra.mrb[220].mxu1 %vm303_vm3, %v1891_v30 }
 0x225   :  { %v1323_v35 = vpop.f32.mrb[116].mxu0  ;;  %3401 = vmatprep.mubr.msk.bf16.mxu1 %vm3653_vm0, %v4909_v54 }
 0x226   :  { %v4680_v17 = vadd.f32 %v1323_v35, %v1105_v46  ;;  %v3233_v41 = vpop.f32.mrb[117].mxu0 }
 0x227   :  { %v1326_v62 = vpop.f32.mrb[118].mxu0  ;;  %v1065_v0 = vpop.f32.mrb[116].mxu1 }
 0x228   :  { %v4685_v32 = vadd.f32 %v1326_v62, %v1106_v60  ;;  %v3234_v23 = vpop.f32.mrb[119].mxu0  ;;  %v1107_v36 = vadd.f32 %v1065_v0, %v4482_v58  ;;  %v3183_v18 = vpop.f32.mrb[117].mxu1 }
 0x229   :  { %v1068_v51 = vpop.f32.mrb[118].mxu1 }
 0x22a   :  { %3452 = vmatmul.mubr.msk.bf16.gmra.mrb[224].mxu0 %vm303_vm3, %v2124_v8  ;;  %v1108_v9 = vadd.f32 %v1068_v51, %v4487_v12  ;;  %v3184_v45 = vpop.f32.mrb[119].mxu1 }
 0x22b   :  { %3455 = vmatprep.mubr.msk.bf16.mxu0 %vm3653_vm0, %v4909_v54 }
 0x22c   :  { %3402 = vmatmul.mubr.msk.bf16.gmra.mrb[224].mxu1 %vm303_vm3, %v1895_v37 }
 0x22d   :  { %v1331_v63 = vpop.f32.mrb[120].mxu0  ;;  %3405 = vmatprep.mubr.msk.bf16.mxu1 %vm3653_vm0, %v4909_v54 }
 0x22e   :  { %v4694_v24 = vadd.f32 %v1331_v63, %v1107_v36  ;;  %v3237_v58 = vpop.f32.mrb[121].mxu0 }
 0x22f   :  { %v1334_v48 = vpop.f32.mrb[122].mxu0  ;;  %v1073_v47 = vpop.f32.mrb[120].mxu1 }
 0x230   :  { %v4699_v12 = vadd.f32 %v1334_v48, %v1108_v9  ;;  %v3238_v27 = vpop.f32.mrb[123].mxu0  ;;  %v1109_v44 = vadd.f32 %v1073_v47, %v4500_v11  ;;  %v3187_v15 = vpop.f32.mrb[121].mxu1 }
 0x231   :  { %v1076_v40 = vpop.f32.mrb[122].mxu1 }
 0x232   :  { %3456 = vmatmul.mubr.msk.bf16.gmra.mrb[228].mxu0 %vm303_vm3, %v2126_v39  ;;  %v1110_v28 = vadd.f32 %v1076_v40, %v4504_v10  ;;  %v3188_v2 = vpop.f32.mrb[123].mxu1 }
 0x233   :  { %3459 = vmatprep.mubr.msk.bf16.mxu0 %vm3653_vm0, %v4909_v54 }
 0x234   :  { %3406 = vmatmul.mubr.msk.bf16.gmra.mrb[228].mxu1 %vm303_vm3, %v1894_v14 }
 0x235   :  { %v1339_v46 = vpop.f32.mrb[124].mxu0 }
 0x236   :  { %v4707_v52 = vadd.f32 %v1339_v46, %v1109_v44  ;;  %v3241_v21 = vpop.f32.mrb[125].mxu0 }
 0x237   :  { %v1342_v30 = vpop.f32.mrb[126].mxu0  ;;  %v1081_v3 = vpop.f32.mrb[124].mxu1 }
 0x238   :  { %v4709_v50 = vadd.f32 %v1342_v30, %v1110_v28  ;;  %v3242_v11 = vpop.f32.mrb[127].mxu0  ;;  %v1111_v29 = vadd.f32 %v1081_v3, %v4514_v20  ;;  %v3191_v1 = vpop.f32.mrb[125].mxu1 }
 0x239   :  { %v1084_v60 = vpop.f32.mrb[126].mxu1 }
 0x23a   :  { %3460 = vmatmul.mubr.msk.bf16.gmra.mrb[232].mxu0 %vm303_vm3, %v2125_v59  ;;  %v3192_v10 = vpop.f32.mrb[127].mxu1 }
 0x23d   :  { %v1347_v5 = vpop.f32.mrb[128].mxu0 }
 0x23e   :  { %v4713_v54 = vadd.f32 %v1347_v5, %v1111_v29  ;;  %v3245_v26 = vpop.f32.mrb[129].mxu0 }
 0x23f   :  { %v1350_v49 = vpop.f32.mrb[130].mxu0  ;;  %v1484_v35 = vpop.f32.mrb[128].mxu1 }
 0x240   :  { %v3246_v41 = vpop.f32.mrb[131].mxu0  ;;  %v1586_v14 = vadd.f32 %v1484_v35, %v4528_v4  ;;  %v3251_v62 = vpop.f32.mrb[129].mxu1 }
 0x241   :  { %v1487_v8 = vpop.f32.mrb[130].mxu1 }
 0x242   :  { %v1587_v0 = vadd.f32 %v1487_v8, %v4533_v57  ;;  %v3252_v23 = vpop.f32.mrb[131].mxu1 }
 0x245   :  { %v1715_v20 = vpop.f32.mrb[132].mxu0 }
 0x246   :  { %v4717_v36 = vadd.f32 %v1715_v20, %v1586_v14  ;;  %v3305_v18 = vpop.f32.mrb[133].mxu0 }
 0x247   :  { %v1718_v51 = vpop.f32.mrb[134].mxu0  ;;  %v1492_v37 = vpop.f32.mrb[132].mxu1 }
 0x248   :  { %v4719_v9 = vadd.f32 %v1718_v51, %v1587_v0  ;;  %v3306_v45 = vpop.f32.mrb[135].mxu0  ;;  %v1588_v61 = vadd.f32 %v1492_v37, %v4544_v55  ;;  %v3255_v59 = vpop.f32.mrb[133].mxu1 }
 0x249   :  { %v1495_v63 = vpop.f32.mrb[134].mxu1 }
 0x24a   :  { %v1589_v4 = vadd.f32 %v1495_v63, %v4549_v56  ;;  %v3256_v58 = vpop.f32.mrb[135].mxu1 }
 0x24d   :  { %v1723_v48 = vpop.f32.mrb[136].mxu0 }
 0x24e   :  { %v4723_v39 = vadd.f32 %v1723_v48, %v1588_v61  ;;  %v3309_v57 = vpop.f32.mrb[137].mxu0 }
 0x24f   :  { %v1726_v47 = vpop.f32.mrb[138].mxu0  ;;  %v1500_v27 = vpop.f32.mrb[136].mxu1 }
 0x250   :  { %v4725_v44 = vadd.f32 %v1726_v47, %v1589_v4  ;;  %v3310_v15 = vpop.f32.mrb[139].mxu0  ;;  %v1590_v40 = vadd.f32 %v1500_v27, %v4560_v16  ;;  %v3259_v28 = vpop.f32.mrb[137].mxu1 }
 0x251   :  { %v1503_v2 = vpop.f32.mrb[138].mxu1 }
 0x252   :  { %v1591_v55 = vadd.f32 %v1503_v2, %v4565_v7  ;;  %v3260_v46 = vpop.f32.mrb[139].mxu1 }
 0x255   :  { %v1731_v21 = vpop.f32.mrb[140].mxu0 }
 0x256   :  { %v4729_v30 = vadd.f32 %v1731_v21, %v1590_v40  ;;  %v3313_v56 = vpop.f32.mrb[141].mxu0 }
 0x257   :  { %v1734_v3 = vpop.f32.mrb[142].mxu0  ;;  %v1508_v11 = vpop.f32.mrb[140].mxu1 }
 0x258   :  { %v4731_v29 = vadd.f32 %v1734_v3, %v1591_v55  ;;  %v3314_v1 = vpop.f32.mrb[143].mxu0  ;;  %v1592_v60 = vadd.f32 %v1508_v11, %v4576_v6  ;;  %v3263_v10 = vpop.f32.mrb[141].mxu1 }
 0x259   :  { %v1511_v5 = vpop.f32.mrb[142].mxu1 }
 0x25a   :  { %v1593_v16 = vadd.f32 %v1511_v5, %v4581_v19  ;;  %v3264_v26 = vpop.f32.mrb[143].mxu1 }
 0x25d   :  { %v1739_v49 = vpop.f32.mrb[144].mxu0 }
 0x25e   :  { %v4735_v35 = vadd.f32 %v1739_v49, %v1592_v60  ;;  %v3317_v7 = vpop.f32.mrb[145].mxu0 }
 0x25f   :  { %v1742_v41 = vpop.f32.mrb[146].mxu0  ;;  %v1516_v14 = vpop.f32.mrb[144].mxu1 }
 0x260   :  { %v4737_v62 = vadd.f32 %v1742_v41, %v1593_v16  ;;  %v3318_v8 = vpop.f32.mrb[147].mxu0  ;;  %v1594_v0 = vadd.f32 %v1516_v14, %v4593_v33  ;;  %v3267_v23 = vpop.f32.mrb[145].mxu1 }
 0x261   :  { %v1519_v20 = vpop.f32.mrb[146].mxu1 }
 0x262   :  { %v1595_v6 = vadd.f32 %v1519_v20, %v4598_v38  ;;  %v3268_v18 = vpop.f32.mrb[147].mxu1 }
 0x265   :  { %v1747_v51 = vpop.f32.mrb[148].mxu0 }
 0x266   :  { %v4741_v37 = vadd.f32 %v1747_v51, %v1594_v0  ;;  %v3321_v19 = vpop.f32.mrb[149].mxu0 }
 0x267   :  { %v1750_v45 = vpop.f32.mrb[150].mxu0  ;;  %v1524_v61 = vpop.f32.mrb[148].mxu1 }
 0x268   :  { %v4743_v59 = vadd.f32 %v1750_v45, %v1595_v6  ;;  %v3322_v63 = vpop.f32.mrb[151].mxu0  ;;  %v1596_v4 = vadd.f32 %v1524_v61, %v4610_v53  ;;  %v3271_v58 = vpop.f32.mrb[149].mxu1 }
 0x269   :  { %v1527_v48 = vpop.f32.mrb[150].mxu1 }
 0x26a   :  { %v1597_v33 = vadd.f32 %v1527_v48, %v4615_v13  ;;  %v3272_v57 = vpop.f32.mrb[151].mxu1 }
 0x26d   :  { %v1755_v47 = vpop.f32.mrb[152].mxu0 }
 0x26e   :  { %v4747_v27 = vadd.f32 %v1755_v47, %v1596_v4  ;;  %v3325_v38 = vpop.f32.mrb[153].mxu0 }
 0x26f   :  { %v1758_v15 = vpop.f32.mrb[154].mxu0  ;;  %v1532_v40 = vpop.f32.mrb[152].mxu1 }
 0x270   :  { %v4749_v28 = vadd.f32 %v1758_v15, %v1597_v33  ;;  %v3326_v2 = vpop.f32.mrb[155].mxu0  ;;  %v1598_v55 = vadd.f32 %v1532_v40, %v4627_v22  ;;  %v3275_v46 = vpop.f32.mrb[153].mxu1 }
 0x271   :  { %v1535_v21 = vpop.f32.mrb[154].mxu1 }
 0x272   :  { %v1599_v53 = vadd.f32 %v1535_v21, %v4632_v42  ;;  %v3276_v56 = vpop.f32.mrb[155].mxu1 }
 0x275   :  { %v1763_v3 = vpop.f32.mrb[156].mxu0 }
 0x276   :  { %v4753_v11 = vadd.f32 %v1763_v3, %v1598_v55  ;;  %v3329_v13 = vpop.f32.mrb[157].mxu0 }
 0x277   :  { %v1766_v1 = vpop.f32.mrb[158].mxu0  ;;  %v1540_v60 = vpop.f32.mrb[156].mxu1 }
 0x278   :  { %v4755_v10 = vadd.f32 %v1766_v1, %v1599_v53  ;;  %v3330_v5 = vpop.f32.mrb[159].mxu0  ;;  %v1600_v16 = vadd.f32 %v1540_v60, %v4644_v31  ;;  %v3279_v26 = vpop.f32.mrb[157].mxu1 }
 0x279   :  { %v1543_v49 = vpop.f32.mrb[158].mxu1 }
 0x27a   :  { %v1601_v22 = vadd.f32 %v1543_v49, %v4649_v34  ;;  %v3280_v7 = vpop.f32.mrb[159].mxu1 }
 0x27d   :  { %v1771_v41 = vpop.f32.mrb[160].mxu0 }
 0x27e   :  { %v4759_v14 = vadd.f32 %v1771_v41, %v1600_v16  ;;  %v3333_v42 = vpop.f32.mrb[161].mxu0 }
 0x27f   :  { %v1774_v8 = vpop.f32.mrb[162].mxu0  ;;  %v1548_v0 = vpop.f32.mrb[160].mxu1 }
 0x280   :  { %v4761_v23 = vadd.f32 %v1774_v8, %v1601_v22  ;;  %v3334_v20 = vpop.f32.mrb[163].mxu0  ;;  %v1602_v6 = vadd.f32 %v1548_v0, %v4661_v43  ;;  %v3283_v18 = vpop.f32.mrb[161].mxu1 }
 0x281   :  { %v1551_v51 = vpop.f32.mrb[162].mxu1 }
 0x282   :  { %v1603_v31 = vadd.f32 %v1551_v51, %v4666_v25  ;;  %v3284_v19 = vpop.f32.mrb[163].mxu1 }
 0x285   :  { %v1779_v45 = vpop.f32.mrb[164].mxu0 }
 0x286   :  { %v4765_v61 = vadd.f32 %v1779_v45, %v1602_v6  ;;  %v3337_v34 = vpop.f32.mrb[165].mxu0 }
 0x287   :  { %v1782_v63 = vpop.f32.mrb[166].mxu0  ;;  %v1556_v4 = vpop.f32.mrb[164].mxu1 }
 0x288   :  { %v4767_v58 = vadd.f32 %v1782_v63, %v1603_v31  ;;  %v3338_v48 = vpop.f32.mrb[167].mxu0  ;;  %v1604_v33 = vadd.f32 %v1556_v4, %v4680_v17  ;;  %v3287_v57 = vpop.f32.mrb[165].mxu1 }
 0x289   :  { %v1559_v47 = vpop.f32.mrb[166].mxu1 }
 0x28a   :  { %v1605_v43 = vadd.f32 %v1559_v47, %v4685_v32  ;;  %v3288_v38 = vpop.f32.mrb[167].mxu1 }
 0x28d   :  { %v1787_v15 = vpop.f32.mrb[168].mxu0 }
 0x28e   :  { %v4771_v40 = vadd.f32 %v1787_v15, %v1604_v33  ;;  %v3341_v25 = vpop.f32.mrb[169].mxu0 }
 0x28f   :  { %v1790_v2 = vpop.f32.mrb[170].mxu0  ;;  %v1564_v55 = vpop.f32.mrb[168].mxu1  ;;  %v2793_v25 = vld [vmem:[#allocation10] sm:$0xff]  }
 0x290   :  { %v4773_v46 = vadd.f32 %v1790_v2, %v1605_v43  ;;  %v3342_v21 = vpop.f32.mrb[171].mxu0  ;;  %v1606_v53 = vadd.f32 %v1564_v55, %v4694_v24  ;;  %v3291_v56 = vpop.f32.mrb[169].mxu1 }
 0x291   :  { %v1567_v3 = vpop.f32.mrb[170].mxu1  ;;  %v2794_v21 = vunpack.c.l.bf16 %v2793_v25 }
 0x292   :  { %v1607_v17 = vadd.f32 %v1567_v3, %v4699_v12  ;;  %v3292_v13 = vpop.f32.mrb[171].mxu1 }
 0x295   :  { %v1795_v1 = vpop.f32.mrb[172].mxu0 }
 0x296   :  { %v4777_v60 = vadd.f32 %v1795_v1, %v1606_v53  ;;  %v3345_v32 = vpop.f32.mrb[173].mxu0  ;;  %v2795_v1 = vunpack.c.h.bf16 %v2793_v25 }
 0x297   :  { %v1798_v5 = vpop.f32.mrb[174].mxu0  ;;  %v1572_v16 = vpop.f32.mrb[172].mxu1 }
 0x298   :  { %v4779_v26 = vadd.f32 %v1798_v5, %v1607_v17  ;;  %v3346_v49 = vpop.f32.mrb[175].mxu0  ;;  %v1608_v22 = vadd.f32 %v1572_v16, %v4707_v52  ;;  %v3295_v7 = vpop.f32.mrb[173].mxu1 }
 0x299   :  { %v1575_v41 = vpop.f32.mrb[174].mxu1 }
 0x29a   :  { %v1609_v24 = vadd.f32 %v1575_v41, %v4709_v50  ;;  %v3296_v42 = vpop.f32.mrb[175].mxu1  ;;  %v2840_v41 = vld [vmem:[#allocation10 + $0x8] sm:$0xff]  }
 0x29d   :  { %v1803_v8 = vpop.f32.mrb[176].mxu0 }
 0x29e   :  { %v4783_v0 = vadd.f32 %v1803_v8, %v1608_v22  ;;  %v3349_v12 = vpop.f32.mrb[177].mxu0 }
 0x29f   :  { %v1806_v20 = vpop.f32.mrb[178].mxu0  ;;  %v1580_v6 = vpop.f32.mrb[176].mxu1 }
 0x2a0   :  { %v4785_v18 = vadd.f32 %v1806_v20, %v1609_v24  ;;  %v3350_v51 = vpop.f32.mrb[179].mxu0  ;;  %v1610_v31 = vadd.f32 %v1580_v6, %v4713_v54  ;;  %v3299_v19 = vpop.f32.mrb[177].mxu1  ;;  %v4792_v54 = vld [vmem:[#allocation8] ss:$0 sm:$0xff] }
 0x2a1   :  { %v1583_v45 = vpop.f32.mrb[178].mxu1  ;;  %v2798_v51 = vunpack.c.l.bf16 %v2840_v41 }
 0x2a2   :  { %v3300_v34 = vpop.f32.mrb[179].mxu1 }
 0x2a5   :  { %v1811_v52 = vpop.f32.mrb[180].mxu0 }
 0x2a6   :  { %v4788_v63 = vadd.f32 %v1811_v52, %v1610_v31  ;;  %v3353_v4 = vpop.f32.mrb[181].mxu0 }
 0x2a7   :  { %v1814_v50 = vpop.f32.mrb[182].mxu0  ;;  %v1972_v48 = vpop.f32.mrb[180].mxu1 }
 0x2a8   :  { %v3354_v33 = vpop.f32.mrb[183].mxu0  ;;  %v2074_v57 = vadd.f32 %v1972_v48, %v4717_v36  ;;  %v3359_v47 = vpop.f32.mrb[181].mxu1 }
 0x2a9   :  { %v1975_v43 = vpop.f32.mrb[182].mxu1 }
 0x2aa   :  { %v2075_v38 = vadd.f32 %v1975_v43, %v4719_v9  ;;  %v3360_v15 = vpop.f32.mrb[183].mxu1 }
 0x2ab   :  { %v2841_v15 = vld [vmem:[#allocation10 + $0x10] sm:$0xff]  }
 0x2ad   :  { %v2203_v2 = vpop.f32.mrb[184].mxu0 }
 0x2ae   :  { %v2305_v55 = vadd.f32 %v2203_v2, %v2074_v57  ;;  %v3413_v53 = vpop.f32.mrb[185].mxu0 }
 0x2af   :  { %v2206_v56 = vpop.f32.mrb[186].mxu0  ;;  %v1980_v3 = vpop.f32.mrb[184].mxu1 }
 0x2b0   :  { %v2337_v17 = vadd.f32 %v4792_v54, %v2305_v55  ;;  %v2306_v13 = vadd.f32 %v2206_v56, %v2075_v38  ;;  %v3414_v32 = vpop.f32.mrb[187].mxu0  ;;  %v2076_v36 = vadd.f32 %v1980_v3, %v4723_v39  ;;  %v3363_v5 = vpop.f32.mrb[185].mxu1  ;;  %v2802_v3 = vunpack.c.l.bf16 %v2841_v15 }
 0x2b1   :  { %v1983_v9 = vpop.f32.mrb[186].mxu1  ;;  %v2803_v5 = vunpack.c.h.bf16 %v2841_v15  ;;  %v2843_v15 = vld [vmem:[#allocation10 + $0x20] sm:$0xff]  }
 0x2b2   :  { %v2412_v16 = vadd.f32 %v2794_v21, %v2337_v17  ;;  %v2338_v49 = vadd.f32 %v4792_v54, %v2306_v13  ;;  %v2077_v22 = vadd.f32 %v1983_v9, %v4725_v44  ;;  %v3364_v7 = vpop.f32.mrb[187].mxu1  ;;  %v2799_v44 = vunpack.c.h.bf16 %v2840_v41 }
 0x2b4   :  { %v2437_v24 = vmax.f32 %v2412_v16, 0.0  ;;  %v2413_v42 = vadd.f32 %v2795_v1, %v2338_v49 }
 0x2b5   :  { %v2211_v8 = vpop.f32.mrb[188].mxu0 }
 0x2b6   :  { %v2767_v12 = vpack.c.bf16 %v2437_v24, %v2437_v24  ;;  %v2438_v20 = vmax.f32 %v2413_v42, 0.0  ;;  %v2307_v6 = vadd.f32 %v2211_v8, %v2076_v36  ;;  %v3417_v31 = vpop.f32.mrb[189].mxu0  ;;  %v2842_v42 = vld [vmem:[#allocation10 + $0x18] sm:$0xff]  }
 0x2b7   :  { %v2214_v19 = vpop.f32.mrb[190].mxu0  ;;  %v1988_v45 = vpop.f32.mrb[188].mxu1 }
 0x2b8   :  { %2564 = vst.msk [vmem:[#allocation11] sm:$0xf] %vm2563_vm11, %v2767_v12  ;;  %v2768_v39 = vpack.c.bf16 %v2438_v20, %v2438_v20  ;;  %v2339_v34 = vadd.f32 %v4792_v54, %v2307_v6  ;;  %v2308_v52 = vadd.f32 %v2214_v19, %v2077_v22  ;;  %v3418_v4 = vpop.f32.mrb[191].mxu0  ;;  %v2078_v50 = vadd.f32 %v1988_v45, %v4729_v30  ;;  %v3367_v48 = vpop.f32.mrb[189].mxu1 }
 0x2b9   :  { %v1991_v57 = vpop.f32.mrb[190].mxu1  ;;  %v2806_v19 = vunpack.c.l.bf16 %v2842_v42  ;;  %v2807_v4 = vunpack.c.h.bf16 %v2842_v42 }
 0x2ba   :  { %2565 = vst.msk [vmem:[#allocation11 + $0x4] sm:$0xf] %vm2563_vm11, %v2768_v39  ;;  %v2414_v33 = vadd.f32 %v2798_v51, %v2339_v34  ;;  %v2340_v47 = vadd.f32 %v4792_v54, %v2308_v52  ;;  %v2079_v43 = vadd.f32 %v1991_v57, %v4731_v29  ;;  %v3368_v38 = vpop.f32.mrb[191].mxu1 }
 0x2bc   :  { %v2439_v25 = vmax.f32 %v2414_v33, 0.0  ;;  %v2415_v2 = vadd.f32 %v2799_v44, %v2340_v47 }
 0x2bd   :  { %v2219_v55 = vpop.f32.mrb[192].mxu0 }
 0x2be   :  { %v2769_v21 = vpack.c.bf16 %v2439_v25, %v2439_v25  ;;  %v2440_v53 = vmax.f32 %v2415_v2, 0.0  ;;  %v2309_v56 = vadd.f32 %v2219_v55, %v2078_v50  ;;  %v3421_v17 = vpop.f32.mrb[193].mxu0 }
 0x2bf   :  { %v2222_v30 = vpop.f32.mrb[194].mxu0  ;;  %v1996_v1 = vpop.f32.mrb[192].mxu1 }
 0x2c0   :  { %2566 = vst.msk [vmem:[#allocation11 + $0x8] sm:$0xf] %vm2563_vm11, %v2769_v21  ;;  %v2770_v13 = vpack.c.bf16 %v2440_v53, %v2440_v53  ;;  %v2341_v32 = vadd.f32 %v4792_v54, %v2309_v56  ;;  %v2310_v36 = vadd.f32 %v2222_v30, %v2079_v43  ;;  %v3422_v29 = vpop.f32.mrb[195].mxu0  ;;  %v2080_v16 = vadd.f32 %v1996_v1, %v4735_v35  ;;  %v3371_v9 = vpop.f32.mrb[193].mxu1 }
 0x2c1   :  { %v1999_v22 = vpop.f32.mrb[194].mxu1 }
 0x2c2   :  { %2567 = vst.msk [vmem:[#allocation11 + $0xc] sm:$0xf] %vm2563_vm11, %v2770_v13  ;;  %v2416_v49 = vadd.f32 %v2802_v3, %v2341_v32  ;;  %v2342_v7 = vadd.f32 %v4792_v54, %v2310_v36  ;;  %v2081_v41 = vadd.f32 %v1999_v22, %v4737_v62  ;;  %v3372_v24 = vpop.f32.mrb[195].mxu1  ;;  %v2810_v3 = vunpack.c.l.bf16 %v2843_v15 }
 0x2c3   :  { %v2811_v36 = vunpack.c.h.bf16 %v2843_v15 }
 0x2c4   :  { %v2441_v8 = vmax.f32 %v2416_v49, 0.0  ;;  %v2417_v12 = vadd.f32 %v2803_v5, %v2342_v7 }
 0x2c5   :  { %v2227_v20 = vpop.f32.mrb[196].mxu0 }
 0x2c6   :  { %v2771_v6 = vpack.c.bf16 %v2441_v8, %v2441_v8  ;;  %v2442_v51 = vmax.f32 %v2417_v12, 0.0  ;;  %v2311_v31 = vadd.f32 %v2227_v20, %v2080_v16  ;;  %v3425_v39 = vpop.f32.mrb[197].mxu0 }
 0x2c7   :  { %v2230_v35 = vpop.f32.mrb[198].mxu0  ;;  %v2004_v34 = vpop.f32.mrb[196].mxu1 }
 0x2c8   :  { %2568 = vst.msk [vmem:[#allocation11 + $0x10] sm:$0xf] %vm2563_vm11, %v2771_v6  ;;  %v2772_v45 = vpack.c.bf16 %v2442_v51, %v2442_v51  ;;  %v2343_v52 = vadd.f32 %v4792_v54, %v2311_v31  ;;  %v2312_v44 = vadd.f32 %v2230_v35, %v2081_v41  ;;  %v3426_v62 = vpop.f32.mrb[199].mxu0  ;;  %v2082_v50 = vadd.f32 %v2004_v34, %v4741_v37  ;;  %v3375_v48 = vpop.f32.mrb[197].mxu1  ;;  %v2844_v41 = vld [vmem:[#allocation10 + $0x28] sm:$0xff]  }
 0x2c9   :  { %v2007_v57 = vpop.f32.mrb[198].mxu1  ;;  %v2814_v51 = vunpack.c.l.bf16 %v2844_v41  ;;  %v2815_v34 = vunpack.c.h.bf16 %v2844_v41 }
 0x2ca   :  { %2569 = vst.msk [vmem:[#allocation11 + $0x14] sm:$0xf] %vm2563_vm11, %v2772_v45  ;;  %v2418_v33 = vadd.f32 %v2806_v19, %v2343_v52  ;;  %v2344_v47 = vadd.f32 %v4792_v54, %v2312_v44  ;;  %v2083_v43 = vadd.f32 %v2007_v57, %v4743_v59  ;;  %v3376_v38 = vpop.f32.mrb[199].mxu1  ;;  %v2845_v57 = vld [vmem:[#allocation10 + $0x30] sm:$0xff]  }
 0x2cc   :  { %v2443_v25 = vmax.f32 %v2418_v33, 0.0  ;;  %v2419_v2 = vadd.f32 %v2807_v4, %v2344_v47 }
 0x2cd   :  { %v2235_v55 = vpop.f32.mrb[200].mxu0 }
 0x2ce   :  { %v2773_v21 = vpack.c.bf16 %v2443_v25, %v2443_v25  ;;  %v2444_v53 = vmax.f32 %v2419_v2, 0.0  ;;  %v2313_v56 = vadd.f32 %v2235_v55, %v2082_v50  ;;  %v3429_v17 = vpop.f32.mrb[201].mxu0  ;;  %v2818_v55 = vunpack.c.l.bf16 %v2845_v57 }
 0x2cf   :  { %v2238_v37 = vpop.f32.mrb[202].mxu0  ;;  %v2012_v13 = vpop.f32.mrb[200].mxu1 }
 0x2d0   :  { %2570 = vst.msk [vmem:[#allocation11 + $0x18] sm:$0xf] %vm2563_vm11, %v2773_v21  ;;  %v2774_v30 = vpack.c.bf16 %v2444_v53, %v2444_v53  ;;  %v2345_v1 = vadd.f32 %v4792_v54, %v2313_v56  ;;  %v2314_v32 = vadd.f32 %v2238_v37, %v2083_v43  ;;  %v3430_v59 = vpop.f32.mrb[203].mxu0  ;;  %v2084_v5 = vadd.f32 %v2012_v13, %v4747_v27  ;;  %v3379_v29 = vpop.f32.mrb[201].mxu1 }
 0x2d1   :  { %v2015_v9 = vpop.f32.mrb[202].mxu1  ;;  %v2819_v37 = vunpack.c.h.bf16 %v2845_v57  ;;  %v2846_v29 = vld [vmem:[#allocation10 + $0x38] sm:$0xff]  }
 0x2d2   :  { %2571 = vst.msk [vmem:[#allocation11 + $0x1c] sm:$0xf] %vm2563_vm11, %v2774_v30  ;;  %v2420_v16 = vadd.f32 %v2810_v3, %v2345_v1  ;;  %v2346_v49 = vadd.f32 %v4792_v54, %v2314_v32  ;;  %v2085_v22 = vadd.f32 %v2015_v9, %v4749_v28  ;;  %v3380_v7 = vpop.f32.mrb[203].mxu1 }
 0x2d4   :  { %v2445_v24 = vmax.f32 %v2420_v16, 0.0  ;;  %v2421_v42 = vadd.f32 %v2811_v36, %v2346_v49 }
 0x2d5   :  { %v2243_v8 = vpop.f32.mrb[204].mxu0 }
 0x2d6   :  { %v2775_v12 = vpack.c.bf16 %v2445_v24, %v2445_v24  ;;  %v2446_v20 = vmax.f32 %v2421_v42, 0.0  ;;  %v2315_v6 = vadd.f32 %v2243_v8, %v2084_v5  ;;  %v3433_v31 = vpop.f32.mrb[205].mxu0  ;;  %v2822_v24 = vunpack.c.l.bf16 %v2846_v29 }
 0x2d7   :  { %v2246_v27 = vpop.f32.mrb[206].mxu0  ;;  %v2020_v39 = vpop.f32.mrb[204].mxu1 }
 0x2d8   :  { %2572 = vst.msk [vmem:[#allocation11 + $0x20] sm:$0xf] %vm2563_vm11, %v2775_v12  ;;  %v2776_v19 = vpack.c.bf16 %v2446_v20, %v2446_v20  ;;  %v2347_v35 = vadd.f32 %v4792_v54, %v2315_v6  ;;  %v2316_v45 = vadd.f32 %v2246_v27, %v2085_v22  ;;  %v3434_v28 = vpop.f32.mrb[207].mxu0  ;;  %v2086_v52 = vadd.f32 %v2020_v39, %v4753_v11  ;;  %v3383_v44 = vpop.f32.mrb[205].mxu1 }
 0x2d9   :  { %v2023_v62 = vpop.f32.mrb[206].mxu1  ;;  %v2847_v28 = vld [vmem:[#allocation10 + $0x40] sm:$0xff]  }
 0x2da   :  { %2573 = vst.msk [vmem:[#allocation11 + $0x24] sm:$0xf] %vm2563_vm11, %v2776_v19  ;;  %v2422_v4 = vadd.f32 %v2814_v51, %v2347_v35  ;;  %v2348_v50 = vadd.f32 %v4792_v54, %v2316_v45  ;;  %v2087_v48 = vadd.f32 %v2023_v62, %v4755_v10  ;;  %v3384_v33 = vpop.f32.mrb[207].mxu1  ;;  %v2823_v51 = vunpack.c.h.bf16 %v2846_v29 }
 0x2db   :  { %v2826_v33 = vunpack.c.l.bf16 %v2847_v28 }
 0x2dc   :  { %v2447_v47 = vmax.f32 %v2422_v4, 0.0  ;;  %v2423_v43 = vadd.f32 %v2815_v34, %v2348_v50 }
 0x2dd   :  { %v2251_v38 = vpop.f32.mrb[208].mxu0 }
 0x2de   :  { %v2777_v15 = vpack.c.bf16 %v2447_v47, %v2447_v47  ;;  %v2448_v25 = vmax.f32 %v2423_v43, 0.0  ;;  %v2317_v2 = vadd.f32 %v2251_v38, %v2086_v52  ;;  %v3437_v21 = vpop.f32.mrb[209].mxu0 }
 0x2df   :  { %v2254_v11 = vpop.f32.mrb[210].mxu0  ;;  %v2028_v56 = vpop.f32.mrb[208].mxu1 }
 0x2e0   :  { %2574 = vst.msk [vmem:[#allocation11 + $0x28] sm:$0xf] %vm2563_vm11, %v2777_v15  ;;  %v2778_v53 = vpack.c.bf16 %v2448_v25, %v2448_v25  ;;  %v2349_v3 = vadd.f32 %v4792_v54, %v2317_v2  ;;  %v2318_v17 = vadd.f32 %v2254_v11, %v2087_v48  ;;  %v3438_v10 = vpop.f32.mrb[211].mxu0  ;;  %v2088_v30 = vadd.f32 %v2028_v56, %v4759_v14  ;;  %v3387_v13 = vpop.f32.mrb[209].mxu1 }
 0x2e1   :  { %v2031_v32 = vpop.f32.mrb[210].mxu1  ;;  %v2827_v25 = vunpack.c.h.bf16 %v2847_v28 }
 0x2e2   :  { %2575 = vst.msk [vmem:[#allocation11 + $0x2c] sm:$0xf] %vm2563_vm11, %v2778_v53  ;;  %v2424_v1 = vadd.f32 %v2818_v55, %v2349_v3  ;;  %v2350_v36 = vadd.f32 %v4792_v54, %v2318_v17  ;;  %v2089_v59 = vadd.f32 %v2031_v32, %v4761_v23  ;;  %v3388_v5 = vpop.f32.mrb[211].mxu1  ;;  %v2848_v17 = vld [vmem:[#allocation10 + $0x48] sm:$0xff]  }
 0x2e4   :  { %v2449_v16 = vmax.f32 %v2424_v1, 0.0  ;;  %v2425_v9 = vadd.f32 %v2819_v37, %v2350_v36  ;;  %v2830_v36 = vunpack.c.l.bf16 %v2848_v17 }
 0x2e5   :  { %v2259_v49 = vpop.f32.mrb[212].mxu0 }
 0x2e6   :  { %v2779_v22 = vpack.c.bf16 %v2449_v16, %v2449_v16  ;;  %v2450_v7 = vmax.f32 %v2425_v9, 0.0  ;;  %v2319_v41 = vadd.f32 %v2259_v49, %v2088_v30  ;;  %v3441_v42 = vpop.f32.mrb[213].mxu0  ;;  %v2831_v49 = vunpack.c.h.bf16 %v2848_v17 }
 0x2e7   :  { %v2262_v14 = vpop.f32.mrb[214].mxu0  ;;  %v2036_v12 = vpop.f32.mrb[212].mxu1 }
 0x2e8   :  { %2576 = vst.msk [vmem:[#allocation11 + $0x30] sm:$0xf] %vm2563_vm11, %v2779_v22  ;;  %v2780_v8 = vpack.c.bf16 %v2450_v7, %v2450_v7  ;;  %v2351_v20 = vadd.f32 %v4792_v54, %v2319_v41  ;;  %v2320_v6 = vadd.f32 %v2262_v14, %v2089_v59  ;;  %v3442_v23 = vpop.f32.mrb[215].mxu0  ;;  %v2090_v31 = vadd.f32 %v2036_v12, %v4765_v61  ;;  %v3391_v27 = vpop.f32.mrb[213].mxu1  ;;  %v2849_v12 = vld [vmem:[#allocation10 + $0x50] sm:$0xff]  }
 0x2e9   :  { %v2039_v39 = vpop.f32.mrb[214].mxu1 }
 0x2ea   :  { %2577 = vst.msk [vmem:[#allocation11 + $0x34] sm:$0xf] %vm2563_vm11, %v2780_v8  ;;  %v2426_v19 = vadd.f32 %v2822_v24, %v2351_v20  ;;  %v2352_v35 = vadd.f32 %v4792_v54, %v2320_v6  ;;  %v2091_v45 = vadd.f32 %v2039_v39, %v4767_v58  ;;  %v3392_v34 = vpop.f32.mrb[215].mxu1 }
 0x2ec   :  { %v2451_v52 = vmax.f32 %v2426_v19, 0.0  ;;  %v2427_v44 = vadd.f32 %v2823_v51, %v2352_v35  ;;  %v2834_v19 = vunpack.c.l.bf16 %v2849_v12 }
 0x2ed   :  { %v2267_v4 = vpop.f32.mrb[216].mxu0 }
 0x2ee   :  { %v2781_v62 = vpack.c.bf16 %v2451_v52, %v2451_v52  ;;  %v2452_v50 = vmax.f32 %v2427_v44, 0.0  ;;  %v2321_v48 = vadd.f32 %v2267_v4, %v2090_v31  ;;  %v3445_v57 = vpop.f32.mrb[217].mxu0  ;;  %v2835_v52 = vunpack.c.h.bf16 %v2849_v12 }
 0x2ef   :  { %v2270_v61 = vpop.f32.mrb[218].mxu0  ;;  %v2044_v43 = vpop.f32.mrb[216].mxu1 }
 0x2f0   :  { %2578 = vst.msk [vmem:[#allocation11 + $0x38] sm:$0xf] %vm2563_vm11, %v2781_v62  ;;  %v2782_v47 = vpack.c.bf16 %v2452_v50, %v2452_v50  ;;  %v2353_v38 = vadd.f32 %v4792_v54, %v2321_v48  ;;  %v2322_v15 = vadd.f32 %v2270_v61, %v2091_v45  ;;  %v3446_v58 = vpop.f32.mrb[219].mxu0  ;;  %v2092_v2 = vadd.f32 %v2044_v43, %v4771_v40  ;;  %v3395_v55 = vpop.f32.mrb[217].mxu1  ;;  %v2850_v61 = vld [vmem:[#allocation10 + $0x58] sm:$0xff]  }
 0x2f1   :  { %v2047_v11 = vpop.f32.mrb[218].mxu1 }
 0x2f2   :  { %2579 = vst.msk [vmem:[#allocation11 + $0x3c] sm:$0xf] %vm2563_vm11, %v2782_v47  ;;  %v2428_v21 = vadd.f32 %v2826_v33, %v2353_v38  ;;  %v2354_v53 = vadd.f32 %v4792_v54, %v2322_v15  ;;  %v2093_v56 = vadd.f32 %v2047_v11, %v4773_v46  ;;  %v3396_v3 = vpop.f32.mrb[219].mxu1 }
 0x2f3   :  { %v2839_v3 = vunpack.c.h.bf16 %v2850_v61 }
 0x2f4   :  { %v2453_v37 = vmax.f32 %v2428_v21, 0.0  ;;  %v2429_v10 = vadd.f32 %v2827_v25, %v2354_v53 }
 0x2f5   :  { %v2275_v30 = vpop.f32.mrb[220].mxu0 }
 0x2f6   :  { %v2783_v13 = vpack.c.bf16 %v2453_v37, %v2453_v37  ;;  %v2454_v1 = vmax.f32 %v2429_v10, 0.0  ;;  %v2323_v32 = vadd.f32 %v2275_v30, %v2092_v2  ;;  %v3449_v59 = vpop.f32.mrb[221].mxu0  ;;  %v2838_v2 = vunpack.c.l.bf16 %v2850_v61 }
 0x2f7   :  { %v2278_v40 = vpop.f32.mrb[222].mxu0  ;;  %v2052_v29 = vpop.f32.mrb[220].mxu1 }
 0x2f8   :  { %2580 = vst.msk [vmem:[#allocation11 + $0x40] sm:$0xf] %vm2563_vm11, %v2783_v13  ;;  %v2784_v5 = vpack.c.bf16 %v2454_v1, %v2454_v1  ;;  %v2355_v16 = vadd.f32 %v4792_v54, %v2323_v32  ;;  %v2324_v9 = vadd.f32 %v2278_v40, %v2093_v56  ;;  %v3450_v46 = vpop.f32.mrb[223].mxu0  ;;  %v2094_v22 = vadd.f32 %v2052_v29, %v4777_v60  ;;  %v3399_v7 = vpop.f32.mrb[221].mxu1  ;;  %v2386_v32 = vld [vmem:[#allocation10 + $0x60] sm:$0xf] }
 0x2f9   :  { %v2055_v24 = vpop.f32.mrb[222].mxu1 }
 0x2fa   :  { %2581 = vst.msk [vmem:[#allocation11 + $0x44] sm:$0xf] %vm2563_vm11, %v2784_v5  ;;  %v2430_v41 = vadd.f32 %v2830_v36, %v2355_v16  ;;  %v2356_v42 = vadd.f32 %v4792_v54, %v2324_v9  ;;  %v2095_v14 = vadd.f32 %v2055_v24, %v4779_v26  ;;  %v3400_v8 = vpop.f32.mrb[223].mxu1  ;;  %v2411_v9 = vunpack.c.l.bf16 %v2386_v32 }
 0x2fc   :  { %v2455_v20 = vmax.f32 %v2430_v41, 0.0  ;;  %v2431_v6 = vadd.f32 %v2831_v49, %v2356_v42 }
 0x2fd   :  { %v2283_v51 = vpop.f32.mrb[224].mxu0 }
 0x2fe   :  { %v2785_v23 = vpack.c.bf16 %v2455_v20, %v2455_v20  ;;  %v2456_v31 = vmax.f32 %v2431_v6, 0.0  ;;  %v2325_v27 = vadd.f32 %v2283_v51, %v2094_v22  ;;  %v3453_v39 = vpop.f32.mrb[225].mxu0 }
 0x2ff   :  { %v2286_v60 = vpop.f32.mrb[226].mxu0  ;;  %v2060_v45 = vpop.f32.mrb[224].mxu1 }
 0x300   :  { %2582 = vst.msk [vmem:[#allocation11 + $0x48] sm:$0xf] %vm2563_vm11, %v2785_v23  ;;  %v2786_v35 = vpack.c.bf16 %v2456_v31, %v2456_v31  ;;  %v2357_v34 = vadd.f32 %v4792_v54, %v2325_v27  ;;  %v2326_v28 = vadd.f32 %v2286_v60, %v2095_v14  ;;  %v3454_v26 = vpop.f32.mrb[227].mxu0  ;;  %v2096_v44 = vadd.f32 %v2060_v45, %v4783_v0  ;;  %v3403_v4 = vpop.f32.mrb[225].mxu1 }
 0x301   :  { %v2063_v50 = vpop.f32.mrb[226].mxu1 }
 0x302   :  { %2583 = vst.msk [vmem:[#allocation11 + $0x4c] sm:$0xf] %vm2563_vm11, %v2786_v35  ;;  %v2432_v62 = vadd.f32 %v2834_v19, %v2357_v34  ;;  %v2358_v48 = vadd.f32 %v4792_v54, %v2326_v28  ;;  %v2097_v33 = vadd.f32 %v2063_v50, %v4785_v18  ;;  %v3404_v57 = vpop.f32.mrb[227].mxu1 }
 0x304   :  { %v2457_v47 = vmax.f32 %v2432_v62, 0.0  ;;  %v2433_v43 = vadd.f32 %v2835_v52, %v2358_v48 }
 0x305   :  { %v2291_v38 = vpop.f32.mrb[228].mxu0 }
 0x306   :  { %v2787_v15 = vpack.c.bf16 %v2457_v47, %v2457_v47  ;;  %v2458_v25 = vmax.f32 %v2433_v43, 0.0  ;;  %v2327_v58 = vadd.f32 %v2291_v38, %v2096_v44  ;;  %v3457_v55 = vpop.f32.mrb[229].mxu0 }
 0x307   :  { %v2294_v0 = vpop.f32.mrb[230].mxu0  ;;  %v2068_v11 = vpop.f32.mrb[228].mxu1 }
 0x308   :  { %2584 = vst.msk [vmem:[#allocation11 + $0x50] sm:$0xf] %vm2563_vm11, %v2787_v15  ;;  %v2788_v21 = vpack.c.bf16 %v2458_v25, %v2458_v25  ;;  %v2359_v53 = vadd.f32 %v4792_v54, %v2327_v58  ;;  %v2328_v56 = vadd.f32 %v2294_v0, %v2097_v33  ;;  %v3458_v18 = vpop.f32.mrb[231].mxu0  ;;  %v2098_v17 = vadd.f32 %v2068_v11, %v4788_v63  ;;  %v3407_v37 = vpop.f32.mrb[229].mxu1 }
 0x309   :  { %v2071_v13 = vpop.f32.mrb[230].mxu1 }
 0x30a   :  { %2585 = vst.msk [vmem:[#allocation11 + $0x54] sm:$0xf] %vm2563_vm11, %v2788_v21  ;;  %v2434_v10 = vadd.f32 %v2838_v2, %v2359_v53  ;;  %v2360_v30 = vadd.f32 %v4792_v54, %v2328_v56  ;;  %v3408_v1 = vpop.f32.mrb[231].mxu1 }
 0x30c   :  { %v2459_v36 = vmax.f32 %v2434_v10, 0.0  ;;  %v2435_v59 = vadd.f32 %v2839_v3, %v2360_v30 }
 0x30d   :  { %v2299_v40 = vpop.f32.mrb[232].mxu0 }
 0x30e   :  { %v2789_v5 = vpack.c.bf16 %v2459_v36, %v2459_v36  ;;  %v2460_v29 = vmax.f32 %v2435_v59, 0.0  ;;  %v2329_v16 = vadd.f32 %v2299_v40, %v2098_v17  ;;  %v3461_v49 = vpop.f32.mrb[233].mxu0 }
 0x30f   :  { %v2302_v46 = vpop.f32.mrb[234].mxu0 }
 0x310   :  { %2586 = vst.msk [vmem:[#allocation11 + $0x58] sm:$0xf] %vm2563_vm11, %v2789_v5  ;;  %v2790_v63 = vpack.c.bf16 %v2460_v29, %v2460_v29  ;;  %v2361_v22 = vadd.f32 %v4792_v54, %v2329_v16  ;;  %v3462_v7 = vpop.f32.mrb[235].mxu0 }
 0x312   :  { %2587 = vst.msk [vmem:[#allocation11 + $0x5c] sm:$0xf] %vm2563_vm11, %v2790_v63  ;;  %v2436_v41 = vadd.f32 %v2411_v9, %v2361_v22 }
 0x314   :  { %v2461_v24 = vmax.f32 %v2436_v41, 0.0 }
 0x316   :  { %v2791_v42 = vpack.c.bf16 %v2461_v24, %v2461_v24 }
 0x318   :  { %2588 = vst.msk [vmem:[#allocation11 + $0x60] sm:$0xf] %vm2563_vm11, %v2791_v42 }
 0x319   :  { %3626 = shalt.err (!%p3623_p8)
}
 0x31a   :  { %s3627_s9 = scalar_lea.hbm %s4887_s5, 1600 }
 0x31b   :  { %p3628_p9 = scmp.ne.s32.totalorder %s4887_s5, %s3627_s9  ;;  %p3631_p10 = scmp.lt.u32.totalorder %s3627_s9, %s4887_s5 }
 0x31d   :  { %p3633_p11 = pnand %p3631_p10, %p3628_p9 }
 0x31f   :  { %3636 = shalt.err (!%p3633_p11)
}
 0x320   :  { %2600 = dma.vmem_to_hbm [thread:$0]  %s2595_s1, 1600, %s4887_s5, [#allocation4], %s3647_s6, %s3647_s6, %s3648_s7  }
 0x321   :  { %3643 = dma.done.wait [#allocation4], 1600  }
 0x322   :  { %3644 = vsyncadd [#allocation4], 4294965696 }
 0x323   :  { %2604 = vsyncpa [#allocation3], 1 }
 0x324   :  { %2605 = vsyncpa [#allocation6], 1 }
 0x325   :  { %2606 = vsyncpa [#allocation9], 1 }
 0x326   :  { %2607 = vsyncpa [#allocation4], 1 }

// kernel: _lambda_.19
= control target key start
LH: loop header
LB: loop body
LE: loop exit
PB: predicated region body
PF: predicated region fallthrough
CT: control target
= control target key end

     0   :  { %9 = vsyncpa [#allocation3], 0  ;;  %s4861_s0 = inlined_call_operand.hbm [shape: bf16[400,32], index: 0, kind: input, shape index: {}, may-alias: {0,1}]   ;;  %s4862_s1 = inlined_call_operand.hbm [shape: bf16[400,32], index: 1, kind: input, shape index: {}, may-alias: {0,1}]   ;;  %s4863_s2 = inlined_call_operand.hbm [shape: bf16[9,32,8], index: 2, kind: input, shape index: {}]   ;;  %s4864_s3 = inlined_call_operand.hbm [shape: f32[1,8], index: 3, kind: input, shape index: {}]   ;;  %s4865_s4 = inlined_call_operand.hbm [shape: bf16[200,8], index: 4, kind: output, shape index: {}]  }
   0x1   :  { %10 = vsyncpa [#allocation6], 0 }
   0x2   :  { %11 = vsyncpa [#allocation9], 0 }
   0x3   :  { %12 = vsyncpa [#allocation4], 0  ;;  %s2625_s17 = scalar_lea.hbm %s4862_s1, 1600  ;;  %s3645_s18 = smov [#allocation5]  }
   0x4   :  { %s34_s19 = sshll.u32 %s3645_s18, 4  ;;  %s3646_s20 = smov [#allocation2]   ;;  %s35_s19 = int_to_ptr.vmem [resolvable:$true] %s34_s19 }
   0x5   :  { %s18_s21 = sshll.u32 %s3646_s20, 4  ;;  %s3548_s24 = scalar_lea.hbm %s4862_s1, 3200  ;;  %s19_s21 = int_to_ptr.vmem [resolvable:$true] %s18_s21 }
   0x6   :  { %p3525_p0 = scmp.ne.s32.totalorder %s2625_s17, %s3548_s24  ;;  %p3527_p1 = scmp.lt.u32.totalorder %s2625_s17, %s4862_s1 }
   0x7   :  { %p3528_p2 = scmp.lt.u32.totalorder %s3548_s24, %s3548_s24  ;;  %p3530_p4 = scmp.lt.u32.totalorder %s3548_s24, %s2625_s17 }
   0x9   :  { %p3529_p3 = por %p3528_p2, %p3527_p1 }
   0xb   :  { %p3531_p5 = por %p3530_p4, %p3529_p3 }
   0xd   :  { %p3532_p6 = pnand %p3531_p5, %p3525_p0 }
   0xf   :  { %3535 = shalt.err (!%p3532_p6)
}
  0x10   :  { %s3536_s27 = scalar_lea.vmem %s35_s19, 1600  ;;  %p3541_p8 = scmp.lt.s32.totalorder %s35_s19, %s35_s19 }
  0x11   :  { %p3537_p7 = scmp.ne.s32.totalorder %s35_s19, %s3536_s27  ;;  %p3542_p9 = scmp.lt.s32.totalorder %s3536_s27, %s3536_s27 }
  0x13   :  { %p3543_p10 = por %p3542_p9, %p3541_p8 }
  0x15   :  { %p3544_p11 = pnand %p3543_p10, %p3537_p7 }
  0x17   :  { %3547 = shalt.err (!%p3544_p11)
}
  0x18   :  { %s3647_s28 = smov 64   ;;  %s3648_s29 = smov 4  }
  0x19   :  { %40 = dma.hbm_to_vmem [thread:$0]  %s2625_s17, 1600, %s35_s19, [#allocation6], %s3647_s28, %s3647_s28, %s3648_s29  }
  0x1a   :  { %s3549_s5 = scalar_lea.hbm %s4861_s0, 1600  ;;  %s3551_s10 = scalar_lea.hbm %s4861_s0, 3200 }
  0x1b   :  { %p3550_p12 = scmp.ne.s32.totalorder %s4861_s0, %s3549_s5  ;;  %p3552_p13 = scmp.lt.u32.totalorder %s3551_s10, %s3549_s5 }
  0x1c   :  { %p3553_p0 = scmp.lt.u32.totalorder %s3549_s5, %s4861_s0 }
  0x1e   :  { %p3554_p1 = por %p3553_p0, %p3552_p13 }
  0x20   :  { %p3555_p2 = pnand %p3554_p1, %p3550_p12 }
  0x22   :  { %3558 = shalt.err (!%p3555_p2)
}
  0x23   :  { %s3559_s13 = scalar_lea.vmem %s19_s21, 1600  ;;  %p3564_p4 = scmp.lt.s32.totalorder %s19_s21, %s19_s21 }
  0x24   :  { %p3560_p3 = scmp.ne.s32.totalorder %s19_s21, %s3559_s13  ;;  %p3565_p5 = scmp.lt.s32.totalorder %s3559_s13, %s3559_s13 }
  0x26   :  { %p3566_p6 = por %p3565_p5, %p3564_p4 }
  0x28   :  { %p3567_p7 = pnand %p3566_p6, %p3560_p3 }
  0x2a   :  { %3570 = shalt.err (!%p3567_p7)
}
  0x2b   :  { %24 = dma.hbm_to_vmem [thread:$0]  %s4861_s0, 1600, %s19_s21, [#allocation3], %s3647_s28, %s3647_s28, %s3648_s29  }
  0x2c   :  { %s3649_s16 = smov [#allocation7]   ;;  %s3650_s18 = smov [#allocation8]  }
  0x2d   :  { %s46_s17 = sshll.u32 %s3649_s16, 4  ;;  %s59_s19 = sshll.u32 %s3650_s18, 4  ;;  %s47_s17 = int_to_ptr.vmem [resolvable:$true] %s46_s17  ;;  %s60_s19 = int_to_ptr.vmem [resolvable:$true] %s59_s19 }
  0x2e   :  { %s3571_s23 = scalar_lea.hbm %s4863_s2, 2304 }
  0x2f   :  { %p3572_p8 = scmp.ne.s32.totalorder %s4863_s2, %s3571_s23  ;;  %p3575_p9 = scmp.lt.u32.totalorder %s3571_s23, %s4863_s2 }
  0x31   :  { %p3577_p10 = pnand %p3575_p9, %p3572_p8 }
  0x33   :  { %3580 = shalt.err (!%p3577_p10)
}
  0x34   :  { %s3581_s0 = scalar_lea.vmem %s47_s17, 2304  ;;  %p3586_p12 = scmp.lt.s32.totalorder %s47_s17, %s47_s17 }
  0x35   :  { %p3582_p11 = scmp.ne.s32.totalorder %s47_s17, %s3581_s0  ;;  %p3587_p13 = scmp.lt.s32.totalorder %s3581_s0, %s3581_s0 }
  0x37   :  { %p3588_p0 = por %p3587_p13, %p3586_p12 }
  0x39   :  { %p3589_p1 = pnand %p3588_p0, %p3582_p11 }
  0x3b   :  { %3592 = shalt.err (!%p3589_p1)
}
  0x3c   :  { %52 = dma.hbm_to_vmem [thread:$0]  %s4863_s2, 2304, %s47_s17, [#allocation6], %s3647_s28, %s3647_s28, %s3648_s29  }
  0x3d   :  { %s3593_s6 = scalar_lea.hbm %s4864_s3, 16 }
  0x3e   :  { %p3594_p2 = scmp.ne.s32.totalorder %s4864_s3, %s3593_s6  ;;  %p3597_p3 = scmp.lt.u32.totalorder %s3593_s6, %s4864_s3 }
  0x40   :  { %p3599_p4 = pnand %p3597_p3, %p3594_p2 }
  0x42   :  { %3602 = shalt.err (!%p3599_p4)
}
  0x43   :  { %s3603_s11 = scalar_lea.vmem %s60_s19, 16  ;;  %s3607_s12 = scalar_lea.vmem %s60_s19, 32 }
  0x44   :  { %p3604_p5 = scmp.ne.s32.totalorder %s60_s19, %s3603_s11  ;;  %p3608_p6 = scmp.lt.s32.totalorder %s60_s19, %s60_s19 }
  0x45   :  { %p3609_p7 = scmp.lt.s32.totalorder %s3607_s12, %s3603_s11 }
  0x47   :  { %p3610_p8 = por %p3609_p7, %p3608_p6 }
  0x49   :  { %p3611_p9 = pnand %p3610_p8, %p3604_p5 }
  0x4b   :  { %3614 = shalt.err (!%p3611_p9)
}
  0x4c   :  { %62 = dma.hbm_to_vmem [thread:$0]  %s4864_s3, 16, %s60_s19, [#allocation9]  }
  0x4d   :  { %3637 = dma.done.wait [#allocation3], 1600  }
  0x4e   :  { %3638 = vsyncadd [#allocation3], 4294965696 }
  0x4f   :  { %3639 = dma.done.wait [#allocation6], 3904  }
  0x50   :  { %3640 = vsyncadd [#allocation6], 4294963392 }
  0x51   :  { %3641 = dma.done.wait [#allocation9], 16  }
  0x52   :  { %3642 = vsyncadd [#allocation9], 4294967280  ;;  %v4867_v0 = vmov 0.0   ;;  %vm3652_vm0 = vmmov 0   ;;  %v3479_v1 = vld [vmem:[#allocation7 + $0x10] sm:$0xff]   ;;  %v3480_v2 = vld [vmem:[#allocation7 + $0x18] sm:$0xff]  }
  0x53   :  { %2962 = vmatprep.subr.bf16.mxu0 %v4867_v0  ;;  %3466 = vmatprep.subr.bf16.mxu1 %v4867_v0  ;;  %v3744_v3 = vld [vmem:[#allocation2] sm:$0xff]   ;;  %v3746_v4 = vld [vmem:[#allocation2 + $0x8] sm:$0xff]   ;;  %vm190_vm1 = vsmask.f32 7424  ;;  %v3753_v8 = vld [vmem:[#allocation2 + $0x38] sm:$0xff]   ;;  %vm305_vm2 = vcmask 261120  }
  0x54   :  { %2966 = vmatprep.mubr.msk.bf16.mxu0 %vm3652_vm0, %v4867_v0  ;;  %2994 = vmatprep.mubr.msk.bf16.mxu1 %vm3652_vm0, %v4867_v0  ;;  %v192_v5 = vshrl.u32 %v3744_v3, 16  ;;  %v194_v6 = vshll.u32 %v3744_v3, 16  ;;  %v3751_v7 = vshll.u32 %v3746_v4, 16  ;;  %v3755_v9 = vld [vmem:[#allocation2 + $0x40] sm:$0xff]   ;;  %v3485_v12 = vld [vmem:[#allocation7 + $0x20] sm:$0xff]   ;;  %v3763_v13 = vshrl.u32 %v3746_v4, 16 }
  0x55   :  { %2963 = vmatpush3.bf16.msra.mxu0 %v3479_v1  ;;  %3468 = vmatpush3.bf16.msra.mxu1 %v3479_v1  ;;  %v3766_v14 = vshll.u32 %v3753_v8, 16  ;;  %v3769_v15 = vshrl.u32 %v3753_v8, 16  ;;  %v3772_v16 = vshll.u32 %v3755_v9, 16  ;;  %v3774_v17 = vld [vmem:[#allocation2 + $0x10] sm:$0xff]   ;;  %v3783_v22 = vld [vmem:[#allocation2 + $0x48] sm:$0xff]   ;;  %v3791_v26 = vshrl.u32 %v3755_v9, 16 }
  0x56   :  { %2964 = vmatprep.subr.bf16.mxu0 %v4867_v0  ;;  %3467 = vmatprep.subr.bf16.mxu1 %v4867_v0  ;;  %v196_v10 = vrot.slane %v194_v6, 1  ;;  %v201_v11 = vrot.slane %v3751_v7, 1  ;;  %v3781_v21 = vshll.u32 %v3774_v17, 16  ;;  %v3486_v25 = vld [vmem:[#allocation7] sm:$0xff]   ;;  %v3794_v27 = vshll.u32 %v3783_v22, 16  ;;  %v3800_v30 = vld [vmem:[#allocation2 + $0x18] sm:$0xff]  }
  0x57   :  { %v249_v19 = vrot.slane %v3766_v14, 1  ;;  %v257_v20 = vrot.slane %v3772_v16, 1  ;;  %v3809_v34 = vld [vmem:[#allocation2 + $0x50] sm:$0xff]   ;;  %v3813_v36 = vshrl.u32 %v3774_v17, 16  ;;  %v3816_v37 = vshll.u32 %v3800_v30, 16  ;;  %v3819_v40 = vld [vmem:[#allocation2 + $0x20] sm:$0xff]  }
  0x58   :  { %v197_v18 = vor.u32 %v196_v10, %v192_v5  ;;  %4879 = vst [vmem:[#allocation15_spill] sm:$0xff] %v3794_v27  ;;  %v205_v28 = vor.u32 %v3763_v13, %v201_v11  ;;  %v209_v29 = vrot.slane %v3781_v21, 1  ;;  %v265_v33 = vrot.slane %v3794_v27, 1  ;;  %v3493_v38 = vld [vmem:[#allocation7 + $0x28] sm:$0xff]   ;;  %v3834_v46 = vld [vmem:[#allocation2 + $0x58] sm:$0xff]   ;;  %v3856_v55 = vld [vmem:[#allocation2 + $0x28] sm:$0xff]  }
  0x59   :  { %2965 = vmatpush3.bf16.msra.mxu0 %v3480_v2  ;;  %3469 = vmatpush3.bf16.msra.mxu1 %v3480_v2  ;;  %v253_v24 = vor.u32 %v3769_v15, %v249_v19  ;;  %v261_v32 = vor.u32 %v3791_v26, %v257_v20  ;;  %v3494_v39 = vld [vmem:[#allocation7 + $0x8] sm:$0xff]   ;;  %v3824_v42 = vshrl.u32 %v3783_v22, 16  ;;  %v3827_v43 = vshll.u32 %v3809_v34, 16  ;;  %v3496_v56 = vld [vmem:[#allocation2 + $0x60] ss:$0 sps:$4 sm:$0xff]   ;;  %s3653_s3 = smov [#allocation10]  }
  0x5a   :  { %3074 = vmatprep.subr.bf16.mxu0 %v4867_v0  ;;  %3018 = vmatprep.subr.bf16.mxu1 %v4867_v0  ;;  %v202_v23 = vsel %vm190_vm1, %v197_v18, %v201_v11  ;;  %v210_v35 = vsel %vm190_vm1, %v205_v28, %v209_v29  ;;  %v213_v44 = vor.u32 %v3813_v36, %v209_v29  ;;  %v217_v45 = vrot.slane %v3816_v37, 1  ;;  %v3497_v58 = vld [vmem:[#allocation5] ss:$0 sps:$4 sm:$0xff]   ;;  %s2611_s14 = sshll.u32 %s3653_s3, 4  ;;  %s2612_s14 = int_to_ptr.vmem [resolvable:$true] %s2611_s14 }
  0x5b   :  { %v258_v31 = vsel %vm190_vm1, %v253_v24, %v257_v20  ;;  %v266_v41 = vsel %vm190_vm1, %v261_v32, %v265_v33  ;;  %4880 = vst [vmem:[#allocation16_spill] sm:$0xff] %v3824_v42  ;;  %4881 = vst [vmem:[#allocation17_spill] sm:$0xff] %v3827_v43  ;;  %v3839_v47 = vshll.u32 %v3819_v40, 16  ;;  %v269_v48 = vor.u32 %v3824_v42, %v265_v33  ;;  %s3615_s15 = scalar_lea.vmem %s2612_s14, 1600  ;;  %p3620_p11 = scmp.lt.s32.totalorder %s2612_s14, %s2612_s14 }
  0x5c   :  { %2967 = vmatmul.mubr.msk.bf16.vlgmr.msra.gmra.mrb[0].mxu0 %vm305_vm2, %v202_v23  ;;  %2995 = vmatmul.mubr.msk.bf16.vlgmr.msra.gmra.mrb[0].mxu1 %vm305_vm2, %v258_v31  ;;  %v273_v49 = vrot.slane %v3827_v43, 1  ;;  %v218_v50 = vsel %vm190_vm1, %v213_v44, %v217_v45  ;;  %v3847_v51 = vshrl.u32 %v3800_v30, 16  ;;  %v3850_v52 = vshrl.u32 %v3809_v34, 16  ;;  %v3889_v23 = vld [vmem:[#allocation2 + $0x30] sm:$0xff]   ;;  %p3616_p10 = scmp.ne.s32.totalorder %s2612_s14, %s3615_s15  ;;  %p3621_p12 = scmp.lt.s32.totalorder %s3615_s15, %s3615_s15 }
  0x5d   :  { %3075 = vmatpush3.bf16.msra.mxu0 %v3485_v12  ;;  %2970 = vmatprep.mubr.msk.bf16.mxu0 %vm3652_vm0, %v4867_v0  ;;  %v3853_v53 = vshll.u32 %v3834_v46, 16  ;;  %v225_v54 = vrot.slane %v3839_v47, 1  ;;  %vm177_vm3 = vcmask 1043456   ;;  %v3866_v61 = vshrl.u32 %v3819_v40, 16 }
  0x5e   :  { %3076 = vmatprep.subr.bf16.mxu0 %v4867_v0  ;;  %2998 = vmatprep.mubr.msk.bf16.mxu1 %vm3652_vm0, %v4867_v0  ;;  %4882 = vst [vmem:[#allocation18_spill] sm:$0xff] %v3850_v52  ;;  %v274_v57 = vsel %vm190_vm1, %v269_v48, %v273_v49  ;;  %v221_v59 = vor.u32 %v3847_v51, %v217_v45  ;;  %v3869_v62 = vshll.u32 %v3856_v55, 16  ;;  %v3880_v11 = vshrl.u32 %v3834_v46, 16  ;;  %p3622_p13 = por %p3621_p12, %p3620_p11 }
  0x5f   :  { %3019 = vmatpush3.bf16.msra.mxu1 %v3486_v25  ;;  %4883 = vst [vmem:[#allocation19_spill] sm:$0xff] %v3853_v53  ;;  %v281_v60 = vrot.slane %v3853_v53, 1  ;;  %v277_v63 = vor.u32 %v3850_v52, %v273_v49  ;;  %v3875_v2 = vsel %vm177_vm3, %v3496_v56, %v3497_v58  ;;  %v229_v18 = vor.u32 %v3866_v61, %v225_v54  ;;  %v3500_v58 = vld [vmem:[#allocation7 + $0x40] sm:$0xff]  }
  0x60   :  { %3020 = vmatprep.subr.bf16.mxu1 %v4867_v0  ;;  %v226_v1 = vsel %vm190_vm1, %v221_v59, %v225_v54  ;;  %4884 = vst [vmem:[#allocation20_spill] sm:$0xff] %v3875_v2  ;;  %4885 = vst [vmem:[#allocation21_spill] sm:$0xff] %v3880_v11  ;;  %v3883_v12 = vshll.u32 %v3875_v2, 16  ;;  %v233_v20 = vrot.slane %v3869_v62, 1  ;;  %v3894_v24 = vrot.slane %v192_v5, 5  ;;  %p3623_p0 = pnand %p3622_p13, %p3616_p10 }
  0x61   :  { %3077 = vmatpush3.bf16.msra.mxu0 %v3493_v38  ;;  %v282_v10 = vsel %vm190_vm1, %v277_v63, %v281_v60  ;;  %v3898_v25 = vrot.slane %v194_v6, 6  ;;  %v285_v28 = vor.u32 %v3880_v11, %v281_v60  ;;  %v3906_v32 = vshrl.u32 %v3856_v55, 16  ;;  %v3502_v60 = vld [vmem:[#allocation7 + $0x48] sm:$0xff]  }
  0x62   :  { %3186 = vmatprep.subr.bf16.mxu0 %v4867_v0  ;;  %4886 = vst [vmem:[#allocation22_spill] sm:$0xff] %v3883_v12  ;;  %v288_v29 = vrot.slane %v3883_v12, 1  ;;  %v234_v31 = vsel %vm190_vm1, %v229_v18, %v233_v20  ;;  %v3909_v33 = vshll.u32 %v3889_v23, 16  ;;  %v3927_v44 = vshrl.u32 %v3889_v23, 16 }
  0x63   :  { %3021 = vmatpush3.bf16.msra.mxu1 %v3494_v39  ;;  %v1152_v6 = vor.u32 %v3898_v25, %v3894_v24  ;;  %v3921_v39 = vshrl.u32 %v3875_v2, 16  ;;  %v662_v54 = vrot.slane %v3744_v3, 1  ;;  %v663_v56 = vrot.slane %v3746_v4, 1  ;;  %v3506_v24 = vld [vmem:[#allocation7 + $0x68] sm:$0xff]  }
  0x64   :  { %2971 = vmatmul.mubr.msk.bf16.gmra.mrb[4].mxu0 %vm305_vm2, %v210_v35  ;;  %3130 = vmatprep.subr.bf16.mxu1 %v4867_v0  ;;  %v289_v5 = vsel %vm190_vm1, %v285_v28, %v288_v29  ;;  %v237_v35 = vor.u32 %v3906_v32, %v233_v20  ;;  %v241_v38 = vrot.slane %v3909_v33, 1  ;;  %vm661_vm4 = vcmask 1046528  }
  0x65   :  { %2974 = vmatprep.mubr.msk.bf16.mxu0 %vm3652_vm0, %v4867_v0  ;;  %2999 = vmatmul.mubr.msk.bf16.gmra.mrb[4].mxu1 %vm305_vm2, %v266_v41  ;;  %4887 = vst [vmem:[#allocation23_spill] sm:$0xff] %v3921_v39  ;;  %v292_v45 = vor.u32 %v3921_v39, %v288_v29  ;;  %v665_v59 = vrot.slane %v3774_v17, 1  ;;  %v669_v18 = vrot.slane %v3819_v40, 1  ;;  %v671_v28 = vrot.slane %v3856_v55, 1 }
  0x66   :  { %3002 = vmatprep.mubr.msk.bf16.mxu1 %vm3652_vm0, %v4867_v0  ;;  %v242_v41 = vsel %vm190_vm1, %v237_v35, %v241_v38  ;;  %v245_v48 = vor.u32 %v3927_v44, %v241_v38  ;;  %v675_v35 = vrot.slane %v3753_v8, 1  ;;  %vm904_vm5 = vcmask 1042432  }
  0x67   :  { %v666_v63 = vsel %vm661_vm4, %v663_v56, %v665_v59  ;;  %v672_v29 = vsel %vm661_vm4, %v669_v18, %v671_v28  ;;  %vm1149_vm6 = vsmask.f32 2304  ;;  %v910_v25 = vrot.slane %v3800_v30, 5 }
  0x68   :  { %v250_v49 = vsel %vm190_vm1, %v245_v48, %v249_v19  ;;  %v664_v19 = vsel %vm661_vm4, %v662_v54, %v663_v56  ;;  %v679_v48 = vrot.slane %v3783_v22, 1  ;;  %v683_v56 = vrot.slane %v3834_v46, 1 }
  0x69   :  { %vm1427_vm7 = vcmask 1041408   ;;  %vm1672_vm8 = vcmask 1045504   ;;  %vm1915_vm9 = vsmask.f32 5376  ;;  %vm2184_vm10 = vcmask 1044480  }
  0x6a   :  { %vm2580_vm11 = vcmask 60416  }
  0x6c   :  { %2975 = vmatmul.mubr.msk.bf16.gmra.mrb[8].mxu0 %vm305_vm2, %v218_v50  ;;  %v3499_v50 = vld [vmem:[#allocation7 + $0x30] sm:$0xff]  }
  0x6d   :  { %2978 = vmatprep.mubr.msk.bf16.mxu0 %vm3652_vm0, %v4867_v0  ;;  %3003 = vmatmul.mubr.msk.bf16.gmra.mrb[8].mxu1 %vm305_vm2, %v274_v57  ;;  %v3501_v57 = vld [vmem:[#allocation7 + $0x38] sm:$0xff]  }
  0x6e   :  { %3006 = vmatprep.mubr.msk.bf16.mxu1 %vm3652_vm0, %v4867_v0 }
  0x74   :  { %2979 = vmatmul.mubr.msk.bf16.gmra.mrb[12].mxu0 %vm305_vm2, %v226_v1  ;;  %v667_v1 = vrot.slane %v3800_v30, 1 }
  0x75   :  { %2982 = vmatprep.mubr.msk.bf16.mxu0 %vm3652_vm0, %v4867_v0  ;;  %3007 = vmatmul.mubr.msk.bf16.gmra.mrb[12].mxu1 %vm305_vm2, %v282_v10 }
  0x76   :  { %3010 = vmatprep.mubr.msk.bf16.mxu1 %vm3652_vm0, %v4867_v0  ;;  %v668_v10 = vsel %vm661_vm4, %v665_v59, %v667_v1  ;;  %v670_v20 = vsel %vm661_vm4, %v667_v1, %v669_v18  ;;  %v905_v59 = vrot.slane %v3744_v3, 5  ;;  %v1154_v1 = vrot.slane %v3751_v7, 6  ;;  %v3503_v18 = vld [vmem:[#allocation7 + $0x50] sm:$0xff]  }
  0x7c   :  { %2983 = vmatmul.mubr.msk.bf16.gmra.mrb[16].mxu0 %vm305_vm2, %v234_v31  ;;  %v673_v31 = vrot.slane %v3889_v23, 1 }
  0x7d   :  { %2986 = vmatprep.mubr.msk.bf16.mxu0 %vm3652_vm0, %v4867_v0  ;;  %3011 = vmatmul.mubr.msk.bf16.gmra.mrb[16].mxu1 %vm305_vm2, %v289_v5 }
  0x7e   :  { %3014 = vmatprep.mubr.msk.bf16.mxu1 %vm3652_vm0, %v4867_v0  ;;  %v674_v5 = vsel %vm661_vm4, %v671_v28, %v673_v31  ;;  %v676_v38 = vsel %vm661_vm4, %v673_v31, %v675_v35  ;;  %v908_v28 = vrot.slane %v3774_v17, 5 }
  0x84   :  { %2987 = vmatmul.mubr.msk.bf16.gmra.mrb[20].mxu0 %vm305_vm2, %v242_v41  ;;  %v677_v41 = vrot.slane %v3755_v9, 1 }
  0x85   :  { %2990 = vmatprep.mubr.msk.bf16.mxu0 %vm3652_vm0, %v4867_v0  ;;  %3015 = vmatmul.mubr.msk.bf16.gmra.mrb[20].mxu1 %vm305_vm2, %v292_v45 }
  0x86   :  { %3022 = vmatprep.mubr.msk.bf16.mxu1 %vm3652_vm0, %v4867_v0  ;;  %v678_v45 = vsel %vm661_vm4, %v675_v35, %v677_v41  ;;  %v1157_v35 = vrot.slane %v3813_v36, 5 }
  0x8c   :  { %2991 = vmatmul.mubr.msk.bf16.gmra.mrb[24].mxu0 %vm305_vm2, %v250_v49  ;;  %v680_v49 = vsel %vm661_vm4, %v677_v41, %v679_v48 }
  0x8d   :  { %3078 = vmatprep.mubr.msk.bf16.mxu0 %vm3652_vm0, %v4867_v0  ;;  %3023 = vmatmul.mubr.msk.bf16.vlgmr.msra.gmra.mrb[24].mxu1 %vm305_vm2, %v3744_v3 }
  0x8e   :  { %3026 = vmatprep.mubr.msk.bf16.mxu1 %vm3652_vm0, %v4867_v0  ;;  %3131 = vmatpush3.bf16.msra.mxu1 %v3499_v50  ;;  %v681_v50 = vrot.slane %v3809_v34, 1 }
  0x8f   :  { %3132 = vmatprep.subr.bf16.mxu1 %v4867_v0 }
  0x90   :  { %v682_v54 = vsel %vm661_vm4, %v679_v48, %v681_v50  ;;  %v1161_v48 = vrot.slane %v3847_v51, 5 }
  0x92   :  { %3133 = vmatpush3.bf16.msra.mxu1 %v3501_v57  ;;  %v684_v57 = vsel %vm661_vm4, %v681_v50, %v683_v56  ;;  %v911_v50 = vsel %vm904_vm5, %v908_v28, %v910_v25 }
  0x93   :  { %3242 = vmatprep.subr.bf16.mxu1 %v4867_v0 }
  0x94   :  { %3079 = vmatmul.mubr.msk.bf16.vlgmr.msra.gmra.mrb[28].mxu0 %vm305_vm2, %v664_v19  ;;  %v685_v19 = vrot.slane %v3875_v2, 1 }
  0x95   :  { %3187 = vmatpush3.bf16.msra.mxu0 %v3500_v58  ;;  %3082 = vmatprep.mubr.msk.bf16.mxu0 %vm3652_vm0, %v4867_v0 }
  0x96   :  { %3188 = vmatprep.subr.bf16.mxu0 %v4867_v0  ;;  %3027 = vmatmul.mubr.msk.bf16.gmra.mrb[28].mxu1 %vm305_vm2, %v3746_v4  ;;  %v686_v58 = vsel %vm661_vm4, %v683_v56, %v685_v19  ;;  %v912_v56 = vrot.slane %v3819_v40, 5 }
  0x97   :  { %3030 = vmatprep.mubr.msk.bf16.mxu1 %vm3652_vm0, %v4867_v0 }
  0x99   :  { %3189 = vmatpush3.bf16.msra.mxu0 %v3502_v60  ;;  %v906_v60 = vrot.slane %v3746_v4, 5 }
  0x9a   :  { %3298 = vmatprep.subr.bf16.mxu0 %v4867_v0 }
  0x9b   :  { %v909_v41 = vsel %vm904_vm5, %v906_v60, %v908_v28 }
  0x9c   :  { %3083 = vmatmul.mubr.msk.bf16.gmra.mrb[32].mxu0 %vm305_vm2, %v666_v63  ;;  %v1153_v63 = vrot.slane %v3763_v13, 5 }
  0x9d   :  { %3086 = vmatprep.mubr.msk.bf16.mxu0 %vm3652_vm0, %v4867_v0 }
  0x9e   :  { %3031 = vmatmul.mubr.msk.bf16.gmra.mrb[32].mxu1 %vm305_vm2, %v3774_v17 }
  0x9f   :  { %3034 = vmatprep.mubr.msk.bf16.mxu1 %vm3652_vm0, %v4867_v0 }
  0xa4   :  { %3087 = vmatmul.mubr.msk.bf16.gmra.mrb[36].mxu0 %vm305_vm2, %v668_v10  ;;  %v907_v10 = vsel %vm904_vm5, %v905_v59, %v906_v60  ;;  %v913_v59 = vsel %vm904_vm5, %v910_v25, %v912_v56  ;;  %v1177_v25 = vrot.slane %v3769_v15, 5 }
  0xa5   :  { %3090 = vmatprep.mubr.msk.bf16.mxu0 %vm3652_vm0, %v4867_v0 }
  0xa6   :  { %3035 = vmatmul.mubr.msk.bf16.gmra.mrb[36].mxu1 %vm305_vm2, %v3800_v30 }
  0xa7   :  { %3038 = vmatprep.mubr.msk.bf16.mxu1 %vm3652_vm0, %v4867_v0 }
  0xac   :  { %3091 = vmatmul.mubr.msk.bf16.gmra.mrb[40].mxu0 %vm305_vm2, %v670_v20  ;;  %v1155_v20 = vor.u32 %v1154_v1, %v1153_v63  ;;  %v914_v63 = vrot.slane %v3856_v55, 5 }
  0xad   :  { %3094 = vmatprep.mubr.msk.bf16.mxu0 %vm3652_vm0, %v4867_v0 }
  0xae   :  { %3039 = vmatmul.mubr.msk.bf16.gmra.mrb[40].mxu1 %vm305_vm2, %v3819_v40  ;;  %v1156_v31 = vsel %vm1149_vm6, %v1152_v6, %v1155_v20 }
  0xaf   :  { %3042 = vmatprep.mubr.msk.bf16.mxu1 %vm3652_vm0, %v4867_v0 }
  0xb4   :  { %3095 = vmatmul.mubr.msk.bf16.gmra.mrb[44].mxu0 %vm305_vm2, %v672_v29  ;;  %v3505_v29 = vld [vmem:[#allocation7 + $0x58] sm:$0xff]  }
  0xb5   :  { %3098 = vmatprep.mubr.msk.bf16.mxu0 %vm3652_vm0, %v4867_v0 }
  0xb6   :  { %3043 = vmatmul.mubr.msk.bf16.gmra.mrb[44].mxu1 %vm305_vm2, %v3856_v55 }
  0xb7   :  { %3046 = vmatprep.mubr.msk.bf16.mxu1 %vm3652_vm0, %v4867_v0 }
  0xbc   :  { %3099 = vmatmul.mubr.msk.bf16.gmra.mrb[48].mxu0 %vm305_vm2, %v674_v5  ;;  %v3504_v5 = vld [vmem:[#allocation7 + $0x60] sm:$0xff]  }
  0xbd   :  { %3102 = vmatprep.mubr.msk.bf16.mxu0 %vm3652_vm0, %v4867_v0 }
  0xbe   :  { %3047 = vmatmul.mubr.msk.bf16.gmra.mrb[48].mxu1 %vm305_vm2, %v3889_v23 }
  0xbf   :  { %3050 = vmatprep.mubr.msk.bf16.mxu1 %vm3652_vm0, %v4867_v0 }
  0xc4   :  { %3103 = vmatmul.mubr.msk.bf16.gmra.mrb[52].mxu0 %vm305_vm2, %v676_v38  ;;  %v1158_v38 = vrot.slane %v3781_v21, 6 }
  0xc5   :  { %3106 = vmatprep.mubr.msk.bf16.mxu0 %vm3652_vm0, %v4867_v0 }
  0xc6   :  { %3051 = vmatmul.mubr.msk.bf16.gmra.mrb[52].mxu1 %vm305_vm2, %v3753_v8 }
  0xc7   :  { %3054 = vmatprep.mubr.msk.bf16.mxu1 %vm3652_vm0, %v4867_v0 }
  0xcc   :  { %3107 = vmatmul.mubr.msk.bf16.gmra.mrb[56].mxu0 %vm305_vm2, %v678_v45  ;;  %v1159_v45 = vor.u32 %v1158_v38, %v1157_v35  ;;  %v1174_v35 = vrot.slane %v3909_v33, 6 }
  0xcd   :  { %3110 = vmatprep.mubr.msk.bf16.mxu0 %vm3652_vm0, %v4867_v0 }
  0xce   :  { %3055 = vmatmul.mubr.msk.bf16.gmra.mrb[56].mxu1 %vm305_vm2, %v3755_v9  ;;  %v1160_v6 = vsel %vm1149_vm6, %v1155_v20, %v1159_v45  ;;  %v915_v20 = vsel %vm904_vm5, %v912_v56, %v914_v63  ;;  %v1182_v56 = vrot.slane %v3772_v16, 6 }
  0xcf   :  { %3058 = vmatprep.mubr.msk.bf16.mxu1 %vm3652_vm0, %v4867_v0 }
  0xd4   :  { %3111 = vmatmul.mubr.msk.bf16.gmra.mrb[60].mxu0 %vm305_vm2, %v680_v49  ;;  %v1162_v49 = vrot.slane %v3816_v37, 6 }
  0xd5   :  { %3114 = vmatprep.mubr.msk.bf16.mxu0 %vm3652_vm0, %v4867_v0 }
  0xd6   :  { %3059 = vmatmul.mubr.msk.bf16.gmra.mrb[60].mxu1 %vm305_vm2, %v3783_v22 }
  0xd7   :  { %3062 = vmatprep.mubr.msk.bf16.mxu1 %vm3652_vm0, %v4867_v0 }
  0xdc   :  { %3115 = vmatmul.mubr.msk.bf16.gmra.mrb[64].mxu0 %vm305_vm2, %v682_v54  ;;  %v1163_v54 = vor.u32 %v1162_v49, %v1161_v48 }
  0xdd   :  { %3118 = vmatprep.mubr.msk.bf16.mxu0 %vm3652_vm0, %v4867_v0 }
  0xde   :  { %3063 = vmatmul.mubr.msk.bf16.gmra.mrb[64].mxu1 %vm305_vm2, %v3809_v34 }
  0xdf   :  { %3066 = vmatprep.mubr.msk.bf16.mxu1 %vm3652_vm0, %v4867_v0 }
  0xe4   :  { %3119 = vmatmul.mubr.msk.bf16.gmra.mrb[68].mxu0 %vm305_vm2, %v684_v57  ;;  %v1164_v57 = vsel %vm1149_vm6, %v1159_v45, %v1163_v54  ;;  %v918_v45 = vrot.slane %v3753_v8, 5  ;;  %v920_v8 = vrot.slane %v3755_v9, 5  ;;  %v922_v9 = vrot.slane %v3783_v22, 5 }
  0xe5   :  { %3122 = vmatprep.mubr.msk.bf16.mxu0 %vm3652_vm0, %v4867_v0 }
  0xe6   :  { %3067 = vmatmul.mubr.msk.bf16.gmra.mrb[68].mxu1 %vm305_vm2, %v3834_v46 }
  0xe7   :  { %3070 = vmatprep.mubr.msk.bf16.mxu1 %vm3652_vm0, %v4867_v0 }
  0xec   :  { %3123 = vmatmul.mubr.msk.bf16.gmra.mrb[72].mxu0 %vm305_vm2, %v686_v58  ;;  %v1166_v58 = vrot.slane %v3839_v47, 6 }
  0xed   :  { %3126 = vmatprep.mubr.msk.bf16.mxu0 %vm3652_vm0, %v4867_v0 }
  0xee   :  { %3071 = vmatmul.mubr.msk.bf16.gmra.mrb[72].mxu1 %vm305_vm2, %v3875_v2 }
  0xef   :  { %3134 = vmatprep.mubr.msk.bf16.mxu1 %vm3652_vm0, %v4867_v0 }
  0xf4   :  { %3127 = vmatmul.mubr.msk.bf16.gmra.mrb[76].mxu0 %vm305_vm2, %v685_v19  ;;  %v1165_v19 = vrot.slane %v3866_v61, 5 }
  0xf5   :  { %3190 = vmatprep.mubr.msk.bf16.mxu0 %vm3652_vm0, %v4867_v0 }
  0xf6   :  { %3135 = vmatmul.mubr.msk.bf16.vlgmr.msra.gmra.mrb[76].mxu1 %vm305_vm2, %v907_v10  ;;  %v1167_v60 = vor.u32 %v1166_v58, %v1165_v19  ;;  %v1169_v10 = vrot.slane %v3906_v32, 5 }
  0xf7   :  { %3138 = vmatprep.mubr.msk.bf16.mxu1 %vm3652_vm0, %v4867_v0  ;;  %3243 = vmatpush3.bf16.msra.mxu1 %v3503_v18  ;;  %v1170_v18 = vrot.slane %v3869_v62, 6 }
  0xf8   :  { %3244 = vmatprep.subr.bf16.mxu1 %v4867_v0  ;;  %v1168_v1 = vsel %vm1149_vm6, %v1163_v54, %v1167_v60  ;;  %v1181_v54 = vrot.slane %v3791_v26, 5 }
  0xf9   :  { %v1171_v28 = vor.u32 %v1170_v18, %v1169_v10  ;;  %v1186_v10 = vrot.slane %v3794_v27, 6 }
  0xfa   :  { %v1183_v19 = vor.u32 %v1182_v56, %v1181_v54 }
  0xfb   :  { %3245 = vmatpush3.bf16.msra.mxu1 %v3505_v29  ;;  %v916_v29 = vrot.slane %v3889_v23, 5 }
  0xfc   :  { %3191 = vmatmul.mubr.msk.bf16.vlgmr.msra.gmra.mrb[80].mxu0 %vm305_vm2, %v1156_v31  ;;  %3354 = vmatprep.subr.bf16.mxu1 %v4867_v0  ;;  %v1172_v31 = vsel %vm1149_vm6, %v1167_v60, %v1171_v28 }
  0xfd   :  { %3299 = vmatpush3.bf16.msra.mxu0 %v3504_v5  ;;  %3194 = vmatprep.mubr.msk.bf16.mxu0 %vm3652_vm0, %v4867_v0  ;;  %v1173_v5 = vrot.slane %v3927_v44, 5  ;;  %v917_v38 = vsel %vm904_vm5, %v914_v63, %v916_v29  ;;  %v919_v48 = vsel %vm904_vm5, %v916_v29, %v918_v45  ;;  %v923_v29 = vsel %vm904_vm5, %v920_v8, %v922_v9 }
  0xfe   :  { %3300 = vmatprep.subr.bf16.mxu0 %v4867_v0  ;;  %3139 = vmatmul.mubr.msk.bf16.gmra.mrb[80].mxu1 %vm305_vm2, %v909_v41 }
  0xff   :  { %3142 = vmatprep.mubr.msk.bf16.mxu1 %vm3652_vm0, %v4867_v0  ;;  %v1175_v41 = vor.u32 %v1174_v35, %v1173_v5 }
 0x101   :  { %3301 = vmatpush3.bf16.msra.mxu0 %v3506_v24  ;;  %v1176_v24 = vsel %vm1149_vm6, %v1171_v28, %v1175_v41 }
 0x102   :  { %3410 = vmatprep.subr.bf16.mxu0 %v4867_v0 }
 0x104   :  { %3195 = vmatmul.mubr.msk.bf16.gmra.mrb[84].mxu0 %vm305_vm2, %v1160_v6  ;;  %v1178_v6 = vrot.slane %v3766_v14, 6 }
 0x105   :  { %3198 = vmatprep.mubr.msk.bf16.mxu0 %vm3652_vm0, %v4867_v0 }
 0x106   :  { %3143 = vmatmul.mubr.msk.bf16.gmra.mrb[84].mxu1 %vm305_vm2, %v911_v50  ;;  %v1179_v49 = vor.u32 %v1178_v6, %v1177_v25  ;;  %v1189_v25 = vrot.slane %v3850_v52, 5  ;;  %v1190_v6 = vrot.slane %v3827_v43, 6  ;;  %v1674_v43 = vrot.slane %v3774_v17, 2 }
 0x107   :  { %3146 = vmatprep.mubr.msk.bf16.mxu1 %vm3652_vm0, %v4867_v0 }
 0x108   :  { %v1180_v50 = vsel %vm1149_vm6, %v1175_v41, %v1179_v49  ;;  %v1184_v63 = vsel %vm1149_vm6, %v1179_v49, %v1183_v19  ;;  %v924_v41 = vrot.slane %v3809_v34, 5  ;;  %v1191_v34 = vor.u32 %v1190_v6, %v1189_v25 }
 0x109   :  { %v928_v6 = vrot.slane %v3875_v2, 5 }
 0x10c   :  { %3199 = vmatmul.mubr.msk.bf16.gmra.mrb[88].mxu0 %vm305_vm2, %v1164_v57  ;;  %v921_v57 = vsel %vm904_vm5, %v918_v45, %v920_v8 }
 0x10d   :  { %3202 = vmatprep.mubr.msk.bf16.mxu0 %vm3652_vm0, %v4867_v0 }
 0x10e   :  { %3147 = vmatmul.mubr.msk.bf16.gmra.mrb[88].mxu1 %vm305_vm2, %v913_v59 }
 0x10f   :  { %3150 = vmatprep.mubr.msk.bf16.mxu1 %vm3652_vm0, %v4867_v0 }
 0x114   :  { %3203 = vmatmul.mubr.msk.bf16.gmra.mrb[92].mxu0 %vm305_vm2, %v1168_v1  ;;  %v1185_v1 = vrot.slane %v3824_v42, 5  ;;  %v3511_v42 = vld [vmem:[#allocation7 + $0x88] sm:$0xff]  }
 0x115   :  { %3206 = vmatprep.mubr.msk.bf16.mxu0 %vm3652_vm0, %v4867_v0 }
 0x116   :  { %3151 = vmatmul.mubr.msk.bf16.gmra.mrb[92].mxu1 %vm305_vm2, %v915_v20  ;;  %v1187_v22 = vor.u32 %v1186_v10, %v1185_v1  ;;  %v1193_v1 = vrot.slane %v3880_v11, 5  ;;  %v1194_v10 = vrot.slane %v3853_v53, 6  ;;  %v4888_v53 = vmov 0.0  }
 0x117   :  { %3154 = vmatprep.mubr.msk.bf16.mxu1 %vm3652_vm0, %v4867_v0 }
 0x11c   :  { %3207 = vmatmul.mubr.msk.bf16.gmra.mrb[96].mxu0 %vm305_vm2, %v1172_v31 }
 0x11d   :  { %3210 = vmatprep.mubr.msk.bf16.mxu0 %vm3652_vm0, %v4867_v0 }
 0x11e   :  { %3155 = vmatmul.mubr.msk.bf16.gmra.mrb[96].mxu1 %vm305_vm2, %v917_v38 }
 0x11f   :  { %3158 = vmatprep.mubr.msk.bf16.mxu1 %vm3652_vm0, %v4867_v0 }
 0x124   :  { %3211 = vmatmul.mubr.msk.bf16.gmra.mrb[100].mxu0 %vm305_vm2, %v1176_v24  ;;  %v1188_v24 = vsel %vm1149_vm6, %v1183_v19, %v1187_v22 }
 0x125   :  { %3214 = vmatprep.mubr.msk.bf16.mxu0 %vm3652_vm0, %v4867_v0 }
 0x126   :  { %3159 = vmatmul.mubr.msk.bf16.gmra.mrb[100].mxu1 %vm305_vm2, %v919_v48 }
 0x127   :  { %3162 = vmatprep.mubr.msk.bf16.mxu1 %vm3652_vm0, %v4867_v0 }
 0x12c   :  { %3215 = vmatmul.mubr.msk.bf16.gmra.mrb[104].mxu0 %vm305_vm2, %v1180_v50  ;;  %v925_v50 = vsel %vm904_vm5, %v922_v9, %v924_v41 }
 0x12d   :  { %3218 = vmatprep.mubr.msk.bf16.mxu0 %vm3652_vm0, %v4867_v0 }
 0x12e   :  { %3163 = vmatmul.mubr.msk.bf16.gmra.mrb[104].mxu1 %vm305_vm2, %v921_v57 }
 0x12f   :  { %v4153_v58 = vpop.f32.mrb[0].mxu0  ;;  %3166 = vmatprep.mubr.msk.bf16.mxu1 %vm3652_vm0, %v4867_v0  ;;  %v4163_v20 = vpop.f32.mrb[0].mxu1 }
 0x130   :  { %v2968_v59 = vpop.f32.mrb[1].mxu0  ;;  %v2996_v28 = vpop.f32.mrb[1].mxu1 }
 0x131   :  { %v4158_v60 = vpop.f32.mrb[2].mxu0  ;;  %v4167_v31 = vpop.f32.mrb[2].mxu1  ;;  %v926_v59 = vrot.slane %v3834_v46, 5  ;;  %v1195_v46 = vor.u32 %v1194_v10, %v1193_v1  ;;  %v4222_v1 = vld [vmem:[#allocation5 + $0x4] sm:$0xff]  }
 0x132   :  { %v2969_v18 = vpop.f32.mrb[3].mxu0  ;;  %v2997_v5 = vpop.f32.mrb[3].mxu1 }
 0x133   :  { %v927_v5 = vsel %vm904_vm5, %v924_v41, %v926_v59  ;;  %v929_v10 = vsel %vm904_vm5, %v926_v59, %v928_v6  ;;  %v930_v59 = vrot.slane %v4222_v1, 5 }
 0x134   :  { %3219 = vmatmul.mubr.msk.bf16.gmra.mrb[108].mxu0 %vm305_vm2, %v1184_v63  ;;  %v1192_v63 = vsel %vm1149_vm6, %v1187_v22, %v1191_v34 }
 0x135   :  { %3222 = vmatprep.mubr.msk.bf16.mxu0 %vm3652_vm0, %v4867_v0 }
 0x136   :  { %3167 = vmatmul.mubr.msk.bf16.gmra.mrb[108].mxu1 %vm305_vm2, %v923_v29 }
 0x137   :  { %v4172_v35 = vpop.f32.mrb[4].mxu0  ;;  %3170 = vmatprep.mubr.msk.bf16.mxu1 %vm3652_vm0, %v4867_v0 }
 0x138   :  { %v2972_v38 = vpop.f32.mrb[5].mxu0  ;;  %v4182_v49 = vpop.f32.mrb[4].mxu1 }
 0x139   :  { %v4177_v45 = vpop.f32.mrb[6].mxu0  ;;  %v3000_v8 = vpop.f32.mrb[5].mxu1 }
 0x13a   :  { %v2973_v48 = vpop.f32.mrb[7].mxu0  ;;  %v4186_v54 = vpop.f32.mrb[6].mxu1  ;;  %v1197_v8 = vrot.slane %v3921_v39, 5 }
 0x13b   :  { %v3001_v56 = vpop.f32.mrb[7].mxu1  ;;  %v1196_v48 = vsel %vm1149_vm6, %v1191_v34, %v1195_v46 }
 0x13c   :  { %3223 = vmatmul.mubr.msk.bf16.gmra.mrb[112].mxu0 %vm305_vm2, %v1188_v24 }
 0x13d   :  { %3226 = vmatprep.mubr.msk.bf16.mxu0 %vm3652_vm0, %v4867_v0 }
 0x13e   :  { %3171 = vmatmul.mubr.msk.bf16.gmra.mrb[112].mxu1 %vm305_vm2, %v925_v50  ;;  %v1198_v50 = vrot.slane %v3883_v12, 6 }
 0x13f   :  { %v4191_v57 = vpop.f32.mrb[8].mxu0  ;;  %3174 = vmatprep.mubr.msk.bf16.mxu1 %vm3652_vm0, %v4867_v0 }
 0x140   :  { %v2976_v19 = vpop.f32.mrb[9].mxu0  ;;  %v4201_v28 = vpop.f32.mrb[8].mxu1  ;;  %v1199_v34 = vor.u32 %v1198_v50, %v1197_v8 }
 0x141   :  { %v4196_v9 = vpop.f32.mrb[10].mxu0  ;;  %v3004_v29 = vpop.f32.mrb[9].mxu1 }
 0x142   :  { %v2977_v18 = vpop.f32.mrb[11].mxu0  ;;  %v4205_v38 = vpop.f32.mrb[10].mxu1 }
 0x143   :  { %v3005_v24 = vpop.f32.mrb[11].mxu1 }
 0x144   :  { %3227 = vmatmul.mubr.msk.bf16.gmra.mrb[116].mxu0 %vm305_vm2, %v1192_v63  ;;  %v4872_v24 = vshll.u32 %v4222_v1, 16 }
 0x145   :  { %3230 = vmatprep.mubr.msk.bf16.mxu0 %vm3652_vm0, %v4867_v0 }
 0x146   :  { %3175 = vmatmul.mubr.msk.bf16.gmra.mrb[116].mxu1 %vm305_vm2, %v927_v5  ;;  %v4871_v5 = vshrl.u32 %v4222_v1, 16  ;;  %v1207_v50 = vrot.slane %v4872_v24, 6 }
 0x147   :  { %v4210_v22 = vpop.f32.mrb[12].mxu0  ;;  %3178 = vmatprep.mubr.msk.bf16.mxu1 %vm3652_vm0, %v4867_v0 }
 0x148   :  { %v2980_v25 = vpop.f32.mrb[13].mxu0  ;;  %v4220_v19 = vpop.f32.mrb[12].mxu1  ;;  %v1204_v8 = vrot.slane %v4871_v5, 5 }
 0x149   :  { %v4215_v41 = vpop.f32.mrb[14].mxu0  ;;  %v3008_v63 = vpop.f32.mrb[13].mxu1 }
 0x14a   :  { %v2981_v56 = vpop.f32.mrb[15].mxu0  ;;  %v4226_v18 = vpop.f32.mrb[14].mxu1  ;;  %v1200_v63 = vsel %vm1149_vm6, %v1195_v46, %v1199_v34  ;;  %v1208_v46 = vor.u32 %v1207_v50, %v1204_v8 }
 0x14b   :  { %v3009_v29 = vpop.f32.mrb[15].mxu1 }
 0x14c   :  { %3231 = vmatmul.mubr.msk.bf16.gmra.mrb[120].mxu0 %vm305_vm2, %v1196_v48 }
 0x14d   :  { %3234 = vmatprep.mubr.msk.bf16.mxu0 %vm3652_vm0, %v4867_v0 }
 0x14e   :  { %3179 = vmatmul.mubr.msk.bf16.gmra.mrb[120].mxu1 %vm305_vm2, %v929_v10 }
 0x14f   :  { %v4233_v25 = vpop.f32.mrb[16].mxu0  ;;  %3182 = vmatprep.mubr.msk.bf16.mxu1 %vm3652_vm0, %v4867_v0 }
 0x150   :  { %v2984_v56 = vpop.f32.mrb[17].mxu0  ;;  %v4245_v10 = vpop.f32.mrb[16].mxu1 }
 0x151   :  { %v4238_v48 = vpop.f32.mrb[18].mxu0  ;;  %v3012_v12 = vpop.f32.mrb[17].mxu1  ;;  %v931_v56 = vsel %vm904_vm5, %v928_v6, %v930_v59  ;;  %v1429_v6 = vrot.slane %v3746_v4, 6 }
 0x152   :  { %v2985_v29 = vpop.f32.mrb[19].mxu0  ;;  %v4249_v0 = vpop.f32.mrb[18].mxu1  ;;  %v1428_v12 = vrot.slane %v3744_v3, 6  ;;  %v1673_v3 = vrot.slane %v3746_v4, 2  ;;  %v3509_v4 = vld [vmem:[#allocation7 + $0x80] sm:$0xff]  }
 0x153   :  { %v3013_v39 = vpop.f32.mrb[19].mxu1 }
 0x154   :  { %3235 = vmatmul.mubr.msk.bf16.gmra.mrb[124].mxu0 %vm305_vm2, %v1200_v63  ;;  %v1209_v39 = vsel %vm1149_vm6, %v1199_v34, %v1208_v46 }
 0x155   :  { %3238 = vmatprep.mubr.msk.bf16.mxu0 %vm3652_vm0, %v4888_v53 }
 0x156   :  { %3183 = vmatmul.mubr.msk.bf16.gmra.mrb[124].mxu1 %vm305_vm2, %v931_v56  ;;  %v3508_v56 = vld [vmem:[#allocation7 + $0x70] sm:$0xff]  }
 0x157   :  { %v4254_v5 = vpop.f32.mrb[20].mxu0  ;;  %3246 = vmatprep.mubr.msk.bf16.mxu1 %vm3652_vm0, %v4888_v53 }
 0x158   :  { %v2988_v24 = vpop.f32.mrb[21].mxu0  ;;  %v4263_v29 = vpop.f32.mrb[20].mxu1 }
 0x159   :  { %v4260_v59 = vpop.f32.mrb[22].mxu0  ;;  %v3016_v8 = vpop.f32.mrb[21].mxu1  ;;  %v1430_v24 = vsel %vm1427_vm7, %v1428_v12, %v1429_v6  ;;  %v1431_v12 = vrot.slane %v3774_v17, 6 }
 0x15a   :  { %v2989_v63 = vpop.f32.mrb[23].mxu0  ;;  %v478_v50 = vpop.f32.mrb[22].mxu1 }
 0x15b   :  { %v3017_v11 = vpop.f32.mrb[23].mxu1  ;;  %v1675_v63 = vsel %vm1672_vm8, %v1673_v3, %v1674_v43  ;;  %v1432_v27 = vsel %vm1427_vm7, %v1429_v6, %v1431_v12  ;;  %v1676_v3 = vrot.slane %v3800_v30, 2 }
 0x15c   :  { %3239 = vmatmul.mubr.msk.bf16.gmra.mrb[128].mxu0 %vm305_vm2, %v1209_v39  ;;  %v3510_v11 = vld [vmem:[#allocation7 + $0x78] sm:$0xff]  }
 0x15d   :  { %3302 = vmatprep.mubr.msk.bf16.mxu0 %vm3652_vm0, %v4888_v53 }
 0x15e   :  { %3247 = vmatmul.mubr.msk.bf16.vlgmr.msra.gmra.mrb[128].mxu1 %vm305_vm2, %v1430_v24 }
 0x15f   :  { %v4272_v34 = vpop.f32.mrb[24].mxu0  ;;  %3250 = vmatprep.mubr.msk.bf16.mxu1 %vm3652_vm0, %v4888_v53  ;;  %3355 = vmatpush3.bf16.msra.mxu1 %v3508_v56 }
 0x160   :  { %v2992_v46 = vpop.f32.mrb[25].mxu0  ;;  %3356 = vmatprep.subr.bf16.mxu1 %v4888_v53  ;;  %v553_v8 = vpop.f32.mrb[24].mxu1 }
 0x161   :  { %v4277_v39 = vpop.f32.mrb[26].mxu0  ;;  %v554_v24 = vadd.f32 %v553_v8, %v4153_v58  ;;  %v3024_v52 = vpop.f32.mrb[25].mxu1 }
 0x162   :  { %v2993_v50 = vpop.f32.mrb[27].mxu0  ;;  %v556_v46 = vpop.f32.mrb[26].mxu1 }
 0x163   :  { %3357 = vmatpush3.bf16.msra.mxu1 %v3510_v11  ;;  %v557_v17 = vadd.f32 %v556_v46, %v4158_v60  ;;  %v3025_v56 = vpop.f32.mrb[27].mxu1  ;;  %v1433_v60 = vrot.slane %v3800_v30, 6  ;;  %v1678_v30 = vrot.slane %v3819_v40, 2 }
 0x164   :  { %3303 = vmatmul.mubr.msk.bf16.vlgmr.msra.gmra.mrb[132].mxu0 %vm305_vm2, %v1675_v63  ;;  %v1677_v63 = vsel %vm1672_vm8, %v1674_v43, %v1676_v3 }
 0x165   :  { %3411 = vmatpush3.bf16.msra.mxu0 %v3509_v4  ;;  %3306 = vmatprep.mubr.msk.bf16.mxu0 %vm3652_vm0, %v4888_v53 }
 0x166   :  { %3412 = vmatprep.subr.bf16.mxu0 %v4888_v53  ;;  %3251 = vmatmul.mubr.msk.bf16.gmra.mrb[132].mxu1 %vm305_vm2, %v1432_v27 }
 0x167   :  { %v772_v52 = vpop.f32.mrb[28].mxu0  ;;  %3254 = vmatprep.mubr.msk.bf16.mxu1 %vm3652_vm0, %v4888_v53 }
 0x168   :  { %v4290_v58 = vadd.f32 %v772_v52, %v554_v24  ;;  %v3080_v6 = vpop.f32.mrb[29].mxu0  ;;  %v1434_v24 = vsel %vm1427_vm7, %v1431_v12, %v1433_v60  ;;  %v1435_v12 = vrot.slane %v3819_v40, 6  ;;  %v1680_v40 = vrot.slane %v3856_v55, 2 }
 0x169   :  { %v775_v11 = vpop.f32.mrb[30].mxu0  ;;  %3413 = vmatpush3.bf16.msra.mxu0 %v3511_v42  ;;  %v561_v4 = vpop.f32.mrb[28].mxu1 }
 0x16a   :  { %v4296_v8 = vadd.f32 %v775_v11, %v557_v17  ;;  %v3081_v50 = vpop.f32.mrb[31].mxu0  ;;  %v562_v46 = vadd.f32 %v561_v4, %v4172_v35  ;;  %v3028_v27 = vpop.f32.mrb[29].mxu1 }
 0x16b   :  { %v564_v56 = vpop.f32.mrb[30].mxu1 }
 0x16c   :  { %3307 = vmatmul.mubr.msk.bf16.gmra.mrb[136].mxu0 %vm305_vm2, %v1677_v63  ;;  %v565_v52 = vadd.f32 %v564_v56, %v4177_v45  ;;  %v3029_v6 = vpop.f32.mrb[31].mxu1  ;;  %v1679_v45 = vsel %vm1672_vm8, %v1676_v3, %v1678_v30 }
 0x16d   :  { %3310 = vmatprep.mubr.msk.bf16.mxu0 %vm3652_vm0, %v4888_v53 }
 0x16e   :  { %3255 = vmatmul.mubr.msk.bf16.gmra.mrb[136].mxu1 %vm305_vm2, %v1434_v24 }
 0x16f   :  { %v780_v42 = vpop.f32.mrb[32].mxu0  ;;  %3258 = vmatprep.mubr.msk.bf16.mxu1 %vm3652_vm0, %v4888_v53 }
 0x170   :  { %v4306_v43 = vadd.f32 %v780_v42, %v562_v46  ;;  %v3084_v35 = vpop.f32.mrb[33].mxu0  ;;  %v1436_v46 = vsel %vm1427_vm7, %v1433_v60, %v1435_v12  ;;  %v1437_v60 = vrot.slane %v3856_v55, 6  ;;  %v1682_v55 = vrot.slane %v3889_v23, 2 }
 0x171   :  { %v783_v17 = vpop.f32.mrb[34].mxu0  ;;  %v569_v11 = vpop.f32.mrb[32].mxu1 }
 0x172   :  { %v4312_v63 = vadd.f32 %v783_v17, %v565_v52  ;;  %v3085_v4 = vpop.f32.mrb[35].mxu0  ;;  %v570_v50 = vadd.f32 %v569_v11, %v4191_v57  ;;  %v3032_v27 = vpop.f32.mrb[33].mxu1 }
 0x173   :  { %v572_v56 = vpop.f32.mrb[34].mxu1 }
 0x174   :  { %3311 = vmatmul.mubr.msk.bf16.gmra.mrb[140].mxu0 %vm305_vm2, %v1679_v45  ;;  %v573_v24 = vadd.f32 %v572_v56, %v4196_v9  ;;  %v3033_v6 = vpop.f32.mrb[35].mxu1  ;;  %v1681_v9 = vsel %vm1672_vm8, %v1678_v30, %v1680_v40 }
 0x175   :  { %3314 = vmatprep.mubr.msk.bf16.mxu0 %vm3652_vm0, %v4888_v53 }
 0x176   :  { %3259 = vmatmul.mubr.msk.bf16.gmra.mrb[140].mxu1 %vm305_vm2, %v1436_v46 }
 0x177   :  { %v788_v3 = vpop.f32.mrb[36].mxu0  ;;  %3262 = vmatprep.mubr.msk.bf16.mxu1 %vm3652_vm0, %v4888_v53 }
 0x178   :  { %v4322_v52 = vadd.f32 %v788_v3, %v570_v50  ;;  %v3088_v57 = vpop.f32.mrb[37].mxu0  ;;  %v1438_v50 = vsel %vm1427_vm7, %v1435_v12, %v1437_v60  ;;  %v1439_v12 = vrot.slane %v3889_v23, 6  ;;  %v4352_v23 = vld [vmem:[#allocation2 + $0x38] sm:$0xff]  }
 0x179   :  { %v791_v42 = vpop.f32.mrb[38].mxu0  ;;  %v577_v35 = vpop.f32.mrb[36].mxu1 }
 0x17a   :  { %v4328_v17 = vadd.f32 %v791_v42, %v573_v24  ;;  %v3089_v45 = vpop.f32.mrb[39].mxu0  ;;  %v578_v11 = vadd.f32 %v577_v35, %v4210_v22  ;;  %v3036_v4 = vpop.f32.mrb[37].mxu1 }
 0x17b   :  { %v580_v27 = vpop.f32.mrb[38].mxu1 }
 0x17c   :  { %3315 = vmatmul.mubr.msk.bf16.gmra.mrb[144].mxu0 %vm305_vm2, %v1681_v9  ;;  %v581_v56 = vadd.f32 %v580_v27, %v4215_v41  ;;  %v3037_v46 = vpop.f32.mrb[39].mxu1  ;;  %v1683_v41 = vsel %vm1672_vm8, %v1680_v40, %v1682_v55  ;;  %v1684_v40 = vrot.slane %v4352_v23, 2 }
 0x17d   :  { %3318 = vmatprep.mubr.msk.bf16.mxu0 %vm3652_vm0, %v4888_v53 }
 0x17e   :  { %3263 = vmatmul.mubr.msk.bf16.gmra.mrb[144].mxu1 %vm305_vm2, %v1438_v50  ;;  %v1685_v46 = vsel %vm1672_vm8, %v1682_v55, %v1684_v40 }
 0x17f   :  { %v796_v30 = vpop.f32.mrb[40].mxu0  ;;  %3266 = vmatprep.mubr.msk.bf16.mxu1 %vm3652_vm0, %v4888_v53 }
 0x180   :  { %v4338_v24 = vadd.f32 %v796_v30, %v578_v11  ;;  %v3092_v22 = vpop.f32.mrb[41].mxu0  ;;  %v1440_v11 = vsel %vm1427_vm7, %v1437_v60, %v1439_v12  ;;  %v1441_v60 = vrot.slane %v4352_v23, 6 }
 0x181   :  { %v799_v6 = vpop.f32.mrb[42].mxu0  ;;  %v585_v3 = vpop.f32.mrb[40].mxu1 }
 0x182   :  { %v4344_v57 = vadd.f32 %v799_v6, %v581_v56  ;;  %v3093_v42 = vpop.f32.mrb[43].mxu0  ;;  %v586_v9 = vadd.f32 %v585_v3, %v4233_v25  ;;  %v3040_v35 = vpop.f32.mrb[41].mxu1 }
 0x183   :  { %v588_v45 = vpop.f32.mrb[42].mxu1 }
 0x184   :  { %3319 = vmatmul.mubr.msk.bf16.gmra.mrb[148].mxu0 %vm305_vm2, %v1683_v41  ;;  %v589_v4 = vadd.f32 %v588_v45, %v4238_v48  ;;  %v3041_v27 = vpop.f32.mrb[43].mxu1 }
 0x185   :  { %3322 = vmatprep.mubr.msk.bf16.mxu0 %vm3652_vm0, %v4888_v53 }
 0x186   :  { %3267 = vmatmul.mubr.msk.bf16.gmra.mrb[148].mxu1 %vm305_vm2, %v1440_v11  ;;  %v4370_v11 = vld [vmem:[#allocation2 + $0x40] sm:$0xff]  }
 0x187   :  { %v804_v50 = vpop.f32.mrb[44].mxu0  ;;  %3270 = vmatprep.mubr.msk.bf16.mxu1 %vm3652_vm0, %v4888_v53  ;;  %v1686_v55 = vrot.slane %v4370_v11, 2 }
 0x188   :  { %v4356_v25 = vadd.f32 %v804_v50, %v586_v9  ;;  %v3096_v56 = vpop.f32.mrb[45].mxu0  ;;  %v1442_v9 = vsel %vm1427_vm7, %v1439_v12, %v1441_v60  ;;  %v1443_v12 = vrot.slane %v4370_v11, 6 }
 0x189   :  { %v807_v48 = vpop.f32.mrb[46].mxu0  ;;  %v593_v30 = vpop.f32.mrb[44].mxu1  ;;  %v1687_v50 = vsel %vm1672_vm8, %v1684_v40, %v1686_v55 }
 0x18a   :  { %v4362_v22 = vadd.f32 %v807_v48, %v589_v4  ;;  %v3097_v6 = vpop.f32.mrb[47].mxu0  ;;  %v594_v41 = vadd.f32 %v593_v30, %v4254_v5  ;;  %v3044_v3 = vpop.f32.mrb[45].mxu1 }
 0x18b   :  { %v596_v42 = vpop.f32.mrb[46].mxu1 }
 0x18c   :  { %3323 = vmatmul.mubr.msk.bf16.gmra.mrb[152].mxu0 %vm305_vm2, %v1685_v46  ;;  %v597_v35 = vadd.f32 %v596_v42, %v4260_v59  ;;  %v3045_v45 = vpop.f32.mrb[47].mxu1 }
 0x18d   :  { %3326 = vmatprep.mubr.msk.bf16.mxu0 %vm3652_vm0, %v4888_v53  ;;  %v4388_v45 = vld [vmem:[#allocation2 + $0x48] sm:$0xff]  }
 0x18e   :  { %3271 = vmatmul.mubr.msk.bf16.gmra.mrb[152].mxu1 %vm305_vm2, %v1442_v9  ;;  %v1688_v40 = vrot.slane %v4388_v45, 2 }
 0x18f   :  { %v812_v4 = vpop.f32.mrb[48].mxu0  ;;  %3274 = vmatprep.mubr.msk.bf16.mxu1 %vm3652_vm0, %v4888_v53 }
 0x190   :  { %v4374_v5 = vadd.f32 %v812_v4, %v594_v41  ;;  %v3100_v27 = vpop.f32.mrb[49].mxu0  ;;  %v1444_v41 = vsel %vm1427_vm7, %v1441_v60, %v1443_v12  ;;  %v1445_v60 = vrot.slane %v4388_v45, 6 }
 0x191   :  { %v815_v59 = vpop.f32.mrb[50].mxu0  ;;  %v601_v56 = vpop.f32.mrb[48].mxu1  ;;  %v1689_v27 = vsel %vm1672_vm8, %v1686_v55, %v1688_v40 }
 0x192   :  { %v4380_v48 = vadd.f32 %v815_v59, %v597_v35  ;;  %v3101_v46 = vpop.f32.mrb[51].mxu0  ;;  %v602_v30 = vadd.f32 %v601_v56, %v4272_v34  ;;  %v3048_v6 = vpop.f32.mrb[49].mxu1 }
 0x193   :  { %v604_v3 = vpop.f32.mrb[50].mxu1 }
 0x194   :  { %3327 = vmatmul.mubr.msk.bf16.gmra.mrb[156].mxu0 %vm305_vm2, %v1687_v50  ;;  %v605_v42 = vadd.f32 %v604_v3, %v4277_v39  ;;  %v3049_v9 = vpop.f32.mrb[51].mxu1 }
 0x195   :  { %3330 = vmatprep.mubr.msk.bf16.mxu0 %vm3652_vm0, %v4888_v53 }
 0x196   :  { %3275 = vmatmul.mubr.msk.bf16.gmra.mrb[156].mxu1 %vm305_vm2, %v1444_v41 }
 0x197   :  { %v820_v35 = vpop.f32.mrb[52].mxu0  ;;  %3278 = vmatprep.mubr.msk.bf16.mxu1 %vm3652_vm0, %v4888_v53 }
 0x198   :  { %v4392_v34 = vadd.f32 %v820_v35, %v602_v30  ;;  %v3104_v4 = vpop.f32.mrb[53].mxu0  ;;  %v1446_v30 = vsel %vm1427_vm7, %v1443_v12, %v1445_v60  ;;  %v4406_v35 = vld [vmem:[#allocation2 + $0x50] sm:$0xff]  }
 0x199   :  { %v823_v39 = vpop.f32.mrb[54].mxu0  ;;  %v609_v59 = vpop.f32.mrb[52].mxu1  ;;  %v1690_v55 = vrot.slane %v4406_v35, 2  ;;  %v1447_v12 = vrot.slane %v4406_v35, 6 }
 0x19a   :  { %v4398_v50 = vadd.f32 %v823_v39, %v605_v42  ;;  %v3105_v56 = vpop.f32.mrb[55].mxu0  ;;  %v610_v46 = vadd.f32 %v609_v59, %v4163_v20  ;;  %v3052_v6 = vpop.f32.mrb[53].mxu1 }
 0x19b   :  { %v612_v3 = vpop.f32.mrb[54].mxu1  ;;  %v1691_v39 = vsel %vm1672_vm8, %v1688_v40, %v1690_v55 }
 0x19c   :  { %3331 = vmatmul.mubr.msk.bf16.gmra.mrb[160].mxu0 %vm305_vm2, %v1689_v27  ;;  %v613_v41 = vadd.f32 %v612_v3, %v4167_v31  ;;  %v3053_v9 = vpop.f32.mrb[55].mxu1 }
 0x19d   :  { %3334 = vmatprep.mubr.msk.bf16.mxu0 %vm3652_vm0, %v4888_v53 }
 0x19e   :  { %3279 = vmatmul.mubr.msk.bf16.gmra.mrb[160].mxu1 %vm305_vm2, %v1446_v30 }
 0x19f   :  { %v828_v42 = vpop.f32.mrb[56].mxu0  ;;  %3282 = vmatprep.mubr.msk.bf16.mxu1 %vm3652_vm0, %v4888_v53 }
 0x1a0   :  { %v4410_v20 = vadd.f32 %v828_v42, %v610_v46  ;;  %v3108_v4 = vpop.f32.mrb[57].mxu0  ;;  %v1448_v46 = vsel %vm1427_vm7, %v1445_v60, %v1447_v12 }
 0x1a1   :  { %v831_v31 = vpop.f32.mrb[58].mxu0  ;;  %v617_v27 = vpop.f32.mrb[56].mxu1  ;;  %v4424_v4 = vld [vmem:[#allocation2 + $0x58] sm:$0xff]  }
 0x1a2   :  { %v4416_v59 = vadd.f32 %v831_v31, %v613_v41  ;;  %v3109_v56 = vpop.f32.mrb[59].mxu0  ;;  %v618_v6 = vadd.f32 %v617_v27, %v4182_v49  ;;  %v3056_v3 = vpop.f32.mrb[57].mxu1  ;;  %v1692_v40 = vrot.slane %v4424_v4, 2  ;;  %v1449_v60 = vrot.slane %v4424_v4, 6 }
 0x1a3   :  { %v620_v30 = vpop.f32.mrb[58].mxu1 }
 0x1a4   :  { %3335 = vmatmul.mubr.msk.bf16.gmra.mrb[164].mxu0 %vm305_vm2, %v1691_v39  ;;  %v621_v9 = vadd.f32 %v620_v30, %v4186_v54  ;;  %v3057_v42 = vpop.f32.mrb[59].mxu1  ;;  %v1693_v39 = vsel %vm1672_vm8, %v1690_v55, %v1692_v40  ;;  %v1694_v55 = vrot.slane %v3875_v2, 2 }
 0x1a5   :  { %3338 = vmatprep.mubr.msk.bf16.mxu0 %vm3652_vm0, %v4888_v53 }
 0x1a6   :  { %3283 = vmatmul.mubr.msk.bf16.gmra.mrb[164].mxu1 %vm305_vm2, %v1448_v46 }
 0x1a7   :  { %v836_v41 = vpop.f32.mrb[60].mxu0  ;;  %3286 = vmatprep.mubr.msk.bf16.mxu1 %vm3652_vm0, %v4888_v53 }
 0x1a8   :  { %v4428_v49 = vadd.f32 %v836_v41, %v618_v6  ;;  %v3112_v31 = vpop.f32.mrb[61].mxu0  ;;  %v1450_v6 = vsel %vm1427_vm7, %v1447_v12, %v1449_v60  ;;  %v1451_v12 = vrot.slane %v3875_v2, 6 }
 0x1a9   :  { %v839_v54 = vpop.f32.mrb[62].mxu0  ;;  %v625_v27 = vpop.f32.mrb[60].mxu1 }
 0x1aa   :  { %v4434_v56 = vadd.f32 %v839_v54, %v621_v9  ;;  %v3113_v3 = vpop.f32.mrb[63].mxu0  ;;  %v626_v30 = vadd.f32 %v625_v27, %v4201_v28  ;;  %v3060_v42 = vpop.f32.mrb[61].mxu1 }
 0x1ab   :  { %v628_v46 = vpop.f32.mrb[62].mxu1 }
 0x1ac   :  { %3339 = vmatmul.mubr.msk.bf16.gmra.mrb[168].mxu0 %vm305_vm2, %v1693_v39  ;;  %v629_v41 = vadd.f32 %v628_v46, %v4205_v38  ;;  %v3061_v31 = vpop.f32.mrb[63].mxu1  ;;  %v1695_v38 = vsel %vm1672_vm8, %v1692_v40, %v1694_v55  ;;  %v1696_v40 = vrot.slane %v4222_v1, 2 }
 0x1ad   :  { %3342 = vmatprep.mubr.msk.bf16.mxu0 %vm3652_vm0, %v4888_v53 }
 0x1ae   :  { %3287 = vmatmul.mubr.msk.bf16.gmra.mrb[168].mxu1 %vm305_vm2, %v1450_v6 }
 0x1af   :  { %v844_v9 = vpop.f32.mrb[64].mxu0  ;;  %3290 = vmatprep.mubr.msk.bf16.mxu1 %vm3652_vm0, %v4888_v53 }
 0x1b0   :  { %v4444_v54 = vadd.f32 %v844_v9, %v626_v30  ;;  %v3116_v28 = vpop.f32.mrb[65].mxu0  ;;  %v1452_v30 = vsel %vm1427_vm7, %v1449_v60, %v1451_v12 }
 0x1b1   :  { %v847_v39 = vpop.f32.mrb[66].mxu0  ;;  %v633_v27 = vpop.f32.mrb[64].mxu1 }
 0x1b2   :  { %v4450_v3 = vadd.f32 %v847_v39, %v629_v41  ;;  %v3117_v42 = vpop.f32.mrb[67].mxu0  ;;  %v634_v46 = vadd.f32 %v633_v27, %v4220_v19  ;;  %v3064_v31 = vpop.f32.mrb[65].mxu1  ;;  %v1453_v39 = vrot.slane %v4222_v1, 6 }
 0x1b3   :  { %v636_v6 = vpop.f32.mrb[66].mxu1 }
 0x1b4   :  { %3343 = vmatmul.mubr.msk.bf16.gmra.mrb[172].mxu0 %vm305_vm2, %v1695_v38  ;;  %v637_v9 = vadd.f32 %v636_v6, %v4226_v18  ;;  %v3065_v28 = vpop.f32.mrb[67].mxu1  ;;  %v1697_v18 = vsel %vm1672_vm8, %v1694_v55, %v1696_v40  ;;  %v1920_v55 = vrot.slane %v3781_v21, 3 }
 0x1b5   :  { %3346 = vmatprep.mubr.msk.bf16.mxu0 %vm3652_vm0, %v4888_v53 }
 0x1b6   :  { %3291 = vmatmul.mubr.msk.bf16.gmra.mrb[172].mxu1 %vm305_vm2, %v1452_v30  ;;  %v1454_v30 = vsel %vm1427_vm7, %v1451_v12, %v1453_v39 }
 0x1b7   :  { %v852_v41 = vpop.f32.mrb[68].mxu0  ;;  %3294 = vmatprep.mubr.msk.bf16.mxu1 %vm3652_vm0, %v4888_v53 }
 0x1b8   :  { %v4461_v19 = vadd.f32 %v852_v41, %v634_v46  ;;  %v3120_v27 = vpop.f32.mrb[69].mxu0  ;;  %v1916_v46 = vrot.slane %v3763_v13, 2  ;;  %v1917_v41 = vrot.slane %v3751_v7, 3 }
 0x1b9   :  { %v855_v60 = vpop.f32.mrb[70].mxu0  ;;  %v641_v38 = vpop.f32.mrb[68].mxu1  ;;  %v1919_v27 = vrot.slane %v3813_v36, 2 }
 0x1ba   :  { %v4466_v42 = vadd.f32 %v855_v60, %v637_v9  ;;  %v3121_v31 = vpop.f32.mrb[71].mxu0  ;;  %v642_v6 = vadd.f32 %v641_v38, %v4245_v10  ;;  %v3068_v28 = vpop.f32.mrb[69].mxu1  ;;  %v1918_v7 = vor.u32 %v1917_v41, %v1916_v46  ;;  %v3517_v41 = vld [vmem:[#allocation2 + $0x8] sm:$0xff]  }
 0x1bb   :  { %v644_v2 = vpop.f32.mrb[70].mxu1  ;;  %v1921_v13 = vor.u32 %v1920_v55, %v1919_v27  ;;  %v1923_v28 = vrot.slane %v3847_v51, 2  ;;  %v2185_v27 = vrot.slane %v3517_v41, 3  ;;  %v3518_v55 = vld [vmem:[#allocation2 + $0x10] sm:$0xff]  }
 0x1bc   :  { %3347 = vmatmul.mubr.msk.bf16.gmra.mrb[176].mxu0 %vm305_vm2, %v1697_v18  ;;  %v645_v9 = vadd.f32 %v644_v2, %v4249_v0  ;;  %v3069_v60 = vpop.f32.mrb[71].mxu1 }
 0x1bd   :  { %3350 = vmatprep.mubr.msk.bf16.mxu0 %vm3652_vm0, %v4888_v53  ;;  %v1922_v31 = vsel %vm1915_vm9, %v1918_v7, %v1921_v13 }
 0x1be   :  { %3295 = vmatmul.mubr.msk.bf16.gmra.mrb[176].mxu1 %vm305_vm2, %v1454_v30  ;;  %v1924_v30 = vrot.slane %v3816_v37, 3 }
 0x1bf   :  { %v860_v10 = vpop.f32.mrb[72].mxu0  ;;  %3358 = vmatprep.mubr.msk.bf16.mxu1 %vm3652_vm0, %v4888_v53 }
 0x1c0   :  { %v4479_v12 = vadd.f32 %v860_v10, %v642_v6  ;;  %v3124_v39 = vpop.f32.mrb[73].mxu0  ;;  %v1925_v51 = vor.u32 %v1924_v30, %v1923_v28  ;;  %v3519_v30 = vld [vmem:[#allocation2 + $0x18] sm:$0xff]  }
 0x1c1   :  { %v863_v36 = vpop.f32.mrb[74].mxu0  ;;  %v649_v21 = vpop.f32.mrb[72].mxu1 }
 0x1c2   :  { %v4483_v18 = vadd.f32 %v863_v36, %v645_v9  ;;  %v3125_v0 = vpop.f32.mrb[75].mxu0  ;;  %v650_v2 = vadd.f32 %v649_v21, %v4263_v29  ;;  %v3072_v38 = vpop.f32.mrb[73].mxu1  ;;  %v2186_v9 = vrot.slane %v3518_v55, 3 }
 0x1c3   :  { %v652_v6 = vpop.f32.mrb[74].mxu1  ;;  %v1926_v38 = vsel %vm1915_vm9, %v1921_v13, %v1925_v51 }
 0x1c4   :  { %3351 = vmatmul.mubr.msk.bf16.gmra.mrb[180].mxu0 %vm305_vm2, %v1696_v40  ;;  %v3073_v46 = vpop.f32.mrb[75].mxu1  ;;  %v2187_v10 = vsel %vm2184_vm10, %v2185_v27, %v2186_v9 }
 0x1c5   :  { %3414 = vmatprep.mubr.msk.bf16.mxu0 %vm3652_vm0, %v4888_v53  ;;  %v2188_v46 = vrot.slane %v3519_v30, 3 }
 0x1c6   :  { %3359 = vmatmul.mubr.msk.bf16.vlgmr.msra.gmra.mrb[180].mxu1 %vm305_vm2, %v1922_v31  ;;  %v1928_v31 = vrot.slane %v3839_v47, 3 }
 0x1c7   :  { %v868_v29 = vpop.f32.mrb[76].mxu0  ;;  %3362 = vmatprep.mubr.msk.bf16.mxu1 %vm3652_vm0, %v4888_v53  ;;  %v2189_v47 = vsel %vm2184_vm10, %v2186_v9, %v2188_v46  ;;  %v3520_v9 = vld [vmem:[#allocation2 + $0x20] sm:$0xff]  }
 0x1c8   :  { %v4493_v40 = vadd.f32 %v868_v29, %v650_v2  ;;  %v3128_v60 = vpop.f32.mrb[77].mxu0  ;;  %v1927_v2 = vrot.slane %v3866_v61, 2 }
 0x1c9   :  { %v871_v37 = vpop.f32.mrb[78].mxu0  ;;  %v1017_v39 = vpop.f32.mrb[76].mxu1 }
 0x1ca   :  { %v3129_v7 = vpop.f32.mrb[79].mxu0  ;;  %v1119_v36 = vadd.f32 %v1017_v39, %v4290_v58  ;;  %v3136_v21 = vpop.f32.mrb[77].mxu1  ;;  %v1929_v61 = vor.u32 %v1928_v31, %v1927_v2 }
 0x1cb   :  { %v1020_v0 = vpop.f32.mrb[78].mxu1  ;;  %v1931_v7 = vrot.slane %v3906_v32, 2 }
 0x1cc   :  { %3415 = vmatmul.mubr.msk.bf16.vlgmr.msra.gmra.mrb[184].mxu0 %vm305_vm2, %v2187_v10  ;;  %v1120_v6 = vadd.f32 %v1020_v0, %v4296_v8  ;;  %v3137_v28 = vpop.f32.mrb[79].mxu1  ;;  %v1930_v39 = vsel %vm1915_vm9, %v1925_v51, %v1929_v61 }
 0x1cd   :  { %3418 = vmatprep.mubr.msk.bf16.mxu0 %vm3652_vm0, %v4888_v53 }
 0x1ce   :  { %3363 = vmatmul.mubr.msk.bf16.gmra.mrb[184].mxu1 %vm305_vm2, %v1926_v38  ;;  %v2190_v38 = vrot.slane %v3520_v9, 3 }
 0x1cf   :  { %v1295_v58 = vpop.f32.mrb[80].mxu0  ;;  %3366 = vmatprep.mubr.msk.bf16.mxu1 %vm3652_vm0, %v4888_v53 }
 0x1d0   :  { %v4507_v41 = vadd.f32 %v1295_v58, %v1119_v36  ;;  %v3192_v13 = vpop.f32.mrb[81].mxu0  ;;  %v1932_v36 = vrot.slane %v3869_v62, 3  ;;  %v2191_v62 = vsel %vm2184_vm10, %v2188_v46, %v2190_v38  ;;  %v3521_v46 = vld [vmem:[#allocation2 + $0x28] sm:$0xff]  }
 0x1d1   :  { %v1298_v27 = vpop.f32.mrb[82].mxu0  ;;  %v1025_v8 = vpop.f32.mrb[80].mxu1 }
 0x1d2   :  { %v4512_v55 = vadd.f32 %v1298_v27, %v1120_v6  ;;  %v3193_v29 = vpop.f32.mrb[83].mxu0  ;;  %v1121_v60 = vadd.f32 %v1025_v8, %v4306_v43  ;;  %v3140_v37 = vpop.f32.mrb[81].mxu1  ;;  %v1933_v32 = vor.u32 %v1932_v36, %v1931_v7  ;;  %v1936_v8 = vrot.slane %v3909_v33, 3 }
 0x1d3   :  { %v1028_v10 = vpop.f32.mrb[82].mxu1  ;;  %v2192_v37 = vrot.slane %v3521_v46, 3  ;;  %v1943_v46 = vrot.slane %v3791_v26, 2 }
 0x1d4   :  { %3419 = vmatmul.mubr.msk.bf16.gmra.mrb[188].mxu0 %vm305_vm2, %v2189_v47  ;;  %v1122_v21 = vadd.f32 %v1028_v10, %v4312_v63  ;;  %v3141_v0 = vpop.f32.mrb[83].mxu1  ;;  %v1934_v27 = vsel %vm1915_vm9, %v1929_v61, %v1933_v32  ;;  %v1935_v47 = vrot.slane %v3927_v44, 2 }
 0x1d5   :  { %3422 = vmatprep.mubr.msk.bf16.mxu0 %vm3652_vm0, %v4888_v53  ;;  %v2193_v33 = vsel %vm2184_vm10, %v2190_v38, %v2192_v37  ;;  %v3522_v38 = vld [vmem:[#allocation2 + $0x30] sm:$0xff]  }
 0x1d6   :  { %3367 = vmatmul.mubr.msk.bf16.gmra.mrb[188].mxu1 %vm305_vm2, %v1930_v39  ;;  %v1937_v44 = vor.u32 %v1936_v8, %v1935_v47 }
 0x1d7   :  { %v1303_v43 = vpop.f32.mrb[84].mxu0  ;;  %3370 = vmatprep.mubr.msk.bf16.mxu1 %vm3652_vm0, %v4888_v53 }
 0x1d8   :  { %v4523_v2 = vadd.f32 %v1303_v43, %v1121_v60  ;;  %v3196_v51 = vpop.f32.mrb[85].mxu0  ;;  %v1938_v43 = vsel %vm1915_vm9, %v1933_v32, %v1937_v44 }
 0x1d9   :  { %v1306_v31 = vpop.f32.mrb[86].mxu0  ;;  %v1033_v63 = vpop.f32.mrb[84].mxu1  ;;  %v1939_v51 = vrot.slane %v3769_v15, 2 }
 0x1da   :  { %v4528_v6 = vadd.f32 %v1306_v31, %v1122_v21  ;;  %v3197_v28 = vpop.f32.mrb[87].mxu0  ;;  %v1123_v30 = vadd.f32 %v1033_v63, %v4322_v52  ;;  %v3144_v58 = vpop.f32.mrb[85].mxu1  ;;  %v1940_v31 = vrot.slane %v3766_v14, 3 }
 0x1db   :  { %v1036_v13 = vpop.f32.mrb[86].mxu1  ;;  %v2194_v28 = vrot.slane %v3522_v38, 3 }
 0x1dc   :  { %3423 = vmatmul.mubr.msk.bf16.gmra.mrb[192].mxu0 %vm305_vm2, %v2191_v62  ;;  %v1124_v29 = vadd.f32 %v1036_v13, %v4328_v17  ;;  %v3145_v60 = vpop.f32.mrb[87].mxu1  ;;  %v1941_v15 = vor.u32 %v1940_v31, %v1939_v51  ;;  %v4889_v51 = vld [vmem:[#allocation16_spill] sm:$0xff] }
 0x1dd   :  { %3426 = vmatprep.mubr.msk.bf16.mxu0 %vm3652_vm0, %v4888_v53  ;;  %v2195_v14 = vsel %vm2184_vm10, %v2192_v37, %v2194_v28  ;;  %v2196_v37 = vrot.slane %v4352_v23, 3  ;;  %v1947_v31 = vrot.slane %v4889_v51, 2 }
 0x1de   :  { %3371 = vmatmul.mubr.msk.bf16.gmra.mrb[192].mxu1 %vm305_vm2, %v1934_v27  ;;  %v1942_v60 = vsel %vm1915_vm9, %v1937_v44, %v1941_v15 }
 0x1df   :  { %v1311_v52 = vpop.f32.mrb[88].mxu0  ;;  %3374 = vmatprep.mubr.msk.bf16.mxu1 %vm3652_vm0, %v4888_v53 }
 0x1e0   :  { %v4539_v10 = vadd.f32 %v1311_v52, %v1123_v30  ;;  %v3200_v61 = vpop.f32.mrb[89].mxu0  ;;  %v1944_v52 = vrot.slane %v3772_v16, 3  ;;  %v2197_v16 = vsel %vm2184_vm10, %v2194_v28, %v2196_v37  ;;  %v2198_v28 = vrot.slane %v4370_v11, 3 }
 0x1e1   :  { %v1314_v39 = vpop.f32.mrb[90].mxu0  ;;  %v1041_v17 = vpop.f32.mrb[88].mxu1 }
 0x1e2   :  { %v4544_v7 = vadd.f32 %v1314_v39, %v1124_v29  ;;  %v3201_v36 = vpop.f32.mrb[91].mxu0  ;;  %v1125_v21 = vadd.f32 %v1041_v17, %v4338_v24  ;;  %v3148_v0 = vpop.f32.mrb[89].mxu1  ;;  %v1945_v26 = vor.u32 %v1944_v52, %v1943_v46  ;;  %v4891_v46 = vld [vmem:[#allocation18_spill] sm:$0xff] }
 0x1e3   :  { %v1044_v9 = vpop.f32.mrb[90].mxu1  ;;  %v1951_v52 = vrot.slane %v4891_v46, 2  ;;  %v4895_v46 = vld [vmem:[#allocation23_spill] sm:$0xff] }
 0x1e4   :  { %3427 = vmatmul.mubr.msk.bf16.gmra.mrb[196].mxu0 %vm305_vm2, %v2193_v33  ;;  %v1126_v62 = vadd.f32 %v1044_v9, %v4344_v57  ;;  %v3149_v63 = vpop.f32.mrb[91].mxu1 }
 0x1e5   :  { %3430 = vmatprep.mubr.msk.bf16.mxu0 %vm3652_vm0, %v4888_v53 }
 0x1e6   :  { %3375 = vmatmul.mubr.msk.bf16.gmra.mrb[196].mxu1 %vm305_vm2, %v1938_v43  ;;  %v1946_v43 = vsel %vm1915_vm9, %v1941_v15, %v1945_v26 }
 0x1e7   :  { %v1319_v24 = vpop.f32.mrb[92].mxu0  ;;  %3378 = vmatprep.mubr.msk.bf16.mxu1 %vm3652_vm0, %v4888_v53 }
 0x1e8   :  { %v4555_v30 = vadd.f32 %v1319_v24, %v1125_v21  ;;  %v3204_v32 = vpop.f32.mrb[93].mxu0 }
 0x1e9   :  { %v1322_v58 = vpop.f32.mrb[94].mxu0  ;;  %v1049_v57 = vpop.f32.mrb[92].mxu1 }
 0x1ea   :  { %v4560_v13 = vadd.f32 %v1322_v58, %v1126_v62  ;;  %v3205_v27 = vpop.f32.mrb[95].mxu0  ;;  %v1127_v47 = vadd.f32 %v1049_v57, %v4356_v25  ;;  %v3152_v8 = vpop.f32.mrb[93].mxu1  ;;  %v4890_v62 = vld [vmem:[#allocation15_spill] sm:$0xff]  ;;  %v2199_v57 = vsel %vm2184_vm10, %v2196_v37, %v2198_v28  ;;  %v2200_v37 = vrot.slane %v4388_v45, 3 }
 0x1eb   :  { %v1052_v29 = vpop.f32.mrb[94].mxu1  ;;  %v1948_v63 = vrot.slane %v4890_v62, 3 }
 0x1ec   :  { %3431 = vmatmul.mubr.msk.bf16.gmra.mrb[200].mxu0 %vm305_vm2, %v2195_v14  ;;  %v1128_v61 = vadd.f32 %v1052_v29, %v4362_v22  ;;  %v3153_v39 = vpop.f32.mrb[95].mxu1 }
 0x1ed   :  { %3434 = vmatprep.mubr.msk.bf16.mxu0 %vm3652_vm0, %v4888_v53  ;;  %v1949_v58 = vor.u32 %v1948_v63, %v1947_v31  ;;  %v4893_v31 = vld [vmem:[#allocation21_spill] sm:$0xff]  ;;  %v4894_v63 = vld [vmem:[#allocation19_spill] sm:$0xff] }
 0x1ee   :  { %3379 = vmatmul.mubr.msk.bf16.gmra.mrb[200].mxu1 %vm305_vm2, %v1942_v60  ;;  %v1955_v62 = vrot.slane %v4893_v31, 2 }
 0x1ef   :  { %v1327_v25 = vpop.f32.mrb[96].mxu0  ;;  %3382 = vmatprep.mubr.msk.bf16.mxu1 %vm3652_vm0, %v4888_v53  ;;  %v1950_v60 = vsel %vm1915_vm9, %v1945_v26, %v1949_v58 }
 0x1f0   :  { %v4572_v33 = vadd.f32 %v1327_v25, %v1127_v47  ;;  %v3208_v44 = vpop.f32.mrb[97].mxu0 }
 0x1f1   :  { %v1330_v17 = vpop.f32.mrb[98].mxu0  ;;  %v1057_v22 = vpop.f32.mrb[96].mxu1 }
 0x1f2   :  { %v4577_v36 = vadd.f32 %v1330_v17, %v1128_v61  ;;  %v3209_v21 = vpop.f32.mrb[99].mxu0  ;;  %v1129_v0 = vadd.f32 %v1057_v22, %v4374_v5  ;;  %v3156_v23 = vpop.f32.mrb[97].mxu1  ;;  %v4892_v61 = vld [vmem:[#allocation17_spill] sm:$0xff] }
 0x1f3   :  { %v1060_v9 = vpop.f32.mrb[98].mxu1  ;;  %v1952_v39 = vrot.slane %v4892_v61, 3  ;;  %v2201_v21 = vsel %vm2184_vm10, %v2198_v28, %v2200_v37  ;;  %v2202_v28 = vrot.slane %v4406_v35, 3  ;;  %v4896_v61 = vld [vmem:[#allocation22_spill] sm:$0xff] }
 0x1f4   :  { %3435 = vmatmul.mubr.msk.bf16.gmra.mrb[204].mxu0 %vm305_vm2, %v2197_v16  ;;  %v1130_v38 = vadd.f32 %v1060_v9, %v4380_v48  ;;  %v3157_v24 = vpop.f32.mrb[99].mxu1 }
 0x1f5   :  { %3438 = vmatprep.mubr.msk.bf16.mxu0 %vm3652_vm0, %v4888_v53  ;;  %v1953_v16 = vor.u32 %v1952_v39, %v1951_v52  ;;  %v1959_v52 = vrot.slane %v4895_v46, 2  ;;  %v1960_v39 = vrot.slane %v4896_v61, 3 }
 0x1f6   :  { %3383 = vmatmul.mubr.msk.bf16.gmra.mrb[204].mxu1 %vm305_vm2, %v1946_v43 }
 0x1f7   :  { %v1335_v5 = vpop.f32.mrb[100].mxu0  ;;  %3386 = vmatprep.mubr.msk.bf16.mxu1 %vm3652_vm0, %v4888_v53  ;;  %v1954_v51 = vsel %vm1915_vm9, %v1949_v58, %v1953_v16 }
 0x1f8   :  { %v4589_v32 = vadd.f32 %v1335_v5, %v1129_v0  ;;  %v3212_v15 = vpop.f32.mrb[101].mxu0 }
 0x1f9   :  { %v1338_v14 = vpop.f32.mrb[102].mxu0  ;;  %v1065_v48 = vpop.f32.mrb[100].mxu1 }
 0x1fa   :  { %v4594_v27 = vadd.f32 %v1338_v14, %v1130_v38  ;;  %v3213_v47 = vpop.f32.mrb[103].mxu0  ;;  %v1131_v8 = vadd.f32 %v1065_v48, %v4392_v34  ;;  %v3160_v11 = vpop.f32.mrb[101].mxu1  ;;  %v1956_v38 = vrot.slane %v4894_v63, 3  ;;  %v2203_v48 = vsel %vm2184_vm10, %v2200_v37, %v2202_v28 }
 0x1fb   :  { %v1068_v29 = vpop.f32.mrb[102].mxu1  ;;  %v2204_v37 = vrot.slane %v4424_v4, 3 }
 0x1fc   :  { %3439 = vmatmul.mubr.msk.bf16.gmra.mrb[208].mxu0 %vm305_vm2, %v2199_v57  ;;  %v1132_v25 = vadd.f32 %v1068_v29, %v4398_v50  ;;  %v3161_v44 = vpop.f32.mrb[103].mxu1  ;;  %v1957_v14 = vor.u32 %v1956_v38, %v1955_v62  ;;  %v4898_v62 = vshll.u32 %v4222_v1, 16 }
 0x1fd   :  { %3442 = vmatprep.mubr.msk.bf16.mxu0 %vm3652_vm0, %v4888_v53 }
 0x1fe   :  { %3387 = vmatmul.mubr.msk.bf16.gmra.mrb[208].mxu1 %vm305_vm2, %v1950_v60  ;;  %v1958_v60 = vsel %vm1915_vm9, %v1953_v16, %v1957_v14  ;;  %v1961_v16 = vor.u32 %v1960_v39, %v1959_v52  ;;  %v1964_v63 = vrot.slane %v4898_v62, 3  ;;  %v3523_v52 = vld [vmem:[#allocation5 + $0x4] sm:$0xff]  }
 0x1ff   :  { %v1343_v34 = vpop.f32.mrb[104].mxu0  ;;  %3390 = vmatprep.mubr.msk.bf16.mxu1 %vm3652_vm0, %v4888_v53  ;;  %v2208_v61 = vrot.slane %v3523_v52, 3 }
 0x200   :  { %v4606_v17 = vadd.f32 %v1343_v34, %v1131_v8  ;;  %v3216_v26 = vpop.f32.mrb[105].mxu0 }
 0x201   :  { %v1346_v22 = vpop.f32.mrb[106].mxu0  ;;  %v1073_v50 = vpop.f32.mrb[104].mxu1 }
 0x202   :  { %v4611_v0 = vadd.f32 %v1346_v22, %v1132_v25  ;;  %v3217_v23 = vpop.f32.mrb[107].mxu0  ;;  %v1133_v9 = vadd.f32 %v1073_v50, %v4410_v20  ;;  %v3164_v45 = vpop.f32.mrb[105].mxu1 }
 0x203   :  { %v1076_v43 = vpop.f32.mrb[106].mxu1 }
 0x204   :  { %3443 = vmatmul.mubr.msk.bf16.gmra.mrb[212].mxu0 %vm305_vm2, %v2201_v21  ;;  %v1134_v24 = vadd.f32 %v1076_v43, %v4416_v59  ;;  %v3165_v5 = vpop.f32.mrb[107].mxu1  ;;  %v2205_v21 = vsel %vm2184_vm10, %v2202_v28, %v2204_v37  ;;  %v1962_v43 = vsel %vm1915_vm9, %v1957_v14, %v1961_v16 }
 0x205   :  { %3446 = vmatprep.mubr.msk.bf16.mxu0 %vm3652_vm0, %v4888_v53  ;;  %v4899_v5 = vld [vmem:[#allocation20_spill] sm:$0xff] }
 0x206   :  { %3391 = vmatmul.mubr.msk.bf16.gmra.mrb[212].mxu1 %vm305_vm2, %v1954_v51  ;;  %v4897_v51 = vshrl.u32 %v4222_v1, 16 }
 0x207   :  { %v1351_v20 = vpop.f32.mrb[108].mxu0  ;;  %3394 = vmatprep.mubr.msk.bf16.mxu1 %vm3652_vm0, %v4888_v53 }
 0x208   :  { %v4623_v15 = vadd.f32 %v1351_v20, %v1133_v9  ;;  %v3220_v58 = vpop.f32.mrb[109].mxu0  ;;  %v1963_v31 = vrot.slane %v4897_v51, 2 }
 0x209   :  { %v1354_v57 = vpop.f32.mrb[110].mxu0  ;;  %v1081_v59 = vpop.f32.mrb[108].mxu1 }
 0x20a   :  { %v4628_v47 = vadd.f32 %v1354_v57, %v1134_v24  ;;  %v3221_v8 = vpop.f32.mrb[111].mxu0  ;;  %v1135_v11 = vadd.f32 %v1081_v59, %v4428_v49  ;;  %v3168_v35 = vpop.f32.mrb[109].mxu1  ;;  %v1965_v14 = vor.u32 %v1964_v63, %v1963_v31 }
 0x20b   :  { %v1084_v29 = vpop.f32.mrb[110].mxu1 }
 0x20c   :  { %3447 = vmatmul.mubr.msk.bf16.gmra.mrb[216].mxu0 %vm305_vm2, %v2203_v48  ;;  %v1136_v25 = vadd.f32 %v1084_v29, %v4434_v56  ;;  %v3169_v44 = vpop.f32.mrb[111].mxu1  ;;  %v1966_v29 = vsel %vm1915_vm9, %v1961_v16, %v1965_v14 }
 0x20d   :  { %3450 = vmatprep.mubr.msk.bf16.mxu0 %vm3652_vm0, %v4888_v53 }
 0x20e   :  { %3395 = vmatmul.mubr.msk.bf16.gmra.mrb[216].mxu1 %vm305_vm2, %v1958_v60 }
 0x20f   :  { %v1359_v49 = vpop.f32.mrb[112].mxu0  ;;  %3398 = vmatprep.mubr.msk.bf16.mxu1 %vm3652_vm0, %v4888_v53 }
 0x210   :  { %v4640_v34 = vadd.f32 %v1359_v49, %v1135_v11  ;;  %v3224_v26 = vpop.f32.mrb[113].mxu0 }
 0x211   :  { %v1362_v22 = vpop.f32.mrb[114].mxu0  ;;  %v1089_v56 = vpop.f32.mrb[112].mxu1 }
 0x212   :  { %v4645_v50 = vadd.f32 %v1362_v22, %v1136_v25  ;;  %v3225_v23 = vpop.f32.mrb[115].mxu0  ;;  %v1137_v9 = vadd.f32 %v1089_v56, %v4444_v54  ;;  %v3172_v4 = vpop.f32.mrb[113].mxu1  ;;  %v2206_v54 = vrot.slane %v4899_v5, 3 }
 0x213   :  { %v1092_v45 = vpop.f32.mrb[114].mxu1 }
 0x214   :  { %3451 = vmatmul.mubr.msk.bf16.gmra.mrb[220].mxu0 %vm305_vm2, %v2205_v21  ;;  %v1138_v38 = vadd.f32 %v1092_v45, %v4450_v3  ;;  %v3173_v24 = vpop.f32.mrb[115].mxu1  ;;  %v2207_v57 = vsel %vm2184_vm10, %v2204_v37, %v2206_v54  ;;  %v2209_v37 = vsel %vm2184_vm10, %v2206_v54, %v2208_v61 }
 0x215   :  { %3454 = vmatprep.mubr.msk.bf16.mxu0 %vm3652_vm0, %v4888_v53 }
 0x216   :  { %3399 = vmatmul.mubr.msk.bf16.gmra.mrb[220].mxu1 %vm305_vm2, %v1962_v43 }
 0x217   :  { %v1367_v28 = vpop.f32.mrb[116].mxu0  ;;  %3402 = vmatprep.mubr.msk.bf16.mxu1 %vm3652_vm0, %v4888_v53 }
 0x218   :  { %v4659_v20 = vadd.f32 %v1367_v28, %v1137_v9  ;;  %v3228_v58 = vpop.f32.mrb[117].mxu0 }
 0x219   :  { %v1370_v1 = vpop.f32.mrb[118].mxu0  ;;  %v1097_v3 = vpop.f32.mrb[116].mxu1 }
 0x21a   :  { %v4664_v48 = vadd.f32 %v1370_v1, %v1138_v38  ;;  %v3229_v59 = vpop.f32.mrb[119].mxu0  ;;  %v1139_v8 = vadd.f32 %v1097_v3, %v4461_v19  ;;  %v3176_v11 = vpop.f32.mrb[117].mxu1 }
 0x21b   :  { %v1100_v35 = vpop.f32.mrb[118].mxu1 }
 0x21c   :  { %3455 = vmatmul.mubr.msk.bf16.gmra.mrb[224].mxu0 %vm305_vm2, %v2207_v57  ;;  %v1140_v60 = vadd.f32 %v1100_v35, %v4466_v42  ;;  %v3177_v46 = vpop.f32.mrb[119].mxu1 }
 0x21d   :  { %3458 = vmatprep.mubr.msk.bf16.mxu0 %vm3652_vm0, %v4888_v53 }
 0x21e   :  { %3403 = vmatmul.mubr.msk.bf16.gmra.mrb[224].mxu1 %vm305_vm2, %v1966_v29 }
 0x21f   :  { %v1375_v39 = vpop.f32.mrb[120].mxu0  ;;  %3406 = vmatprep.mubr.msk.bf16.mxu1 %vm3652_vm0, %v4888_v53 }
 0x220   :  { %v4673_v25 = vadd.f32 %v1375_v39, %v1139_v8  ;;  %v3232_v19 = vpop.f32.mrb[121].mxu0 }
 0x221   :  { %v1378_v44 = vpop.f32.mrb[122].mxu0  ;;  %v1105_v49 = vpop.f32.mrb[120].mxu1 }
 0x222   :  { %v4678_v42 = vadd.f32 %v1378_v44, %v1140_v60  ;;  %v3233_v26 = vpop.f32.mrb[123].mxu0  ;;  %v1141_v16 = vadd.f32 %v1105_v49, %v4479_v12  ;;  %v3180_v22 = vpop.f32.mrb[121].mxu1 }
 0x223   :  { %v1108_v21 = vpop.f32.mrb[122].mxu1 }
 0x224   :  { %3459 = vmatmul.mubr.msk.bf16.gmra.mrb[228].mxu0 %vm305_vm2, %v2209_v37  ;;  %v1142_v56 = vadd.f32 %v1108_v21, %v4483_v18  ;;  %v3181_v23 = vpop.f32.mrb[123].mxu1 }
 0x225   :  { %3462 = vmatprep.mubr.msk.bf16.mxu0 %vm3652_vm0, %v4888_v53 }
 0x226   :  { %3407 = vmatmul.mubr.msk.bf16.gmra.mrb[228].mxu1 %vm305_vm2, %v1965_v14 }
 0x227   :  { %v1383_v9 = vpop.f32.mrb[124].mxu0 }
 0x228   :  { %v4686_v4 = vadd.f32 %v1383_v9, %v1141_v16  ;;  %v3236_v45 = vpop.f32.mrb[125].mxu0 }
 0x229   :  { %v1386_v43 = vpop.f32.mrb[126].mxu0  ;;  %v1113_v51 = vpop.f32.mrb[124].mxu1 }
 0x22a   :  { %v4688_v31 = vadd.f32 %v1386_v43, %v1142_v56  ;;  %v3237_v12 = vpop.f32.mrb[127].mxu0  ;;  %v1143_v62 = vadd.f32 %v1113_v51, %v4493_v40  ;;  %v3184_v63 = vpop.f32.mrb[125].mxu1 }
 0x22b   :  { %v1116_v18 = vpop.f32.mrb[126].mxu1 }
 0x22c   :  { %3463 = vmatmul.mubr.msk.bf16.gmra.mrb[232].mxu0 %vm305_vm2, %v2208_v61  ;;  %v3185_v38 = vpop.f32.mrb[127].mxu1 }
 0x22f   :  { %v1391_v24 = vpop.f32.mrb[128].mxu0 }
 0x230   :  { %v4692_v53 = vadd.f32 %v1391_v24, %v1143_v62  ;;  %v3240_v5 = vpop.f32.mrb[129].mxu0 }
 0x231   :  { %v1394_v54 = vpop.f32.mrb[130].mxu0  ;;  %v1540_v28 = vpop.f32.mrb[128].mxu1 }
 0x232   :  { %v3241_v58 = vpop.f32.mrb[131].mxu0  ;;  %v1642_v14 = vadd.f32 %v1540_v28, %v4507_v41  ;;  %v3248_v1 = vpop.f32.mrb[129].mxu1 }
 0x233   :  { %v1543_v57 = vpop.f32.mrb[130].mxu1 }
 0x234   :  { %v1643_v3 = vadd.f32 %v1543_v57, %v4512_v55  ;;  %v3249_v59 = vpop.f32.mrb[131].mxu1 }
 0x237   :  { %v1783_v40 = vpop.f32.mrb[132].mxu0 }
 0x238   :  { %v4696_v8 = vadd.f32 %v1783_v40, %v1642_v14  ;;  %v3304_v11 = vpop.f32.mrb[133].mxu0 }
 0x239   :  { %v1786_v35 = vpop.f32.mrb[134].mxu0  ;;  %v1548_v29 = vpop.f32.mrb[132].mxu1 }
 0x23a   :  { %v4698_v60 = vadd.f32 %v1786_v35, %v1643_v3  ;;  %v3305_v46 = vpop.f32.mrb[135].mxu0  ;;  %v1644_v52 = vadd.f32 %v1548_v29, %v4523_v2  ;;  %v3252_v61 = vpop.f32.mrb[133].mxu1 }
 0x23b   :  { %v1551_v39 = vpop.f32.mrb[134].mxu1 }
 0x23c   :  { %v1645_v41 = vadd.f32 %v1551_v39, %v4528_v6  ;;  %v3253_v19 = vpop.f32.mrb[135].mxu1 }
 0x23f   :  { %v1791_v44 = vpop.f32.mrb[136].mxu0 }
 0x240   :  { %v4702_v37 = vadd.f32 %v1791_v44, %v1644_v52  ;;  %v3308_v55 = vpop.f32.mrb[137].mxu0 }
 0x241   :  { %v1794_v49 = vpop.f32.mrb[138].mxu0  ;;  %v1556_v26 = vpop.f32.mrb[136].mxu1 }
 0x242   :  { %v4704_v16 = vadd.f32 %v1794_v49, %v1645_v41  ;;  %v3309_v22 = vpop.f32.mrb[139].mxu0  ;;  %v1646_v21 = vadd.f32 %v1556_v26, %v4539_v10  ;;  %v3256_v56 = vpop.f32.mrb[137].mxu1 }
 0x243   :  { %v1559_v23 = vpop.f32.mrb[138].mxu1 }
 0x244   :  { %v1647_v2 = vadd.f32 %v1559_v23, %v4544_v7  ;;  %v3257_v9 = vpop.f32.mrb[139].mxu1 }
 0x247   :  { %v1799_v45 = vpop.f32.mrb[140].mxu0 }
 0x248   :  { %v4708_v43 = vadd.f32 %v1799_v45, %v1646_v21  ;;  %v3312_v6 = vpop.f32.mrb[141].mxu0 }
 0x249   :  { %v1802_v51 = vpop.f32.mrb[142].mxu0  ;;  %v1564_v12 = vpop.f32.mrb[140].mxu1 }
 0x24a   :  { %v4710_v62 = vadd.f32 %v1802_v51, %v1647_v2  ;;  %v3313_v63 = vpop.f32.mrb[143].mxu0  ;;  %v1648_v18 = vadd.f32 %v1564_v12, %v4555_v30  ;;  %v3260_v38 = vpop.f32.mrb[141].mxu1 }
 0x24b   :  { %v1567_v24 = vpop.f32.mrb[142].mxu1 }
 0x24c   :  { %v1649_v10 = vadd.f32 %v1567_v24, %v4560_v13  ;;  %v3261_v5 = vpop.f32.mrb[143].mxu1 }
 0x24f   :  { %v1807_v54 = vpop.f32.mrb[144].mxu0 }
 0x250   :  { %v4714_v28 = vadd.f32 %v1807_v54, %v1648_v18  ;;  %v3316_v7 = vpop.f32.mrb[145].mxu0 }
 0x251   :  { %v1810_v58 = vpop.f32.mrb[146].mxu0  ;;  %v1572_v14 = vpop.f32.mrb[144].mxu1 }
 0x252   :  { %v4716_v1 = vadd.f32 %v1810_v58, %v1649_v10  ;;  %v3317_v57 = vpop.f32.mrb[147].mxu0  ;;  %v1650_v3 = vadd.f32 %v1572_v14, %v4572_v33  ;;  %v3264_v59 = vpop.f32.mrb[145].mxu1 }
 0x253   :  { %v1575_v40 = vpop.f32.mrb[146].mxu1 }
 0x254   :  { %v1651_v30 = vadd.f32 %v1575_v40, %v4577_v36  ;;  %v3265_v11 = vpop.f32.mrb[147].mxu1 }
 0x257   :  { %v1815_v35 = vpop.f32.mrb[148].mxu0 }
 0x258   :  { %v4720_v29 = vadd.f32 %v1815_v35, %v1650_v3  ;;  %v3320_v13 = vpop.f32.mrb[149].mxu0 }
 0x259   :  { %v1818_v46 = vpop.f32.mrb[150].mxu0  ;;  %v1580_v52 = vpop.f32.mrb[148].mxu1 }
 0x25a   :  { %v4722_v61 = vadd.f32 %v1818_v46, %v1651_v30  ;;  %v3321_v39 = vpop.f32.mrb[151].mxu0  ;;  %v1652_v41 = vadd.f32 %v1580_v52, %v4589_v32  ;;  %v3268_v19 = vpop.f32.mrb[149].mxu1 }
 0x25b   :  { %v1583_v44 = vpop.f32.mrb[150].mxu1 }
 0x25c   :  { %v1653_v33 = vadd.f32 %v1583_v44, %v4594_v27  ;;  %v3269_v55 = vpop.f32.mrb[151].mxu1 }
 0x25f   :  { %v1823_v49 = vpop.f32.mrb[152].mxu0 }
 0x260   :  { %v4726_v26 = vadd.f32 %v1823_v49, %v1652_v41  ;;  %v3324_v36 = vpop.f32.mrb[153].mxu0 }
 0x261   :  { %v1826_v22 = vpop.f32.mrb[154].mxu0  ;;  %v1588_v21 = vpop.f32.mrb[152].mxu1 }
 0x262   :  { %v4728_v56 = vadd.f32 %v1826_v22, %v1653_v33  ;;  %v3325_v23 = vpop.f32.mrb[155].mxu0  ;;  %v1654_v2 = vadd.f32 %v1588_v21, %v4606_v17  ;;  %v3272_v9 = vpop.f32.mrb[153].mxu1 }
 0x263   :  { %v1591_v45 = vpop.f32.mrb[154].mxu1 }
 0x264   :  { %v1655_v32 = vadd.f32 %v1591_v45, %v4611_v0  ;;  %v3273_v6 = vpop.f32.mrb[155].mxu1 }
 0x267   :  { %v1831_v51 = vpop.f32.mrb[156].mxu0 }
 0x268   :  { %v4732_v12 = vadd.f32 %v1831_v51, %v1654_v2  ;;  %v3328_v27 = vpop.f32.mrb[157].mxu0 }
 0x269   :  { %v1834_v63 = vpop.f32.mrb[158].mxu0  ;;  %v1596_v18 = vpop.f32.mrb[156].mxu1 }
 0x26a   :  { %v4734_v38 = vadd.f32 %v1834_v63, %v1655_v32  ;;  %v3329_v24 = vpop.f32.mrb[159].mxu0  ;;  %v1656_v10 = vadd.f32 %v1596_v18, %v4623_v15  ;;  %v3276_v5 = vpop.f32.mrb[157].mxu1 }
 0x26b   :  { %v1599_v54 = vpop.f32.mrb[158].mxu1 }
 0x26c   :  { %v1657_v17 = vadd.f32 %v1599_v54, %v4628_v47  ;;  %v3277_v7 = vpop.f32.mrb[159].mxu1 }
 0x26f   :  { %v1839_v58 = vpop.f32.mrb[160].mxu0 }
 0x270   :  { %v4738_v14 = vadd.f32 %v1839_v58, %v1656_v10  ;;  %v3332_v0 = vpop.f32.mrb[161].mxu0 }
 0x271   :  { %v1842_v57 = vpop.f32.mrb[162].mxu0  ;;  %v1604_v3 = vpop.f32.mrb[160].mxu1 }
 0x272   :  { %v4740_v59 = vadd.f32 %v1842_v57, %v1657_v17  ;;  %v3333_v40 = vpop.f32.mrb[163].mxu0  ;;  %v1658_v30 = vadd.f32 %v1604_v3, %v4640_v34  ;;  %v3280_v11 = vpop.f32.mrb[161].mxu1 }
 0x273   :  { %v1607_v35 = vpop.f32.mrb[162].mxu1 }
 0x274   :  { %v1659_v15 = vadd.f32 %v1607_v35, %v4645_v50  ;;  %v3281_v13 = vpop.f32.mrb[163].mxu1 }
 0x277   :  { %v1847_v46 = vpop.f32.mrb[164].mxu0 }
 0x278   :  { %v4744_v52 = vadd.f32 %v1847_v46, %v1658_v30  ;;  %v3336_v47 = vpop.f32.mrb[165].mxu0 }
 0x279   :  { %v1850_v39 = vpop.f32.mrb[166].mxu0  ;;  %v1612_v41 = vpop.f32.mrb[164].mxu1 }
 0x27a   :  { %v4746_v19 = vadd.f32 %v1850_v39, %v1659_v15  ;;  %v3337_v44 = vpop.f32.mrb[167].mxu0  ;;  %v1660_v33 = vadd.f32 %v1612_v41, %v4659_v20  ;;  %v3284_v55 = vpop.f32.mrb[165].mxu1 }
 0x27b   :  { %v1615_v49 = vpop.f32.mrb[166].mxu1 }
 0x27c   :  { %v1661_v34 = vadd.f32 %v1615_v49, %v4664_v48  ;;  %v3285_v36 = vpop.f32.mrb[167].mxu1 }
 0x27f   :  { %v1855_v22 = vpop.f32.mrb[168].mxu0 }
 0x280   :  { %v4750_v21 = vadd.f32 %v1855_v22, %v1660_v33  ;;  %v3340_v50 = vpop.f32.mrb[169].mxu0 }
 0x281   :  { %v1858_v23 = vpop.f32.mrb[170].mxu0  ;;  %v1620_v2 = vpop.f32.mrb[168].mxu1 }
 0x282   :  { %v4752_v9 = vadd.f32 %v1858_v23, %v1661_v34  ;;  %v3341_v45 = vpop.f32.mrb[171].mxu0  ;;  %v1662_v32 = vadd.f32 %v1620_v2, %v4673_v25  ;;  %v3288_v6 = vpop.f32.mrb[169].mxu1  ;;  %v4771_v23 = vld [vmem:[#allocation8] ss:$0 sm:$0xff] }
 0x283   :  { %v1623_v51 = vpop.f32.mrb[170].mxu1 }
 0x284   :  { %v1663_v20 = vadd.f32 %v1623_v51, %v4678_v42  ;;  %v3289_v27 = vpop.f32.mrb[171].mxu1 }
 0x287   :  { %v1863_v63 = vpop.f32.mrb[172].mxu0 }
 0x288   :  { %v4756_v18 = vadd.f32 %v1863_v63, %v1662_v32  ;;  %v3344_v48 = vpop.f32.mrb[173].mxu0 }
 0x289   :  { %v1866_v24 = vpop.f32.mrb[174].mxu0  ;;  %v1628_v10 = vpop.f32.mrb[172].mxu1 }
 0x28a   :  { %v4758_v5 = vadd.f32 %v1866_v24, %v1663_v20  ;;  %v3345_v54 = vpop.f32.mrb[175].mxu0  ;;  %v1664_v17 = vadd.f32 %v1628_v10, %v4686_v4  ;;  %v3292_v7 = vpop.f32.mrb[173].mxu1 }
 0x28b   :  { %v1631_v58 = vpop.f32.mrb[174].mxu1 }
 0x28c   :  { %v1665_v25 = vadd.f32 %v1631_v58, %v4688_v31  ;;  %v3293_v0 = vpop.f32.mrb[175].mxu1 }
 0x28f   :  { %v1871_v57 = vpop.f32.mrb[176].mxu0 }
 0x290   :  { %v4762_v3 = vadd.f32 %v1871_v57, %v1664_v17  ;;  %v3348_v42 = vpop.f32.mrb[177].mxu0 }
 0x291   :  { %v1874_v40 = vpop.f32.mrb[178].mxu0  ;;  %v1636_v30 = vpop.f32.mrb[176].mxu1 }
 0x292   :  { %v4764_v11 = vadd.f32 %v1874_v40, %v1665_v25  ;;  %v3349_v35 = vpop.f32.mrb[179].mxu0  ;;  %v1666_v15 = vadd.f32 %v1636_v30, %v4692_v53  ;;  %v3296_v13 = vpop.f32.mrb[177].mxu1 }
 0x293   :  { %v1639_v46 = vpop.f32.mrb[178].mxu1 }
 0x294   :  { %v3297_v47 = vpop.f32.mrb[179].mxu1 }
 0x297   :  { %v1879_v4 = vpop.f32.mrb[180].mxu0 }
 0x298   :  { %v4767_v39 = vadd.f32 %v1879_v4, %v1666_v15  ;;  %v3352_v41 = vpop.f32.mrb[181].mxu0 }
 0x299   :  { %v1882_v31 = vpop.f32.mrb[182].mxu0  ;;  %v2052_v44 = vpop.f32.mrb[180].mxu1 }
 0x29a   :  { %v3353_v33 = vpop.f32.mrb[183].mxu0  ;;  %v2154_v55 = vadd.f32 %v2052_v44, %v4696_v8  ;;  %v3360_v49 = vpop.f32.mrb[181].mxu1 }
 0x29b   :  { %v2055_v34 = vpop.f32.mrb[182].mxu1 }
 0x29c   :  { %v2155_v36 = vadd.f32 %v2055_v34, %v4698_v60  ;;  %v3361_v22 = vpop.f32.mrb[183].mxu1 }
 0x29f   :  { %v2295_v50 = vpop.f32.mrb[184].mxu0 }
 0x2a0   :  { %v2397_v53 = vadd.f32 %v2295_v50, %v2154_v55  ;;  %v3416_v2 = vpop.f32.mrb[185].mxu0 }
 0x2a1   :  { %v2298_v45 = vpop.f32.mrb[186].mxu0  ;;  %v2060_v32 = vpop.f32.mrb[184].mxu1 }
 0x2a2   :  { %v2429_v6 = vadd.f32 %v4771_v23, %v2397_v53  ;;  %v2398_v51 = vadd.f32 %v2298_v45, %v2155_v36  ;;  %v3417_v20 = vpop.f32.mrb[187].mxu0  ;;  %v2156_v27 = vadd.f32 %v2060_v32, %v4702_v37  ;;  %v3364_v63 = vpop.f32.mrb[185].mxu1 }
 0x2a3   :  { %v2063_v48 = vpop.f32.mrb[186].mxu1 }
 0x2a4   :  { %v2454_v8 = vmax.f32 %v2429_v6, 0.0  ;;  %v2430_v24 = vadd.f32 %v4771_v23, %v2398_v51  ;;  %v2157_v60 = vadd.f32 %v2063_v48, %v4704_v16  ;;  %v3365_v10 = vpop.f32.mrb[187].mxu1 }
 0x2a6   :  { %v2802_v54 = vpack.c.bf16 %v2454_v8, %v2454_v8  ;;  %v2455_v17 = vmax.f32 %v2430_v24, 0.0 }
 0x2a7   :  { %v2303_v7 = vpop.f32.mrb[188].mxu0 }
 0x2a8   :  { %2581 = vst.msk [vmem:[#allocation10] sm:$0xf] %vm2580_vm11, %v2802_v54  ;;  %v2803_v58 = vpack.c.bf16 %v2455_v17, %v2455_v17  ;;  %v2399_v25 = vadd.f32 %v2303_v7, %v2156_v27  ;;  %v3420_v0 = vpop.f32.mrb[189].mxu0 }
 0x2a9   :  { %v2306_v57 = vpop.f32.mrb[190].mxu0  ;;  %v2068_v37 = vpop.f32.mrb[188].mxu1 }
 0x2aa   :  { %2582 = vst.msk [vmem:[#allocation10 + $0x4] sm:$0xf] %vm2580_vm11, %v2803_v58  ;;  %v2431_v42 = vadd.f32 %v4771_v23, %v2399_v25  ;;  %v2400_v40 = vadd.f32 %v2306_v57, %v2157_v60  ;;  %v3421_v30 = vpop.f32.mrb[191].mxu0  ;;  %v2158_v35 = vadd.f32 %v2068_v37, %v4708_v43  ;;  %v3368_v16 = vpop.f32.mrb[189].mxu1 }
 0x2ab   :  { %v2071_v13 = vpop.f32.mrb[190].mxu1 }
 0x2ac   :  { %v2456_v15 = vmax.f32 %v2431_v42, 0.0  ;;  %v2432_v46 = vadd.f32 %v4771_v23, %v2400_v40  ;;  %v2159_v47 = vadd.f32 %v2071_v13, %v4710_v62  ;;  %v3369_v4 = vpop.f32.mrb[191].mxu1 }
 0x2ae   :  { %v2804_v41 = vpack.c.bf16 %v2456_v15, %v2456_v15  ;;  %v2457_v31 = vmax.f32 %v2432_v46, 0.0 }
 0x2af   :  { %v2311_v44 = vpop.f32.mrb[192].mxu0 }
 0x2b0   :  { %2583 = vst.msk [vmem:[#allocation10 + $0x8] sm:$0xf] %vm2580_vm11, %v2804_v41  ;;  %v2805_v33 = vpack.c.bf16 %v2457_v31, %v2457_v31  ;;  %v2401_v55 = vadd.f32 %v2311_v44, %v2158_v35  ;;  %v3424_v49 = vpop.f32.mrb[193].mxu0 }
 0x2b1   :  { %v2314_v34 = vpop.f32.mrb[194].mxu0  ;;  %v2076_v43 = vpop.f32.mrb[192].mxu1 }
 0x2b2   :  { %2584 = vst.msk [vmem:[#allocation10 + $0xc] sm:$0xf] %vm2580_vm11, %v2805_v33  ;;  %v2433_v36 = vadd.f32 %v4771_v23, %v2401_v55  ;;  %v2402_v22 = vadd.f32 %v2314_v34, %v2159_v47  ;;  %v3425_v50 = vpop.f32.mrb[195].mxu0  ;;  %v2160_v53 = vadd.f32 %v2076_v43, %v4714_v28  ;;  %v3372_v62 = vpop.f32.mrb[193].mxu1 }
 0x2b3   :  { %v2079_v45 = vpop.f32.mrb[194].mxu1 }
 0x2b4   :  { %v2458_v2 = vmax.f32 %v2433_v36, 0.0  ;;  %v2434_v32 = vadd.f32 %v4771_v23, %v2402_v22  ;;  %v2161_v6 = vadd.f32 %v2079_v45, %v4716_v1  ;;  %v3373_v51 = vpop.f32.mrb[195].mxu1 }
 0x2b6   :  { %v2806_v20 = vpack.c.bf16 %v2458_v2, %v2458_v2  ;;  %v2459_v27 = vmax.f32 %v2434_v32, 0.0 }
 0x2b7   :  { %v2319_v63 = vpop.f32.mrb[196].mxu0 }
 0x2b8   :  { %2585 = vst.msk [vmem:[#allocation10 + $0x10] sm:$0xf] %vm2580_vm11, %v2806_v20  ;;  %v2807_v8 = vpack.c.bf16 %v2459_v27, %v2459_v27  ;;  %v2403_v48 = vadd.f32 %v2319_v63, %v2160_v53  ;;  %v3428_v24 = vpop.f32.mrb[197].mxu0 }
 0x2b9   :  { %v2322_v60 = vpop.f32.mrb[198].mxu0  ;;  %v2084_v28 = vpop.f32.mrb[196].mxu1 }
 0x2ba   :  { %2586 = vst.msk [vmem:[#allocation10 + $0x14] sm:$0xf] %vm2580_vm11, %v2807_v8  ;;  %v2435_v10 = vadd.f32 %v4771_v23, %v2403_v48  ;;  %v2404_v54 = vadd.f32 %v2322_v60, %v2161_v6  ;;  %v3429_v17 = vpop.f32.mrb[199].mxu0  ;;  %v2162_v7 = vadd.f32 %v2084_v28, %v4720_v29  ;;  %v3376_v1 = vpop.f32.mrb[197].mxu1 }
 0x2bb   :  { %v2087_v25 = vpop.f32.mrb[198].mxu1 }
 0x2bc   :  { %v2460_v58 = vmax.f32 %v2435_v10, 0.0  ;;  %v2436_v0 = vadd.f32 %v4771_v23, %v2404_v54  ;;  %v2163_v57 = vadd.f32 %v2087_v25, %v4722_v61  ;;  %v3377_v37 = vpop.f32.mrb[199].mxu1 }
 0x2be   :  { %v2808_v42 = vpack.c.bf16 %v2460_v58, %v2460_v58  ;;  %v2461_v40 = vmax.f32 %v2436_v0, 0.0 }
 0x2bf   :  { %v2327_v30 = vpop.f32.mrb[200].mxu0 }
 0x2c0   :  { %2587 = vst.msk [vmem:[#allocation10 + $0x18] sm:$0xf] %vm2580_vm11, %v2808_v42  ;;  %v2809_v35 = vpack.c.bf16 %v2461_v40, %v2461_v40  ;;  %v2405_v16 = vadd.f32 %v2327_v30, %v2162_v7  ;;  %v3432_v15 = vpop.f32.mrb[201].mxu0 }
 0x2c1   :  { %v2330_v13 = vpop.f32.mrb[202].mxu0  ;;  %v2092_v29 = vpop.f32.mrb[200].mxu1 }
 0x2c2   :  { %2588 = vst.msk [vmem:[#allocation10 + $0x1c] sm:$0xf] %vm2580_vm11, %v2809_v35  ;;  %v2437_v46 = vadd.f32 %v4771_v23, %v2405_v16  ;;  %v2406_v47 = vadd.f32 %v2330_v13, %v2163_v57  ;;  %v3433_v4 = vpop.f32.mrb[203].mxu0  ;;  %v2164_v41 = vadd.f32 %v2092_v29, %v4726_v26  ;;  %v3380_v61 = vpop.f32.mrb[201].mxu1 }
 0x2c3   :  { %v2095_v44 = vpop.f32.mrb[202].mxu1 }
 0x2c4   :  { %v2462_v31 = vmax.f32 %v2437_v46, 0.0  ;;  %v2438_v33 = vadd.f32 %v4771_v23, %v2406_v47  ;;  %v2165_v55 = vadd.f32 %v2095_v44, %v4728_v56  ;;  %v3381_v49 = vpop.f32.mrb[203].mxu1 }
 0x2c6   :  { %v2810_v34 = vpack.c.bf16 %v2462_v31, %v2462_v31  ;;  %v2463_v43 = vmax.f32 %v2438_v33, 0.0 }
 0x2c7   :  { %v2335_v36 = vpop.f32.mrb[204].mxu0 }
 0x2c8   :  { %2589 = vst.msk [vmem:[#allocation10 + $0x20] sm:$0xf] %vm2580_vm11, %v2810_v34  ;;  %v2811_v22 = vpack.c.bf16 %v2463_v43, %v2463_v43  ;;  %v2407_v50 = vadd.f32 %v2335_v36, %v2164_v41  ;;  %v3436_v53 = vpop.f32.mrb[205].mxu0 }
 0x2c9   :  { %v2338_v62 = vpop.f32.mrb[206].mxu0  ;;  %v2100_v26 = vpop.f32.mrb[204].mxu1 }
 0x2ca   :  { %2590 = vst.msk [vmem:[#allocation10 + $0x24] sm:$0xf] %vm2580_vm11, %v2811_v22  ;;  %v2439_v2 = vadd.f32 %v4771_v23, %v2407_v50  ;;  %v2408_v45 = vadd.f32 %v2338_v62, %v2165_v55  ;;  %v3437_v32 = vpop.f32.mrb[207].mxu0  ;;  %v2166_v6 = vadd.f32 %v2100_v26, %v4732_v12  ;;  %v3384_v56 = vpop.f32.mrb[205].mxu1 }
 0x2cb   :  { %v2103_v20 = vpop.f32.mrb[206].mxu1 }
 0x2cc   :  { %v2464_v51 = vmax.f32 %v2439_v2, 0.0  ;;  %v2440_v27 = vadd.f32 %v4771_v23, %v2408_v45  ;;  %v2167_v63 = vadd.f32 %v2103_v20, %v4734_v38  ;;  %v3385_v8 = vpop.f32.mrb[207].mxu1 }
 0x2ce   :  { %v2812_v48 = vpack.c.bf16 %v2464_v51, %v2464_v51  ;;  %v2465_v24 = vmax.f32 %v2440_v27, 0.0 }
 0x2cf   :  { %v2343_v60 = vpop.f32.mrb[208].mxu0 }
 0x2d0   :  { %2591 = vst.msk [vmem:[#allocation10 + $0x28] sm:$0xf] %vm2580_vm11, %v2812_v48  ;;  %v2813_v28 = vpack.c.bf16 %v2465_v24, %v2465_v24  ;;  %v2409_v10 = vadd.f32 %v2343_v60, %v2166_v6  ;;  %v3440_v54 = vpop.f32.mrb[209].mxu0 }
 0x2d1   :  { %v2346_v17 = vpop.f32.mrb[210].mxu0  ;;  %v2108_v12 = vpop.f32.mrb[208].mxu1 }
 0x2d2   :  { %2592 = vst.msk [vmem:[#allocation10 + $0x2c] sm:$0xf] %vm2580_vm11, %v2813_v28  ;;  %v2441_v7 = vadd.f32 %v4771_v23, %v2409_v10  ;;  %v2410_v1 = vadd.f32 %v2346_v17, %v2167_v63  ;;  %v3441_v58 = vpop.f32.mrb[211].mxu0  ;;  %v2168_v25 = vadd.f32 %v2108_v12, %v4738_v14  ;;  %v3388_v38 = vpop.f32.mrb[209].mxu1 }
 0x2d3   :  { %v2111_v57 = vpop.f32.mrb[210].mxu1 }
 0x2d4   :  { %v2466_v0 = vmax.f32 %v2441_v7, 0.0  ;;  %v2442_v37 = vadd.f32 %v4771_v23, %v2410_v1  ;;  %v2169_v42 = vadd.f32 %v2111_v57, %v4740_v59  ;;  %v3389_v40 = vpop.f32.mrb[211].mxu1 }
 0x2d6   :  { %v2814_v30 = vpack.c.bf16 %v2466_v0, %v2466_v0  ;;  %v2467_v35 = vmax.f32 %v2442_v37, 0.0 }
 0x2d7   :  { %v2351_v16 = vpop.f32.mrb[212].mxu0 }
 0x2d8   :  { %2593 = vst.msk [vmem:[#allocation10 + $0x30] sm:$0xf] %vm2580_vm11, %v2814_v30  ;;  %v2815_v15 = vpack.c.bf16 %v2467_v35, %v2467_v35  ;;  %v2411_v13 = vadd.f32 %v2351_v16, %v2168_v25  ;;  %v3444_v29 = vpop.f32.mrb[213].mxu0 }
 0x2d9   :  { %v2354_v46 = vpop.f32.mrb[214].mxu0  ;;  %v2116_v14 = vpop.f32.mrb[212].mxu1 }
 0x2da   :  { %2594 = vst.msk [vmem:[#allocation10 + $0x34] sm:$0xf] %vm2580_vm11, %v2815_v15  ;;  %v2443_v47 = vadd.f32 %v4771_v23, %v2411_v13  ;;  %v2412_v4 = vadd.f32 %v2354_v46, %v2169_v42  ;;  %v3445_v41 = vpop.f32.mrb[215].mxu0  ;;  %v2170_v61 = vadd.f32 %v2116_v14, %v4744_v52  ;;  %v3392_v59 = vpop.f32.mrb[213].mxu1 }
 0x2db   :  { %v2119_v44 = vpop.f32.mrb[214].mxu1 }
 0x2dc   :  { %v2468_v31 = vmax.f32 %v2443_v47, 0.0  ;;  %v2444_v33 = vadd.f32 %v4771_v23, %v2412_v4  ;;  %v2171_v55 = vadd.f32 %v2119_v44, %v4746_v19  ;;  %v3393_v49 = vpop.f32.mrb[215].mxu1 }
 0x2de   :  { %v2816_v34 = vpack.c.bf16 %v2468_v31, %v2468_v31  ;;  %v2469_v43 = vmax.f32 %v2444_v33, 0.0 }
 0x2df   :  { %v2359_v36 = vpop.f32.mrb[216].mxu0 }
 0x2e0   :  { %2595 = vst.msk [vmem:[#allocation10 + $0x38] sm:$0xf] %vm2580_vm11, %v2816_v34  ;;  %v2817_v22 = vpack.c.bf16 %v2469_v43, %v2469_v43  ;;  %v2413_v50 = vadd.f32 %v2359_v36, %v2170_v61  ;;  %v3448_v53 = vpop.f32.mrb[217].mxu0 }
 0x2e1   :  { %v2362_v62 = vpop.f32.mrb[218].mxu0  ;;  %v2124_v52 = vpop.f32.mrb[216].mxu1 }
 0x2e2   :  { %2596 = vst.msk [vmem:[#allocation10 + $0x3c] sm:$0xf] %vm2580_vm11, %v2817_v22  ;;  %v2445_v26 = vadd.f32 %v4771_v23, %v2413_v50  ;;  %v2414_v2 = vadd.f32 %v2362_v62, %v2171_v55  ;;  %v3449_v45 = vpop.f32.mrb[219].mxu0  ;;  %v2172_v32 = vadd.f32 %v2124_v52, %v4750_v21  ;;  %v3396_v19 = vpop.f32.mrb[217].mxu1 }
 0x2e3   :  { %v2127_v56 = vpop.f32.mrb[218].mxu1 }
 0x2e4   :  { %v2470_v6 = vmax.f32 %v2445_v26, 0.0  ;;  %v2446_v51 = vadd.f32 %v4771_v23, %v2414_v2  ;;  %v2173_v20 = vadd.f32 %v2127_v56, %v4752_v9  ;;  %v3397_v27 = vpop.f32.mrb[219].mxu1 }
 0x2e6   :  { %v2818_v63 = vpack.c.bf16 %v2470_v6, %v2470_v6  ;;  %v2471_v8 = vmax.f32 %v2446_v51, 0.0 }
 0x2e7   :  { %v2367_v48 = vpop.f32.mrb[220].mxu0 }
 0x2e8   :  { %2597 = vst.msk [vmem:[#allocation10 + $0x40] sm:$0xf] %vm2580_vm11, %v2818_v63  ;;  %v2819_v24 = vpack.c.bf16 %v2471_v8, %v2471_v8  ;;  %v2415_v60 = vadd.f32 %v2367_v48, %v2172_v32  ;;  %v3452_v28 = vpop.f32.mrb[221].mxu0 }
 0x2e9   :  { %v2370_v10 = vpop.f32.mrb[222].mxu0  ;;  %v2132_v21 = vpop.f32.mrb[220].mxu1 }
 0x2ea   :  { %2598 = vst.msk [vmem:[#allocation10 + $0x44] sm:$0xf] %vm2580_vm11, %v2819_v24  ;;  %v2447_v54 = vadd.f32 %v4771_v23, %v2415_v60  ;;  %v2416_v17 = vadd.f32 %v2370_v10, %v2173_v20  ;;  %v3453_v12 = vpop.f32.mrb[223].mxu0  ;;  %v2174_v7 = vadd.f32 %v2132_v21, %v4756_v18  ;;  %v3400_v9 = vpop.f32.mrb[221].mxu1 }
 0x2eb   :  { %v2135_v58 = vpop.f32.mrb[222].mxu1 }
 0x2ec   :  { %v2472_v1 = vmax.f32 %v2447_v54, 0.0  ;;  %v2448_v25 = vadd.f32 %v4771_v23, %v2416_v17  ;;  %v2175_v38 = vadd.f32 %v2135_v58, %v4758_v5  ;;  %v3401_v0 = vpop.f32.mrb[223].mxu1 }
 0x2ee   :  { %v2820_v57 = vpack.c.bf16 %v2472_v1, %v2472_v1  ;;  %v2473_v37 = vmax.f32 %v2448_v25, 0.0 }
 0x2ef   :  { %v2375_v42 = vpop.f32.mrb[224].mxu0 }
 0x2f0   :  { %2599 = vst.msk [vmem:[#allocation10 + $0x48] sm:$0xf] %vm2580_vm11, %v2820_v57  ;;  %v2821_v40 = vpack.c.bf16 %v2473_v37, %v2473_v37  ;;  %v2417_v30 = vadd.f32 %v2375_v42, %v2174_v7  ;;  %v3456_v35 = vpop.f32.mrb[225].mxu0 }
 0x2f1   :  { %v2378_v16 = vpop.f32.mrb[226].mxu0  ;;  %v2140_v18 = vpop.f32.mrb[224].mxu1 }
 0x2f2   :  { %2600 = vst.msk [vmem:[#allocation10 + $0x4c] sm:$0xf] %vm2580_vm11, %v2821_v40  ;;  %v2449_v15 = vadd.f32 %v4771_v23, %v2417_v30  ;;  %v2418_v13 = vadd.f32 %v2378_v16, %v2175_v38  ;;  %v3457_v29 = vpop.f32.mrb[227].mxu0  ;;  %v2176_v46 = vadd.f32 %v2140_v18, %v4762_v3  ;;  %v3404_v5 = vpop.f32.mrb[225].mxu1 }
 0x2f3   :  { %v2143_v47 = vpop.f32.mrb[226].mxu1 }
 0x2f4   :  { %v2474_v14 = vmax.f32 %v2449_v15, 0.0  ;;  %v2450_v4 = vadd.f32 %v4771_v23, %v2418_v13  ;;  %v2177_v41 = vadd.f32 %v2143_v47, %v4764_v11  ;;  %v3405_v61 = vpop.f32.mrb[227].mxu1 }
 0x2f6   :  { %v2822_v59 = vpack.c.bf16 %v2474_v14, %v2474_v14  ;;  %v2475_v31 = vmax.f32 %v2450_v4, 0.0 }
 0x2f7   :  { %v2383_v44 = vpop.f32.mrb[228].mxu0 }
 0x2f8   :  { %2601 = vst.msk [vmem:[#allocation10 + $0x50] sm:$0xf] %vm2580_vm11, %v2822_v59  ;;  %v2823_v33 = vpack.c.bf16 %v2475_v31, %v2475_v31  ;;  %v2419_v55 = vadd.f32 %v2383_v44, %v2176_v46  ;;  %v3460_v49 = vpop.f32.mrb[229].mxu0 }
 0x2f9   :  { %v2386_v34 = vpop.f32.mrb[230].mxu0  ;;  %v2148_v3 = vpop.f32.mrb[228].mxu1 }
 0x2fa   :  { %2602 = vst.msk [vmem:[#allocation10 + $0x54] sm:$0xf] %vm2580_vm11, %v2823_v33  ;;  %v2451_v43 = vadd.f32 %v4771_v23, %v2419_v55  ;;  %v2420_v36 = vadd.f32 %v2386_v34, %v2177_v41  ;;  %v3461_v22 = vpop.f32.mrb[231].mxu0  ;;  %v2178_v50 = vadd.f32 %v2148_v3, %v4767_v39  ;;  %v3408_v11 = vpop.f32.mrb[229].mxu1 }
 0x2fb   :  { %v2151_v52 = vpop.f32.mrb[230].mxu1 }
 0x2fc   :  { %v2476_v53 = vmax.f32 %v2451_v43, 0.0  ;;  %v2452_v62 = vadd.f32 %v4771_v23, %v2420_v36  ;;  %v3409_v26 = vpop.f32.mrb[231].mxu1 }
 0x2fe   :  { %v2824_v2 = vpack.c.bf16 %v2476_v53, %v2476_v53  ;;  %v2477_v45 = vmax.f32 %v2452_v62, 0.0 }
 0x2ff   :  { %v2391_v32 = vpop.f32.mrb[232].mxu0 }
 0x300   :  { %2603 = vst.msk [vmem:[#allocation10 + $0x58] sm:$0xf] %vm2580_vm11, %v2824_v2  ;;  %v2825_v19 = vpack.c.bf16 %v2477_v45, %v2477_v45  ;;  %v2421_v6 = vadd.f32 %v2391_v32, %v2178_v50  ;;  %v3464_v56 = vpop.f32.mrb[233].mxu0 }
 0x301   :  { %v2394_v51 = vpop.f32.mrb[234].mxu0 }
 0x302   :  { %2604 = vst.msk [vmem:[#allocation10 + $0x5c] sm:$0xf] %vm2580_vm11, %v2825_v19  ;;  %v2453_v20 = vadd.f32 %v4771_v23, %v2421_v6  ;;  %v3465_v39 = vpop.f32.mrb[235].mxu0 }
 0x304   :  { %v2478_v27 = vmax.f32 %v2453_v20, 0.0 }
 0x306   :  { %v2826_v63 = vpack.c.bf16 %v2478_v27, %v2478_v27 }
 0x308   :  { %2605 = vst.msk [vmem:[#allocation10 + $0x60] sm:$0xf] %vm2580_vm11, %v2826_v63 }
 0x309   :  { %3626 = shalt.err (!%p3623_p0)
}
 0x30a   :  { %s3627_s18 = scalar_lea.hbm %s4865_s4, 1600 }
 0x30b   :  { %p3628_p1 = scmp.ne.s32.totalorder %s4865_s4, %s3627_s18  ;;  %p3631_p2 = scmp.lt.u32.totalorder %s3627_s18, %s4865_s4 }
 0x30d   :  { %p3633_p3 = pnand %p3631_p2, %p3628_p1 }
 0x30f   :  { %3636 = shalt.err (!%p3633_p3)
}
 0x310   :  { %2617 = dma.vmem_to_hbm [thread:$0]  %s2612_s14, 1600, %s4865_s4, [#allocation4], %s3647_s28, %s3647_s28, %s3648_s29  }
 0x311   :  { %3643 = dma.done.wait [#allocation4], 1600  }
 0x312   :  { %3644 = vsyncadd [#allocation4], 4294965696 }
 0x313   :  { %2621 = vsyncpa [#allocation3], 1 }
 0x314   :  { %2622 = vsyncpa [#allocation6], 1 }
 0x315   :  { %2623 = vsyncpa [#allocation9], 1 }
 0x316   :  { %2624 = vsyncpa [#allocation4], 1 }

</bundles_post_ra>
